<compile_context>
chip_gen: v7x
topology: tpu7x:2x2x1
jax: 0.10.0
libtpu: 0.0.40
codegen_flags: <defaults>
</compile_context>

<pallas_src>
import functools

import jax
import jax.numpy as jnp
from jax.experimental import pallas as pl
from jax.experimental.pallas import tpu as pltpu

LEAKY_SLOPE = 0.01
BN_EPS = 1e-5


def _round_up(x, m):
    return (x + m - 1) // m * m


def _pick_tm(m, wp):
    """M tile: <=512, multiple of 16, >= wp+1 (tap window), >=2 tiles (v7x)."""
    n_tiles = max(2, pl.cdiv(m, 512))
    tm = _round_up(pl.cdiv(m, n_tiles), 16)
    tm = max(tm, _round_up(wp + 1, 16))
    tm = min(tm, _round_up(m, 16))
    return tm


def _interior_mask(n_imgs, hp, wp, m_pad):
    """(m_pad, 1) f32 mask: 1 on interior rows of the centre-aligned padded
    layout (flattened (n, hp, wp)), 0 on border / tile-padding rows."""
    r = jnp.arange(m_pad, dtype=jnp.int32)
    rr = r % (hp * wp)
    hh = rr // wp
    ww = rr % wp
    keep = (hh >= 1) & (hh <= hp - 2) & (ww >= 1) & (ww <= wp - 2)
    keep = keep & (r < n_imgs * hp * wp)
    return keep.astype(jnp.float32).reshape(m_pad, 1)


# --------------------------------------------------------------------------
# Generic fused GEMM kernel (im2col convs, 1x1 convs):
#   out  = mask( [leaky]( acc*scale + shift ) [+ residual] )
#   out2 = mask( [leaky]( out*scale2 + shift2 ) )          (optional)
# --------------------------------------------------------------------------
def _gemm_kernel(*refs, act, has_res, has_out2, act2, has_mask):
    a_ref, w_ref, s_ref, t_ref = refs[:4]
    idx = 4
    mask_ref = None
    if has_mask:
        mask_ref = refs[idx]; idx += 1
    r_ref = None
    if has_res:
        r_ref = refs[idx]; idx += 1
    s2_ref = t2_ref = None
    if has_out2:
        s2_ref, t2_ref = refs[idx], refs[idx + 1]; idx += 2
    o_ref = refs[idx]; idx += 1
    o2_ref = None
    if has_out2:
        o2_ref = refs[idx]; idx += 1
    acc_ref = refs[idx]

    k = pl.program_id(2)

    @pl.when(k == 0)
    def _init():
        acc_ref[...] = jnp.zeros_like(acc_ref)

    acc_ref[...] += jnp.dot(a_ref[...], w_ref[...],
                            preferred_element_type=jnp.float32)

    @pl.when(k == pl.num_programs(2) - 1)
    def _epilogue():
        y = acc_ref[...] * s_ref[...] + t_ref[...]
        if act:
            y = jnp.maximum(y, LEAKY_SLOPE * y)
        if has_res:
            y = y + r_ref[...].astype(jnp.float32)
        if has_mask:
            keep = mask_ref[...] > 0.0
            o_ref[...] = jnp.where(keep, y, 0.0).astype(o_ref.dtype)
        else:
            o_ref[...] = y.astype(o_ref.dtype)
        if has_out2:
            y2 = y * s2_ref[...] + t2_ref[...]
            if act2:
                y2 = jnp.maximum(y2, LEAKY_SLOPE * y2)
            if has_mask:
                y2 = jnp.where(keep, y2, 0.0)
            o2_ref[...] = y2.astype(o2_ref.dtype)


def gemm_fused(a, wmat, scale, shift, *, tm, m_pad=None, act=False,
               residual=None, out2_ss=None, act2=True, mask=None,
               out_dtype=jnp.bfloat16, out2_dtype=jnp.bfloat16):
    """a: (M, K); wmat: (K, N).  Returns (m_pad, n_pad) [, (m_pad, n_pad)]."""
    assert not (residual is not None and out2_ss is not None)
    m, k_dim = a.shape
    n = wmat.shape[1]
    tn = 128
    n_pad = _round_up(n, tn)
    if m_pad is None:
        m_pad = _round_up(m, tm)
    assert m_pad % tm == 0

    k0 = _round_up(k_dim, 128)
    if k0 <= 1280:
        nk, tk = 1, k0
    else:
        tk = 512                                   # multiple of 256 (v6e/v7x MXU)
        nk = pl.cdiv(k0, tk)
    k_pad = nk * tk

    if a.shape == (m_pad, k_pad) and a.dtype == jnp.bfloat16:
        a_p = a                                    # already padded / bf16: no copy
    else:
        a_p = jnp.pad(a, ((0, m_pad - m), (0, k_pad - k_dim))).astype(jnp.bfloat16)
    w_p = jnp.pad(wmat.astype(jnp.float32),
                  ((0, k_pad - k_dim), (0, n_pad - n))).astype(jnp.bfloat16)
    s_p = jnp.pad(scale.astype(jnp.float32), (0, n_pad - n)).reshape(1, n_pad)
    t_p = jnp.pad(shift.astype(jnp.float32), (0, n_pad - n)).reshape(1, n_pad)

    vec_spec = pl.BlockSpec((1, tn), lambda i, j, k: (0, j))
    in_specs = [
        pl.BlockSpec((tm, tk), lambda i, j, k: (i, k)),   # A (streams)
        pl.BlockSpec((tk, tn), lambda i, j, k: (k, j)),   # W (resident over M)
        vec_spec, vec_spec,                               # scale, shift
    ]
    inputs = [a_p, w_p, s_p, t_p]

    if mask is not None:
        inputs.append(mask)
        in_specs.append(pl.BlockSpec((tm, 1), lambda i, j, k: (i, 0)))
    if residual is not None:
        inputs.append(residual)
        in_specs.append(pl.BlockSpec((tm, tn), lambda i, j, k: (i, j)))
    if out2_ss is not None:
        s2 = jnp.pad(out2_ss[0].astype(jnp.float32), (0, n_pad - n)).reshape(1, n_pad)
        t2 = jnp.pad(out2_ss[1].astype(jnp.float32), (0, n_pad - n)).reshape(1, n_pad)
        inputs += [s2, t2]
        in_specs += [vec_spec, vec_spec]

    out_spec = pl.BlockSpec((tm, tn), lambda i, j, k: (i, j))
    if out2_ss is None:
        out_shape = jax.ShapeDtypeStruct((m_pad, n_pad), out_dtype)
        out_specs = out_spec
    else:
        out_shape = (jax.ShapeDtypeStruct((m_pad, n_pad), out_dtype),
                     jax.ShapeDtypeStruct((m_pad, n_pad), out2_dtype))
        out_specs = (out_spec, out_spec)

    flops = 2 * m_pad * k_pad * n_pad
    bytes_accessed = sum(int(x.size) * x.dtype.itemsize for x in inputs)
    bytes_accessed += m_pad * n_pad * jnp.dtype(out_dtype).itemsize
    if out2_ss is not None:
        bytes_accessed += m_pad * n_pad * jnp.dtype(out2_dtype).itemsize

    kernel = functools.partial(_gemm_kernel, act=act,
                               has_res=residual is not None,
                               has_out2=out2_ss is not None, act2=act2,
                               has_mask=mask is not None)

    return pl.pallas_call(
        kernel,
        out_shape=out_shape,
        grid_spec=pltpu.PrefetchScalarGridSpec(
            num_scalar_prefetch=0,
            grid=(m_pad // tm, n_pad // tn, nk),
            in_specs=in_specs,
            out_specs=out_specs,
            scratch_shapes=[pltpu.VMEM((tm, tn), jnp.float32)]),
        compiler_params=pltpu.CompilerParams(
            dimension_semantics=("parallel", "parallel", "arbitrary"),
            vmem_limit_bytes=32 * 1024 * 1024),
        cost_estimate=pl.CostEstimate(flops=int(flops), transcendentals=0,
                                      bytes_accessed=int(bytes_accessed)),
    )(*inputs)


# --------------------------------------------------------------------------
# In-kernel-tap 3x3 stride-1 "same" conv on flat, centre-aligned padded-layout
# activations (no im2col).  out = mask([leaky](acc*scale+shift) [+ residual])
# --------------------------------------------------------------------------
def _tapconv_kernel(*refs, tm, cin_pad, offs, act, has_res):
    ap_ref, ac_ref, an_ref, w_ref, s_ref, t_ref, mask_ref = refs[:7]
    idx = 7
    r_ref = None
    if has_res:
        r_ref = refs[idx]; idx += 1
    o_ref = refs[idx]

    # 3*tm row window around the current M tile (prev | cur | next blocks).
    win = jnp.concatenate([ap_ref[...], ac_ref[...], an_ref[...]], axis=0)

    acc = jnp.zeros(o_ref.shape, jnp.float32)
    for t, off in enumerate(offs):                      # 9 static tap offsets
        a_t = win[tm + off:2 * tm + off, :]             # (tm, cin_pad) bf16
        w_t = w_ref[t * cin_pad:(t + 1) * cin_pad, :]   # (cin_pad, tn) bf16
        acc = acc + jnp.dot(a_t, w_t, preferred_element_type=jnp.float32)

    y = acc * s_ref[...] + t_ref[...]
    if act:
        y = jnp.maximum(y, LEAKY_SLOPE * y)
    if has_res:
        y = y + r_ref[...].astype(jnp.float32)
    keep = mask_ref[...] > 0.0
    o_ref[...] = jnp.where(keep, y, 0.0).astype(o_ref.dtype)


def conv3x3_fused(a_flat, w, scale, shift, *, hp, wp, tm, mask, act=False,
                  residual=None, out_dtype=jnp.bfloat16):
    """a_flat: (m_pad, cin_pad) bf16, rows = flattened (n, hp, wp) centre-aligned
    padded layout with zero borders.  Returns (m_pad, n_pad) in the same layout."""
    m_pad, cin_pad = a_flat.shape
    assert m_pad % tm == 0 and tm >= wp + 1
    kh, kw, cin, cout = w.shape
    assert kh == 3 and kw == 3
    tn = 128
    n_pad = _round_up(cout, tn)

    w9 = jnp.pad(w.astype(jnp.float32).reshape(9, cin, cout),
                 ((0, 0), (0, cin_pad - cin), (0, n_pad - cout)))
    w9 = w9.astype(jnp.bfloat16).reshape(9 * cin_pad, n_pad)
    s_p = jnp.pad(scale.astype(jnp.float32), (0, n_pad - cout)).reshape(1, n_pad)
    t_p = jnp.pad(shift.astype(jnp.float32), (0, n_pad - cout)).reshape(1, n_pad)

    offs = tuple((ky - 1) * wp + (kx - 1) for ky in range(3) for kx in range(3))
    m_tiles = m_pad // tm
    last = m_tiles - 1

    # Same activation passed 3x: prev / cur / next M blocks (clamped at the
    # ends; the clamped rows only feed image-border outputs, which are masked).
    a_spec_prev = pl.BlockSpec((tm, cin_pad),
                               lambda i, j: (jnp.maximum(i - 1, 0), 0))
    a_spec_cur = pl.BlockSpec((tm, cin_pad), lambda i, j: (i, 0))
    a_spec_next = pl.BlockSpec((tm, cin_pad),
                               lambda i, j: (jnp.minimum(i + 1, last), 0))
    vec_spec = pl.BlockSpec((1, tn), lambda i, j: (0, j))

    inputs = [a_flat, a_flat, a_flat, w9, s_p, t_p, mask]
    in_specs = [a_spec_prev, a_spec_cur, a_spec_next,
                pl.BlockSpec((9 * cin_pad, tn), lambda i, j: (0, j)),
                vec_spec, vec_spec,
                pl.BlockSpec((tm, 1), lambda i, j: (i, 0))]
    if residual is not None:
        inputs.append(residual)
        in_specs.append(pl.BlockSpec((tm, tn), lambda i, j: (i, j)))

    out_shape = jax.ShapeDtypeStruct((m_pad, n_pad), out_dtype)
    out_specs = pl.BlockSpec((tm, tn), lambda i, j: (i, j))

    flops = 2 * m_pad * 9 * cin_pad * n_pad
    bytes_accessed = 3 * int(a_flat.size) * a_flat.dtype.itemsize
    bytes_accessed += sum(int(x.size) * x.dtype.itemsize for x in inputs[3:])
    bytes_accessed += m_pad * n_pad * jnp.dtype(out_dtype).itemsize

    kernel = functools.partial(_tapconv_kernel, tm=tm, cin_pad=cin_pad,
                               offs=offs, act=act, has_res=residual is not None)

    return pl.pallas_call(
        kernel,
        out_shape=out_shape,
        grid_spec=pltpu.PrefetchScalarGridSpec(
            num_scalar_prefetch=0,
            grid=(m_tiles, n_pad // tn),
            in_specs=in_specs,
            out_specs=out_specs),
        compiler_params=pltpu.CompilerParams(
            dimension_semantics=("parallel", "parallel"),
            vmem_limit_bytes=32 * 1024 * 1024),
        cost_estimate=pl.CostEstimate(flops=int(flops), transcendentals=0,
                                      bytes_accessed=int(bytes_accessed)),
    )(*inputs)


# --------------------------------------------------------------------------
# Host-side im2col over a padded output grid (conv1 and fused pool3+conv4 only)
# --------------------------------------------------------------------------
def _im2col_padded_out(x, k, stride, pad, out_pad, mode):
    """im2col whose output grid includes `out_pad` virtual positions per side
    (rows there are junk and get zeroed by the interior mask downstream)."""
    n, h, w, c = x.shape
    ho = (h + 2 * pad - k) // stride + 1
    wo = (w + 2 * pad - k) // stride + 1
    hop, wop = ho + 2 * out_pad, wo + 2 * out_pad
    extra = out_pad * stride
    xp = x
    if pad:
        xp = jnp.pad(xp, ((0, 0), (pad, pad), (pad, pad), (0, 0)), mode=mode)
    xp = jnp.pad(xp, ((0, 0), (extra, extra), (extra, extra), (0, 0)))
    cols = []
    for ky in range(k):
        for kx in range(k):
            sl = xp[:, ky:ky + hop * stride:stride, kx:kx + wop * stride:stride, :]
            cols.append(sl.reshape(n * hop * wop, c))
    return jnp.concatenate(cols, axis=1), (n, hop, wop)


# --------------------------------------------------------------------------
# EncoderNetworkRes forward
# --------------------------------------------------------------------------
def encoder_forward(params, x_nchw):
    p = params
    f32, bf16 = jnp.float32, jnp.bfloat16
    n_img = x_nchw.shape[0]
    ch = p["w1"].shape[-1]
    csize = p["w7"].shape[-1]

    x = jnp.transpose(x_nchw, (0, 2, 3, 1)).astype(f32)           # NHWC

    # ---------------- level 1 (post-conv1 resolution) ----------------
    a_cols, (_, h1p, w1p) = _im2col_padded_out(x, 5, 2, 2, 1, "constant")
    h1, w1 = h1p - 2, w1p - 2
    m1 = n_img * h1p * w1p
    tm1 = _pick_tm(m1, w1p)
    m1p = _round_up(m1, tm1)
    mask1 = _interior_mask(n_img, h1p, w1p, m1p)

    s1, t1 = p["bn1"]
    # out1 = leaky(bn1(conv1(x)));  a1 = leaky(bn2(out1))   (both bf16, padded layout)
    out1, a1 = gemm_fused(
        a_cols, p["w1"].reshape(25 * 3, ch),
        s1, t1 + s1 * p["b1"],
        tm=tm1, m_pad=m1p, act=True, out2_ss=p["bn2"], mask=mask1,
        out_dtype=bf16, out2_dtype=bf16)

    # hidden = leaky(bn3(conv2(a1)))        (in-kernel-tap 3x3 conv)
    s3, t3 = p["bn3"]
    hid = conv3x3_fused(a1, p["w2"], s3, t3 + s3 * p["b2"],
                        hp=h1p, wp=w1p, tm=tm1, mask=mask1, act=True)

    # out2 = conv3(hidden) + out1           (residual read in bf16)
    out2 = conv3x3_fused(hid, p["w3"], jnp.ones((ch,), f32), p["b3"],
                         hp=h1p, wp=w1p, tm=tm1, mask=mask1, act=False,
                         residual=out1)

    # ---------------- level boundary: pool3 (blur s2) + conv4 (1x1) fused ----
    # TODO(synk): this stride-2 layer (and conv1) still uses host-side im2col;
    # the constant-flat-offset tap trick only applies to stride-1 convs.
    cpad1 = out1.shape[1]
    out2_sp = out2[:m1].reshape(n_img, h1p, w1p, cpad1)[:, 1:1 + h1, 1:1 + w1, :ch]
    blur = jnp.array([1.0, 2.0, 1.0], f32) / 4.0
    blur2 = jnp.outer(blur, blur)                                  # (3, 3)
    w4eff = blur2[:, :, None, None] * p["w4"][0, 0][None, None]    # (3,3,ch,2ch)

    a4_cols, (_, h2p, w2p) = _im2col_padded_out(out2_sp, 3, 2, 1, 1, "reflect")
    h2, w2 = h2p - 2, w2p - 2
    m2 = n_img * h2p * w2p
    tm2 = _pick_tm(m2, w2p)
    m2p = _round_up(m2, tm2)
    mask2 = _interior_mask(n_img, h2p, w2p, m2p)

    # out3 = conv4(pool3(out2));  a5 = leaky(bn5(out3))
    out3, a5 = gemm_fused(
        a4_cols, w4eff.reshape(9 * ch, 2 * ch),
        jnp.ones((2 * ch,), f32), p["b4"],
        tm=tm2, m_pad=m2p, act=False, out2_ss=p["bn5"], mask=mask2,
        out_dtype=bf16, out2_dtype=bf16)

    # hidden = leaky(bn6(conv5(a5)))
    s6, t6 = p["bn6"]
    hid2 = conv3x3_fused(a5, p["w5"], s6, t6 + s6 * p["b5"],
                         hp=h2p, wp=w2p, tm=tm2, mask=mask2, act=True)

    # out4 = conv6(hidden) + out3
    out4 = conv3x3_fused(hid2, p["w6"], jnp.ones((2 * ch,), f32), p["b6"],
                         hp=h2p, wp=w2p, tm=tm2, mask=mask2, act=False,
                         residual=out3)

    # out = conv7(bn7(out4))  (bn7 folded into conv7's 1x1 weights/bias)
    s7, t7 = p["bn7"]
    w7 = p["w7"][0, 0]                                   # (2ch, csize)
    c2pad = out4.shape[1]
    w7f = jnp.pad(w7 * s7[:, None], ((0, c2pad - 2 * ch), (0, 0)))
    b7f = p["b7"] + t7 @ w7
    out7 = gemm_fused(out4, w7f, jnp.ones((csize,), f32), b7f,
                      tm=tm2, m_pad=m2p, out_dtype=f32)

    out = out7[:m2].reshape(n_img, h2p, w2p, -1)[:, 1:1 + h2, 1:1 + w2, :csize]
    return jnp.transpose(out, (0, 3, 1, 2))              # NCHW


# --------------------------------------------------------------------------
# Deterministic synthetic parameters
# --------------------------------------------------------------------------
def _conv_params(key, k, cin, cout):
    kw, kb = jax.random.split(key)
    fan_in = float(k * k * cin)
    w = jax.random.normal(kw, (k, k, cin, cout), jnp.float32) / jnp.sqrt(fan_in)
    b = 0.01 * jax.random.normal(kb, (cout,), jnp.float32)
    return w, b


def _bn_params(key, c):
    k1, k2, k3, k4 = jax.random.split(key, 4)
    gamma = 1.0 + 0.1 * jax.random.normal(k1, (c,), jnp.float32)
    beta = 0.1 * jax.random.normal(k2, (c,), jnp.float32)
    mean = 0.1 * jax.random.normal(k3, (c,), jnp.float32)
    var = 0.5 + 0.5 * jax.random.uniform(k4, (c,), jnp.float32)
    scale = gamma / jnp.sqrt(var + BN_EPS)
    shift = beta - mean * scale
    return scale, shift


def init_params(key, ch, csize):
    keys = jax.random.split(key, 14)
    p = {}
    p["w1"], p["b1"] = _conv_params(keys[0], 5, 3, ch)
    p["w2"], p["b2"] = _conv_params(keys[1], 3, ch, ch)
    p["w3"], p["b3"] = _conv_params(keys[2], 3, ch, ch)
    p["w4"], p["b4"] = _conv_params(keys[3], 1, ch, 2 * ch)
    p["w5"], p["b5"] = _conv_params(keys[4], 3, 2 * ch, 2 * ch)
    p["w6"], p["b6"] = _conv_params(keys[5], 3, 2 * ch, 2 * ch)
    p["w7"], p["b7"] = _conv_params(keys[6], 1, 2 * ch, csize)
    p["bn1"] = _bn_params(keys[7], ch)
    p["bn2"] = _bn_params(keys[8], ch)
    p["bn3"] = _bn_params(keys[9], ch)
    p["bn5"] = _bn_params(keys[10], 2 * ch)
    p["bn6"] = _bn_params(keys[11], 2 * ch)
    p["bn7"] = _bn_params(keys[12], 2 * ch)
    return p


if __name__ == "__main__":
    ch, csize = 8, 16            # small synthetic sizes (module defaults: 64, 128)
    batch, spatial = 2, 16

    root = jax.random.PRNGKey(0)
    k_params, k_input = jax.random.split(root)
    params = init_params(k_params, ch, csize)
    x = jax.random.normal(k_input, (batch, 3, spatial, spatial), jnp.float32)  # NCHW

    fwd = jax.jit(encoder_forward)
    out = jax.block_until_ready(fwd(params, x))

    expected = (batch, csize, spatial // 4, spatial // 4)  # stride-2 conv + blurpool
    assert out.shape == expected, (out.shape, expected)
    assert bool(jnp.all(jnp.isfinite(out)))
    print("KERNEL_OK")
</pallas_src>

<mosaic_0001>
module attributes {stable_mosaic.version = 11 : i64} {
  func.func @_gemm_kernel(%arg0: i32, %arg1: i32, %arg2: i32, %arg3: memref<112x128xbf16, #tpu.memory_space<vmem>>, %arg4: memref<128x128xbf16, #tpu.memory_space<vmem>>, %arg5: memref<1x128xf32, #tpu.memory_space<vmem>>, %arg6: memref<1x128xf32, #tpu.memory_space<vmem>>, %arg7: memref<112x1xf32, #tpu.memory_space<vmem>>, %arg8: memref<1x128xf32, #tpu.memory_space<vmem>>, %arg9: memref<1x128xf32, #tpu.memory_space<vmem>>, %arg10: memref<112x128xbf16, #tpu.memory_space<vmem>>, %arg11: memref<112x128xbf16, #tpu.memory_space<vmem>>, %arg12: memref<112x128xf32, #tpu.memory_space<vmem>>) attributes {dimension_semantics = [#tpu.dimension_semantics<parallel>, #tpu.dimension_semantics<parallel>, #tpu.dimension_semantics<arbitrary>], iteration_bounds = array<i64: 2, 1, 1>, scalar_prefetch = 0 : i64, scratch_operands = 1 : i64, tpu.core_type = #tpu.core_type<tc>, window_params = [{transform_indices = @transform_0, window_bounds = array<i64: 112, 128>}, {transform_indices = @transform_1, window_bounds = array<i64: 128, 128>}, {transform_indices = @transform_2, window_bounds = array<i64: 1, 128>}, {transform_indices = @transform_3, window_bounds = array<i64: 1, 128>}, {transform_indices = @transform_4, window_bounds = array<i64: 112, 1>}, {transform_indices = @transform_5, window_bounds = array<i64: 1, 128>}, {transform_indices = @transform_6, window_bounds = array<i64: 1, 128>}, {transform_indices = @transform_7, window_bounds = array<i64: 112, 128>}, {transform_indices = @transform_8, window_bounds = array<i64: 112, 128>}]} {
    %c0_i32 = arith.constant 0 : i32
    %0 = arith.cmpi eq, %arg2, %c0_i32 : i32
    %1 = arith.extui %0 : i1 to i32
    %c0_i32_0 = arith.constant 0 : i32
    %2 = arith.cmpi ne, %1, %c0_i32_0 : i32
    scf.if %2 {
      %cst_10 = arith.constant 0.000000e+00 : f32
      %12 = vector.broadcast %cst_10 : f32 to vector<112x128xf32>
      %c0_11 = arith.constant 0 : index
      %c0_12 = arith.constant 0 : index
      %13 = vector.load %arg12[%c0_11, %c0_12] : memref<112x128xf32, #tpu.memory_space<vmem>>, vector<112x128xf32>
      tpu.vector_store %arg12[%c0_11, %c0_12], %12 {strides = array<i32>} : memref<112x128xf32, #tpu.memory_space<vmem>>, vector<112x128xf32>,
    } else {
    }
    %c0 = arith.constant 0 : index
    %c0_1 = arith.constant 0 : index
    %3 = vector.load %arg12[%c0, %c0_1] : memref<112x128xf32, #tpu.memory_space<vmem>>, vector<112x128xf32>
    %c0_2 = arith.constant 0 : index
    %c0_3 = arith.constant 0 : index
    %4 = vector.load %arg3[%c0_2, %c0_3] : memref<112x128xbf16, #tpu.memory_space<vmem>>, vector<112x128xbf16>
    %c0_4 = arith.constant 0 : index
    %c0_5 = arith.constant 0 : index
    %5 = vector.load %arg4[%c0_4, %c0_5] : memref<128x128xbf16, #tpu.memory_space<vmem>>, vector<128x128xbf16>
    %cst = arith.constant dense<0.000000e+00> : vector<112x128xf32>
    %6 = tpu.matmul %4, %5, %cst {dimension_numbers = #tpu.dot_dimension_numbers<[1], [0], [0], [1], [0, 0, 1, 1], [], []>} : vector<112x128xbf16>, vector<128x128xbf16>, vector<112x128xf32> -> vector<112x128xf32>
    %7 = arith.addf %3, %6 : vector<112x128xf32>
    %c0_6 = arith.constant 0 : index
    %c0_7 = arith.constant 0 : index
    %8 = vector.load %arg12[%c0_6, %c0_7] : memref<112x128xf32, #tpu.memory_space<vmem>>, vector<112x128xf32>
    tpu.vector_store %arg12[%c0_6, %c0_7], %7 {strides = array<i32>} : memref<112x128xf32, #tpu.memory_space<vmem>>, vector<112x128xf32>,
    %c0_i32_8 = arith.constant 0 : i32
    %9 = arith.cmpi eq, %arg2, %c0_i32_8 : i32
    %10 = arith.extui %9 : i1 to i32
    %c0_i32_9 = arith.constant 0 : i32
    %11 = arith.cmpi ne, %10, %c0_i32_9 : i32
    scf.if %11 {
      %c0_10 = arith.constant 0 : index
      %c0_11 = arith.constant 0 : index
      %12 = vector.load %arg12[%c0_10, %c0_11] : memref<112x128xf32, #tpu.memory_space<vmem>>, vector<112x128xf32>
      %c0_12 = arith.constant 0 : index
      %c0_13 = arith.constant 0 : index
      %13 = vector.load %arg5[%c0_12, %c0_13] : memref<1x128xf32, #tpu.memory_space<vmem>>, vector<1x128xf32>
      %14 = vector.broadcast %13 : vector<1x128xf32> to vector<112x128xf32>
      %15 = arith.mulf %12, %14 : vector<112x128xf32>
      %c0_14 = arith.constant 0 : index
      %c0_15 = arith.constant 0 : index
      %16 = vector.load %arg6[%c0_14, %c0_15] : memref<1x128xf32, #tpu.memory_space<vmem>>, vector<1x128xf32>
      %17 = vector.broadcast %16 : vector<1x128xf32> to vector<112x128xf32>
      %18 = arith.addf %15, %17 : vector<112x128xf32>
      %cst_16 = arith.constant 0.00999999977 : f32
      %19 = vector.broadcast %cst_16 : f32 to vector<112x128xf32>
      %20 = arith.mulf %19, %18 : vector<112x128xf32>
      %21 = arith.maximumf %18, %20 : vector<112x128xf32>
      %c0_17 = arith.constant 0 : index
      %c0_18 = arith.constant 0 : index
      %22 = vector.load %arg7[%c0_17, %c0_18] : memref<112x1xf32, #tpu.memory_space<vmem>>, vector<112x1xf32>
      %cst_19 = arith.constant 0.000000e+00 : f32
      %23 = vector.broadcast %cst_19 : f32 to vector<112x1xf32>
      %24 = arith.cmpf ogt, %22, %23 : vector<112x1xf32>
      %cst_20 = arith.constant 0.000000e+00 : f32
      %25 = vector.shape_cast %24 : vector<112x1xi1> to vector<112x1xi1>
      %26 = vector.broadcast %25 : vector<112x1xi1> to vector<112x128xi1>
      %27 = vector.broadcast %cst_20 : f32 to vector<112x128xf32>
      %28 = arith.select %26, %21, %27 : vector<112x128xi1>, vector<112x128xf32>
      %29 = arith.truncf %28 : vector<112x128xf32> to vector<112x128xbf16>
      %c0_21 = arith.constant 0 : index
      %c0_22 = arith.constant 0 : index
      %30 = vector.load %arg10[%c0_21, %c0_22] : memref<112x128xbf16, #tpu.memory_space<vmem>>, vector<112x128xbf16>
      tpu.vector_store %arg10[%c0_21, %c0_22], %29 {strides = array<i32>} : memref<112x128xbf16, #tpu.memory_space<vmem>>, vector<112x128xbf16>,
      %c0_23 = arith.constant 0 : index
      %c0_24 = arith.constant 0 : index
      %31 = vector.load %arg8[%c0_23, %c0_24] : memref<1x128xf32, #tpu.memory_space<vmem>>, vector<1x128xf32>
      %32 = vector.broadcast %31 : vector<1x128xf32> to vector<112x128xf32>
      %33 = arith.mulf %21, %32 : vector<112x128xf32>
      %c0_25 = arith.constant 0 : index
      %c0_26 = arith.constant 0 : index
      %34 = vector.load %arg9[%c0_25, %c0_26] : memref<1x128xf32, #tpu.memory_space<vmem>>, vector<1x128xf32>
      %35 = vector.broadcast %34 : vector<1x128xf32> to vector<112x128xf32>
      %36 = arith.addf %33, %35 : vector<112x128xf32>
      %cst_27 = arith.constant 0.00999999977 : f32
      %37 = vector.broadcast %cst_27 : f32 to vector<112x128xf32>
      %38 = arith.mulf %37, %36 : vector<112x128xf32>
      %39 = arith.maximumf %36, %38 : vector<112x128xf32>
      %cst_28 = arith.constant 0.000000e+00 : f32
      %40 = vector.shape_cast %24 : vector<112x1xi1> to vector<112x1xi1>
      %41 = vector.broadcast %40 : vector<112x1xi1> to vector<112x128xi1>
      %42 = vector.broadcast %cst_28 : f32 to vector<112x128xf32>
      %43 = arith.select %41, %39, %42 : vector<112x128xi1>, vector<112x128xf32>
      %44 = arith.truncf %43 : vector<112x128xf32> to vector<112x128xbf16>
      %c0_29 = arith.constant 0 : index
      %c0_30 = arith.constant 0 : index
      %45 = vector.load %arg11[%c0_29, %c0_30] : memref<112x128xbf16, #tpu.memory_space<vmem>>, vector<112x128xbf16>
      tpu.vector_store %arg11[%c0_29, %c0_30], %44 {strides = array<i32>} : memref<112x128xbf16, #tpu.memory_space<vmem>>, vector<112x128xbf16>,
    } else {
    }
    return
  }
  func.func @transform_0(%arg0: i32, %arg1: i32, %arg2: i32) -> (i32, i32) {
    %c0_i32 = arith.constant 0 : i32
    return %arg0, %arg2 : i32, i32
  }
  func.func @transform_1(%arg0: i32, %arg1: i32, %arg2: i32) -> (i32, i32) {
    %c0_i32 = arith.constant 0 : i32
    return %arg2, %arg1 : i32, i32
  }
  func.func @transform_2(%arg0: i32, %arg1: i32, %arg2: i32) -> (i32, i32) {
    %c0_i32 = arith.constant 0 : i32
    %c0_i32_0 = arith.constant 0 : i32
    return %c0_i32, %arg1 : i32, i32
  }
  func.func @transform_3(%arg0: i32, %arg1: i32, %arg2: i32) -> (i32, i32) {
    %c0_i32 = arith.constant 0 : i32
    %c0_i32_0 = arith.constant 0 : i32
    return %c0_i32, %arg1 : i32, i32
  }
  func.func @transform_4(%arg0: i32, %arg1: i32, %arg2: i32) -> (i32, i32) {
    %c0_i32 = arith.constant 0 : i32
    %c0_i32_0 = arith.constant 0 : i32
    return %arg0, %c0_i32 : i32, i32
  }
  func.func @transform_5(%arg0: i32, %arg1: i32, %arg2: i32) -> (i32, i32) {
    %c0_i32 = arith.constant 0 : i32
    %c0_i32_0 = arith.constant 0 : i32
    return %c0_i32, %arg1 : i32, i32
  }
  func.func @transform_6(%arg0: i32, %arg1: i32, %arg2: i32) -> (i32, i32) {
    %c0_i32 = arith.constant 0 : i32
    %c0_i32_0 = arith.constant 0 : i32
    return %c0_i32, %arg1 : i32, i32
  }
  func.func @transform_7(%arg0: i32, %arg1: i32, %arg2: i32) -> (i32, i32) {
    %c0_i32 = arith.constant 0 : i32
    return %arg0, %arg1 : i32, i32
  }
  func.func @transform_8(%arg0: i32, %arg1: i32, %arg2: i32) -> (i32, i32) {
    %c0_i32 = arith.constant 0 : i32
    return %arg0, %arg1 : i32, i32
  }
}

module attributes {stable_mosaic.version = 11 : i64} {
  func.func @_tapconv_kernel(%arg0: i32, %arg1: i32, %arg2: memref<112x128xbf16, #tpu.memory_space<vmem>>, %arg3: memref<112x128xbf16, #tpu.memory_space<vmem>>, %arg4: memref<112x128xbf16, #tpu.memory_space<vmem>>, %arg5: memref<1152x128xbf16, #tpu.memory_space<vmem>>, %arg6: memref<1x128xf32, #tpu.memory_space<vmem>>, %arg7: memref<1x128xf32, #tpu.memory_space<vmem>>, %arg8: memref<112x1xf32, #tpu.memory_space<vmem>>, %arg9: memref<112x128xbf16, #tpu.memory_space<vmem>>) attributes {dimension_semantics = [#tpu.dimension_semantics<parallel>, #tpu.dimension_semantics<parallel>], iteration_bounds = array<i64: 2, 1>, scalar_prefetch = 0 : i64, scratch_operands = 0 : i64, tpu.core_type = #tpu.core_type<tc>, window_params = [{transform_indices = @transform_0, window_bounds = array<i64: 112, 128>}, {transform_indices = @transform_1, window_bounds = array<i64: 112, 128>}, {transform_indices = @transform_2, window_bounds = array<i64: 112, 128>}, {transform_indices = @transform_3, window_bounds = array<i64: 1152, 128>}, {transform_indices = @transform_4, window_bounds = array<i64: 1, 128>}, {transform_indices = @transform_5, window_bounds = array<i64: 1, 128>}, {transform_indices = @transform_6, window_bounds = array<i64: 112, 1>}, {transform_indices = @transform_7, window_bounds = array<i64: 112, 128>}]} {
    %c0 = arith.constant 0 : index
    %c0_0 = arith.constant 0 : index
    %0 = vector.load %arg2[%c0, %c0_0] : memref<112x128xbf16, #tpu.memory_space<vmem>>, vector<112x128xbf16>
    %c0_1 = arith.constant 0 : index
    %c0_2 = arith.constant 0 : index
    %1 = vector.load %arg3[%c0_1, %c0_2] : memref<112x128xbf16, #tpu.memory_space<vmem>>, vector<112x128xbf16>
    %c0_3 = arith.constant 0 : index
    %c0_4 = arith.constant 0 : index
    %2 = vector.load %arg4[%c0_3, %c0_4] : memref<112x128xbf16, #tpu.memory_space<vmem>>, vector<112x128xbf16>
    %3 = tpu.concatenate %0, %1, %2 in 0 : vector<112x128xbf16>, vector<112x128xbf16>, vector<112x128xbf16> -> vector<336x128xbf16>
    %cst = arith.constant 0.000000e+00 : f32
    %4 = vector.broadcast %cst : f32 to vector<112x128xf32>
    %5 = vector.extract_strided_slice %3 {offsets = [101, 0], sizes = [112, 128], strides = [1, 1]} : vector<336x128xbf16> to vector<112x128xbf16>
    %c0_5 = arith.constant 0 : index
    %c0_6 = arith.constant 0 : index
    %6 = vector.load %arg5[%c0_5, %c0_6] : memref<1152x128xbf16, #tpu.memory_space<vmem>>, vector<128x128xbf16>
    %cst_7 = arith.constant dense<0.000000e+00> : vector<112x128xf32>
    %7 = tpu.matmul %5, %6, %cst_7 {dimension_numbers = #tpu.dot_dimension_numbers<[1], [0], [0], [1], [0, 0, 1, 1], [], []>} : vector<112x128xbf16>, vector<128x128xbf16>, vector<112x128xf32> -> vector<112x128xf32>
    %8 = arith.addf %4, %7 : vector<112x128xf32>
    %9 = vector.extract_strided_slice %3 {offsets = [102, 0], sizes = [112, 128], strides = [1, 1]} : vector<336x128xbf16> to vector<112x128xbf16>
    %c128 = arith.constant 128 : index
    %c0_8 = arith.constant 0 : index
    %10 = vector.load %arg5[%c128, %c0_8] : memref<1152x128xbf16, #tpu.memory_space<vmem>>, vector<128x128xbf16>
    %cst_9 = arith.constant dense<0.000000e+00> : vector<112x128xf32>
    %11 = tpu.matmul %9, %10, %cst_9 {dimension_numbers = #tpu.dot_dimension_numbers<[1], [0], [0], [1], [0, 0, 1, 1], [], []>} : vector<112x128xbf16>, vector<128x128xbf16>, vector<112x128xf32> -> vector<112x128xf32>
    %12 = arith.addf %8, %11 : vector<112x128xf32>
    %13 = vector.extract_strided_slice %3 {offsets = [103, 0], sizes = [112, 128], strides = [1, 1]} : vector<336x128xbf16> to vector<112x128xbf16>
    %c256 = arith.constant 256 : index
    %c0_10 = arith.constant 0 : index
    %14 = vector.load %arg5[%c256, %c0_10] : memref<1152x128xbf16, #tpu.memory_space<vmem>>, vector<128x128xbf16>
    %cst_11 = arith.constant dense<0.000000e+00> : vector<112x128xf32>
    %15 = tpu.matmul %13, %14, %cst_11 {dimension_numbers = #tpu.dot_dimension_numbers<[1], [0], [0], [1], [0, 0, 1, 1], [], []>} : vector<112x128xbf16>, vector<128x128xbf16>, vector<112x128xf32> -> vector<112x128xf32>
    %16 = arith.addf %12, %15 : vector<112x128xf32>
    %17 = vector.extract_strided_slice %3 {offsets = [111, 0], sizes = [112, 128], strides = [1, 1]} : vector<336x128xbf16> to vector<112x128xbf16>
    %c384 = arith.constant 384 : index
    %c0_12 = arith.constant 0 : index
    %18 = vector.load %arg5[%c384, %c0_12] : memref<1152x128xbf16, #tpu.memory_space<vmem>>, vector<128x128xbf16>
    %cst_13 = arith.constant dense<0.000000e+00> : vector<112x128xf32>
    %19 = tpu.matmul %17, %18, %cst_13 {dimension_numbers = #tpu.dot_dimension_numbers<[1], [0], [0], [1], [0, 0, 1, 1], [], []>} : vector<112x128xbf16>, vector<128x128xbf16>, vector<112x128xf32> -> vector<112x128xf32>
    %20 = arith.addf %16, %19 : vector<112x128xf32>
    %21 = vector.extract_strided_slice %3 {offsets = [112, 0], sizes = [112, 128], strides = [1, 1]} : vector<336x128xbf16> to vector<112x128xbf16>
    %c512 = arith.constant 512 : index
    %c0_14 = arith.constant 0 : index
    %22 = vector.load %arg5[%c512, %c0_14] : memref<1152x128xbf16, #tpu.memory_space<vmem>>, vector<128x128xbf16>
    %cst_15 = arith.constant dense<0.000000e+00> : vector<112x128xf32>
    %23 = tpu.matmul %21, %22, %cst_15 {dimension_numbers = #tpu.dot_dimension_numbers<[1], [0], [0], [1], [0, 0, 1, 1], [], []>} : vector<112x128xbf16>, vector<128x128xbf16>, vector<112x128xf32> -> vector<112x128xf32>
    %24 = arith.addf %20, %23 : vector<112x128xf32>
    %25 = vector.extract_strided_slice %3 {offsets = [113, 0], sizes = [112, 128], strides = [1, 1]} : vector<336x128xbf16> to vector<112x128xbf16>
    %c640 = arith.constant 640 : index
    %c0_16 = arith.constant 0 : index
    %26 = vector.load %arg5[%c640, %c0_16] : memref<1152x128xbf16, #tpu.memory_space<vmem>>, vector<128x128xbf16>
    %cst_17 = arith.constant dense<0.000000e+00> : vector<112x128xf32>
    %27 = tpu.matmul %25, %26, %cst_17 {dimension_numbers = #tpu.dot_dimension_numbers<[1], [0], [0], [1], [0, 0, 1, 1], [], []>} : vector<112x128xbf16>, vector<128x128xbf16>, vector<112x128xf32> -> vector<112x128xf32>
    %28 = arith.addf %24, %27 : vector<112x128xf32>
    %29 = vector.extract_strided_slice %3 {offsets = [121, 0], sizes = [112, 128], strides = [1, 1]} : vector<336x128xbf16> to vector<112x128xbf16>
    %c768 = arith.constant 768 : index
    %c0_18 = arith.constant 0 : index
    %30 = vector.load %arg5[%c768, %c0_18] : memref<1152x128xbf16, #tpu.memory_space<vmem>>, vector<128x128xbf16>
    %cst_19 = arith.constant dense<0.000000e+00> : vector<112x128xf32>
    %31 = tpu.matmul %29, %30, %cst_19 {dimension_numbers = #tpu.dot_dimension_numbers<[1], [0], [0], [1], [0, 0, 1, 1], [], []>} : vector<112x128xbf16>, vector<128x128xbf16>, vector<112x128xf32> -> vector<112x128xf32>
    %32 = arith.addf %28, %31 : vector<112x128xf32>
    %33 = vector.extract_strided_slice %3 {offsets = [122, 0], sizes = [112, 128], strides = [1, 1]} : vector<336x128xbf16> to vector<112x128xbf16>
    %c896 = arith.constant 896 : index
    %c0_20 = arith.constant 0 : index
    %34 = vector.load %arg5[%c896, %c0_20] : memref<1152x128xbf16, #tpu.memory_space<vmem>>, vector<128x128xbf16>
    %cst_21 = arith.constant dense<0.000000e+00> : vector<112x128xf32>
    %35 = tpu.matmul %33, %34, %cst_21 {dimension_numbers = #tpu.dot_dimension_numbers<[1], [0], [0], [1], [0, 0, 1, 1], [], []>} : vector<112x128xbf16>, vector<128x128xbf16>, vector<112x128xf32> -> vector<112x128xf32>
    %36 = arith.addf %32, %35 : vector<112x128xf32>
    %37 = vector.extract_strided_slice %3 {offsets = [123, 0], sizes = [112, 128], strides = [1, 1]} : vector<336x128xbf16> to vector<112x128xbf16>
    %c1024 = arith.constant 1024 : index
    %c0_22 = arith.constant 0 : index
    %38 = vector.load %arg5[%c1024, %c0_22] : memref<1152x128xbf16, #tpu.memory_space<vmem>>, vector<128x128xbf16>
    %cst_23 = arith.constant dense<0.000000e+00> : vector<112x128xf32>
    %39 = tpu.matmul %37, %38, %cst_23 {dimension_numbers = #tpu.dot_dimension_numbers<[1], [0], [0], [1], [0, 0, 1, 1], [], []>} : vector<112x128xbf16>, vector<128x128xbf16>, vector<112x128xf32> -> vector<112x128xf32>
    %40 = arith.addf %36, %39 : vector<112x128xf32>
    %c0_24 = arith.constant 0 : index
    %c0_25 = arith.constant 0 : index
    %41 = vector.load %arg6[%c0_24, %c0_25] : memref<1x128xf32, #tpu.memory_space<vmem>>, vector<1x128xf32>
    %42 = vector.broadcast %41 : vector<1x128xf32> to vector<112x128xf32>
    %43 = arith.mulf %40, %42 : vector<112x128xf32>
    %c0_26 = arith.constant 0 : index
    %c0_27 = arith.constant 0 : index
    %44 = vector.load %arg7[%c0_26, %c0_27] : memref<1x128xf32, #tpu.memory_space<vmem>>, vector<1x128xf32>
    %45 = vector.broadcast %44 : vector<1x128xf32> to vector<112x128xf32>
    %46 = arith.addf %43, %45 : vector<112x128xf32>
    %cst_28 = arith.constant 0.00999999977 : f32
    %47 = vector.broadcast %cst_28 : f32 to vector<112x128xf32>
    %48 = arith.mulf %47, %46 : vector<112x128xf32>
    %49 = arith.maximumf %46, %48 : vector<112x128xf32>
    %c0_29 = arith.constant 0 : index
    %c0_30 = arith.constant 0 : index
    %50 = vector.load %arg8[%c0_29, %c0_30] : memref<112x1xf32, #tpu.memory_space<vmem>>, vector<112x1xf32>
    %cst_31 = arith.constant 0.000000e+00 : f32
    %51 = vector.broadcast %cst_31 : f32 to vector<112x1xf32>
    %52 = arith.cmpf ogt, %50, %51 : vector<112x1xf32>
    %cst_32 = arith.constant 0.000000e+00 : f32
    %53 = vector.shape_cast %52 : vector<112x1xi1> to vector<112x1xi1>
    %54 = vector.broadcast %53 : vector<112x1xi1> to vector<112x128xi1>
    %55 = vector.broadcast %cst_32 : f32 to vector<112x128xf32>
    %56 = arith.select %54, %49, %55 : vector<112x128xi1>, vector<112x128xf32>
    %57 = arith.truncf %56 : vector<112x128xf32> to vector<112x128xbf16>
    %c0_33 = arith.constant 0 : index
    %c0_34 = arith.constant 0 : index
    %58 = vector.load %arg9[%c0_33, %c0_34] : memref<112x128xbf16, #tpu.memory_space<vmem>>, vector<112x128xbf16>
    tpu.vector_store %arg9[%c0_33, %c0_34], %57 {strides = array<i32>} : memref<112x128xbf16, #tpu.memory_space<vmem>>, vector<112x128xbf16>,
    return
  }
  func.func @transform_0(%arg0: i32, %arg1: i32) -> (i32, i32) {
    %c1_i32 = arith.constant 1 : i32
    %0 = arith.subi %arg0, %c1_i32 : i32
    %c0_i32 = arith.constant 0 : i32
    %1 = arith.maxsi %0, %c0_i32 : i32
    %c0_i32_0 = arith.constant 0 : i32
    %c0_i32_1 = arith.constant 0 : i32
    return %1, %c0_i32_0 : i32, i32
  }
  func.func @transform_1(%arg0: i32, %arg1: i32) -> (i32, i32) {
    %c0_i32 = arith.constant 0 : i32
    %c0_i32_0 = arith.constant 0 : i32
    return %arg0, %c0_i32 : i32, i32
  }
  func.func @transform_2(%arg0: i32, %arg1: i32) -> (i32, i32) {
    %c1_i32 = arith.constant 1 : i32
    %0 = arith.addi %arg0, %c1_i32 : i32
    %c1_i32_0 = arith.constant 1 : i32
    %1 = arith.minsi %0, %c1_i32_0 : i32
    %c0_i32 = arith.constant 0 : i32
    %c0_i32_1 = arith.constant 0 : i32
    return %1, %c0_i32 : i32, i32
  }
  func.func @transform_3(%arg0: i32, %arg1: i32) -> (i32, i32) {
    %c0_i32 = arith.constant 0 : i32
    %c0_i32_0 = arith.constant 0 : i32
    return %c0_i32, %arg1 : i32, i32
  }
  func.func @transform_4(%arg0: i32, %arg1: i32) -> (i32, i32) {
    %c0_i32 = arith.constant 0 : i32
    %c0_i32_0 = arith.constant 0 : i32
    return %c0_i32, %arg1 : i32, i32
  }
  func.func @transform_5(%arg0: i32, %arg1: i32) -> (i32, i32) {
    %c0_i32 = arith.constant 0 : i32
    %c0_i32_0 = arith.constant 0 : i32
    return %c0_i32, %arg1 : i32, i32
  }
  func.func @transform_6(%arg0: i32, %arg1: i32) -> (i32, i32) {
    %c0_i32 = arith.constant 0 : i32
    %c0_i32_0 = arith.constant 0 : i32
    return %arg0, %c0_i32 : i32, i32
  }
  func.func @transform_7(%arg0: i32, %arg1: i32) -> (i32, i32) {
    %c0_i32 = arith.constant 0 : i32
    return %arg0, %arg1 : i32, i32
  }
}

module attributes {stable_mosaic.version = 11 : i64} {
  func.func @_tapconv_kernel(%arg0: i32, %arg1: i32, %arg2: memref<112x128xbf16, #tpu.memory_space<vmem>>, %arg3: memref<112x128xbf16, #tpu.memory_space<vmem>>, %arg4: memref<112x128xbf16, #tpu.memory_space<vmem>>, %arg5: memref<1152x128xbf16, #tpu.memory_space<vmem>>, %arg6: memref<1x128xf32, #tpu.memory_space<vmem>>, %arg7: memref<1x128xf32, #tpu.memory_space<vmem>>, %arg8: memref<112x1xf32, #tpu.memory_space<vmem>>, %arg9: memref<112x128xbf16, #tpu.memory_space<vmem>>, %arg10: memref<112x128xbf16, #tpu.memory_space<vmem>>) attributes {dimension_semantics = [#tpu.dimension_semantics<parallel>, #tpu.dimension_semantics<parallel>], iteration_bounds = array<i64: 2, 1>, scalar_prefetch = 0 : i64, scratch_operands = 0 : i64, tpu.core_type = #tpu.core_type<tc>, window_params = [{transform_indices = @transform_0, window_bounds = array<i64: 112, 128>}, {transform_indices = @transform_1, window_bounds = array<i64: 112, 128>}, {transform_indices = @transform_2, window_bounds = array<i64: 112, 128>}, {transform_indices = @transform_3, window_bounds = array<i64: 1152, 128>}, {transform_indices = @transform_4, window_bounds = array<i64: 1, 128>}, {transform_indices = @transform_5, window_bounds = array<i64: 1, 128>}, {transform_indices = @transform_6, window_bounds = array<i64: 112, 1>}, {transform_indices = @transform_7, window_bounds = array<i64: 112, 128>}, {transform_indices = @transform_8, window_bounds = array<i64: 112, 128>}]} {
    %c0 = arith.constant 0 : index
    %c0_0 = arith.constant 0 : index
    %0 = vector.load %arg2[%c0, %c0_0] : memref<112x128xbf16, #tpu.memory_space<vmem>>, vector<112x128xbf16>
    %c0_1 = arith.constant 0 : index
    %c0_2 = arith.constant 0 : index
    %1 = vector.load %arg3[%c0_1, %c0_2] : memref<112x128xbf16, #tpu.memory_space<vmem>>, vector<112x128xbf16>
    %c0_3 = arith.constant 0 : index
    %c0_4 = arith.constant 0 : index
    %2 = vector.load %arg4[%c0_3, %c0_4] : memref<112x128xbf16, #tpu.memory_space<vmem>>, vector<112x128xbf16>
    %3 = tpu.concatenate %0, %1, %2 in 0 : vector<112x128xbf16>, vector<112x128xbf16>, vector<112x128xbf16> -> vector<336x128xbf16>
    %cst = arith.constant 0.000000e+00 : f32
    %4 = vector.broadcast %cst : f32 to vector<112x128xf32>
    %5 = vector.extract_strided_slice %3 {offsets = [101, 0], sizes = [112, 128], strides = [1, 1]} : vector<336x128xbf16> to vector<112x128xbf16>
    %c0_5 = arith.constant 0 : index
    %c0_6 = arith.constant 0 : index
    %6 = vector.load %arg5[%c0_5, %c0_6] : memref<1152x128xbf16, #tpu.memory_space<vmem>>, vector<128x128xbf16>
    %cst_7 = arith.constant dense<0.000000e+00> : vector<112x128xf32>
    %7 = tpu.matmul %5, %6, %cst_7 {dimension_numbers = #tpu.dot_dimension_numbers<[1], [0], [0], [1], [0, 0, 1, 1], [], []>} : vector<112x128xbf16>, vector<128x128xbf16>, vector<112x128xf32> -> vector<112x128xf32>
    %8 = arith.addf %4, %7 : vector<112x128xf32>
    %9 = vector.extract_strided_slice %3 {offsets = [102, 0], sizes = [112, 128], strides = [1, 1]} : vector<336x128xbf16> to vector<112x128xbf16>
    %c128 = arith.constant 128 : index
    %c0_8 = arith.constant 0 : index
    %10 = vector.load %arg5[%c128, %c0_8] : memref<1152x128xbf16, #tpu.memory_space<vmem>>, vector<128x128xbf16>
    %cst_9 = arith.constant dense<0.000000e+00> : vector<112x128xf32>
    %11 = tpu.matmul %9, %10, %cst_9 {dimension_numbers = #tpu.dot_dimension_numbers<[1], [0], [0], [1], [0, 0, 1, 1], [], []>} : vector<112x128xbf16>, vector<128x128xbf16>, vector<112x128xf32> -> vector<112x128xf32>
    %12 = arith.addf %8, %11 : vector<112x128xf32>
    %13 = vector.extract_strided_slice %3 {offsets = [103, 0], sizes = [112, 128], strides = [1, 1]} : vector<336x128xbf16> to vector<112x128xbf16>
    %c256 = arith.constant 256 : index
    %c0_10 = arith.constant 0 : index
    %14 = vector.load %arg5[%c256, %c0_10] : memref<1152x128xbf16, #tpu.memory_space<vmem>>, vector<128x128xbf16>
    %cst_11 = arith.constant dense<0.000000e+00> : vector<112x128xf32>
    %15 = tpu.matmul %13, %14, %cst_11 {dimension_numbers = #tpu.dot_dimension_numbers<[1], [0], [0], [1], [0, 0, 1, 1], [], []>} : vector<112x128xbf16>, vector<128x128xbf16>, vector<112x128xf32> -> vector<112x128xf32>
    %16 = arith.addf %12, %15 : vector<112x128xf32>
    %17 = vector.extract_strided_slice %3 {offsets = [111, 0], sizes = [112, 128], strides = [1, 1]} : vector<336x128xbf16> to vector<112x128xbf16>
    %c384 = arith.constant 384 : index
    %c0_12 = arith.constant 0 : index
    %18 = vector.load %arg5[%c384, %c0_12] : memref<1152x128xbf16, #tpu.memory_space<vmem>>, vector<128x128xbf16>
    %cst_13 = arith.constant dense<0.000000e+00> : vector<112x128xf32>
    %19 = tpu.matmul %17, %18, %cst_13 {dimension_numbers = #tpu.dot_dimension_numbers<[1], [0], [0], [1], [0, 0, 1, 1], [], []>} : vector<112x128xbf16>, vector<128x128xbf16>, vector<112x128xf32> -> vector<112x128xf32>
    %20 = arith.addf %16, %19 : vector<112x128xf32>
    %21 = vector.extract_strided_slice %3 {offsets = [112, 0], sizes = [112, 128], strides = [1, 1]} : vector<336x128xbf16> to vector<112x128xbf16>
    %c512 = arith.constant 512 : index
    %c0_14 = arith.constant 0 : index
    %22 = vector.load %arg5[%c512, %c0_14] : memref<1152x128xbf16, #tpu.memory_space<vmem>>, vector<128x128xbf16>
    %cst_15 = arith.constant dense<0.000000e+00> : vector<112x128xf32>
    %23 = tpu.matmul %21, %22, %cst_15 {dimension_numbers = #tpu.dot_dimension_numbers<[1], [0], [0], [1], [0, 0, 1, 1], [], []>} : vector<112x128xbf16>, vector<128x128xbf16>, vector<112x128xf32> -> vector<112x128xf32>
    %24 = arith.addf %20, %23 : vector<112x128xf32>
    %25 = vector.extract_strided_slice %3 {offsets = [113, 0], sizes = [112, 128], strides = [1, 1]} : vector<336x128xbf16> to vector<112x128xbf16>
    %c640 = arith.constant 640 : index
    %c0_16 = arith.constant 0 : index
    %26 = vector.load %arg5[%c640, %c0_16] : memref<1152x128xbf16, #tpu.memory_space<vmem>>, vector<128x128xbf16>
    %cst_17 = arith.constant dense<0.000000e+00> : vector<112x128xf32>
    %27 = tpu.matmul %25, %26, %cst_17 {dimension_numbers = #tpu.dot_dimension_numbers<[1], [0], [0], [1], [0, 0, 1, 1], [], []>} : vector<112x128xbf16>, vector<128x128xbf16>, vector<112x128xf32> -> vector<112x128xf32>
    %28 = arith.addf %24, %27 : vector<112x128xf32>
    %29 = vector.extract_strided_slice %3 {offsets = [121, 0], sizes = [112, 128], strides = [1, 1]} : vector<336x128xbf16> to vector<112x128xbf16>
    %c768 = arith.constant 768 : index
    %c0_18 = arith.constant 0 : index
    %30 = vector.load %arg5[%c768, %c0_18] : memref<1152x128xbf16, #tpu.memory_space<vmem>>, vector<128x128xbf16>
    %cst_19 = arith.constant dense<0.000000e+00> : vector<112x128xf32>
    %31 = tpu.matmul %29, %30, %cst_19 {dimension_numbers = #tpu.dot_dimension_numbers<[1], [0], [0], [1], [0, 0, 1, 1], [], []>} : vector<112x128xbf16>, vector<128x128xbf16>, vector<112x128xf32> -> vector<112x128xf32>
    %32 = arith.addf %28, %31 : vector<112x128xf32>
    %33 = vector.extract_strided_slice %3 {offsets = [122, 0], sizes = [112, 128], strides = [1, 1]} : vector<336x128xbf16> to vector<112x128xbf16>
    %c896 = arith.constant 896 : index
    %c0_20 = arith.constant 0 : index
    %34 = vector.load %arg5[%c896, %c0_20] : memref<1152x128xbf16, #tpu.memory_space<vmem>>, vector<128x128xbf16>
    %cst_21 = arith.constant dense<0.000000e+00> : vector<112x128xf32>
    %35 = tpu.matmul %33, %34, %cst_21 {dimension_numbers = #tpu.dot_dimension_numbers<[1], [0], [0], [1], [0, 0, 1, 1], [], []>} : vector<112x128xbf16>, vector<128x128xbf16>, vector<112x128xf32> -> vector<112x128xf32>
    %36 = arith.addf %32, %35 : vector<112x128xf32>
    %37 = vector.extract_strided_slice %3 {offsets = [123, 0], sizes = [112, 128], strides = [1, 1]} : vector<336x128xbf16> to vector<112x128xbf16>
    %c1024 = arith.constant 1024 : index
    %c0_22 = arith.constant 0 : index
    %38 = vector.load %arg5[%c1024, %c0_22] : memref<1152x128xbf16, #tpu.memory_space<vmem>>, vector<128x128xbf16>
    %cst_23 = arith.constant dense<0.000000e+00> : vector<112x128xf32>
    %39 = tpu.matmul %37, %38, %cst_23 {dimension_numbers = #tpu.dot_dimension_numbers<[1], [0], [0], [1], [0, 0, 1, 1], [], []>} : vector<112x128xbf16>, vector<128x128xbf16>, vector<112x128xf32> -> vector<112x128xf32>
    %40 = arith.addf %36, %39 : vector<112x128xf32>
    %c0_24 = arith.constant 0 : index
    %c0_25 = arith.constant 0 : index
    %41 = vector.load %arg6[%c0_24, %c0_25] : memref<1x128xf32, #tpu.memory_space<vmem>>, vector<1x128xf32>
    %42 = vector.broadcast %41 : vector<1x128xf32> to vector<112x128xf32>
    %43 = arith.mulf %40, %42 : vector<112x128xf32>
    %c0_26 = arith.constant 0 : index
    %c0_27 = arith.constant 0 : index
    %44 = vector.load %arg7[%c0_26, %c0_27] : memref<1x128xf32, #tpu.memory_space<vmem>>, vector<1x128xf32>
    %45 = vector.broadcast %44 : vector<1x128xf32> to vector<112x128xf32>
    %46 = arith.addf %43, %45 : vector<112x128xf32>
    %c0_28 = arith.constant 0 : index
    %c0_29 = arith.constant 0 : index
    %47 = vector.load %arg9[%c0_28, %c0_29] : memref<112x128xbf16, #tpu.memory_space<vmem>>, vector<112x128xbf16>
    %48 = arith.extf %47 : vector<112x128xbf16> to vector<112x128xf32>
    %49 = arith.addf %46, %48 : vector<112x128xf32>
    %c0_30 = arith.constant 0 : index
    %c0_31 = arith.constant 0 : index
    %50 = vector.load %arg8[%c0_30, %c0_31] : memref<112x1xf32, #tpu.memory_space<vmem>>, vector<112x1xf32>
    %cst_32 = arith.constant 0.000000e+00 : f32
    %51 = vector.broadcast %cst_32 : f32 to vector<112x1xf32>
    %52 = arith.cmpf ogt, %50, %51 : vector<112x1xf32>
    %cst_33 = arith.constant 0.000000e+00 : f32
    %53 = vector.shape_cast %52 : vector<112x1xi1> to vector<112x1xi1>
    %54 = vector.broadcast %53 : vector<112x1xi1> to vector<112x128xi1>
    %55 = vector.broadcast %cst_33 : f32 to vector<112x128xf32>
    %56 = arith.select %54, %49, %55 : vector<112x128xi1>, vector<112x128xf32>
    %57 = arith.truncf %56 : vector<112x128xf32> to vector<112x128xbf16>
    %c0_34 = arith.constant 0 : index
    %c0_35 = arith.constant 0 : index
    %58 = vector.load %arg10[%c0_34, %c0_35] : memref<112x128xbf16, #tpu.memory_space<vmem>>, vector<112x128xbf16>
    tpu.vector_store %arg10[%c0_34, %c0_35], %57 {strides = array<i32>} : memref<112x128xbf16, #tpu.memory_space<vmem>>, vector<112x128xbf16>,
    return
  }
  func.func @transform_0(%arg0: i32, %arg1: i32) -> (i32, i32) {
    %c1_i32 = arith.constant 1 : i32
    %0 = arith.subi %arg0, %c1_i32 : i32
    %c0_i32 = arith.constant 0 : i32
    %1 = arith.maxsi %0, %c0_i32 : i32
    %c0_i32_0 = arith.constant 0 : i32
    %c0_i32_1 = arith.constant 0 : i32
    return %1, %c0_i32_0 : i32, i32
  }
  func.func @transform_1(%arg0: i32, %arg1: i32) -> (i32, i32) {
    %c0_i32 = arith.constant 0 : i32
    %c0_i32_0 = arith.constant 0 : i32
    return %arg0, %c0_i32 : i32, i32
  }
  func.func @transform_2(%arg0: i32, %arg1: i32) -> (i32, i32) {
    %c1_i32 = arith.constant 1 : i32
    %0 = arith.addi %arg0, %c1_i32 : i32
    %c1_i32_0 = arith.constant 1 : i32
    %1 = arith.minsi %0, %c1_i32_0 : i32
    %c0_i32 = arith.constant 0 : i32
    %c0_i32_1 = arith.constant 0 : i32
    return %1, %c0_i32 : i32, i32
  }
  func.func @transform_3(%arg0: i32, %arg1: i32) -> (i32, i32) {
    %c0_i32 = arith.constant 0 : i32
    %c0_i32_0 = arith.constant 0 : i32
    return %c0_i32, %arg1 : i32, i32
  }
  func.func @transform_4(%arg0: i32, %arg1: i32) -> (i32, i32) {
    %c0_i32 = arith.constant 0 : i32
    %c0_i32_0 = arith.constant 0 : i32
    return %c0_i32, %arg1 : i32, i32
  }
  func.func @transform_5(%arg0: i32, %arg1: i32) -> (i32, i32) {
    %c0_i32 = arith.constant 0 : i32
    %c0_i32_0 = arith.constant 0 : i32
    return %c0_i32, %arg1 : i32, i32
  }
  func.func @transform_6(%arg0: i32, %arg1: i32) -> (i32, i32) {
    %c0_i32 = arith.constant 0 : i32
    %c0_i32_0 = arith.constant 0 : i32
    return %arg0, %c0_i32 : i32, i32
  }
  func.func @transform_7(%arg0: i32, %arg1: i32) -> (i32, i32) {
    %c0_i32 = arith.constant 0 : i32
    return %arg0, %arg1 : i32, i32
  }
  func.func @transform_8(%arg0: i32, %arg1: i32) -> (i32, i32) {
    %c0_i32 = arith.constant 0 : i32
    return %arg0, %arg1 : i32, i32
  }
}

module attributes {stable_mosaic.version = 11 : i64} {
  func.func @_tapconv_kernel(%arg0: i32, %arg1: i32, %arg2: memref<48x128xbf16, #tpu.memory_space<vmem>>, %arg3: memref<48x128xbf16, #tpu.memory_space<vmem>>, %arg4: memref<48x128xbf16, #tpu.memory_space<vmem>>, %arg5: memref<1152x128xbf16, #tpu.memory_space<vmem>>, %arg6: memref<1x128xf32, #tpu.memory_space<vmem>>, %arg7: memref<1x128xf32, #tpu.memory_space<vmem>>, %arg8: memref<48x1xf32, #tpu.memory_space<vmem>>, %arg9: memref<48x128xbf16, #tpu.memory_space<vmem>>) attributes {dimension_semantics = [#tpu.dimension_semantics<parallel>, #tpu.dimension_semantics<parallel>], iteration_bounds = array<i64: 2, 1>, scalar_prefetch = 0 : i64, scratch_operands = 0 : i64, tpu.core_type = #tpu.core_type<tc>, window_params = [{transform_indices = @transform_0, window_bounds = array<i64: 48, 128>}, {transform_indices = @transform_1, window_bounds = array<i64: 48, 128>}, {transform_indices = @transform_2, window_bounds = array<i64: 48, 128>}, {transform_indices = @transform_3, window_bounds = array<i64: 1152, 128>}, {transform_indices = @transform_4, window_bounds = array<i64: 1, 128>}, {transform_indices = @transform_5, window_bounds = array<i64: 1, 128>}, {transform_indices = @transform_6, window_bounds = array<i64: 48, 1>}, {transform_indices = @transform_7, window_bounds = array<i64: 48, 128>}]} {
    %c0 = arith.constant 0 : index
    %c0_0 = arith.constant 0 : index
    %0 = vector.load %arg2[%c0, %c0_0] : memref<48x128xbf16, #tpu.memory_space<vmem>>, vector<48x128xbf16>
    %c0_1 = arith.constant 0 : index
    %c0_2 = arith.constant 0 : index
    %1 = vector.load %arg3[%c0_1, %c0_2] : memref<48x128xbf16, #tpu.memory_space<vmem>>, vector<48x128xbf16>
    %c0_3 = arith.constant 0 : index
    %c0_4 = arith.constant 0 : index
    %2 = vector.load %arg4[%c0_3, %c0_4] : memref<48x128xbf16, #tpu.memory_space<vmem>>, vector<48x128xbf16>
    %3 = tpu.concatenate %0, %1, %2 in 0 : vector<48x128xbf16>, vector<48x128xbf16>, vector<48x128xbf16> -> vector<144x128xbf16>
    %cst = arith.constant 0.000000e+00 : f32
    %4 = vector.broadcast %cst : f32 to vector<48x128xf32>
    %5 = vector.extract_strided_slice %3 {offsets = [41, 0], sizes = [48, 128], strides = [1, 1]} : vector<144x128xbf16> to vector<48x128xbf16>
    %c0_5 = arith.constant 0 : index
    %c0_6 = arith.constant 0 : index
    %6 = vector.load %arg5[%c0_5, %c0_6] : memref<1152x128xbf16, #tpu.memory_space<vmem>>, vector<128x128xbf16>
    %cst_7 = arith.constant dense<0.000000e+00> : vector<48x128xf32>
    %7 = tpu.matmul %5, %6, %cst_7 {dimension_numbers = #tpu.dot_dimension_numbers<[1], [0], [0], [1], [0, 0, 1, 1], [], []>} : vector<48x128xbf16>, vector<128x128xbf16>, vector<48x128xf32> -> vector<48x128xf32>
    %8 = arith.addf %4, %7 : vector<48x128xf32>
    %9 = vector.extract_strided_slice %3 {offsets = [42, 0], sizes = [48, 128], strides = [1, 1]} : vector<144x128xbf16> to vector<48x128xbf16>
    %c128 = arith.constant 128 : index
    %c0_8 = arith.constant 0 : index
    %10 = vector.load %arg5[%c128, %c0_8] : memref<1152x128xbf16, #tpu.memory_space<vmem>>, vector<128x128xbf16>
    %cst_9 = arith.constant dense<0.000000e+00> : vector<48x128xf32>
    %11 = tpu.matmul %9, %10, %cst_9 {dimension_numbers = #tpu.dot_dimension_numbers<[1], [0], [0], [1], [0, 0, 1, 1], [], []>} : vector<48x128xbf16>, vector<128x128xbf16>, vector<48x128xf32> -> vector<48x128xf32>
    %12 = arith.addf %8, %11 : vector<48x128xf32>
    %13 = vector.extract_strided_slice %3 {offsets = [43, 0], sizes = [48, 128], strides = [1, 1]} : vector<144x128xbf16> to vector<48x128xbf16>
    %c256 = arith.constant 256 : index
    %c0_10 = arith.constant 0 : index
    %14 = vector.load %arg5[%c256, %c0_10] : memref<1152x128xbf16, #tpu.memory_space<vmem>>, vector<128x128xbf16>
    %cst_11 = arith.constant dense<0.000000e+00> : vector<48x128xf32>
    %15 = tpu.matmul %13, %14, %cst_11 {dimension_numbers = #tpu.dot_dimension_numbers<[1], [0], [0], [1], [0, 0, 1, 1], [], []>} : vector<48x128xbf16>, vector<128x128xbf16>, vector<48x128xf32> -> vector<48x128xf32>
    %16 = arith.addf %12, %15 : vector<48x128xf32>
    %17 = vector.extract_strided_slice %3 {offsets = [47, 0], sizes = [48, 128], strides = [1, 1]} : vector<144x128xbf16> to vector<48x128xbf16>
    %c384 = arith.constant 384 : index
    %c0_12 = arith.constant 0 : index
    %18 = vector.load %arg5[%c384, %c0_12] : memref<1152x128xbf16, #tpu.memory_space<vmem>>, vector<128x128xbf16>
    %cst_13 = arith.constant dense<0.000000e+00> : vector<48x128xf32>
    %19 = tpu.matmul %17, %18, %cst_13 {dimension_numbers = #tpu.dot_dimension_numbers<[1], [0], [0], [1], [0, 0, 1, 1], [], []>} : vector<48x128xbf16>, vector<128x128xbf16>, vector<48x128xf32> -> vector<48x128xf32>
    %20 = arith.addf %16, %19 : vector<48x128xf32>
    %21 = vector.extract_strided_slice %3 {offsets = [48, 0], sizes = [48, 128], strides = [1, 1]} : vector<144x128xbf16> to vector<48x128xbf16>
    %c512 = arith.constant 512 : index
    %c0_14 = arith.constant 0 : index
    %22 = vector.load %arg5[%c512, %c0_14] : memref<1152x128xbf16, #tpu.memory_space<vmem>>, vector<128x128xbf16>
    %cst_15 = arith.constant dense<0.000000e+00> : vector<48x128xf32>
    %23 = tpu.matmul %21, %22, %cst_15 {dimension_numbers = #tpu.dot_dimension_numbers<[1], [0], [0], [1], [0, 0, 1, 1], [], []>} : vector<48x128xbf16>, vector<128x128xbf16>, vector<48x128xf32> -> vector<48x128xf32>
    %24 = arith.addf %20, %23 : vector<48x128xf32>
    %25 = vector.extract_strided_slice %3 {offsets = [49, 0], sizes = [48, 128], strides = [1, 1]} : vector<144x128xbf16> to vector<48x128xbf16>
    %c640 = arith.constant 640 : index
    %c0_16 = arith.constant 0 : index
    %26 = vector.load %arg5[%c640, %c0_16] : memref<1152x128xbf16, #tpu.memory_space<vmem>>, vector<128x128xbf16>
    %cst_17 = arith.constant dense<0.000000e+00> : vector<48x128xf32>
    %27 = tpu.matmul %25, %26, %cst_17 {dimension_numbers = #tpu.dot_dimension_numbers<[1], [0], [0], [1], [0, 0, 1, 1], [], []>} : vector<48x128xbf16>, vector<128x128xbf16>, vector<48x128xf32> -> vector<48x128xf32>
    %28 = arith.addf %24, %27 : vector<48x128xf32>
    %29 = vector.extract_strided_slice %3 {offsets = [53, 0], sizes = [48, 128], strides = [1, 1]} : vector<144x128xbf16> to vector<48x128xbf16>
    %c768 = arith.constant 768 : index
    %c0_18 = arith.constant 0 : index
    %30 = vector.load %arg5[%c768, %c0_18] : memref<1152x128xbf16, #tpu.memory_space<vmem>>, vector<128x128xbf16>
    %cst_19 = arith.constant dense<0.000000e+00> : vector<48x128xf32>
    %31 = tpu.matmul %29, %30, %cst_19 {dimension_numbers = #tpu.dot_dimension_numbers<[1], [0], [0], [1], [0, 0, 1, 1], [], []>} : vector<48x128xbf16>, vector<128x128xbf16>, vector<48x128xf32> -> vector<48x128xf32>
    %32 = arith.addf %28, %31 : vector<48x128xf32>
    %33 = vector.extract_strided_slice %3 {offsets = [54, 0], sizes = [48, 128], strides = [1, 1]} : vector<144x128xbf16> to vector<48x128xbf16>
    %c896 = arith.constant 896 : index
    %c0_20 = arith.constant 0 : index
    %34 = vector.load %arg5[%c896, %c0_20] : memref<1152x128xbf16, #tpu.memory_space<vmem>>, vector<128x128xbf16>
    %cst_21 = arith.constant dense<0.000000e+00> : vector<48x128xf32>
    %35 = tpu.matmul %33, %34, %cst_21 {dimension_numbers = #tpu.dot_dimension_numbers<[1], [0], [0], [1], [0, 0, 1, 1], [], []>} : vector<48x128xbf16>, vector<128x128xbf16>, vector<48x128xf32> -> vector<48x128xf32>
    %36 = arith.addf %32, %35 : vector<48x128xf32>
    %37 = vector.extract_strided_slice %3 {offsets = [55, 0], sizes = [48, 128], strides = [1, 1]} : vector<144x128xbf16> to vector<48x128xbf16>
    %c1024 = arith.constant 1024 : index
    %c0_22 = arith.constant 0 : index
    %38 = vector.load %arg5[%c1024, %c0_22] : memref<1152x128xbf16, #tpu.memory_space<vmem>>, vector<128x128xbf16>
    %cst_23 = arith.constant dense<0.000000e+00> : vector<48x128xf32>
    %39 = tpu.matmul %37, %38, %cst_23 {dimension_numbers = #tpu.dot_dimension_numbers<[1], [0], [0], [1], [0, 0, 1, 1], [], []>} : vector<48x128xbf16>, vector<128x128xbf16>, vector<48x128xf32> -> vector<48x128xf32>
    %40 = arith.addf %36, %39 : vector<48x128xf32>
    %c0_24 = arith.constant 0 : index
    %c0_25 = arith.constant 0 : index
    %41 = vector.load %arg6[%c0_24, %c0_25] : memref<1x128xf32, #tpu.memory_space<vmem>>, vector<1x128xf32>
    %42 = vector.broadcast %41 : vector<1x128xf32> to vector<48x128xf32>
    %43 = arith.mulf %40, %42 : vector<48x128xf32>
    %c0_26 = arith.constant 0 : index
    %c0_27 = arith.constant 0 : index
    %44 = vector.load %arg7[%c0_26, %c0_27] : memref<1x128xf32, #tpu.memory_space<vmem>>, vector<1x128xf32>
    %45 = vector.broadcast %44 : vector<1x128xf32> to vector<48x128xf32>
    %46 = arith.addf %43, %45 : vector<48x128xf32>
    %cst_28 = arith.constant 0.00999999977 : f32
    %47 = vector.broadcast %cst_28 : f32 to vector<48x128xf32>
    %48 = arith.mulf %47, %46 : vector<48x128xf32>
    %49 = arith.maximumf %46, %48 : vector<48x128xf32>
    %c0_29 = arith.constant 0 : index
    %c0_30 = arith.constant 0 : index
    %50 = vector.load %arg8[%c0_29, %c0_30] : memref<48x1xf32, #tpu.memory_space<vmem>>, vector<48x1xf32>
    %cst_31 = arith.constant 0.000000e+00 : f32
    %51 = vector.broadcast %cst_31 : f32 to vector<48x1xf32>
    %52 = arith.cmpf ogt, %50, %51 : vector<48x1xf32>
    %cst_32 = arith.constant 0.000000e+00 : f32
    %53 = vector.shape_cast %52 : vector<48x1xi1> to vector<48x1xi1>
    %54 = vector.broadcast %53 : vector<48x1xi1> to vector<48x128xi1>
    %55 = vector.broadcast %cst_32 : f32 to vector<48x128xf32>
    %56 = arith.select %54, %49, %55 : vector<48x128xi1>, vector<48x128xf32>
    %57 = arith.truncf %56 : vector<48x128xf32> to vector<48x128xbf16>
    %c0_33 = arith.constant 0 : index
    %c0_34 = arith.constant 0 : index
    %58 = vector.load %arg9[%c0_33, %c0_34] : memref<48x128xbf16, #tpu.memory_space<vmem>>, vector<48x128xbf16>
    tpu.vector_store %arg9[%c0_33, %c0_34], %57 {strides = array<i32>} : memref<48x128xbf16, #tpu.memory_space<vmem>>, vector<48x128xbf16>,
    return
  }
  func.func @transform_0(%arg0: i32, %arg1: i32) -> (i32, i32) {
    %c1_i32 = arith.constant 1 : i32
    %0 = arith.subi %arg0, %c1_i32 : i32
    %c0_i32 = arith.constant 0 : i32
    %1 = arith.maxsi %0, %c0_i32 : i32
    %c0_i32_0 = arith.constant 0 : i32
    %c0_i32_1 = arith.constant 0 : i32
    return %1, %c0_i32_0 : i32, i32
  }
  func.func @transform_1(%arg0: i32, %arg1: i32) -> (i32, i32) {
    %c0_i32 = arith.constant 0 : i32
    %c0_i32_0 = arith.constant 0 : i32
    return %arg0, %c0_i32 : i32, i32
  }
  func.func @transform_2(%arg0: i32, %arg1: i32) -> (i32, i32) {
    %c1_i32 = arith.constant 1 : i32
    %0 = arith.addi %arg0, %c1_i32 : i32
    %c1_i32_0 = arith.constant 1 : i32
    %1 = arith.minsi %0, %c1_i32_0 : i32
    %c0_i32 = arith.constant 0 : i32
    %c0_i32_1 = arith.constant 0 : i32
    return %1, %c0_i32 : i32, i32
  }
  func.func @transform_3(%arg0: i32, %arg1: i32) -> (i32, i32) {
    %c0_i32 = arith.constant 0 : i32
    %c0_i32_0 = arith.constant 0 : i32
    return %c0_i32, %arg1 : i32, i32
  }
  func.func @transform_4(%arg0: i32, %arg1: i32) -> (i32, i32) {
    %c0_i32 = arith.constant 0 : i32
    %c0_i32_0 = arith.constant 0 : i32
    return %c0_i32, %arg1 : i32, i32
  }
  func.func @transform_5(%arg0: i32, %arg1: i32) -> (i32, i32) {
    %c0_i32 = arith.constant 0 : i32
    %c0_i32_0 = arith.constant 0 : i32
    return %c0_i32, %arg1 : i32, i32
  }
  func.func @transform_6(%arg0: i32, %arg1: i32) -> (i32, i32) {
    %c0_i32 = arith.constant 0 : i32
    %c0_i32_0 = arith.constant 0 : i32
    return %arg0, %c0_i32 : i32, i32
  }
  func.func @transform_7(%arg0: i32, %arg1: i32) -> (i32, i32) {
    %c0_i32 = arith.constant 0 : i32
    return %arg0, %arg1 : i32, i32
  }
}

module attributes {stable_mosaic.version = 11 : i64} {
  func.func @_gemm_kernel(%arg0: i32, %arg1: i32, %arg2: i32, %arg3: memref<48x128xbf16, #tpu.memory_space<vmem>>, %arg4: memref<128x128xbf16, #tpu.memory_space<vmem>>, %arg5: memref<1x128xf32, #tpu.memory_space<vmem>>, %arg6: memref<1x128xf32, #tpu.memory_space<vmem>>, %arg7: memref<48x1xf32, #tpu.memory_space<vmem>>, %arg8: memref<1x128xf32, #tpu.memory_space<vmem>>, %arg9: memref<1x128xf32, #tpu.memory_space<vmem>>, %arg10: memref<48x128xbf16, #tpu.memory_space<vmem>>, %arg11: memref<48x128xbf16, #tpu.memory_space<vmem>>, %arg12: memref<48x128xf32, #tpu.memory_space<vmem>>) attributes {dimension_semantics = [#tpu.dimension_semantics<parallel>, #tpu.dimension_semantics<parallel>, #tpu.dimension_semantics<arbitrary>], iteration_bounds = array<i64: 2, 1, 1>, scalar_prefetch = 0 : i64, scratch_operands = 1 : i64, tpu.core_type = #tpu.core_type<tc>, window_params = [{transform_indices = @transform_0, window_bounds = array<i64: 48, 128>}, {transform_indices = @transform_1, window_bounds = array<i64: 128, 128>}, {transform_indices = @transform_2, window_bounds = array<i64: 1, 128>}, {transform_indices = @transform_3, window_bounds = array<i64: 1, 128>}, {transform_indices = @transform_4, window_bounds = array<i64: 48, 1>}, {transform_indices = @transform_5, window_bounds = array<i64: 1, 128>}, {transform_indices = @transform_6, window_bounds = array<i64: 1, 128>}, {transform_indices = @transform_7, window_bounds = array<i64: 48, 128>}, {transform_indices = @transform_8, window_bounds = array<i64: 48, 128>}]} {
    %c0_i32 = arith.constant 0 : i32
    %0 = arith.cmpi eq, %arg2, %c0_i32 : i32
    %1 = arith.extui %0 : i1 to i32
    %c0_i32_0 = arith.constant 0 : i32
    %2 = arith.cmpi ne, %1, %c0_i32_0 : i32
    scf.if %2 {
      %cst_10 = arith.constant 0.000000e+00 : f32
      %12 = vector.broadcast %cst_10 : f32 to vector<48x128xf32>
      %c0_11 = arith.constant 0 : index
      %c0_12 = arith.constant 0 : index
      %13 = vector.load %arg12[%c0_11, %c0_12] : memref<48x128xf32, #tpu.memory_space<vmem>>, vector<48x128xf32>
      tpu.vector_store %arg12[%c0_11, %c0_12], %12 {strides = array<i32>} : memref<48x128xf32, #tpu.memory_space<vmem>>, vector<48x128xf32>,
    } else {
    }
    %c0 = arith.constant 0 : index
    %c0_1 = arith.constant 0 : index
    %3 = vector.load %arg12[%c0, %c0_1] : memref<48x128xf32, #tpu.memory_space<vmem>>, vector<48x128xf32>
    %c0_2 = arith.constant 0 : index
    %c0_3 = arith.constant 0 : index
    %4 = vector.load %arg3[%c0_2, %c0_3] : memref<48x128xbf16, #tpu.memory_space<vmem>>, vector<48x128xbf16>
    %c0_4 = arith.constant 0 : index
    %c0_5 = arith.constant 0 : index
    %5 = vector.load %arg4[%c0_4, %c0_5] : memref<128x128xbf16, #tpu.memory_space<vmem>>, vector<128x128xbf16>
    %cst = arith.constant dense<0.000000e+00> : vector<48x128xf32>
    %6 = tpu.matmul %4, %5, %cst {dimension_numbers = #tpu.dot_dimension_numbers<[1], [0], [0], [1], [0, 0, 1, 1], [], []>} : vector<48x128xbf16>, vector<128x128xbf16>, vector<48x128xf32> -> vector<48x128xf32>
    %7 = arith.addf %3, %6 : vector<48x128xf32>
    %c0_6 = arith.constant 0 : index
    %c0_7 = arith.constant 0 : index
    %8 = vector.load %arg12[%c0_6, %c0_7] : memref<48x128xf32, #tpu.memory_space<vmem>>, vector<48x128xf32>
    tpu.vector_store %arg12[%c0_6, %c0_7], %7 {strides = array<i32>} : memref<48x128xf32, #tpu.memory_space<vmem>>, vector<48x128xf32>,
    %c0_i32_8 = arith.constant 0 : i32
    %9 = arith.cmpi eq, %arg2, %c0_i32_8 : i32
    %10 = arith.extui %9 : i1 to i32
    %c0_i32_9 = arith.constant 0 : i32
    %11 = arith.cmpi ne, %10, %c0_i32_9 : i32
    scf.if %11 {
      %c0_10 = arith.constant 0 : index
      %c0_11 = arith.constant 0 : index
      %12 = vector.load %arg12[%c0_10, %c0_11] : memref<48x128xf32, #tpu.memory_space<vmem>>, vector<48x128xf32>
      %c0_12 = arith.constant 0 : index
      %c0_13 = arith.constant 0 : index
      %13 = vector.load %arg5[%c0_12, %c0_13] : memref<1x128xf32, #tpu.memory_space<vmem>>, vector<1x128xf32>
      %14 = vector.broadcast %13 : vector<1x128xf32> to vector<48x128xf32>
      %15 = arith.mulf %12, %14 : vector<48x128xf32>
      %c0_14 = arith.constant 0 : index
      %c0_15 = arith.constant 0 : index
      %16 = vector.load %arg6[%c0_14, %c0_15] : memref<1x128xf32, #tpu.memory_space<vmem>>, vector<1x128xf32>
      %17 = vector.broadcast %16 : vector<1x128xf32> to vector<48x128xf32>
      %18 = arith.addf %15, %17 : vector<48x128xf32>
      %c0_16 = arith.constant 0 : index
      %c0_17 = arith.constant 0 : index
      %19 = vector.load %arg7[%c0_16, %c0_17] : memref<48x1xf32, #tpu.memory_space<vmem>>, vector<48x1xf32>
      %cst_18 = arith.constant 0.000000e+00 : f32
      %20 = vector.broadcast %cst_18 : f32 to vector<48x1xf32>
      %21 = arith.cmpf ogt, %19, %20 : vector<48x1xf32>
      %cst_19 = arith.constant 0.000000e+00 : f32
      %22 = vector.shape_cast %21 : vector<48x1xi1> to vector<48x1xi1>
      %23 = vector.broadcast %22 : vector<48x1xi1> to vector<48x128xi1>
      %24 = vector.broadcast %cst_19 : f32 to vector<48x128xf32>
      %25 = arith.select %23, %18, %24 : vector<48x128xi1>, vector<48x128xf32>
      %26 = arith.truncf %25 : vector<48x128xf32> to vector<48x128xbf16>
      %c0_20 = arith.constant 0 : index
      %c0_21 = arith.constant 0 : index
      %27 = vector.load %arg10[%c0_20, %c0_21] : memref<48x128xbf16, #tpu.memory_space<vmem>>, vector<48x128xbf16>
      tpu.vector_store %arg10[%c0_20, %c0_21], %26 {strides = array<i32>} : memref<48x128xbf16, #tpu.memory_space<vmem>>, vector<48x128xbf16>,
      %c0_22 = arith.constant 0 : index
      %c0_23 = arith.constant 0 : index
      %28 = vector.load %arg8[%c0_22, %c0_23] : memref<1x128xf32, #tpu.memory_space<vmem>>, vector<1x128xf32>
      %29 = vector.broadcast %28 : vector<1x128xf32> to vector<48x128xf32>
      %30 = arith.mulf %18, %29 : vector<48x128xf32>
      %c0_24 = arith.constant 0 : index
      %c0_25 = arith.constant 0 : index
      %31 = vector.load %arg9[%c0_24, %c0_25] : memref<1x128xf32, #tpu.memory_space<vmem>>, vector<1x128xf32>
      %32 = vector.broadcast %31 : vector<1x128xf32> to vector<48x128xf32>
      %33 = arith.addf %30, %32 : vector<48x128xf32>
      %cst_26 = arith.constant 0.00999999977 : f32
      %34 = vector.broadcast %cst_26 : f32 to vector<48x128xf32>
      %35 = arith.mulf %34, %33 : vector<48x128xf32>
      %36 = arith.maximumf %33, %35 : vector<48x128xf32>
      %cst_27 = arith.constant 0.000000e+00 : f32
      %37 = vector.shape_cast %21 : vector<48x1xi1> to vector<48x1xi1>
      %38 = vector.broadcast %37 : vector<48x1xi1> to vector<48x128xi1>
      %39 = vector.broadcast %cst_27 : f32 to vector<48x128xf32>
      %40 = arith.select %38, %36, %39 : vector<48x128xi1>, vector<48x128xf32>
      %41 = arith.truncf %40 : vector<48x128xf32> to vector<48x128xbf16>
      %c0_28 = arith.constant 0 : index
      %c0_29 = arith.constant 0 : index
      %42 = vector.load %arg11[%c0_28, %c0_29] : memref<48x128xbf16, #tpu.memory_space<vmem>>, vector<48x128xbf16>
      tpu.vector_store %arg11[%c0_28, %c0_29], %41 {strides = array<i32>} : memref<48x128xbf16, #tpu.memory_space<vmem>>, vector<48x128xbf16>,
    } else {
    }
    return
  }
  func.func @transform_0(%arg0: i32, %arg1: i32, %arg2: i32) -> (i32, i32) {
    %c0_i32 = arith.constant 0 : i32
    return %arg0, %arg2 : i32, i32
  }
  func.func @transform_1(%arg0: i32, %arg1: i32, %arg2: i32) -> (i32, i32) {
    %c0_i32 = arith.constant 0 : i32
    return %arg2, %arg1 : i32, i32
  }
  func.func @transform_2(%arg0: i32, %arg1: i32, %arg2: i32) -> (i32, i32) {
    %c0_i32 = arith.constant 0 : i32
    %c0_i32_0 = arith.constant 0 : i32
    return %c0_i32, %arg1 : i32, i32
  }
  func.func @transform_3(%arg0: i32, %arg1: i32, %arg2: i32) -> (i32, i32) {
    %c0_i32 = arith.constant 0 : i32
    %c0_i32_0 = arith.constant 0 : i32
    return %c0_i32, %arg1 : i32, i32
  }
  func.func @transform_4(%arg0: i32, %arg1: i32, %arg2: i32) -> (i32, i32) {
    %c0_i32 = arith.constant 0 : i32
    %c0_i32_0 = arith.constant 0 : i32
    return %arg0, %c0_i32 : i32, i32
  }
  func.func @transform_5(%arg0: i32, %arg1: i32, %arg2: i32) -> (i32, i32) {
    %c0_i32 = arith.constant 0 : i32
    %c0_i32_0 = arith.constant 0 : i32
    return %c0_i32, %arg1 : i32, i32
  }
  func.func @transform_6(%arg0: i32, %arg1: i32, %arg2: i32) -> (i32, i32) {
    %c0_i32 = arith.constant 0 : i32
    %c0_i32_0 = arith.constant 0 : i32
    return %c0_i32, %arg1 : i32, i32
  }
  func.func @transform_7(%arg0: i32, %arg1: i32, %arg2: i32) -> (i32, i32) {
    %c0_i32 = arith.constant 0 : i32
    return %arg0, %arg1 : i32, i32
  }
  func.func @transform_8(%arg0: i32, %arg1: i32, %arg2: i32) -> (i32, i32) {
    %c0_i32 = arith.constant 0 : i32
    return %arg0, %arg1 : i32, i32
  }
}

module attributes {stable_mosaic.version = 11 : i64} {
  func.func @_tapconv_kernel(%arg0: i32, %arg1: i32, %arg2: memref<48x128xbf16, #tpu.memory_space<vmem>>, %arg3: memref<48x128xbf16, #tpu.memory_space<vmem>>, %arg4: memref<48x128xbf16, #tpu.memory_space<vmem>>, %arg5: memref<1152x128xbf16, #tpu.memory_space<vmem>>, %arg6: memref<1x128xf32, #tpu.memory_space<vmem>>, %arg7: memref<1x128xf32, #tpu.memory_space<vmem>>, %arg8: memref<48x1xf32, #tpu.memory_space<vmem>>, %arg9: memref<48x128xbf16, #tpu.memory_space<vmem>>, %arg10: memref<48x128xbf16, #tpu.memory_space<vmem>>) attributes {dimension_semantics = [#tpu.dimension_semantics<parallel>, #tpu.dimension_semantics<parallel>], iteration_bounds = array<i64: 2, 1>, scalar_prefetch = 0 : i64, scratch_operands = 0 : i64, tpu.core_type = #tpu.core_type<tc>, window_params = [{transform_indices = @transform_0, window_bounds = array<i64: 48, 128>}, {transform_indices = @transform_1, window_bounds = array<i64: 48, 128>}, {transform_indices = @transform_2, window_bounds = array<i64: 48, 128>}, {transform_indices = @transform_3, window_bounds = array<i64: 1152, 128>}, {transform_indices = @transform_4, window_bounds = array<i64: 1, 128>}, {transform_indices = @transform_5, window_bounds = array<i64: 1, 128>}, {transform_indices = @transform_6, window_bounds = array<i64: 48, 1>}, {transform_indices = @transform_7, window_bounds = array<i64: 48, 128>}, {transform_indices = @transform_8, window_bounds = array<i64: 48, 128>}]} {
    %c0 = arith.constant 0 : index
    %c0_0 = arith.constant 0 : index
    %0 = vector.load %arg2[%c0, %c0_0] : memref<48x128xbf16, #tpu.memory_space<vmem>>, vector<48x128xbf16>
    %c0_1 = arith.constant 0 : index
    %c0_2 = arith.constant 0 : index
    %1 = vector.load %arg3[%c0_1, %c0_2] : memref<48x128xbf16, #tpu.memory_space<vmem>>, vector<48x128xbf16>
    %c0_3 = arith.constant 0 : index
    %c0_4 = arith.constant 0 : index
    %2 = vector.load %arg4[%c0_3, %c0_4] : memref<48x128xbf16, #tpu.memory_space<vmem>>, vector<48x128xbf16>
    %3 = tpu.concatenate %0, %1, %2 in 0 : vector<48x128xbf16>, vector<48x128xbf16>, vector<48x128xbf16> -> vector<144x128xbf16>
    %cst = arith.constant 0.000000e+00 : f32
    %4 = vector.broadcast %cst : f32 to vector<48x128xf32>
    %5 = vector.extract_strided_slice %3 {offsets = [41, 0], sizes = [48, 128], strides = [1, 1]} : vector<144x128xbf16> to vector<48x128xbf16>
    %c0_5 = arith.constant 0 : index
    %c0_6 = arith.constant 0 : index
    %6 = vector.load %arg5[%c0_5, %c0_6] : memref<1152x128xbf16, #tpu.memory_space<vmem>>, vector<128x128xbf16>
    %cst_7 = arith.constant dense<0.000000e+00> : vector<48x128xf32>
    %7 = tpu.matmul %5, %6, %cst_7 {dimension_numbers = #tpu.dot_dimension_numbers<[1], [0], [0], [1], [0, 0, 1, 1], [], []>} : vector<48x128xbf16>, vector<128x128xbf16>, vector<48x128xf32> -> vector<48x128xf32>
    %8 = arith.addf %4, %7 : vector<48x128xf32>
    %9 = vector.extract_strided_slice %3 {offsets = [42, 0], sizes = [48, 128], strides = [1, 1]} : vector<144x128xbf16> to vector<48x128xbf16>
    %c128 = arith.constant 128 : index
    %c0_8 = arith.constant 0 : index
    %10 = vector.load %arg5[%c128, %c0_8] : memref<1152x128xbf16, #tpu.memory_space<vmem>>, vector<128x128xbf16>
    %cst_9 = arith.constant dense<0.000000e+00> : vector<48x128xf32>
    %11 = tpu.matmul %9, %10, %cst_9 {dimension_numbers = #tpu.dot_dimension_numbers<[1], [0], [0], [1], [0, 0, 1, 1], [], []>} : vector<48x128xbf16>, vector<128x128xbf16>, vector<48x128xf32> -> vector<48x128xf32>
    %12 = arith.addf %8, %11 : vector<48x128xf32>
    %13 = vector.extract_strided_slice %3 {offsets = [43, 0], sizes = [48, 128], strides = [1, 1]} : vector<144x128xbf16> to vector<48x128xbf16>
    %c256 = arith.constant 256 : index
    %c0_10 = arith.constant 0 : index
    %14 = vector.load %arg5[%c256, %c0_10] : memref<1152x128xbf16, #tpu.memory_space<vmem>>, vector<128x128xbf16>
    %cst_11 = arith.constant dense<0.000000e+00> : vector<48x128xf32>
    %15 = tpu.matmul %13, %14, %cst_11 {dimension_numbers = #tpu.dot_dimension_numbers<[1], [0], [0], [1], [0, 0, 1, 1], [], []>} : vector<48x128xbf16>, vector<128x128xbf16>, vector<48x128xf32> -> vector<48x128xf32>
    %16 = arith.addf %12, %15 : vector<48x128xf32>
    %17 = vector.extract_strided_slice %3 {offsets = [47, 0], sizes = [48, 128], strides = [1, 1]} : vector<144x128xbf16> to vector<48x128xbf16>
    %c384 = arith.constant 384 : index
    %c0_12 = arith.constant 0 : index
    %18 = vector.load %arg5[%c384, %c0_12] : memref<1152x128xbf16, #tpu.memory_space<vmem>>, vector<128x128xbf16>
    %cst_13 = arith.constant dense<0.000000e+00> : vector<48x128xf32>
    %19 = tpu.matmul %17, %18, %cst_13 {dimension_numbers = #tpu.dot_dimension_numbers<[1], [0], [0], [1], [0, 0, 1, 1], [], []>} : vector<48x128xbf16>, vector<128x128xbf16>, vector<48x128xf32> -> vector<48x128xf32>
    %20 = arith.addf %16, %19 : vector<48x128xf32>
    %21 = vector.extract_strided_slice %3 {offsets = [48, 0], sizes = [48, 128], strides = [1, 1]} : vector<144x128xbf16> to vector<48x128xbf16>
    %c512 = arith.constant 512 : index
    %c0_14 = arith.constant 0 : index
    %22 = vector.load %arg5[%c512, %c0_14] : memref<1152x128xbf16, #tpu.memory_space<vmem>>, vector<128x128xbf16>
    %cst_15 = arith.constant dense<0.000000e+00> : vector<48x128xf32>
    %23 = tpu.matmul %21, %22, %cst_15 {dimension_numbers = #tpu.dot_dimension_numbers<[1], [0], [0], [1], [0, 0, 1, 1], [], []>} : vector<48x128xbf16>, vector<128x128xbf16>, vector<48x128xf32> -> vector<48x128xf32>
    %24 = arith.addf %20, %23 : vector<48x128xf32>
    %25 = vector.extract_strided_slice %3 {offsets = [49, 0], sizes = [48, 128], strides = [1, 1]} : vector<144x128xbf16> to vector<48x128xbf16>
    %c640 = arith.constant 640 : index
    %c0_16 = arith.constant 0 : index
    %26 = vector.load %arg5[%c640, %c0_16] : memref<1152x128xbf16, #tpu.memory_space<vmem>>, vector<128x128xbf16>
    %cst_17 = arith.constant dense<0.000000e+00> : vector<48x128xf32>
    %27 = tpu.matmul %25, %26, %cst_17 {dimension_numbers = #tpu.dot_dimension_numbers<[1], [0], [0], [1], [0, 0, 1, 1], [], []>} : vector<48x128xbf16>, vector<128x128xbf16>, vector<48x128xf32> -> vector<48x128xf32>
    %28 = arith.addf %24, %27 : vector<48x128xf32>
    %29 = vector.extract_strided_slice %3 {offsets = [53, 0], sizes = [48, 128], strides = [1, 1]} : vector<144x128xbf16> to vector<48x128xbf16>
    %c768 = arith.constant 768 : index
    %c0_18 = arith.constant 0 : index
    %30 = vector.load %arg5[%c768, %c0_18] : memref<1152x128xbf16, #tpu.memory_space<vmem>>, vector<128x128xbf16>
    %cst_19 = arith.constant dense<0.000000e+00> : vector<48x128xf32>
    %31 = tpu.matmul %29, %30, %cst_19 {dimension_numbers = #tpu.dot_dimension_numbers<[1], [0], [0], [1], [0, 0, 1, 1], [], []>} : vector<48x128xbf16>, vector<128x128xbf16>, vector<48x128xf32> -> vector<48x128xf32>
    %32 = arith.addf %28, %31 : vector<48x128xf32>
    %33 = vector.extract_strided_slice %3 {offsets = [54, 0], sizes = [48, 128], strides = [1, 1]} : vector<144x128xbf16> to vector<48x128xbf16>
    %c896 = arith.constant 896 : index
    %c0_20 = arith.constant 0 : index
    %34 = vector.load %arg5[%c896, %c0_20] : memref<1152x128xbf16, #tpu.memory_space<vmem>>, vector<128x128xbf16>
    %cst_21 = arith.constant dense<0.000000e+00> : vector<48x128xf32>
    %35 = tpu.matmul %33, %34, %cst_21 {dimension_numbers = #tpu.dot_dimension_numbers<[1], [0], [0], [1], [0, 0, 1, 1], [], []>} : vector<48x128xbf16>, vector<128x128xbf16>, vector<48x128xf32> -> vector<48x128xf32>
    %36 = arith.addf %32, %35 : vector<48x128xf32>
    %37 = vector.extract_strided_slice %3 {offsets = [55, 0], sizes = [48, 128], strides = [1, 1]} : vector<144x128xbf16> to vector<48x128xbf16>
    %c1024 = arith.constant 1024 : index
    %c0_22 = arith.constant 0 : index
    %38 = vector.load %arg5[%c1024, %c0_22] : memref<1152x128xbf16, #tpu.memory_space<vmem>>, vector<128x128xbf16>
    %cst_23 = arith.constant dense<0.000000e+00> : vector<48x128xf32>
    %39 = tpu.matmul %37, %38, %cst_23 {dimension_numbers = #tpu.dot_dimension_numbers<[1], [0], [0], [1], [0, 0, 1, 1], [], []>} : vector<48x128xbf16>, vector<128x128xbf16>, vector<48x128xf32> -> vector<48x128xf32>
    %40 = arith.addf %36, %39 : vector<48x128xf32>
    %c0_24 = arith.constant 0 : index
    %c0_25 = arith.constant 0 : index
    %41 = vector.load %arg6[%c0_24, %c0_25] : memref<1x128xf32, #tpu.memory_space<vmem>>, vector<1x128xf32>
    %42 = vector.broadcast %41 : vector<1x128xf32> to vector<48x128xf32>
    %43 = arith.mulf %40, %42 : vector<48x128xf32>
    %c0_26 = arith.constant 0 : index
    %c0_27 = arith.constant 0 : index
    %44 = vector.load %arg7[%c0_26, %c0_27] : memref<1x128xf32, #tpu.memory_space<vmem>>, vector<1x128xf32>
    %45 = vector.broadcast %44 : vector<1x128xf32> to vector<48x128xf32>
    %46 = arith.addf %43, %45 : vector<48x128xf32>
    %c0_28 = arith.constant 0 : index
    %c0_29 = arith.constant 0 : index
    %47 = vector.load %arg9[%c0_28, %c0_29] : memref<48x128xbf16, #tpu.memory_space<vmem>>, vector<48x128xbf16>
    %48 = arith.extf %47 : vector<48x128xbf16> to vector<48x128xf32>
    %49 = arith.addf %46, %48 : vector<48x128xf32>
    %c0_30 = arith.constant 0 : index
    %c0_31 = arith.constant 0 : index
    %50 = vector.load %arg8[%c0_30, %c0_31] : memref<48x1xf32, #tpu.memory_space<vmem>>, vector<48x1xf32>
    %cst_32 = arith.constant 0.000000e+00 : f32
    %51 = vector.broadcast %cst_32 : f32 to vector<48x1xf32>
    %52 = arith.cmpf ogt, %50, %51 : vector<48x1xf32>
    %cst_33 = arith.constant 0.000000e+00 : f32
    %53 = vector.shape_cast %52 : vector<48x1xi1> to vector<48x1xi1>
    %54 = vector.broadcast %53 : vector<48x1xi1> to vector<48x128xi1>
    %55 = vector.broadcast %cst_33 : f32 to vector<48x128xf32>
    %56 = arith.select %54, %49, %55 : vector<48x128xi1>, vector<48x128xf32>
    %57 = arith.truncf %56 : vector<48x128xf32> to vector<48x128xbf16>
    %c0_34 = arith.constant 0 : index
    %c0_35 = arith.constant 0 : index
    %58 = vector.load %arg10[%c0_34, %c0_35] : memref<48x128xbf16, #tpu.memory_space<vmem>>, vector<48x128xbf16>
    tpu.vector_store %arg10[%c0_34, %c0_35], %57 {strides = array<i32>} : memref<48x128xbf16, #tpu.memory_space<vmem>>, vector<48x128xbf16>,
    return
  }
  func.func @transform_0(%arg0: i32, %arg1: i32) -> (i32, i32) {
    %c1_i32 = arith.constant 1 : i32
    %0 = arith.subi %arg0, %c1_i32 : i32
    %c0_i32 = arith.constant 0 : i32
    %1 = arith.maxsi %0, %c0_i32 : i32
    %c0_i32_0 = arith.constant 0 : i32
    %c0_i32_1 = arith.constant 0 : i32
    return %1, %c0_i32_0 : i32, i32
  }
  func.func @transform_1(%arg0: i32, %arg1: i32) -> (i32, i32) {
    %c0_i32 = arith.constant 0 : i32
    %c0_i32_0 = arith.constant 0 : i32
    return %arg0, %c0_i32 : i32, i32
  }
  func.func @transform_2(%arg0: i32, %arg1: i32) -> (i32, i32) {
    %c1_i32 = arith.constant 1 : i32
    %0 = arith.addi %arg0, %c1_i32 : i32
    %c1_i32_0 = arith.constant 1 : i32
    %1 = arith.minsi %0, %c1_i32_0 : i32
    %c0_i32 = arith.constant 0 : i32
    %c0_i32_1 = arith.constant 0 : i32
    return %1, %c0_i32 : i32, i32
  }
  func.func @transform_3(%arg0: i32, %arg1: i32) -> (i32, i32) {
    %c0_i32 = arith.constant 0 : i32
    %c0_i32_0 = arith.constant 0 : i32
    return %c0_i32, %arg1 : i32, i32
  }
  func.func @transform_4(%arg0: i32, %arg1: i32) -> (i32, i32) {
    %c0_i32 = arith.constant 0 : i32
    %c0_i32_0 = arith.constant 0 : i32
    return %c0_i32, %arg1 : i32, i32
  }
  func.func @transform_5(%arg0: i32, %arg1: i32) -> (i32, i32) {
    %c0_i32 = arith.constant 0 : i32
    %c0_i32_0 = arith.constant 0 : i32
    return %c0_i32, %arg1 : i32, i32
  }
  func.func @transform_6(%arg0: i32, %arg1: i32) -> (i32, i32) {
    %c0_i32 = arith.constant 0 : i32
    %c0_i32_0 = arith.constant 0 : i32
    return %arg0, %c0_i32 : i32, i32
  }
  func.func @transform_7(%arg0: i32, %arg1: i32) -> (i32, i32) {
    %c0_i32 = arith.constant 0 : i32
    return %arg0, %arg1 : i32, i32
  }
  func.func @transform_8(%arg0: i32, %arg1: i32) -> (i32, i32) {
    %c0_i32 = arith.constant 0 : i32
    return %arg0, %arg1 : i32, i32
  }
}

module attributes {stable_mosaic.version = 11 : i64} {
  func.func @_gemm_kernel(%arg0: i32, %arg1: i32, %arg2: i32, %arg3: memref<48x128xbf16, #tpu.memory_space<vmem>>, %arg4: memref<128x128xbf16, #tpu.memory_space<vmem>>, %arg5: memref<1x128xf32, #tpu.memory_space<vmem>>, %arg6: memref<1x128xf32, #tpu.memory_space<vmem>>, %arg7: memref<48x128xf32, #tpu.memory_space<vmem>>, %arg8: memref<48x128xf32, #tpu.memory_space<vmem>>) attributes {dimension_semantics = [#tpu.dimension_semantics<parallel>, #tpu.dimension_semantics<parallel>, #tpu.dimension_semantics<arbitrary>], iteration_bounds = array<i64: 2, 1, 1>, scalar_prefetch = 0 : i64, scratch_operands = 1 : i64, tpu.core_type = #tpu.core_type<tc>, window_params = [{transform_indices = @transform_0, window_bounds = array<i64: 48, 128>}, {transform_indices = @transform_1, window_bounds = array<i64: 128, 128>}, {transform_indices = @transform_2, window_bounds = array<i64: 1, 128>}, {transform_indices = @transform_3, window_bounds = array<i64: 1, 128>}, {transform_indices = @transform_4, window_bounds = array<i64: 48, 128>}]} {
    %c0_i32 = arith.constant 0 : i32
    %0 = arith.cmpi eq, %arg2, %c0_i32 : i32
    %1 = arith.extui %0 : i1 to i32
    %c0_i32_0 = arith.constant 0 : i32
    %2 = arith.cmpi ne, %1, %c0_i32_0 : i32
    scf.if %2 {
      %cst_10 = arith.constant 0.000000e+00 : f32
      %12 = vector.broadcast %cst_10 : f32 to vector<48x128xf32>
      %c0_11 = arith.constant 0 : index
      %c0_12 = arith.constant 0 : index
      %13 = vector.load %arg8[%c0_11, %c0_12] : memref<48x128xf32, #tpu.memory_space<vmem>>, vector<48x128xf32>
      tpu.vector_store %arg8[%c0_11, %c0_12], %12 {strides = array<i32>} : memref<48x128xf32, #tpu.memory_space<vmem>>, vector<48x128xf32>,
    } else {
    }
    %c0 = arith.constant 0 : index
    %c0_1 = arith.constant 0 : index
    %3 = vector.load %arg8[%c0, %c0_1] : memref<48x128xf32, #tpu.memory_space<vmem>>, vector<48x128xf32>
    %c0_2 = arith.constant 0 : index
    %c0_3 = arith.constant 0 : index
    %4 = vector.load %arg3[%c0_2, %c0_3] : memref<48x128xbf16, #tpu.memory_space<vmem>>, vector<48x128xbf16>
    %c0_4 = arith.constant 0 : index
    %c0_5 = arith.constant 0 : index
    %5 = vector.load %arg4[%c0_4, %c0_5] : memref<128x128xbf16, #tpu.memory_space<vmem>>, vector<128x128xbf16>
    %cst = arith.constant dense<0.000000e+00> : vector<48x128xf32>
    %6 = tpu.matmul %4, %5, %cst {dimension_numbers = #tpu.dot_dimension_numbers<[1], [0], [0], [1], [0, 0, 1, 1], [], []>} : vector<48x128xbf16>, vector<128x128xbf16>, vector<48x128xf32> -> vector<48x128xf32>
    %7 = arith.addf %3, %6 : vector<48x128xf32>
    %c0_6 = arith.constant 0 : index
    %c0_7 = arith.constant 0 : index
    %8 = vector.load %arg8[%c0_6, %c0_7] : memref<48x128xf32, #tpu.memory_space<vmem>>, vector<48x128xf32>
    tpu.vector_store %arg8[%c0_6, %c0_7], %7 {strides = array<i32>} : memref<48x128xf32, #tpu.memory_space<vmem>>, vector<48x128xf32>,
    %c0_i32_8 = arith.constant 0 : i32
    %9 = arith.cmpi eq, %arg2, %c0_i32_8 : i32
    %10 = arith.extui %9 : i1 to i32
    %c0_i32_9 = arith.constant 0 : i32
    %11 = arith.cmpi ne, %10, %c0_i32_9 : i32
    scf.if %11 {
      %c0_10 = arith.constant 0 : index
      %c0_11 = arith.constant 0 : index
      %12 = vector.load %arg8[%c0_10, %c0_11] : memref<48x128xf32, #tpu.memory_space<vmem>>, vector<48x128xf32>
      %c0_12 = arith.constant 0 : index
      %c0_13 = arith.constant 0 : index
      %13 = vector.load %arg5[%c0_12, %c0_13] : memref<1x128xf32, #tpu.memory_space<vmem>>, vector<1x128xf32>
      %14 = vector.broadcast %13 : vector<1x128xf32> to vector<48x128xf32>
      %15 = arith.mulf %12, %14 : vector<48x128xf32>
      %c0_14 = arith.constant 0 : index
      %c0_15 = arith.constant 0 : index
      %16 = vector.load %arg6[%c0_14, %c0_15] : memref<1x128xf32, #tpu.memory_space<vmem>>, vector<1x128xf32>
      %17 = vector.broadcast %16 : vector<1x128xf32> to vector<48x128xf32>
      %18 = arith.addf %15, %17 : vector<48x128xf32>
      %c0_16 = arith.constant 0 : index
      %c0_17 = arith.constant 0 : index
      %19 = vector.load %arg7[%c0_16, %c0_17] : memref<48x128xf32, #tpu.memory_space<vmem>>, vector<48x128xf32>
      tpu.vector_store %arg7[%c0_16, %c0_17], %18 {strides = array<i32>} : memref<48x128xf32, #tpu.memory_space<vmem>>, vector<48x128xf32>,
    } else {
    }
    return
  }
  func.func @transform_0(%arg0: i32, %arg1: i32, %arg2: i32) -> (i32, i32) {
    %c0_i32 = arith.constant 0 : i32
    return %arg0, %arg2 : i32, i32
  }
  func.func @transform_1(%arg0: i32, %arg1: i32, %arg2: i32) -> (i32, i32) {
    %c0_i32 = arith.constant 0 : i32
    return %arg2, %arg1 : i32, i32
  }
  func.func @transform_2(%arg0: i32, %arg1: i32, %arg2: i32) -> (i32, i32) {
    %c0_i32 = arith.constant 0 : i32
    %c0_i32_0 = arith.constant 0 : i32
    return %c0_i32, %arg1 : i32, i32
  }
  func.func @transform_3(%arg0: i32, %arg1: i32, %arg2: i32) -> (i32, i32) {
    %c0_i32 = arith.constant 0 : i32
    %c0_i32_0 = arith.constant 0 : i32
    return %c0_i32, %arg1 : i32, i32
  }
  func.func @transform_4(%arg0: i32, %arg1: i32, %arg2: i32) -> (i32, i32) {
    %c0_i32 = arith.constant 0 : i32
    return %arg0, %arg1 : i32, i32
  }
}

</mosaic_0001>

<bundles_post_ra>
// kernel: encoder_forward.7
= control target key start
LH: loop header
LB: loop body
LE: loop exit
PB: predicated region body
PF: predicated region fallthrough
CT: control target
= control target key end

     0   :  { %s1740_s27 = smov 0   ;;  %s1742_s28 = smov 0   ;;  %s2074_s0 = inlined_call_operand.vmem [shape: bf16[224,128], index: 0, kind: input, shape index: {}]   ;;  %s2075_s1 = inlined_call_operand.vmem [shape: bf16[128,128], index: 1, kind: input, shape index: {}]   ;;  %s2076_s2 = inlined_call_operand.vmem [shape: f32[1,128], index: 2, kind: input, shape index: {}]   ;;  %s2077_s3 = inlined_call_operand.vmem [shape: f32[1,128], index: 3, kind: input, shape index: {}]   ;;  %s2078_s4 = inlined_call_operand.vmem [shape: f32[224,1], index: 4, kind: input, shape index: {}]   ;;  %s2079_s5 = inlined_call_operand.vmem [shape: f32[1,128], index: 5, kind: input, shape index: {}]   ;;  %s2080_s6 = inlined_call_operand.vmem [shape: f32[1,128], index: 6, kind: input, shape index: {}]   ;;  %s2081_s7 = inlined_call_operand.vmem [shape: bf16[224,128], index: 7, kind: output, shape index: {0}]   ;;  %s2082_s8 = inlined_call_operand.vmem [shape: bf16[224,128], index: 8, kind: output, shape index: {1}]  }
   0x1   :  { %s1744_s29 = smov 0  }
   0x2 LB: > { %s38_s30 = sadd.s32 1, %s1686_s28  ;;  %p1385_p0 = scmp.ge.s32.totalorder %s1690_s29, 1  ;;  %s1690_s29 = sphi %s1744_s29, %s19_s29   ;;  %s1686_s28 = sphi %s1742_s28, %s2084_s28   ;;  %s1682_s27 = sphi %s1740_s27, %s2083_s27  }
   0x3   : > { %p40_p1 = scmp.ge.s32.totalorder %s38_s30, 2  ;;  %p353_p2 = scmp.lt.s32.totalorder %s1690_s29, 3 }
   0x5   : > { %s2086_s30 = smov (%p40_p1, %s38_s30), 0  ;;  %p354_p3 = pnand %p1385_p0, %p353_p2 }
   0x6   : > { %v1653_v0 = vld [vmem:[%s2075_s1] sm:$0xff] (!%p354_p3)   ;;  %v1692_v1 = vmov (!%p354_p3), 0.0   ;;  %v1654_v2 = vld [vmem:[%s2075_s1 + $0x8] sm:$0xff] (!%p354_p3)   ;;  %s426_s13 = smul.u32 (!%p354_p3), 14, %s1682_s27  ;;  %vm1693_vm0 = vmmov (!%p354_p3), 0   ;;  %v1694_v3 = vmov (!%p354_p3), 0  }
   0x7   : > { %357 = sbr.rel (%p354_p3) target bundleno = 302 (0x12e), region = 48  ;;  %1564 = vmatprep.subr.bf16.mxu0 (!%p354_p3), %v1692_v1  ;;  %1608 = vmatprep.subr.bf16.mxu1 (!%p354_p3), %v1692_v1  ;;  %v1655_v4 = vld [vmem:[%s2075_s1 + $0x10] sm:$0xff] (!%p354_p3)   ;;  %v1656_v5 = vld [vmem:[%s2075_s1 + $0x18] sm:$0xff] (!%p354_p3)   ;;  %v1657_v6 = vld [vmem:[%s2075_s1 + $0x20] sm:$0xff] (!%p354_p3)  }
   0x8   : > { %1565 = vmatpush3.bf16.msra.mxu0 (!%p354_p3), %v1653_v0  ;;  %1616 = vmatpush3.bf16.msra.mxu1 (!%p354_p3), %v1653_v0  ;;  %p427_p4 = scmp.lt.s32.totalorder (!%p354_p3), %s426_s13, 27  ;;  %v1658_v10 = vld [vmem:[%s2075_s1 + $0x28] sm:$0xff] (!%p354_p3)   ;;  %v1659_v18 = vld [vmem:[%s2075_s1 + $0x30] sm:$0xff] (!%p354_p3)   ;;  %v1660_v23 = vld [vmem:[%s2075_s1 + $0x38] sm:$0xff] (!%p354_p3)  }
   0x9   : > { %1566 = vmatprep.subr.bf16.mxu0 (!%p354_p3), %v1692_v1  ;;  %1609 = vmatprep.subr.bf16.mxu1 (!%p354_p3), %v1692_v1  ;;  %v1882_v52 = vld [vmem:[%s2076_s2] ss:$0 sm:$0xff] (!%p354_p3) }
   0xa   : > { %1580 = vmatprep.mubr.msk.bf16.mxu0 (!%p354_p3), %vm1693_vm0, %v1692_v1  ;;  %1596 = vmatprep.mubr.msk.bf16.mxu1 (!%p354_p3), %vm1693_vm0, %v1692_v1  ;;  %v1891_v56 = vld [vmem:[%s2077_s3] ss:$0 sm:$0xff] (!%p354_p3) }
   0xb   : > { %1652 = vset.pattern.permute.xlu1 (!%p354_p3), %v1694_v3  ;;  %1651 = vset.pattern.permute.xlu0 (!%p354_p3), %v1694_v3 }
   0xc   : > { %1567 = vmatpush3.bf16.msra.mxu0 (!%p354_p3), %v1654_v2  ;;  %1617 = vmatpush3.bf16.msra.mxu1 (!%p354_p3), %v1654_v2 }
   0xd   : > { %1568 = vmatprep.subr.bf16.mxu0 (!%p354_p3), %v1692_v1  ;;  %1610 = vmatprep.subr.bf16.mxu1 (!%p354_p3), %v1692_v1 }
   0xe   : > { %s2088_s13 = smov (!%p427_p4, %s426_s13), 27 }
   0xf   : > { %s1782_s16 = sshll.u32 %s2088_s13, 2  ;;  %s1387_s22 = sshll.u32 %s2088_s13, 3 }
  0x10   : > { %s1788_s19 = scalar_lea.vmem %s2074_s0, %s1782_s16  ;;  %1569 = vmatpush3.bf16.msra.mxu0 %v1655_v4  ;;  %1618 = vmatpush3.bf16.msra.mxu1 %v1655_v4  ;;  %s1801_s27 = scalar_lea.vmem %s2078_s4, %s1387_s22 }
  0x11   : > { %1570 = vmatprep.subr.bf16.mxu0 %v1692_v1  ;;  %1611 = vmatprep.subr.bf16.mxu1 %v1692_v1  ;;  %v839_v7 = vld [vmem:[%s1801_s27 + $0x10] sm:$0xff]  ;;  %v837_v8 = vld [vmem:[%s1801_s27] sm:$0xff]  ;;  %v840_v9 = vld [vmem:[%s1801_s27 + $0x18] sm:$0xff]  ;;  %s1935_s26 = scalar_lea.vmem %s2081_s7, %s1782_s16  ;;  %s1966_s10 = scalar_lea.vmem %s2082_s8, %s1782_s16 }
  0x12   : > { %vm853_vm1 = vcmp.gt.f32.partialorder %v839_v7, 0.0  ;;  %vm851_vm2 = vcmp.gt.f32.partialorder %v837_v8, 0.0  ;;  %vm854_vm3 = vcmp.gt.f32.partialorder %v840_v9, 0.0  ;;  %v838_v11 = vld [vmem:[%s1801_s27 + $0x8] sm:$0xff]  ;;  %v841_v15 = vld [vmem:[%s1801_s27 + $0x20] sm:$0xff]  ;;  %v844_v19 = vld [vmem:[%s1801_s27 + $0x38] sm:$0xff] }
  0x13   : > { %v867_v12 = vsel %vm853_vm1, 1, %v1694_v3  ;;  %v865_v13 = vsel %vm851_vm2, 1, %v1694_v3  ;;  %vm852_vm4 = vcmp.gt.f32.partialorder %v838_v11, 0.0  ;;  %v842_v14 = vld [vmem:[%s1801_s27 + $0x28] sm:$0xff]  ;;  %v868_v16 = vsel %vm854_vm3, 1, %v1694_v3  ;;  %v843_v20 = vld [vmem:[%s1801_s27 + $0x30] sm:$0xff] }
  0x14   : > { %1571 = vmatpush3.bf16.msra.mxu0 %v1656_v5  ;;  %1619 = vmatpush3.bf16.msra.mxu1 %v1656_v5  ;;  %v866_v17 = vsel %vm852_vm4, 1, %v1694_v3  ;;  %vm856_vm5 = vcmp.gt.f32.partialorder %v842_v14, 0.0  ;;  %vm855_vm6 = vcmp.gt.f32.partialorder %v841_v15, 0.0  ;;  %vm858_vm7 = vcmp.gt.f32.partialorder %v844_v19, 0.0  ;;  %v846_v24 = vld [vmem:[%s1801_s27 + $0x48] sm:$0xff]  ;;  %v845_v25 = vld [vmem:[%s1801_s27 + $0x40] sm:$0xff] }
  0x15   : > { %1572 = vmatprep.subr.bf16.mxu0 %v1692_v1  ;;  %1612 = vmatprep.subr.bf16.mxu1 %v1692_v1  ;;  %v870_v21 = vsel %vm856_vm5, 1, %v1694_v3  ;;  %v869_v22 = vsel %vm855_vm6, 1, %v1694_v3  ;;  %vm857_vm8 = vcmp.gt.f32.partialorder %v843_v20, 0.0  ;;  %v1661_v26 = vld [vmem:[%s1788_s19] sm:$0xff]   ;;  %v872_v28 = vsel %vm858_vm7, 1, %v1694_v3  ;;  %v848_v30 = vld [vmem:[%s1801_s27 + $0x58] sm:$0xff] }
  0x16   : > { %886 = vperm.xlu1 %1652, %v867_v12   ;;  %880 = vperm.xlu0 %1651, %v865_v13   ;;  %v1662_v27 = vld [vmem:[%s1788_s19 + $0x20] sm:$0xff]   ;;  %v871_v29 = vsel %vm857_vm8, 1, %v1694_v3  ;;  %vm860_vm9 = vcmp.gt.f32.partialorder %v846_v24, 0.0  ;;  %vm859_vm10 = vcmp.gt.f32.partialorder %v845_v25, 0.0  ;;  %v847_v31 = vld [vmem:[%s1801_s27 + $0x50] sm:$0xff]  ;;  %vm862_vm11 = vcmp.gt.f32.partialorder %v848_v30, 0.0 }
  0x17   : > { %v874_v32 = vsel %vm860_vm9, 1, %v1694_v3  ;;  %v873_v33 = vsel %vm859_vm10, 1, %v1694_v3  ;;  %vm861_vm12 = vcmp.gt.f32.partialorder %v847_v31, 0.0  ;;  %v850_v34 = vld [vmem:[%s1801_s27 + $0x68] sm:$0xff]  ;;  %v849_v35 = vld [vmem:[%s1801_s27 + $0x60] sm:$0xff]  ;;  %v876_v38 = vsel %vm862_vm11, 1, %v1694_v3 }
  0x18   : > { %1573 = vmatpush3.bf16.msra.mxu0 %v1657_v6  ;;  %1620 = vmatpush3.bf16.msra.mxu1 %v1657_v6  ;;  %v1663_v36 = vld [vmem:[%s1788_s19 + $0x8] sm:$0xff]   ;;  %v875_v39 = vsel %vm861_vm12, 1, %v1694_v3  ;;  %vm864_vm13 = vcmp.gt.f32.partialorder %v850_v34, 0.0  ;;  %vm863_vm14 = vcmp.gt.f32.partialorder %v849_v35, 0.0  ;;  %v1665_v42 = vld [vmem:[%s1788_s19 + $0x10] sm:$0xff]   ;;  %v1667_v44 = vld [vmem:[%s1788_s19 + $0x18] sm:$0xff]  }
  0x19   : > { %1574 = vmatprep.subr.bf16.mxu0 %v1692_v1  ;;  %1613 = vmatprep.subr.bf16.mxu1 %v1692_v1  ;;  %v1664_v37 = vld [vmem:[%s1788_s19 + $0x28] sm:$0xff]   ;;  %v878_v40 = vsel %vm864_vm13, 1, %v1694_v3  ;;  %v877_v41 = vsel %vm863_vm14, 1, %v1694_v3  ;;  %v1666_v43 = vld [vmem:[%s1788_s19 + $0x30] sm:$0xff]   ;;  %v1911_v12 = vld [vmem:[%s2080_s6] ss:$0 sm:$0xff] }
  0x1a   : > { %889 = vperm.xlu1 %1652, %v868_v16   ;;  %883 = vperm.xlu0 %1651, %v866_v17  }
  0x1c   : > { %1575 = vmatpush3.bf16.msra.mxu0 %v1658_v10  ;;  %1621 = vmatpush3.bf16.msra.mxu1 %v1658_v10  ;;  %v1905_v10 = vld [vmem:[%s2079_s5] ss:$0 sm:$0xff] }
  0x1d   : > { %1576 = vmatprep.subr.bf16.mxu0 %v1692_v1  ;;  %1614 = vmatprep.subr.bf16.mxu1 %v1692_v1 }
  0x1e   : > { %895 = vperm.xlu1 %1652, %v870_v21   ;;  %892 = vperm.xlu0 %1651, %v869_v22  }
  0x20   : > { %1577 = vmatpush3.bf16.msra.mxu0 %v1659_v18  ;;  %1622 = vmatpush3.bf16.msra.mxu1 %v1659_v18 }
  0x21   : > { %1578 = vmatprep.subr.bf16.mxu0 %v1692_v1  ;;  %1615 = vmatprep.subr.bf16.mxu1 %v1692_v1 }
  0x22   : > { %901 = vperm.xlu1 %1652, %v872_v28   ;;  %898 = vperm.xlu0 %1651, %v871_v29  }
  0x24   : > { %1579 = vmatpush3.bf16.msra.mxu0 %v1660_v23  ;;  %1623 = vmatpush3.bf16.msra.mxu1 %v1660_v23 }
  0x26   : > { %907 = vperm.xlu1 %1652, %v874_v32   ;;  %904 = vperm.xlu0 %1651, %v873_v33  }
  0x27   : > { %1581 = vmatmul.mubr.bf16.vlgmr.msra.gmra.mrb[0].mxu0 %v1661_v26  ;;  %1597 = vmatmul.mubr.bf16.vlgmr.msra.gmra.mrb[0].mxu1 %v1662_v27 }
  0x28   : > { %1584 = vmatprep.mubr.msk.bf16.mxu0 %vm1693_vm0, %v1692_v1  ;;  %1600 = vmatprep.mubr.msk.bf16.mxu1 %vm1693_vm0, %v1692_v1 }
  0x2a   : > { %913 = vperm.xlu1 %1652, %v876_v38   ;;  %910 = vperm.xlu0 %1651, %v875_v39  }
  0x2e   : > { %919 = vperm.xlu1 %1652, %v878_v40   ;;  %916 = vperm.xlu0 %1651, %v877_v41  }
  0x2f   : > { %1585 = vmatmul.mubr.bf16.gmra.mrb[4].mxu0 %v1663_v36  ;;  %1601 = vmatmul.mubr.bf16.gmra.mrb[4].mxu1 %v1664_v37 }
  0x30   : > { %1588 = vmatprep.mubr.msk.bf16.mxu0 %vm1693_vm0, %v1692_v1  ;;  %1604 = vmatprep.mubr.msk.bf16.mxu1 %vm1693_vm0, %v1692_v1 }
  0x37   : > { %1589 = vmatmul.mubr.bf16.gmra.mrb[8].mxu0 %v1665_v42  ;;  %1605 = vmatmul.mubr.bf16.gmra.mrb[8].mxu1 %v1666_v43 }
  0x38   : > { %1592 = vmatprep.mubr.msk.bf16.mxu0 %vm1693_vm0, %v1692_v1 }
  0x3f   : > { %1593 = vmatmul.mubr.bf16.gmra.mrb[12].mxu0 %v1667_v44 }
  0x95   : > { %v1865_v45 = vpop.permute.xlu0 %880  ;;  %v1867_v46 = vpop.permute.xlu1 %886 }
  0x96   : > { %vm921_vm15 = vcmp.eq.s32.totalorder %v1865_v45, 1  ;;  %vm923_vm1 = vcmp.eq.s32.totalorder %v1867_v46, 1 }
  0x99   : > { %v1869_v47 = vpop.permute.xlu0 %883  ;;  %v1871_v48 = vpop.permute.xlu1 %889 }
  0x9a   : > { %vm922_vm2 = vcmp.eq.s32.totalorder %v1869_v47, 1  ;;  %vm924_vm5 = vcmp.eq.s32.totalorder %v1871_v48, 1 }
  0x9d   : > { %v1873_v49 = vpop.permute.xlu0 %892  ;;  %v1875_v50 = vpop.permute.xlu1 %895 }
  0x9e   : > { %vm926_vm7 = vcmp.eq.s32.totalorder %v1875_v50, 1  ;;  %vm925_vm8 = vcmp.eq.s32.totalorder %v1873_v49, 1 }
  0xa1   : > { %v1877_v51 = vpop.permute.xlu0 %898  ;;  %v1884_v53 = vpop.permute.xlu1 %901 }
  0xa2   : > { %vm928_vm11 = vcmp.eq.s32.totalorder %v1884_v53, 1  ;;  %vm927_vm12 = vcmp.eq.s32.totalorder %v1877_v51, 1 }
  0xa5   : > { %v1886_v54 = vpop.permute.xlu0 %904  ;;  %v1913_v15 = vpop.permute.xlu1 %907 }
  0xa6   : > { %vm929_vm0 = vcmp.eq.s32.totalorder %v1886_v54, 1  ;;  %vm930_vm3 = vcmp.eq.s32.totalorder %v1913_v15, 1 }
  0xa9   : > { %v1915_v17 = vpop.permute.xlu0 %910 }
  0xaa   : > { %vm931_vm4 = vcmp.eq.s32.totalorder %v1915_v17, 1 }
  0xfa   : > { %v667_v55 = vpop.f32.mrb[0].mxu0  ;;  %v699_v57 = vpop.f32.mrb[0].mxu1 }
  0xfb   : > { %v774_v58 = vmul.f32 %v1882_v52, %v667_v55  ;;  %v782_v59 = vmul.f32 %v1882_v52, %v699_v57  ;;  %v1582_v60 = vpop.f32.mrb[1].mxu0  ;;  %v1598_v61 = vpop.f32.mrb[1].mxu1 }
  0xfc   : > { %v670_v62 = vpop.f32.mrb[2].mxu0  ;;  %v702_v63 = vpop.f32.mrb[2].mxu1 }
  0xfd   : > { %v795_v0 = vadd.f32 %v1891_v56, %v774_v58  ;;  %v803_v1 = vadd.f32 %v1891_v56, %v782_v59  ;;  %v775_v2 = vmul.f32 %v1882_v52, %v670_v62  ;;  %v783_v3 = vmul.f32 %v1882_v52, %v702_v63  ;;  %v1583_v4 = vpop.f32.mrb[3].mxu0  ;;  %v1599_v5 = vpop.f32.mrb[3].mxu1 }
  0xfe   : > { %v1946_v57 = vpop.permute.xlu1 %913 }
  0xff   : > { %v809_v6 = vmul.f32 0.01, %v795_v0  ;;  %v817_v7 = vmul.f32 0.01, %v803_v1  ;;  %v796_v8 = vadd.f32 %v1891_v56, %v775_v2  ;;  %v804_v9 = vadd.f32 %v1891_v56, %v783_v3 }
 0x100   : > { %vm932_vm6 = vcmp.eq.s32.totalorder %v1946_v57, 1 }
 0x101   : > { %v823_v11 = vmax.f32 %v795_v0, %v809_v6  ;;  %v810_v13 = vmul.f32 0.01, %v796_v8  ;;  %v818_v14 = vmul.f32 0.01, %v804_v9  ;;  %v831_v16 = vmax.f32 %v803_v1, %v817_v7 }
 0x102   : > { %v675_v18 = vpop.f32.mrb[4].mxu0  ;;  %v707_v19 = vpop.f32.mrb[4].mxu1 }
 0x103   : > { %v935_v20 = vsel %vm921_vm15, %v823_v11, 0.0  ;;  %v1026_v21 = vmul.f32 %v1905_v10, %v823_v11  ;;  %v824_v22 = vmax.f32 %v796_v8, %v810_v13  ;;  %v776_v23 = vmul.f32 %v1882_v52, %v675_v18  ;;  %v1586_v24 = vpop.f32.mrb[5].mxu0  ;;  %v1602_v25 = vpop.f32.mrb[5].mxu1 }
 0x104   : > { %v784_v26 = vmul.f32 %v1882_v52, %v707_v19  ;;  %v832_v27 = vmax.f32 %v804_v9, %v818_v14  ;;  %v943_v28 = vsel %vm929_vm0, %v831_v16, 0.0  ;;  %v1034_v29 = vmul.f32 %v1905_v10, %v831_v16  ;;  %v678_v30 = vpop.f32.mrb[6].mxu0  ;;  %v710_v31 = vpop.f32.mrb[6].mxu1 }
 0x105   : > { %v1047_v32 = vadd.f32 %v1911_v12, %v1026_v21  ;;  %v936_v33 = vsel %vm922_vm2, %v824_v22, 0.0  ;;  %v1027_v34 = vmul.f32 %v1905_v10, %v824_v22  ;;  %v797_v35 = vadd.f32 %v1891_v56, %v776_v23  ;;  %v1587_v36 = vpop.f32.mrb[7].mxu0  ;;  %v1603_v37 = vpop.f32.mrb[7].mxu1 }
 0x106   : > { %v1470_v38 = vpack.c.bf16 %v936_v33, %v935_v20  ;;  %v805_v39 = vadd.f32 %v1891_v56, %v784_v26  ;;  %v944_v40 = vsel %vm930_vm3, %v832_v27, 0.0  ;;  %v1035_v41 = vmul.f32 %v1905_v10, %v832_v27 }
 0x107   : > { %v1061_v42 = vmul.f32 0.01, %v1047_v32  ;;  %v1048_v43 = vadd.f32 %v1911_v12, %v1027_v34  ;;  %v811_v44 = vmul.f32 0.01, %v797_v35  ;;  %v1490_v55 = vpack.c.bf16 %v944_v40, %v943_v28 }
 0x108   : > { %1471 = vst [vmem:[%s1935_s26] sm:$0xff] %v1470_v38   ;;  %v819_v58 = vmul.f32 0.01, %v805_v39  ;;  %v1056_v59 = vadd.f32 %v1911_v12, %v1035_v41  ;;  %v1055_v60 = vadd.f32 %v1911_v12, %v1034_v29  ;;  %v777_v61 = vmul.f32 %v1882_v52, %v678_v30 }
 0x109   : > { %v1075_v62 = vmax.f32 %v1047_v32, %v1061_v42  ;;  %v1062_v63 = vmul.f32 0.01, %v1048_v43  ;;  %v825_v0 = vmax.f32 %v797_v35, %v811_v44  ;;  %1540 = vst [vmem:[%s1935_s26 + $0x20] sm:$0xff] %v1490_v55   ;;  %v785_v1 = vmul.f32 %v1882_v52, %v710_v31  ;;  %v1986_v42 = vpop.permute.xlu1 %919 }
 0x10a   : > { %v1070_v2 = vmul.f32 0.01, %v1056_v59  ;;  %v1069_v3 = vmul.f32 0.01, %v1055_v60  ;;  %v798_v4 = vadd.f32 %v1891_v56, %v777_v61  ;;  %v833_v5 = vmax.f32 %v805_v39, %v819_v58  ;;  %v683_v6 = vpop.f32.mrb[8].mxu0  ;;  %v715_v7 = vpop.f32.mrb[8].mxu1 }
 0x10b   : > { %v1089_v8 = vsel %vm921_vm15, %v1075_v62, 0.0  ;;  %v1076_v9 = vmax.f32 %v1048_v43, %v1062_v63  ;;  %v937_v11 = vsel %vm923_vm1, %v825_v0, 0.0  ;;  %v1028_v13 = vmul.f32 %v1905_v10, %v825_v0  ;;  %v1590_v14 = vpop.f32.mrb[9].mxu0  ;;  %v1606_v16 = vpop.f32.mrb[9].mxu1 }
 0x10c   : > { %v1084_v18 = vmax.f32 %v1056_v59, %v1070_v2  ;;  %v1083_v19 = vmax.f32 %v1055_v60, %v1069_v3  ;;  %v812_v20 = vmul.f32 0.01, %v798_v4  ;;  %v806_v21 = vadd.f32 %v1891_v56, %v785_v1  ;;  %v686_v22 = vpop.f32.mrb[10].mxu0  ;;  %v718_v23 = vpop.f32.mrb[10].mxu1 }
 0x10d   : > { %v1090_v45 = vsel %vm922_vm2, %v1076_v9, 0.0  ;;  %v1049_v24 = vadd.f32 %v1911_v12, %v1028_v13  ;;  %v945_v25 = vsel %vm931_vm4, %v833_v5, 0.0  ;;  %v1036_v26 = vmul.f32 %v1905_v10, %v833_v5  ;;  %v1591_v27 = vpop.f32.mrb[11].mxu0  ;;  %v1607_v28 = vpop.f32.mrb[11].mxu1 }
 0x10e   : > { %v1505_v29 = vpack.c.bf16 %v1090_v45, %v1089_v8  ;;  %v1098_v30 = vsel %vm930_vm3, %v1084_v18, 0.0  ;;  %v1097_v31 = vsel %vm929_vm0, %v1083_v19, 0.0  ;;  %v826_v47 = vmax.f32 %v798_v4, %v812_v20  ;;  %v1992_v58 = vpop.permute.xlu0 %916 }
 0x10f   : > { %v1063_v32 = vmul.f32 0.01, %v1049_v24  ;;  %v1525_v33 = vpack.c.bf16 %v1098_v30, %v1097_v31  ;;  %v820_v34 = vmul.f32 0.01, %v806_v21  ;;  %v1057_v35 = vadd.f32 %v1911_v12, %v1036_v26 }
 0x110   : > { %1506 = vst [vmem:[%s1966_s10] sm:$0xff] %v1505_v29   ;;  %v938_v36 = vsel %vm924_vm5, %v826_v47, 0.0  ;;  %v1029_v37 = vmul.f32 %v1905_v10, %v826_v47  ;;  %v778_v38 = vmul.f32 %v1882_v52, %v683_v6  ;;  %v786_v15 = vmul.f32 %v1882_v52, %v715_v7 }
 0x111   : > { %v1077_v39 = vmax.f32 %v1049_v24, %v1063_v32  ;;  %1546 = vst [vmem:[%s1966_s10 + $0x20] sm:$0xff] %v1525_v33   ;;  %v1475_v54 = vpack.c.bf16 %v938_v36, %v937_v11  ;;  %v834_v40 = vmax.f32 %v806_v21, %v820_v34  ;;  %v1071_v41 = vmul.f32 0.01, %v1057_v35 }
 0x112   : > { %v1050_v43 = vadd.f32 %v1911_v12, %v1029_v37  ;;  %v799_v44 = vadd.f32 %v1891_v56, %v778_v38  ;;  %v807_v55 = vadd.f32 %v1891_v56, %v786_v15  ;;  %v779_v59 = vmul.f32 %v1882_v52, %v686_v22  ;;  %v691_v60 = vpop.f32.mrb[12].mxu0 }
 0x113   : > { %1537 = vst [vmem:[%s1935_s26 + $0x8] sm:$0xff] %v1475_v54   ;;  %v946_v61 = vsel %vm932_vm6, %v834_v40, 0.0  ;;  %v1037_v62 = vmul.f32 %v1905_v10, %v834_v40  ;;  %v1085_v63 = vmax.f32 %v1057_v35, %v1071_v41  ;;  %v1594_v0 = vpop.f32.mrb[13].mxu0  ;;  %v1091_v5 = vsel %vm923_vm1, %v1077_v39, 0.0 }
 0x114   : > { %v1064_v1 = vmul.f32 0.01, %v1050_v43  ;;  %v1495_v2 = vpack.c.bf16 %v946_v61, %v945_v25  ;;  %v813_v3 = vmul.f32 0.01, %v799_v44  ;;  %v821_v4 = vmul.f32 0.01, %v807_v55 }
 0x115   : > { %v1058_v6 = vadd.f32 %v1911_v12, %v1037_v62  ;;  %vm934_vm9 = vcmp.eq.s32.totalorder %v1986_v42, 1  ;;  %vm933_vm10 = vcmp.eq.s32.totalorder %v1992_v58, 1  ;;  %v800_v7 = vadd.f32 %v1891_v56, %v779_v59  ;;  %v694_v9 = vpop.f32.mrb[14].mxu0 }
 0x116   : > { %v787_v8 = vmul.f32 %v1882_v52, %v718_v23  ;;  %v1078_v11 = vmax.f32 %v1050_v43, %v1064_v1  ;;  %1541 = vst [vmem:[%s1935_s26 + $0x28] sm:$0xff] %v1495_v2   ;;  %v827_v13 = vmax.f32 %v799_v44, %v813_v3  ;;  %v835_v14 = vmax.f32 %v807_v55, %v821_v4  ;;  %v1595_v18 = vpop.f32.mrb[15].mxu0 }
 0x117   : > { %v780_v16 = vmul.f32 %v1882_v52, %v691_v60  ;;  %v1072_v46 = vmul.f32 0.01, %v1058_v6  ;;  %v814_v19 = vmul.f32 0.01, %v800_v7  ;;  %v781_v21 = vmul.f32 %v1882_v52, %v694_v9 }
 0x118   : > { %v808_v20 = vadd.f32 %v1891_v56, %v787_v8  ;;  %v1092_v22 = vsel %vm924_vm5, %v1078_v11, 0.0  ;;  %v1099_v23 = vsel %vm931_vm4, %v1085_v63, 0.0  ;;  %v939_v45 = vsel %vm925_vm8, %v827_v13, 0.0 }
 0x119   : > { %v1030_v24 = vmul.f32 %v1905_v10, %v827_v13  ;;  %v1510_v25 = vpack.c.bf16 %v1092_v22, %v1091_v5  ;;  %v1086_v26 = vmax.f32 %v1058_v6, %v1072_v46  ;;  %v1038_v27 = vmul.f32 %v1905_v10, %v835_v14 }
 0x11a   : > { %v828_v28 = vmax.f32 %v800_v7, %v814_v19  ;;  %v822_v30 = vmul.f32 0.01, %v808_v20  ;;  %v801_v48 = vadd.f32 %v1891_v56, %v780_v16  ;;  %v802_v52 = vadd.f32 %v1891_v56, %v781_v21 }
 0x11b   : > { %v1051_v29 = vadd.f32 %v1911_v12, %v1030_v24  ;;  %1543 = vst [vmem:[%s1966_s10 + $0x8] sm:$0xff] %v1510_v25   ;;  %v1100_v17 = vsel %vm932_vm6, %v1086_v26, 0.0  ;;  %v1059_v31 = vadd.f32 %v1911_v12, %v1038_v27  ;;  %v947_v57 = vsel %vm933_vm10, %v835_v14, 0.0 }
 0x11c   : > { %v940_v47 = vsel %vm926_vm7, %v828_v28, 0.0  ;;  %v1031_v32 = vmul.f32 %v1905_v10, %v828_v28  ;;  %v1530_v33 = vpack.c.bf16 %v1100_v17, %v1099_v23  ;;  %v836_v36 = vmax.f32 %v808_v20, %v822_v30 }
 0x11d   : > { %v1065_v34 = vmul.f32 0.01, %v1051_v29  ;;  %v1480_v35 = vpack.c.bf16 %v940_v47, %v939_v45  ;;  %v1073_v37 = vmul.f32 0.01, %v1059_v31  ;;  %v815_v56 = vmul.f32 0.01, %v801_v48 }
 0x11e   : > { %v1052_v38 = vadd.f32 %v1911_v12, %v1031_v32  ;;  %v816_v15 = vmul.f32 0.01, %v802_v52  ;;  %1547 = vst [vmem:[%s1966_s10 + $0x28] sm:$0xff] %v1530_v33   ;;  %v948_v39 = vsel %vm934_vm9, %v836_v36, 0.0  ;;  %v1039_v54 = vmul.f32 %v1905_v10, %v836_v36 }
 0x11f   : > { %1538 = vst [vmem:[%s1935_s26 + $0x10] sm:$0xff] %v1480_v35   ;;  %v1079_v40 = vmax.f32 %v1051_v29, %v1065_v34  ;;  %v1500_v43 = vpack.c.bf16 %v948_v39, %v947_v57  ;;  %v829_v44 = vmax.f32 %v801_v48, %v815_v56  ;;  %v1087_v60 = vmax.f32 %v1059_v31, %v1073_v37 }
 0x120   : > { %v1066_v41 = vmul.f32 0.01, %v1052_v38  ;;  %v1060_v55 = vadd.f32 %v1911_v12, %v1039_v54  ;;  %v830_v59 = vmax.f32 %v802_v52, %v816_v15 }
 0x121   : > { %1542 = vst [vmem:[%s1935_s26 + $0x30] sm:$0xff] %v1500_v43   ;;  %v1032_v62 = vmul.f32 %v1905_v10, %v829_v44  ;;  %v941_v0 = vsel %vm927_vm12, %v829_v44, 0.0  ;;  %v1093_v3 = vsel %vm925_vm8, %v1079_v40, 0.0 }
 0x122   : > { %v1080_v61 = vmax.f32 %v1052_v38, %v1066_v41  ;;  %v1074_v63 = vmul.f32 0.01, %v1060_v55  ;;  %v942_v1 = vsel %vm928_vm11, %v830_v59, 0.0  ;;  %v1033_v2 = vmul.f32 %v1905_v10, %v830_v59 }
 0x123   : > { %v1053_v5 = vadd.f32 %v1911_v12, %v1032_v62  ;;  %v1485_v6 = vpack.c.bf16 %v942_v1, %v941_v0  ;;  %v1101_v10 = vsel %vm933_vm10, %v1087_v60, 0.0 }
 0x124   : > { %v1094_v4 = vsel %vm926_vm7, %v1080_v61, 0.0  ;;  %v1088_v8 = vmax.f32 %v1060_v55, %v1074_v63  ;;  %v1054_v9 = vadd.f32 %v1911_v12, %v1033_v2 }
 0x125   : > { %v1515_v7 = vpack.c.bf16 %v1094_v4, %v1093_v3  ;;  %v1067_v11 = vmul.f32 0.01, %v1053_v5  ;;  %1539 = vst [vmem:[%s1935_s26 + $0x18] sm:$0xff] %v1485_v6  }
 0x126   : > { %v1102_v49 = vsel %vm934_vm9, %v1088_v8, 0.0  ;;  %v1068_v50 = vmul.f32 0.01, %v1054_v9 }
 0x127   : > { %1544 = vst [vmem:[%s1966_s10 + $0x10] sm:$0xff] %v1515_v7   ;;  %v1535_v13 = vpack.c.bf16 %v1102_v49, %v1101_v10  ;;  %v1081_v14 = vmax.f32 %v1053_v5, %v1067_v11 }
 0x128   : > { %v1082_v16 = vmax.f32 %v1054_v9, %v1068_v50 }
 0x129   : > { %1548 = vst [vmem:[%s1966_s10 + $0x30] sm:$0xff] %v1535_v13   ;;  %v1095_v18 = vsel %vm927_vm12, %v1081_v14, 0.0 }
 0x12a   : > { %v1096_v12 = vsel %vm928_vm11, %v1082_v16, 0.0 }
 0x12b   : > { %v1520_v46 = vpack.c.bf16 %v1096_v12, %v1095_v18 }
 0x12d   : > { %1545 = vst [vmem:[%s1966_s10 + $0x18] sm:$0xff] %v1520_v46  }
 0x12e PF: > { %s19_s29 = sadd.s32 1, %s1690_s29   ;;  %s2083_s27 = smov %s1686_s28 }
 0x12f   : > { %p16_p5 = scmp.ge.s32.totalorder %s19_s29, 4   ;;  %s2084_s28 = smov %s2086_s30 }
 0x131   :  { %18 = sbr.rel (!%p16_p5) target bundleno = 2 (0x2), region = 116 }

// kernel: encoder_forward.8
= control target key start
LH: loop header
LB: loop body
LE: loop exit
PB: predicated region body
PF: predicated region fallthrough
CT: control target
= control target key end

     0   :  { %s3825_s24 = smov 0   ;;  %s3827_s25 = smov 0   ;;  %s4681_s0 = inlined_call_operand.vmem [shape: bf16[224,128], index: 0, kind: input, shape index: {}, may-alias: {0,1,2}]   ;;  %s4682_s1 = inlined_call_operand.vmem [shape: bf16[224,128], index: 1, kind: input, shape index: {}, may-alias: {0,1,2}]   ;;  %s4683_s2 = inlined_call_operand.vmem [shape: bf16[224,128], index: 2, kind: input, shape index: {}, may-alias: {0,1,2}]   ;;  %s4684_s3 = inlined_call_operand.vmem [shape: bf16[1152,128], index: 3, kind: input, shape index: {}]   ;;  %s4685_s4 = inlined_call_operand.vmem [shape: f32[1,128], index: 4, kind: input, shape index: {}]   ;;  %s4686_s5 = inlined_call_operand.vmem [shape: f32[1,128], index: 5, kind: input, shape index: {}]   ;;  %s4687_s6 = inlined_call_operand.vmem [shape: f32[224,1], index: 6, kind: input, shape index: {}]   ;;  %s4688_s7 = inlined_call_operand.vmem [shape: bf16[224,128], index: 7, kind: output, shape index: {}]  }
   0x1   :  { %s3829_s26 = smov 0  }
   0x2 LB: > { %s29_s27 = sadd.s32 1, %s3776_s25  ;;  %p2719_p0 = scmp.ge.s32.totalorder %s3780_s26, 1  ;;  %s3780_s26 = sphi %s3829_s26, %s17_s26   ;;  %s3776_s25 = sphi %s3827_s25, %s4690_s25   ;;  %s3772_s24 = sphi %s3825_s24, %s4689_s24  }
   0x3   : > { %p31_p1 = scmp.ge.s32.totalorder %s29_s27, 2  ;;  %p334_p2 = scmp.lt.s32.totalorder %s3780_s26, 3 }
   0x5   : > { %s4692_s27 = smov (%p31_p1, %s29_s27), 0  ;;  %p335_p3 = pnand %p2719_p0, %p334_p2 }
   0x6   : > { %v3666_v0 = vld [vmem:[%s4684_s3 + $0x40] sm:$0xff] (!%p335_p3)   ;;  %v3782_v1 = vmov (!%p335_p3), 0.0   ;;  %v3668_v3 = vld [vmem:[%s4684_s3 + $0x48] sm:$0xff] (!%p335_p3)   ;;  %vm3783_vm0 = vmmov (!%p335_p3), 0   ;;  %s2720_s11 = sadd.s32 (!%p335_p3), 4294967295, %s3772_s24  ;;  %s412_s14 = smul.u32 (!%p335_p3), 14, %s3772_s24 }
   0x7   : > { %338 = sbr.rel (%p335_p3) target bundleno = 516 (0x204), region = 48  ;;  %3015 = vmatprep.subr.bf16.mxu1 (!%p335_p3), %v3782_v1  ;;  %3191 = vmatprep.subr.bf16.mxu0 (!%p335_p3), %v3782_v1  ;;  %v3667_v2 = vld [vmem:[%s4684_s3 + $0x100] sm:$0xff] (!%p335_p3)   ;;  %v3669_v4 = vld [vmem:[%s4684_s3 + $0x108] sm:$0xff] (!%p335_p3)   ;;  %p401_p4 = scmp.gt.s32.totalorder (!%p335_p3), %s2720_s11, 0  ;;  %v3670_v5 = vld [vmem:[%s4684_s3 + $0x50] sm:$0xff] (!%p335_p3)   ;;  %vm558_vm1 = vcmask (!%p335_p3), 1044480  }
   0x8   : > { %3016 = vmatpush3.bf16.msra.mxu1 (!%p335_p3), %v3666_v0  ;;  %3031 = vmatprep.mubr.msk.bf16.mxu1 (!%p335_p3), %vm3783_vm0, %v3782_v1  ;;  %p413_p5 = scmp.lt.s32.totalorder (!%p335_p3), %s412_s14, 27  ;;  %v3671_v6 = vld [vmem:[%s4684_s3 + $0x110] sm:$0xff] (!%p335_p3)   ;;  %v3672_v7 = vld [vmem:[%s4684_s3 + $0x58] sm:$0xff] (!%p335_p3)   ;;  %v3674_v9 = vld [vmem:[%s4684_s3 + $0x60] sm:$0xff] (!%p335_p3)   ;;  %vm1520_vm2 = vsmask.f32 (!%p335_p3), 7424 }
   0x9   : > { %3192 = vmatpush3.bf16.msra.mxu0 (!%p335_p3), %v3667_v2  ;;  %3017 = vmatprep.subr.bf16.mxu1 (!%p335_p3), %v3782_v1  ;;  %v3673_v8 = vld [vmem:[%s4684_s3 + $0x118] sm:$0xff] (!%p335_p3)   ;;  %v3675_v10 = vld [vmem:[%s4684_s3 + $0x120] sm:$0xff] (!%p335_p3)   ;;  %v3676_v11 = vld [vmem:[%s4684_s3 + $0x68] sm:$0xff] (!%p335_p3)   ;;  %vm1928_vm3 = vcmask (!%p335_p3), 1042432   ;;  %vm718_vm4 = vsmask.f32 (!%p335_p3), 5376 }
   0xa   : > { %3193 = vmatprep.subr.bf16.mxu0 (!%p335_p3), %v3782_v1  ;;  %3207 = vmatprep.mubr.msk.bf16.mxu0 (!%p335_p3), %vm3783_vm0, %v3782_v1  ;;  %v3677_v12 = vld [vmem:[%s4684_s3 + $0x128] sm:$0xff] (!%p335_p3)   ;;  %v3678_v13 = vld [vmem:[%s4684_s3 + $0x70] sm:$0xff] (!%p335_p3)   ;;  %v3680_v17 = vld [vmem:[%s4684_s3 + $0x78] sm:$0xff] (!%p335_p3)   ;;  %vm1720_vm5 = vsmask.f32 (!%p335_p3), 3328 }
   0xb   : > { %v3679_v16 = vld [vmem:[%s4684_s3 + $0x130] sm:$0xff] (!%p335_p3)   ;;  %v3681_v20 = vld [vmem:[%s4684_s3 + $0x138] sm:$0xff] (!%p335_p3)   ;;  %v3684_v23 = vld [vmem:[%s4684_s3 + $0x140] sm:$0xff] (!%p335_p3)   ;;  %vm950_vm6 = vsmask.f32 (!%p335_p3), 4352 }
   0xc   : > { %3018 = vmatpush3.bf16.msra.mxu1 (!%p335_p3), %v3668_v3  ;;  %v3687_v24 = vld [vmem:[%s4684_s3] sm:$0xff] (!%p335_p3)   ;;  %v3685_v26 = vld [vmem:[%s4684_s3 + $0x148] sm:$0xff] (!%p335_p3)   ;;  %v3688_v30 = vld [vmem:[%s4684_s3 + $0x150] sm:$0xff] (!%p335_p3)  }
   0xd   : > { %3194 = vmatpush3.bf16.msra.mxu0 (!%p335_p3), %v3669_v4  ;;  %3019 = vmatprep.subr.bf16.mxu1 (!%p335_p3), %v3782_v1  ;;  %v3691_v27 = vld [vmem:[%s4684_s3 + $0x8] sm:$0xff] (!%p335_p3)   ;;  %v3694_v31 = vld [vmem:[%s4684_s3 + $0x10] sm:$0xff] (!%p335_p3)   ;;  %v3689_v33 = vld [vmem:[%s4684_s3 + $0x158] sm:$0xff] (!%p335_p3)  }
   0xe   : > { %s4694_s11 = smov (!%p401_p4, %s2720_s11), 0  ;;  %3195 = vmatprep.subr.bf16.mxu0 %v3782_v1  ;;  %s4696_s14 = smov (!%p413_p5, %s412_s14), 27  ;;  %v3698_v34 = vld [vmem:[%s4684_s3 + $0x18] sm:$0xff]   ;;  %v3692_v36 = vld [vmem:[%s4684_s3 + $0x160] sm:$0xff]   ;;  %v3693_v40 = vld [vmem:[%s4684_s3 + $0x168] sm:$0xff]  }
   0xf   : > { %s403_s19 = smul.u32 14, %s4694_s11  ;;  %s2722_s28 = sshll.u32 %s4696_s14, 2  ;;  %v3701_v38 = vld [vmem:[%s4684_s3 + $0x20] sm:$0xff]   ;;  %v3704_v42 = vld [vmem:[%s4684_s3 + $0x28] sm:$0xff]   ;;  %v3696_v46 = vld [vmem:[%s4684_s3 + $0x170] sm:$0xff]  }
  0x10   : > { %3020 = vmatpush3.bf16.msra.mxu1 %v3670_v5  ;;  %s3901_s17 = scalar_lea.vmem %s4682_s1, %s2722_s28  ;;  %v3707_v49 = vld [vmem:[%s4684_s3 + $0x30] sm:$0xff]   ;;  %v3697_v50 = vld [vmem:[%s4684_s3 + $0x178] sm:$0xff]   ;;  %v3700_v59 = vld [vmem:[%s4684_s3 + $0x180] sm:$0xff]   ;;  %s2724_s22 = sshll.u32 %s4696_s14, 3 }
  0x11   : > { %p404_p6 = scmp.lt.s32.totalorder %s403_s19, 27  ;;  %3196 = vmatpush3.bf16.msra.mxu0 %v3671_v6  ;;  %3021 = vmatprep.subr.bf16.mxu1 %v3782_v1  ;;  %v3918_v15 = vld [vmem:[%s3901_s17] sm:$0xff]   ;;  %v3937_v22 = vld [vmem:[%s3901_s17 + $0x8] sm:$0xff]   ;;  %v3963_v29 = vld [vmem:[%s3901_s17 + $0x10] sm:$0xff]   ;;  %s4364_s8 = scalar_lea.vmem %s4687_s6, %s2724_s22 }
  0x12   : > { %3197 = vmatprep.subr.bf16.mxu0 %v3782_v1  ;;  %v560_v19 = vrot.slane %v3918_v15, 3  ;;  %v562_v25 = vrot.slane %v3937_v22, 3  ;;  %v564_v32 = vrot.slane %v3963_v29, 3  ;;  %v3993_v37 = vld [vmem:[%s3901_s17 + $0x18] sm:$0xff]   ;;  %v4010_v41 = vshll.u32 %v3918_v15, 16  ;;  %v4019_v44 = vld [vmem:[%s3901_s17 + $0x20] sm:$0xff]   ;;  %s4640_s22 = scalar_lea.vmem %s4688_s7, %s2722_s28 }
  0x13   : > { %s4698_s19 = smov (!%p404_p6, %s403_s19), 27  ;;  %v566_v39 = vrot.slane %v3993_v37, 3  ;;  %v4022_v45 = vshrl.u32 %v3918_v15, 16  ;;  %v4028_v47 = vshll.u32 %v3937_v22, 16  ;;  %v568_v51 = vrot.slane %v4019_v44, 3  ;;  %v3708_v54 = vld [vmem:[%s4684_s3 + $0x38] sm:$0xff]  }
  0x14   : > { %s2721_s29 = sshll.u32 %s4698_s19, 2  ;;  %3022 = vmatpush3.bf16.msra.mxu1 %v3672_v7  ;;  %v563_v28 = vsel %vm558_vm1, %v560_v19, %v562_v25  ;;  %v565_v35 = vsel %vm558_vm1, %v562_v25, %v564_v32  ;;  %v1521_v48 = vrot.slane %v4010_v41, 1  ;;  %v4059_v56 = vld [vmem:[%s3901_s17 + $0x28] sm:$0xff]   ;;  %v4062_v57 = vshrl.u32 %v3937_v22, 16  ;;  %v3705_v4 = vld [vmem:[%s4684_s3 + $0x190] sm:$0xff]  }
  0x15   : > { %3198 = vmatpush3.bf16.msra.mxu0 %v3673_v8  ;;  %3023 = vmatprep.subr.bf16.mxu1 %v3782_v1  ;;  %s407_s13 = scalar_lea.vmem %s4681_s0, %s2721_s29  ;;  %s418_s29 = sadd.s32 1, %s3772_s24  ;;  %v567_v43 = vsel %vm558_vm1, %v564_v32, %v566_v39  ;;  %v1523_v53 = vrot.slane %v4028_v47, 1  ;;  %v569_v55 = vsel %vm558_vm1, %v566_v39, %v568_v51  ;;  %v4069_v60 = vshll.u32 %v3963_v29, 16  ;;  %v3703_v0 = vld [vmem:[%s4684_s3 + $0x188] sm:$0xff]   ;;  %v4092_v5 = vld [vmem:[%s3901_s17 + $0x30] sm:$0xff]  }
  0x16   : > { %3199 = vmatprep.subr.bf16.mxu0 %v3782_v1  ;;  %v3915_v14 = vld [vmem:[%s407_s13 + $0x30] sm:$0xff]   ;;  %p419_p7 = scmp.lt.s32.totalorder %s418_s29, 1  ;;  %v1522_v52 = vor.u32 %v1521_v48, %v4022_v45  ;;  %v570_v61 = vrot.slane %v4059_v56, 3  ;;  %v4095_v6 = vshrl.u32 %v3963_v29, 16  ;;  %v4098_v7 = vshll.u32 %v3993_v37, 16 }
  0x17   : > { %v559_v18 = vrot.slane %v3915_v14, 3  ;;  %v1525_v62 = vor.u32 %v1523_v53, %v4062_v57  ;;  %v1526_v63 = vrot.slane %v4069_v60, 1  ;;  %v4085_v2 = vshrl.u32 %v3915_v14, 16  ;;  %v3714_v48 = vld [vmem:[%s4684_s3 + $0x1b0] sm:$0xff]  }
  0x18   : > { %3024 = vmatpush3.bf16.msra.mxu1 %v3674_v9  ;;  %s4700_s29 = smov (!%p419_p7, %s418_s29), 1  ;;  %v1524_v58 = vsel %vm1520_vm2, %v1522_v52, %v1523_v53  ;;  %v571_v3 = vsel %vm558_vm1, %v568_v51, %v570_v61  ;;  %v723_v9 = vshll.u32 %v3915_v14, 16  ;;  %v742_v39 = vrot.slane %v4028_v47, 3  ;;  %v3713_v52 = vld [vmem:[%s4684_s3 + $0x88] sm:$0xff]   ;;  %v3717_v53 = vld [vmem:[%s4684_s3 + $0x1b8] sm:$0xff]  }
  0x19   : > { %3200 = vmatpush3.bf16.msra.mxu0 %v3675_v10  ;;  %3025 = vmatprep.subr.bf16.mxu1 %v3782_v1  ;;  %v561_v21 = vsel %vm558_vm1, %v559_v18, %v560_v19  ;;  %s421_s20 = smul.u32 14, %s4700_s29  ;;  %v1527_v8 = vsel %vm1520_vm2, %v1525_v62, %v1526_v63  ;;  %v572_v10 = vrot.slane %v4092_v5, 3  ;;  %v730_v18 = vrot.slane %v4022_v45, 2 }
  0x1a   : > { %3201 = vmatprep.subr.bf16.mxu0 %v3782_v1  ;;  %v1930_v19 = vrot.slane %v3937_v22, 5  ;;  %v4195_v62 = vshll.u32 %v4092_v5, 16 }
  0x1b   : > { %p422_p8 = scmp.lt.s32.totalorder %s421_s20, 27  ;;  %v573_v25 = vsel %vm558_vm1, %v570_v61, %v572_v10  ;;  %v4192_v61 = vshrl.u32 %v4059_v56, 16  ;;  %v3718_v10 = vld [vmem:[%s4684_s3 + $0x98] sm:$0xff]  }
  0x1c   : > { %3026 = vmatpush3.bf16.msra.mxu1 %v3676_v11  ;;  %v722_v11 = vrot.slane %v4085_v2, 2 }
  0x1d   : > { %3202 = vmatpush3.bf16.msra.mxu0 %v3677_v12  ;;  %3027 = vmatprep.subr.bf16.mxu1 %v3782_v1  ;;  %s4702_s20 = smov (!%p422_p8, %s421_s20), 27  ;;  %v1528_v12 = vor.u32 %v1526_v63, %v4095_v6  ;;  %v3715_v63 = vld [vmem:[%s4684_s3 + $0x90] sm:$0xff]  }
  0x1e   : > { %3203 = vmatprep.subr.bf16.mxu0 %v3782_v1  ;;  %s2723_s24 = sshll.u32 %s4702_s20, 2 }
  0x1f   : > { %s4046_s13 = scalar_lea.vmem %s4683_s2, %s2723_s24 }
  0x20   : > { %3028 = vmatpush3.bf16.msra.mxu1 %v3678_v13  ;;  %v1529_v13 = vrot.slane %v4098_v7, 1 }
  0x21   : > { %3204 = vmatpush3.bf16.msra.mxu0 %v3679_v16  ;;  %3029 = vmatprep.subr.bf16.mxu1 %v3782_v1  ;;  %v3709_v16 = vld [vmem:[%s4684_s3 + $0x198] sm:$0xff]  }
  0x22   : > { %3205 = vmatprep.subr.bf16.mxu0 %v3782_v1 }
  0x24   : > { %3030 = vmatpush3.bf16.msra.mxu1 %v3680_v17  ;;  %v1929_v17 = vrot.slane %v3918_v15, 5 }
  0x25   : > { %3206 = vmatpush3.bf16.msra.mxu0 %v3681_v20  ;;  %3059 = vmatprep.subr.bf16.mxu1 %v3782_v1  ;;  %v725_v20 = vrot.slane %v723_v9, 3 }
  0x26   : > { %3235 = vmatprep.subr.bf16.mxu0 %v3782_v1 }
  0x27   : > { %3032 = vmatmul.mubr.bf16.vlgmr.msra.gmra.mrb[0].mxu1 %v561_v21  ;;  %v733_v21 = vrot.slane %v4010_v41, 3 }
  0x28   : > { %3208 = vmatmul.mubr.bf16.vlgmr.msra.gmra.mrb[0].mxu0 %v3918_v15  ;;  %3035 = vmatprep.mubr.msk.bf16.mxu1 %vm3783_vm0, %v3782_v1  ;;  %v3710_v15 = vld [vmem:[%s4684_s3 + $0x1a0] sm:$0xff]  }
  0x29   : > { %3236 = vmatpush3.bf16.msra.mxu0 %v3684_v23  ;;  %3211 = vmatprep.mubr.msk.bf16.mxu0 %vm3783_vm0, %v3782_v1  ;;  %v4122_v23 = vshrl.u32 %v3993_v37, 16  ;;  %v734_v32 = vor.u32 %v733_v21, %v730_v18 }
  0x2a   : > { %3237 = vmatprep.subr.bf16.mxu0 %v3782_v1  ;;  %3060 = vmatpush3.bf16.msra.mxu1 %v3687_v24  ;;  %v4125_v24 = vshll.u32 %v4019_v44, 16 }
  0x2b   : > { %3061 = vmatprep.subr.bf16.mxu1 %v3782_v1 }
  0x2d   : > { %3238 = vmatpush3.bf16.msra.mxu0 %v3685_v26  ;;  %v4132_v26 = vsel %vm1928_vm3, %v1929_v17, %v1930_v19  ;;  %v4220_v17 = vshrl.u32 %v4092_v5, 16 }
  0x2e   : > { %3239 = vmatprep.subr.bf16.mxu0 %v3782_v1  ;;  %3062 = vmatpush3.bf16.msra.mxu1 %v3691_v27  ;;  %v1530_v27 = vsel %vm1520_vm2, %v1528_v12, %v1529_v13  ;;  %v757_v12 = vrot.slane %v4122_v23, 2 }
  0x2f   : > { %3036 = vmatmul.mubr.bf16.gmra.mrb[4].mxu1 %v563_v28  ;;  %3063 = vmatprep.subr.bf16.mxu1 %v3782_v1 }
  0x30   : > { %3212 = vmatmul.mubr.bf16.gmra.mrb[4].mxu0 %v3937_v22  ;;  %3039 = vmatprep.mubr.msk.bf16.mxu1 %vm3783_vm0, %v3782_v1  ;;  %v1932_v22 = vrot.slane %v3963_v29, 5 }
  0x31   : > { %3240 = vmatpush3.bf16.msra.mxu0 %v3688_v30  ;;  %3215 = vmatprep.mubr.msk.bf16.mxu0 %vm3783_vm0, %v3782_v1  ;;  %v1934_v30 = vrot.slane %v3993_v37, 5 }
  0x32   : > { %3241 = vmatprep.subr.bf16.mxu0 %v3782_v1  ;;  %3064 = vmatpush3.bf16.msra.mxu1 %v3694_v31  ;;  %v4138_v28 = vsel %vm1928_vm3, %v1930_v19, %v1932_v22  ;;  %v726_v31 = vor.u32 %v725_v20, %v722_v11  ;;  %v3720_v19 = vld [vmem:[%s4684_s3 + $0xa0] sm:$0xff]  }
  0x33   : > { %3065 = vmatprep.subr.bf16.mxu1 %v3782_v1 }
  0x35   : > { %3242 = vmatpush3.bf16.msra.mxu0 %v3689_v33  ;;  %v1531_v33 = vor.u32 %v1529_v13, %v4122_v23  ;;  %v760_v13 = vrot.slane %v4098_v7, 3 }
  0x36   : > { %3243 = vmatprep.subr.bf16.mxu0 %v3782_v1  ;;  %3066 = vmatpush3.bf16.msra.mxu1 %v3698_v34  ;;  %v1532_v34 = vrot.slane %v4125_v24, 1 }
  0x37   : > { %3040 = vmatmul.mubr.bf16.gmra.mrb[8].mxu1 %v565_v35  ;;  %3067 = vmatprep.subr.bf16.mxu1 %v3782_v1  ;;  %v3712_v35 = vld [vmem:[%s4684_s3 + $0x1a8] sm:$0xff]   ;;  %v761_v20 = vor.u32 %v760_v13, %v757_v12  ;;  %v1732_v12 = vrot.slane %v4122_v23, 4  ;;  %v1733_v13 = vrot.slane %v4098_v7, 5 }
  0x38   : > { %3216 = vmatmul.mubr.bf16.gmra.mrb[8].mxu0 %v3963_v29  ;;  %3043 = vmatprep.mubr.msk.bf16.mxu1 %vm3783_vm0, %v3782_v1  ;;  %v4146_v29 = vsel %vm1928_vm3, %v1932_v22, %v1934_v30 }
  0x39   : > { %3244 = vmatpush3.bf16.msra.mxu0 %v3692_v36  ;;  %3219 = vmatprep.mubr.msk.bf16.mxu0 %vm3783_vm0, %v3782_v1  ;;  %v739_v36 = vrot.slane %v4062_v57, 2 }
  0x3a   : > { %3245 = vmatprep.subr.bf16.mxu0 %v3782_v1  ;;  %3068 = vmatpush3.bf16.msra.mxu1 %v3701_v38  ;;  %v735_v38 = vsel %vm718_vm4, %v726_v31, %v734_v32  ;;  %v769_v31 = vrot.slane %v4125_v24, 3 }
  0x3b   : > { %3069 = vmatprep.subr.bf16.mxu1 %v3782_v1 }
  0x3d   : > { %3246 = vmatpush3.bf16.msra.mxu0 %v3693_v40  ;;  %v3711_v40 = vld [vmem:[%s4684_s3 + $0x80] sm:$0xff]  }
  0x3e   : > { %3247 = vmatprep.subr.bf16.mxu0 %v3782_v1  ;;  %3070 = vmatpush3.bf16.msra.mxu1 %v3704_v42  ;;  %v1533_v42 = vsel %vm1520_vm2, %v1531_v33, %v1532_v34 }
  0x3f   : > { %3044 = vmatmul.mubr.bf16.gmra.mrb[12].mxu1 %v567_v43  ;;  %3071 = vmatprep.subr.bf16.mxu1 %v3782_v1  ;;  %v4164_v43 = vshrl.u32 %v4019_v44, 16 }
  0x40   : > { %3220 = vmatmul.mubr.bf16.gmra.mrb[12].mxu0 %v3993_v37  ;;  %3047 = vmatprep.mubr.msk.bf16.mxu1 %vm3783_vm0, %v3782_v1  ;;  %v1938_v37 = vrot.slane %v4059_v56, 5 }
  0x41   : > { %3248 = vmatpush3.bf16.msra.mxu0 %v3696_v46  ;;  %3251 = vmatprep.mubr.msk.bf16.mxu0 %vm3783_vm0, %v3782_v1  ;;  %v4167_v46 = vshll.u32 %v4059_v56, 16 }
  0x42   : > { %3249 = vmatprep.subr.bf16.mxu0 %v3782_v1  ;;  %3072 = vmatpush3.bf16.msra.mxu1 %v3707_v49  ;;  %v743_v49 = vor.u32 %v742_v39, %v739_v36  ;;  %v1725_v36 = vrot.slane %v4028_v47, 5 }
  0x43   : > { %3073 = vmatprep.subr.bf16.mxu1 %v3782_v1  ;;  %v1535_v51 = vrot.slane %v4167_v46, 1 }
  0x45   : > { %3250 = vmatpush3.bf16.msra.mxu0 %v3697_v50  ;;  %v1534_v50 = vor.u32 %v1532_v34, %v4164_v43  ;;  %v1722_v34 = vrot.slane %v4010_v41, 5 }
  0x46   : > { %3279 = vmatprep.subr.bf16.mxu0 %v3782_v1  ;;  %3074 = vmatpush3.bf16.msra.mxu1 %v3708_v54  ;;  %v744_v54 = vsel %vm718_vm4, %v734_v32, %v743_v49  ;;  %v1721_v32 = vrot.slane %v4022_v45, 4 }
  0x47   : > { %3048 = vmatmul.mubr.bf16.gmra.mrb[16].mxu1 %v569_v55  ;;  %3103 = vmatprep.subr.bf16.mxu1 %v3782_v1  ;;  %v748_v55 = vrot.slane %v4095_v6, 2 }
  0x48   : > { %3252 = vmatmul.mubr.bf16.vlgmr.msra.gmra.mrb[0].mxu0 %v1524_v58  ;;  %3051 = vmatprep.mubr.msk.bf16.mxu1 %vm3783_vm0, %v3782_v1  ;;  %v751_v58 = vrot.slane %v4069_v60, 3 }
  0x49   : > { %3280 = vmatpush3.bf16.msra.mxu0 %v3700_v59  ;;  %3255 = vmatprep.mubr.msk.bf16.mxu0 %vm3783_vm0, %v3782_v1  ;;  %v1536_v59 = vsel %vm1520_vm2, %v1534_v50, %v1535_v51  ;;  %v775_v50 = vrot.slane %v4192_v61, 2 }
  0x4a   : > { %3281 = vmatprep.subr.bf16.mxu0 %v3782_v1 }
  0x4d   : > { %3282 = vmatpush3.bf16.msra.mxu0 %v3703_v0  ;;  %v752_v0 = vor.u32 %v751_v58, %v748_v55  ;;  %v1729_v55 = vrot.slane %v4069_v60, 5 }
  0x4e   : > { %3283 = vmatprep.subr.bf16.mxu0 %v3782_v1 }
  0x4f   : > { %3052 = vmatmul.mubr.bf16.gmra.mrb[20].mxu1 %v571_v3  ;;  %v1537_v3 = vor.u32 %v1535_v51, %v4192_v61  ;;  %v753_v11 = vsel %vm718_vm4, %v743_v49, %v752_v0  ;;  %v762_v22 = vsel %vm718_vm4, %v752_v0, %v761_v20  ;;  %v778_v51 = vrot.slane %v4167_v46, 3 }
  0x50   : > { %3256 = vmatmul.mubr.bf16.gmra.mrb[4].mxu0 %v1527_v8  ;;  %3055 = vmatprep.mubr.msk.bf16.mxu1 %vm3783_vm0, %v3782_v1  ;;  %v4209_v8 = vld [vmem:[%s4046_s13] sm:$0xff]  }
  0x51   : > { %3259 = vmatprep.mubr.msk.bf16.mxu0 %vm3783_vm0, %v3782_v1  ;;  %3284 = vmatpush3.bf16.msra.mxu0 %v3705_v4  ;;  %v1538_v4 = vrot.slane %v4195_v62, 1  ;;  %v4223_v18 = vshll.u32 %v4209_v8, 16  ;;  %v779_v58 = vor.u32 %v778_v51, %v775_v50  ;;  %v3728_v50 = vld [vmem:[%s4684_s3 + $0xc0] sm:$0xff]   ;;  %v3731_v51 = vld [vmem:[%s4684_s3 + $0x1f0] sm:$0xff]  }
  0x52   : > { %3285 = vmatprep.subr.bf16.mxu0 %v3782_v1 }
  0x53   : > { %v1540_v21 = vor.u32 %v1538_v4, %v4220_v17 }
  0x55   : > { %3286 = vmatpush3.bf16.msra.mxu0 %v3709_v16  ;;  %v1539_v16 = vsel %vm1520_vm2, %v1537_v3, %v1538_v4  ;;  %v784_v3 = vrot.slane %v4220_v17, 2  ;;  %v787_v4 = vrot.slane %v4195_v62, 3 }
  0x56   : > { %3287 = vmatprep.subr.bf16.mxu0 %v3782_v1 }
  0x57   : > { %3056 = vmatmul.mubr.bf16.gmra.mrb[24].mxu1 %v573_v25  ;;  %v1544_v25 = vrot.slane %v4223_v18, 1 }
  0x58   : > { %3260 = vmatmul.mubr.bf16.gmra.mrb[8].mxu0 %v1530_v27  ;;  %3075 = vmatprep.mubr.msk.bf16.mxu1 %vm3783_vm0, %v3782_v1  ;;  %v766_v27 = vrot.slane %v4164_v43, 2 }
  0x59   : > { %3263 = vmatprep.mubr.msk.bf16.mxu0 %vm3783_vm0, %v3782_v1  ;;  %3288 = vmatpush3.bf16.msra.mxu0 %v3710_v15  ;;  %v3722_v15 = vld [vmem:[%s4684_s3 + $0xa8] sm:$0xff]   ;;  %v1545_v33 = vsel %vm1520_vm2, %v1540_v21, %v1544_v25  ;;  %v951_v21 = vrot.slane %v4085_v2, 3 }
  0x5a   : > { %3289 = vmatprep.subr.bf16.mxu0 %v3782_v1  ;;  %v770_v39 = vor.u32 %v769_v31, %v766_v27  ;;  %v955_v27 = vrot.slane %v4010_v41, 4 }
  0x5c   : > { %v771_v49 = vsel %vm718_vm4, %v761_v20, %v770_v39  ;;  %v780_v0 = vsel %vm718_vm4, %v770_v39, %v779_v58  ;;  %v3726_v20 = vld [vmem:[%s4684_s3 + $0x1d8] sm:$0xff]   ;;  %v958_v39 = vrot.slane %v4062_v57, 3 }
  0x5d   : > { %3290 = vmatpush3.bf16.msra.mxu0 %v3712_v35  ;;  %v1724_v35 = vrot.slane %v4062_v57, 4 }
  0x5e   : > { %3291 = vmatprep.subr.bf16.mxu0 %v3782_v1 }
  0x5f   : > { %3076 = vmatmul.mubr.bf16.vlgmr.msra.gmra.mrb[0].mxu1 %v735_v38  ;;  %v3724_v38 = vld [vmem:[%s4684_s3 + $0xb0] sm:$0xff]  }
  0x60   : > { %3264 = vmatmul.mubr.bf16.gmra.mrb[12].mxu0 %v1533_v42  ;;  %3079 = vmatprep.mubr.msk.bf16.mxu1 %vm3783_vm0, %v3782_v1  ;;  %v1726_v42 = vor.u32 %v1725_v36, %v1724_v35  ;;  %v3729_v36 = vld [vmem:[%s4684_s3 + $0x1e8] sm:$0xff]  }
  0x61   : > { %3267 = vmatprep.mubr.msk.bf16.mxu0 %vm3783_vm0, %v3782_v1  ;;  %3104 = vmatpush3.bf16.msra.mxu1 %v3711_v40  ;;  %v1723_v40 = vor.u32 %v1722_v34, %v1721_v32  ;;  %v1736_v32 = vrot.slane %v4164_v43, 4  ;;  %v3727_v34 = vld [vmem:[%s4684_s3 + $0x1e0] sm:$0xff]  }
  0x62   : > { %3105 = vmatprep.subr.bf16.mxu1 %v3782_v1  ;;  %3292 = vmatpush3.bf16.msra.mxu0 %v3714_v48  ;;  %v3725_v48 = vld [vmem:[%s4684_s3 + $0xb8] sm:$0xff]  }
  0x63   : > { %3293 = vmatprep.subr.bf16.mxu0 %v3782_v1 }
  0x65   : > { %3106 = vmatpush3.bf16.msra.mxu1 %v3713_v52  ;;  %v1727_v52 = vsel %vm1720_vm5, %v1723_v40, %v1726_v42  ;;  %v959_v40 = vrot.slane %v4028_v47, 4 }
  0x66   : > { %3107 = vmatprep.subr.bf16.mxu1 %v3782_v1  ;;  %3294 = vmatpush3.bf16.msra.mxu0 %v3717_v53  ;;  %v3719_v53 = vld [vmem:[%s4684_s3 + $0x1c0] sm:$0xff]  }
  0x67   : > { %3080 = vmatmul.mubr.bf16.gmra.mrb[4].mxu1 %v744_v54  ;;  %3323 = vmatprep.subr.bf16.mxu0 %v3782_v1  ;;  %v1728_v54 = vrot.slane %v4095_v6, 4 }
  0x68   : > { %3268 = vmatmul.mubr.bf16.gmra.mrb[16].mxu0 %v1536_v59  ;;  %3083 = vmatprep.mubr.msk.bf16.mxu1 %vm3783_vm0, %v3782_v1 }
  0x69   : > { %3271 = vmatprep.mubr.msk.bf16.mxu0 %vm3783_vm0, %v3782_v1  ;;  %3108 = vmatpush3.bf16.msra.mxu1 %v3715_v63  ;;  %v1730_v59 = vor.u32 %v1729_v55, %v1728_v54  ;;  %v3721_v63 = vld [vmem:[%s4684_s3 + $0x1c8] sm:$0xff]   ;;  %v3733_v55 = vld [vmem:[%s4684_s3 + $0x1f8] sm:$0xff]  }
  0x6a   : > { %3109 = vmatprep.subr.bf16.mxu1 %v3782_v1  ;;  %v3730_v54 = vld [vmem:[%s4684_s3 + $0xc8] sm:$0xff]  }
  0x6d   : > { %3110 = vmatpush3.bf16.msra.mxu1 %v3718_v10  ;;  %v1731_v10 = vsel %vm1720_vm5, %v1726_v42, %v1730_v59 }
  0x6e   : > { %3111 = vmatprep.subr.bf16.mxu1 %v3782_v1 }
  0x6f   : > { %3084 = vmatmul.mubr.bf16.gmra.mrb[8].mxu1 %v753_v11  ;;  %v3723_v11 = vld [vmem:[%s4684_s3 + $0x1d0] sm:$0xff]  }
  0x70   : > { %3272 = vmatmul.mubr.bf16.gmra.mrb[20].mxu0 %v1539_v16  ;;  %3087 = vmatprep.mubr.msk.bf16.mxu1 %vm3783_vm0, %v3782_v1  ;;  %v788_v16 = vor.u32 %v787_v4, %v784_v3  ;;  %v1744_v3 = vrot.slane %v4220_v17, 4  ;;  %v1745_v4 = vrot.slane %v4195_v62, 5 }
  0x71   : > { %3275 = vmatprep.mubr.msk.bf16.mxu0 %vm3783_vm0, %v3782_v1  ;;  %3112 = vmatpush3.bf16.msra.mxu1 %v3720_v19  ;;  %v1734_v19 = vor.u32 %v1733_v13, %v1732_v12  ;;  %v1748_v13 = vshrl.u32 %v4209_v8, 16 }
  0x72   : > { %3113 = vmatprep.subr.bf16.mxu1 %v3782_v1  ;;  %v789_v25 = vsel %vm718_vm4, %v779_v58, %v788_v16  ;;  %v1746_v12 = vor.u32 %v1745_v4, %v1744_v3  ;;  %v3734_v16 = vld [vmem:[%s4684_s3 + $0xd8] sm:$0xff]   ;;  %v2387_v3 = vld [vmem:[%s4364_s8 + $0x48] sm:$0xff] }
  0x73   : > { %v1735_v31 = vsel %vm1720_vm5, %v1730_v59, %v1734_v19  ;;  %v962_v59 = vrot.slane %v4095_v6, 3  ;;  %vm2401_vm1 = vcmp.gt.f32.partialorder %v2387_v3, 0.0  ;;  %v3748_v3 = vld [vmem:[%s4684_s3 + $0x108] sm:$0xff]  }
  0x75   : > { %3114 = vmatpush3.bf16.msra.mxu1 %v3722_v15  ;;  %v952_v15 = vrot.slane %v723_v9, 4 }
  0x76   : > { %3115 = vmatprep.subr.bf16.mxu1 %v3782_v1 }
  0x77   : > { %3088 = vmatmul.mubr.bf16.gmra.mrb[12].mxu1 %v762_v22  ;;  %v954_v22 = vrot.slane %v4022_v45, 3  ;;  %v953_v14 = vor.u32 %v952_v15, %v951_v21  ;;  %v2379_v21 = vld [vmem:[%s4364_s8 + $0x8] sm:$0xff]  ;;  %v966_v15 = vrot.slane %v4122_v23, 3 }
  0x78   : > { %3276 = vmatmul.mubr.bf16.gmra.mrb[24].mxu0 %v1545_v33  ;;  %3091 = vmatprep.mubr.msk.bf16.mxu1 %vm3783_vm0, %v3782_v1  ;;  %v1737_v33 = vrot.slane %v4125_v24, 5  ;;  %vm2393_vm9 = vcmp.gt.f32.partialorder %v2379_v21, 0.0  ;;  %v974_v21 = vrot.slane %v4192_v61, 3 }
  0x79   : > { %3295 = vmatprep.mubr.msk.bf16.mxu0 %vm3783_vm0, %v3782_v1  ;;  %3116 = vmatpush3.bf16.msra.mxu1 %v3724_v38  ;;  %v956_v9 = vor.u32 %v955_v27, %v954_v22  ;;  %v967_v22 = vrot.slane %v4098_v7, 4  ;;  %v2381_v27 = vld [vmem:[%s4364_s8 + $0x18] sm:$0xff] }
  0x7a   : > { %3117 = vmatprep.subr.bf16.mxu1 %v3782_v1  ;;  %v1738_v35 = vor.u32 %v1737_v33, %v1736_v32  ;;  %vm2395_vm10 = vcmp.gt.f32.partialorder %v2381_v27, 0.0 }
  0x7b   : > { %v957_v38 = vsel %vm950_vm6, %v953_v14, %v956_v9  ;;  %v1750_v14 = vrot.slane %v1748_v13, 4 }
  0x7c   : > { %v1739_v42 = vsel %vm1720_vm5, %v1734_v19, %v1738_v35  ;;  %v3784_v19 = vmov 0  }
  0x7d   : > { %3118 = vmatpush3.bf16.msra.mxu1 %v3725_v48  ;;  %v1740_v48 = vrot.slane %v4192_v61, 4  ;;  %3664 = vset.pattern.permute.xlu0 %v3784_v19  ;;  %v2415_v27 = vsel %vm2401_vm1, 1, %v3784_v19 }
  0x7e   : > { %3147 = vmatprep.subr.bf16.mxu1 %v3782_v1  ;;  %3665 = vset.pattern.permute.xlu1 %v3784_v19 }
  0x7f   : > { %3092 = vmatmul.mubr.bf16.gmra.mrb[16].mxu1 %v771_v49  ;;  %v1741_v49 = vrot.slane %v4167_v46, 5 }
  0x80   : > { %3296 = vmatmul.mubr.bf16.vlgmr.msra.gmra.mrb[0].mxu0 %v1727_v52  ;;  %3095 = vmatprep.mubr.msk.bf16.mxu1 %vm3783_vm0, %v3782_v1  ;;  %v960_v52 = vor.u32 %v959_v40, %v958_v39  ;;  %v2407_v39 = vsel %vm2393_vm9, 1, %v3784_v19  ;;  %v968_v40 = vor.u32 %v967_v22, %v966_v15  ;;  %v975_v22 = vrot.slane %v4167_v46, 4 }
  0x81   : > { %3324 = vmatpush3.bf16.msra.mxu0 %v3719_v53  ;;  %3299 = vmatprep.mubr.msk.bf16.mxu0 %vm3783_vm0, %v3782_v1  ;;  %v1742_v53 = vor.u32 %v1741_v49, %v1740_v48  ;;  %v3738_v49 = vld [vmem:[%s4684_s3 + $0xe8] sm:$0xff]  }
  0x82   : > { %3325 = vmatprep.subr.bf16.mxu0 %v3782_v1  ;;  %v961_v58 = vsel %vm950_vm6, %v956_v9, %v960_v52  ;;  %v1751_v9 = vrot.slane %v4223_v18, 5 }
  0x84   : > { %v1752_v48 = vor.u32 %v1751_v9, %v1750_v14  ;;  %v976_v14 = vor.u32 %v975_v22, %v974_v21  ;;  %v3750_v21 = vld [vmem:[%s4684_s3 + $0x118] sm:$0xff]  }
  0x85   : > { %3326 = vmatpush3.bf16.msra.mxu0 %v3721_v63  ;;  %v963_v63 = vrot.slane %v4069_v60, 4 }
  0x86   : > { %3327 = vmatprep.subr.bf16.mxu0 %v3782_v1 }
  0x87   : > { %3096 = vmatmul.mubr.bf16.gmra.mrb[20].mxu1 %v780_v0  ;;  %v1743_v0 = vsel %vm1720_vm5, %v1738_v35, %v1742_v53  ;;  %v3736_v35 = vld [vmem:[%s4684_s3 + $0xe0] sm:$0xff]  }
  0x88   : > { %3300 = vmatmul.mubr.bf16.gmra.mrb[4].mxu0 %v1731_v10  ;;  %3099 = vmatprep.mubr.msk.bf16.mxu1 %vm3783_vm0, %v3782_v1  ;;  %v3732_v10 = vld [vmem:[%s4684_s3 + $0xd0] sm:$0xff]  }
  0x89   : > { %3303 = vmatprep.mubr.msk.bf16.mxu0 %vm3783_vm0, %v3782_v1  ;;  %3328 = vmatpush3.bf16.msra.mxu0 %v3723_v11  ;;  %v964_v11 = vor.u32 %v963_v63, %v962_v59  ;;  %v1753_v59 = vsel %vm1720_vm5, %v1746_v12, %v1752_v48  ;;  %v3740_v63 = vld [vmem:[%s4684_s3 + $0xf0] sm:$0xff]  }
  0x8a   : > { %3329 = vmatprep.subr.bf16.mxu0 %v3782_v1 }
  0x8d   : > { %3330 = vmatpush3.bf16.msra.mxu0 %v3726_v20  ;;  %v2378_v20 = vld [vmem:[%s4364_s8] sm:$0xff] }
  0x8e   : > { %3331 = vmatprep.subr.bf16.mxu0 %v3782_v1  ;;  %vm2392_vm7 = vcmp.gt.f32.partialorder %v2378_v20, 0.0  ;;  %v2389_v20 = vld [vmem:[%s4364_s8 + $0x58] sm:$0xff] }
  0x8f   : > { %3100 = vmatmul.mubr.bf16.gmra.mrb[24].mxu1 %v789_v25  ;;  %v2380_v25 = vld [vmem:[%s4364_s8 + $0x10] sm:$0xff]  ;;  %v2406_v32 = vsel %vm2392_vm7, 1, %v3784_v19  ;;  %vm2403_vm4 = vcmp.gt.f32.partialorder %v2389_v20, 0.0 }
  0x90   : > { %3304 = vmatmul.mubr.bf16.gmra.mrb[8].mxu0 %v1735_v31  ;;  %3119 = vmatprep.mubr.msk.bf16.mxu1 %vm3783_vm0, %v3782_v1  ;;  %vm2394_vm8 = vcmp.gt.f32.partialorder %v2380_v25, 0.0  ;;  %v965_v31 = vsel %vm950_vm6, %v960_v52, %v964_v11  ;;  %v970_v52 = vrot.slane %v4164_v43, 3  ;;  %v2417_v9 = vsel %vm2403_vm4, 1, %v3784_v19 }
  0x91   : > { %3307 = vmatprep.mubr.msk.bf16.mxu0 %vm3783_vm0, %v3782_v1  ;;  %3332 = vmatpush3.bf16.msra.mxu0 %v3727_v34  ;;  %v2408_v33 = vsel %vm2394_vm8, 1, %v3784_v19  ;;  %v1747_v34 = vsel %vm1720_vm5, %v1742_v53, %v1746_v12  ;;  %v3741_v12 = vld [vmem:[%s4684_s3 + $0xf8] sm:$0xff]  }
  0x92   : > { %3333 = vmatprep.subr.bf16.mxu0 %v3782_v1  ;;  %2421 = vperm.xlu0 %3664, %v2406_v32   ;;  %v2390_v32 = vld [vmem:[%s4364_s8 + $0x60] sm:$0xff] }
  0x93   : > { %2427 = vperm.xlu1 %3665, %v2408_v33   ;;  %v2391_v33 = vld [vmem:[%s4364_s8 + $0x68] sm:$0xff]  ;;  %vm2404_vm5 = vcmp.gt.f32.partialorder %v2390_v32, 0.0  ;;  %v2119_v32 = vrot.slane %v4022_v45, 5 }
  0x94   : > { %vm2405_vm7 = vcmp.gt.f32.partialorder %v2391_v33, 0.0  ;;  %v2120_v33 = vrot.slane %v4010_v41, 6 }
  0x95   : > { %3334 = vmatpush3.bf16.msra.mxu0 %v3729_v36  ;;  %v2382_v36 = vld [vmem:[%s4364_s8 + $0x20] sm:$0xff] }
  0x96   : > { %3335 = vmatprep.subr.bf16.mxu0 %v3782_v1  ;;  %vm2396_vm11 = vcmp.gt.f32.partialorder %v2382_v36, 0.0  ;;  %2424 = vperm.xlu0 %3664, %v2407_v39   ;;  %v979_v39 = vrot.slane %v4195_v62, 4 }
  0x97   : > { %3120 = vmatmul.mubr.bf16.vlgmr.msra.gmra.mrb[0].mxu1 %v957_v38  ;;  %v2383_v38 = vld [vmem:[%s4364_s8 + $0x28] sm:$0xff]  ;;  %v2410_v53 = vsel %vm2396_vm11, 1, %v3784_v19 }
  0x98   : > { %3308 = vmatmul.mubr.bf16.gmra.mrb[12].mxu0 %v1739_v42  ;;  %3123 = vmatprep.mubr.msk.bf16.mxu1 %vm3783_vm0, %v3782_v1  ;;  %v2409_v42 = vsel %vm2395_vm10, 1, %v3784_v19  ;;  %vm2397_vm12 = vcmp.gt.f32.partialorder %v2383_v38, 0.0  ;;  %v978_v38 = vrot.slane %v4220_v17, 3 }
  0x99   : > { %3311 = vmatprep.mubr.msk.bf16.mxu0 %vm3783_vm0, %v3782_v1  ;;  %3148 = vmatpush3.bf16.msra.mxu1 %v3728_v50  ;;  %v2384_v50 = vld [vmem:[%s4364_s8 + $0x30] sm:$0xff] }
  0x9a   : > { %3149 = vmatprep.subr.bf16.mxu1 %v3782_v1  ;;  %3336 = vmatpush3.bf16.msra.mxu0 %v3731_v51  ;;  %v2385_v51 = vld [vmem:[%s4364_s8 + $0x38] sm:$0xff]  ;;  %vm2398_vm13 = vcmp.gt.f32.partialorder %v2384_v50, 0.0  ;;  %v980_v48 = vor.u32 %v979_v39, %v978_v38  ;;  %v1158_v50 = vrot.slane %v4022_v45, 7  ;;  %v2126_v38 = vrot.slane %v4095_v6, 5 }
  0x9b   : > { %3337 = vmatprep.subr.bf16.mxu0 %v3782_v1  ;;  %2430 = vperm.xlu1 %3665, %v2409_v42   ;;  %vm2399_vm14 = vcmp.gt.f32.partialorder %v2385_v51, 0.0  ;;  %v2412_v4 = vsel %vm2398_vm13, 1, %v3784_v19  ;;  %v3739_v42 = vld [vmem:[%s4684_s3 + $0x210] sm:$0xff]   ;;  %v1157_v51 = vrot.slane %v4085_v2, 7  ;;  %v2127_v39 = vrot.slane %v4069_v60, 6 }
  0x9c   : > { %2433 = vperm.xlu0 %3664, %v2410_v53   ;;  %v1936_v53 = vrot.slane %v4019_v44, 5  ;;  %v3745_v44 = vld [vmem:[%s4684_s3 + $0x230] sm:$0xff]  }
  0x9d   : > { %3150 = vmatpush3.bf16.msra.mxu1 %v3730_v54  ;;  %v969_v54 = vsel %vm950_vm6, %v964_v11, %v968_v40  ;;  %v2413_v11 = vsel %vm2399_vm14, 1, %v3784_v19 }
  0x9e   : > { %3151 = vmatprep.subr.bf16.mxu1 %v3782_v1  ;;  %3338 = vmatpush3.bf16.msra.mxu0 %v3733_v55  ;;  %v971_v55 = vrot.slane %v4125_v24, 4  ;;  %v1937_v2 = vsel %vm1928_vm3, %v1934_v30, %v1936_v53  ;;  %v3747_v30 = vld [vmem:[%s4684_s3 + $0x100] sm:$0xff]   ;;  %v1939_v56 = vsel %vm1928_vm3, %v1936_v53, %v1938_v37 }
  0x9f   : > { %3124 = vmatmul.mubr.bf16.gmra.mrb[4].mxu1 %v961_v58  ;;  %3367 = vmatprep.subr.bf16.mxu0 %v3782_v1  ;;  %v2411_v58 = vsel %vm2397_vm12, 1, %v3784_v19 }
  0xa0   : > { %3312 = vmatmul.mubr.bf16.gmra.mrb[16].mxu0 %v1743_v0  ;;  %3127 = vmatprep.mubr.msk.bf16.mxu1 %vm3783_vm0, %v3782_v1  ;;  %v2386_v0 = vld [vmem:[%s4364_s8 + $0x40] sm:$0xff] }
  0xa1   : > { %3315 = vmatprep.mubr.msk.bf16.mxu0 %vm3783_vm0, %v3782_v1  ;;  %3152 = vmatpush3.bf16.msra.mxu1 %v3732_v10  ;;  %v972_v10 = vor.u32 %v971_v55, %v970_v52  ;;  %vm2400_vm15 = vcmp.gt.f32.partialorder %v2386_v0, 0.0  ;;  %v1159_v52 = vor.u32 %v1158_v50, %v4010_v41  ;;  %v1161_v55 = vrot.slane %v4062_v57, 7 }
  0xa2   : > { %3153 = vmatprep.subr.bf16.mxu1 %v3782_v1  ;;  %2436 = vperm.xlu1 %3665, %v2411_v58   ;;  %v2414_v25 = vsel %vm2400_vm15, 1, %v3784_v19  ;;  %v1164_v0 = vrot.slane %v4095_v6, 7  ;;  %v2121_v41 = vor.u32 %v2120_v33, %v2119_v32 }
  0xa3   : > { %2439 = vperm.xlu0 %3664, %v2412_v4   ;;  %v973_v15 = vsel %vm950_vm6, %v968_v40, %v972_v10  ;;  %v977_v36 = vsel %vm950_vm6, %v972_v10, %v976_v14  ;;  %v2419_v40 = vsel %vm2405_vm7, 1, %v3784_v19  ;;  %v1162_v58 = vor.u32 %v1161_v55, %v4028_v47 }
  0xa4   : > { %v1165_v4 = vor.u32 %v1164_v0, %v4069_v60  ;;  %v1940_v10 = vrot.slane %v4092_v5, 5  ;;  %v1176_v60 = vrot.slane %v4220_v17, 7 }
  0xa5   : > { %3154 = vmatpush3.bf16.msra.mxu1 %v3734_v16  ;;  %v2388_v16 = vld [vmem:[%s4364_s8 + $0x50] sm:$0xff] }
  0xa6   : > { %3155 = vmatprep.subr.bf16.mxu1 %v3782_v1  ;;  %2442 = vperm.xlu1 %3665, %v2413_v11   ;;  %vm2402_vm2 = vcmp.gt.f32.partialorder %v2388_v16, 0.0  ;;  %v3749_v11 = vld [vmem:[%s4684_s3 + $0x110] sm:$0xff]   ;;  %v1167_v16 = vrot.slane %v4122_v23, 7  ;;  %v1941_v20 = vsel %vm1928_vm3, %v1938_v37, %v1940_v10  ;;  %v2143_v37 = vrot.slane %v4195_v62, 6 }
  0xa7   : > { %3128 = vmatmul.mubr.bf16.gmra.mrb[8].mxu1 %v965_v31  ;;  %v3735_v31 = vld [vmem:[%s4684_s3 + $0x200] sm:$0xff]   ;;  %2445 = vperm.xlu0 %3664, %v2414_v25   ;;  %v1942_v25 = vrot.slane %v4209_v8, 5 }
  0xa8   : > { %3316 = vmatmul.mubr.bf16.gmra.mrb[20].mxu0 %v1747_v34  ;;  %3131 = vmatprep.mubr.msk.bf16.mxu1 %vm3783_vm0, %v3782_v1  ;;  %v2416_v34 = vsel %vm2402_vm2, 1, %v3784_v19  ;;  %v1168_v5 = vor.u32 %v1167_v16, %v4098_v7 }
  0xa9   : > { %3319 = vmatprep.mubr.msk.bf16.mxu0 %vm3783_vm0, %v3782_v1  ;;  %3156 = vmatpush3.bf16.msra.mxu1 %v3736_v35  ;;  %v3737_v35 = vld [vmem:[%s4684_s3 + $0x208] sm:$0xff]  }
  0xaa   : > { %3157 = vmatprep.subr.bf16.mxu1 %v3782_v1  ;;  %2448 = vperm.xlu1 %3665, %v2415_v27   ;;  %v1943_v27 = vsel %vm1928_vm3, %v1940_v10, %v1942_v25  ;;  %vm2118_vm3 = vsmask.f32 2304 }
  0xab   : > { %2451 = vperm.xlu0 %3664, %v2416_v34   ;;  %v2122_v34 = vrot.slane %v4062_v57, 5 }
  0xad   : > { %3158 = vmatpush3.bf16.msra.mxu1 %v3738_v49  ;;  %v981_v49 = vsel %vm950_vm6, %v976_v14, %v980_v48  ;;  %vm1156_vm6 = vsmask.f32 256  ;;  %v2123_v14 = vrot.slane %v4028_v47, 6  ;;  %v3753_v47 = vld [vmem:[%s4684_s3 + $0x130] sm:$0xff]   ;;  %v2128_v48 = vor.u32 %v2127_v39, %v2126_v38 }
  0xae   : > { %3159 = vmatprep.subr.bf16.mxu1 %v3782_v1  ;;  %2454 = vperm.xlu1 %3665, %v2417_v9   ;;  %v1169_v22 = vsel %vm1156_vm6, %v1164_v0, %v1168_v5  ;;  %v3752_v9 = vld [vmem:[%s4684_s3 + $0x128] sm:$0xff]  }
  0xaf   : > { %3132 = vmatmul.mubr.bf16.gmra.mrb[12].mxu1 %v969_v54  ;;  %v3744_v54 = vld [vmem:[%s4684_s3 + $0x228] sm:$0xff]   ;;  %v2124_v57 = vor.u32 %v2123_v14, %v2122_v34  ;;  %v4626_v34 = vld [vmem:[%s4686_s5] ss:$0 sm:$0xff] }
  0xb0   : > { %3320 = vmatmul.mubr.bf16.gmra.mrb[24].mxu0 %v1753_v59  ;;  %3135 = vmatprep.mubr.msk.bf16.mxu1 %vm3783_vm0, %v3782_v1  ;;  %v3746_v59 = vld [vmem:[%s4684_s3 + $0x238] sm:$0xff]  }
  0xb1   : > { %3339 = vmatprep.mubr.msk.bf16.mxu0 %vm3783_vm0, %v3782_v1  ;;  %3160 = vmatpush3.bf16.msra.mxu1 %v3740_v63  ;;  %v1163_v63 = vsel %vm1156_vm6, %v1158_v50, %v1162_v58  ;;  %v2131_v50 = vrot.slane %v4098_v7, 6  ;;  %v2135_v7 = vrot.slane %v4125_v24, 6  ;;  %v2142_v58 = vrot.slane %v4220_v17, 5  ;;  %v3757_v17 = vld [vmem:[%s3901_s17 + $0x30] sm:$0xff]  }
  0xb2   : > { %3161 = vmatprep.subr.bf16.mxu1 %v3782_v1  ;;  %2460 = vperm.xlu1 %3665, %v2419_v40   ;;  %v3754_v40 = vld [vmem:[%s4684_s3 + $0x138] sm:$0xff]  }
  0xb5   : > { %3162 = vmatpush3.bf16.msra.mxu1 %v3741_v12  ;;  %v1166_v12 = vsel %vm1156_vm6, %v1161_v55, %v1165_v4  ;;  %v2138_v55 = vrot.slane %v4192_v61, 5 }
  0xb6   : > { %3411 = vmatprep.subr.bf16.mxu1 %v3782_v1 }
  0xb7   : > { %3136 = vmatmul.mubr.bf16.gmra.mrb[16].mxu1 %v973_v15  ;;  %v3751_v15 = vld [vmem:[%s4684_s3 + $0x120] sm:$0xff]  }
  0xb8   : > { %3340 = vmatmul.mubr.bf16.vlgmr.msra.gmra.mrb[0].mxu0 %v4132_v26  ;;  %3139 = vmatprep.mubr.msk.bf16.mxu1 %vm3783_vm0, %v3782_v1  ;;  %v2418_v26 = vsel %vm2404_vm5, 1, %v3784_v19  ;;  %v3742_v19 = vld [vmem:[%s4684_s3 + $0x218] sm:$0xff]  }
  0xb9   : > { %3368 = vmatpush3.bf16.msra.mxu0 %v3735_v31  ;;  %3343 = vmatprep.mubr.msk.bf16.mxu0 %vm3783_vm0, %v3782_v1  ;;  %v1170_v31 = vrot.slane %v4164_v43, 7 }
  0xba   : > { %3369 = vmatprep.subr.bf16.mxu0 %v3782_v1  ;;  %2457 = vperm.xlu0 %3664, %v2418_v26   ;;  %v1173_v26 = vrot.slane %v4192_v61, 7  ;;  %v3756_v61 = vld [vmem:[%s3901_s17 + $0x28] sm:$0xff]  }
  0xbb   : > { %v1171_v45 = vor.u32 %v1170_v31, %v4125_v24 }
  0xbd   : > { %3370 = vmatpush3.bf16.msra.mxu0 %v3737_v35  ;;  %v1172_v35 = vsel %vm1156_vm6, %v1167_v16, %v1171_v45 }
  0xbe   : > { %3371 = vmatprep.subr.bf16.mxu0 %v3782_v1 }
  0xbf   : > { %3140 = vmatmul.mubr.bf16.gmra.mrb[20].mxu1 %v977_v36  ;;  %v2125_v36 = vsel %vm2118_vm3, %v2121_v41, %v2124_v57 }
  0xc0   : > { %3344 = vmatmul.mubr.bf16.gmra.mrb[4].mxu0 %v4138_v28  ;;  %3143 = vmatprep.mubr.msk.bf16.mxu1 %vm3783_vm0, %v3782_v1  ;;  %v3743_v28 = vld [vmem:[%s4684_s3 + $0x220] sm:$0xff]  }
  0xc1   : > { %3347 = vmatprep.mubr.msk.bf16.mxu0 %vm3783_vm0, %v3782_v1  ;;  %3372 = vmatpush3.bf16.msra.mxu0 %v3739_v42  ;;  %v1174_v42 = vor.u32 %v1173_v26, %v4167_v46 }
  0xc2   : > { %3373 = vmatprep.subr.bf16.mxu0 %v3782_v1 }
  0xc3   : > { %v1175_v6 = vsel %vm1156_vm6, %v1170_v31, %v1174_v42 }
  0xc5   : > { %3374 = vmatpush3.bf16.msra.mxu0 %v3742_v19  ;;  %v2129_v19 = vsel %vm2118_vm3, %v2124_v57, %v2128_v48 }
  0xc6   : > { %3375 = vmatprep.subr.bf16.mxu0 %v3782_v1 }
  0xc7   : > { %3144 = vmatmul.mubr.bf16.gmra.mrb[24].mxu1 %v981_v49  ;;  %v2130_v49 = vrot.slane %v4122_v23, 5  ;;  %v2134_v23 = vrot.slane %v4164_v43, 5 }
  0xc8   : > { %3348 = vmatmul.mubr.bf16.gmra.mrb[8].mxu0 %v4146_v29  ;;  %3163 = vmatprep.mubr.msk.bf16.mxu1 %vm3783_vm0, %v3782_v1  ;;  %v1160_v29 = vsel %vm1156_vm6, %v1157_v51, %v1159_v52 }
  0xc9   : > { %3351 = vmatprep.mubr.msk.bf16.mxu0 %vm3783_vm0, %v3782_v1  ;;  %3376 = vmatpush3.bf16.msra.mxu0 %v3743_v28  ;;  %v1177_v28 = vor.u32 %v1176_v60, %v4195_v62  ;;  %v2132_v51 = vor.u32 %v2131_v50, %v2130_v49 }
  0xca   : > { %3377 = vmatprep.subr.bf16.mxu0 %v3782_v1 }
  0xcb   : > { %v1178_v52 = vsel %vm1156_vm6, %v1173_v26, %v1177_v28  ;;  %v2133_v53 = vsel %vm2118_vm3, %v2128_v48, %v2132_v51 }
  0xcd   : > { %3378 = vmatpush3.bf16.msra.mxu0 %v3744_v54  ;;  %v2136_v54 = vor.u32 %v2135_v7, %v2134_v23 }
  0xce   : > { %3379 = vmatprep.subr.bf16.mxu0 %v3782_v1 }
  0xcf   : > { %3164 = vmatmul.mubr.bf16.vlgmr.msra.gmra.mrb[0].mxu1 %v1160_v29  ;;  %v2137_v29 = vsel %vm2118_vm3, %v2132_v51, %v2136_v54 }
  0xd0   : > { %3352 = vmatmul.mubr.bf16.gmra.mrb[12].mxu0 %v1937_v2  ;;  %3167 = vmatprep.mubr.msk.bf16.mxu1 %vm3783_vm0, %v3782_v1  ;;  %v2139_v2 = vrot.slane %v4167_v46, 6  ;;  %v2144_v46 = vor.u32 %v2143_v37, %v2142_v58 }
  0xd1   : > { %3355 = vmatprep.mubr.msk.bf16.mxu0 %vm3783_vm0, %v3782_v1  ;;  %3419 = vmatpush3.bf16.msra.mxu1 %v3747_v30 }
  0xd2   : > { %3412 = vmatprep.subr.bf16.mxu1 %v3782_v1  ;;  %3380 = vmatpush3.bf16.msra.mxu0 %v3745_v44  ;;  %v3755_v44 = vld [vmem:[%s3901_s17 + $0x20] sm:$0xff]   ;;  %v2140_v24 = vor.u32 %v2139_v2, %v2138_v55 }
  0xd3   : > { %3381 = vmatprep.subr.bf16.mxu0 %v3782_v1 }
  0xd4   : > { %v2141_v43 = vsel %vm2118_vm3, %v2136_v54, %v2140_v24  ;;  %v2145_v30 = vsel %vm2118_vm3, %v2140_v24, %v2144_v46 }
  0xd5   : > { %3420 = vmatpush3.bf16.msra.mxu1 %v3748_v3 }
  0xd6   : > { %3413 = vmatprep.subr.bf16.mxu1 %v3782_v1  ;;  %3382 = vmatpush3.bf16.msra.mxu0 %v3746_v59  ;;  %v2146_v59 = vrot.slane %v1748_v13, 5 }
  0xd7   : > { %3168 = vmatmul.mubr.bf16.gmra.mrb[4].mxu1 %v1163_v63  ;;  %v2147_v63 = vrot.slane %v4223_v18, 6 }
  0xd8   : > { %3356 = vmatmul.mubr.bf16.gmra.mrb[16].mxu0 %v1939_v56  ;;  %3171 = vmatprep.mubr.msk.bf16.mxu1 %vm3783_vm0, %v3782_v1 }
  0xd9   : > { %3359 = vmatprep.mubr.msk.bf16.mxu0 %vm3783_vm0, %v3782_v1  ;;  %3421 = vmatpush3.bf16.msra.mxu1 %v3749_v11  ;;  %v2148_v62 = vor.u32 %v2147_v63, %v2146_v59 }
  0xda   : > { %3414 = vmatprep.subr.bf16.mxu1 %v3782_v1 }
  0xdb   : > { %v2149_v0 = vsel %vm2118_vm3, %v2144_v46, %v2148_v62 }
  0xdd   : > { %3422 = vmatpush3.bf16.msra.mxu1 %v3750_v21 }
  0xde   : > { %3415 = vmatprep.subr.bf16.mxu1 %v3782_v1 }
  0xdf   : > { %3172 = vmatmul.mubr.bf16.gmra.mrb[8].mxu1 %v1166_v12 }
  0xe0   : > { %3360 = vmatmul.mubr.bf16.gmra.mrb[20].mxu0 %v1941_v20  ;;  %3175 = vmatprep.mubr.msk.bf16.mxu1 %vm3783_vm0, %v3782_v1 }
  0xe1   : > { %3363 = vmatprep.mubr.msk.bf16.mxu0 %vm3783_vm0, %v3782_v1  ;;  %3423 = vmatpush3.bf16.msra.mxu1 %v3751_v15 }
  0xe2   : > { %3416 = vmatprep.subr.bf16.mxu1 %v3782_v1 }
  0xe5   : > { %3424 = vmatpush3.bf16.msra.mxu1 %v3752_v9 }
  0xe6   : > { %3417 = vmatprep.subr.bf16.mxu1 %v3782_v1 }
  0xe7   : > { %3176 = vmatmul.mubr.bf16.gmra.mrb[12].mxu1 %v1169_v22 }
  0xe8   : > { %3364 = vmatmul.mubr.bf16.gmra.mrb[24].mxu0 %v1943_v27  ;;  %3179 = vmatprep.mubr.msk.bf16.mxu1 %vm3783_vm0, %v3782_v1  ;;  %v4621_v27 = vld [vmem:[%s4685_s4] ss:$0 sm:$0xff] }
  0xe9   : > { %3383 = vmatprep.mubr.msk.bf16.mxu0 %vm3783_vm0, %v3782_v1  ;;  %3425 = vmatpush3.bf16.msra.mxu1 %v3753_v47 }
  0xea   : > { %3418 = vmatprep.subr.bf16.mxu1 %v3782_v1 }
  0xed   : > { %3426 = vmatpush3.bf16.msra.mxu1 %v3754_v40 }
  0xef   : > { %3180 = vmatmul.mubr.bf16.gmra.mrb[16].mxu1 %v1172_v35 }
  0xf0   : > { %3384 = vmatmul.mubr.bf16.vlgmr.msra.gmra.mrb[0].mxu0 %v2125_v36  ;;  %3183 = vmatprep.mubr.msk.bf16.mxu1 %vm3783_vm0, %v3782_v1 }
  0xf1   : > { %3387 = vmatprep.mubr.msk.bf16.mxu0 %vm3783_vm0, %v3782_v1 }
  0xf7   : > { %3184 = vmatmul.mubr.bf16.gmra.mrb[20].mxu1 %v1175_v6 }
  0xf8   : > { %3388 = vmatmul.mubr.bf16.gmra.mrb[4].mxu0 %v2129_v19  ;;  %3187 = vmatprep.mubr.msk.bf16.mxu1 %vm3783_vm0, %v3782_v1 }
  0xf9   : > { %3391 = vmatprep.mubr.msk.bf16.mxu0 %vm3783_vm0, %v3782_v1 }
  0xff   : > { %3188 = vmatmul.mubr.bf16.gmra.mrb[24].mxu1 %v1178_v52 }
 0x100   : > { %3392 = vmatmul.mubr.bf16.gmra.mrb[8].mxu0 %v2133_v53  ;;  %3223 = vmatprep.mubr.msk.bf16.mxu1 %vm3783_vm0, %v3782_v1 }
 0x101   : > { %3395 = vmatprep.mubr.msk.bf16.mxu0 %vm3783_vm0, %v3782_v1 }
 0x107   : > { %3224 = vmatmul.mubr.bf16.vlgmr.msra.gmra.mrb[16].mxu1 %v3755_v44 }
 0x108   : > { %3396 = vmatmul.mubr.bf16.gmra.mrb[12].mxu0 %v2137_v29  ;;  %3227 = vmatprep.mubr.msk.bf16.mxu1 %vm3783_vm0, %v3782_v1 }
 0x109   : > { %3399 = vmatprep.mubr.msk.bf16.mxu0 %vm3783_vm0, %v3782_v1 }
 0x10f   : > { %3228 = vmatmul.mubr.bf16.gmra.mrb[20].mxu1 %v3756_v61 }
 0x110   : > { %3400 = vmatmul.mubr.bf16.gmra.mrb[16].mxu0 %v2141_v43  ;;  %3231 = vmatprep.mubr.msk.bf16.mxu1 %vm3783_vm0, %v3782_v1 }
 0x111   : > { %3403 = vmatprep.mubr.msk.bf16.mxu0 %vm3783_vm0, %v3782_v1  ;;  %v2422_v33 = vpop.permute.xlu0 %2421 }
 0x112   : > { %v2428_v60 = vpop.permute.xlu1 %2427 }
 0x113   : > { %vm2464_vm9 = vcmp.eq.s32.totalorder %v2428_v60, 1 }
 0x115   : > { %v2425_v36 = vpop.permute.xlu0 %2424 }
 0x116   : > { %vm2463_vm8 = vcmp.eq.s32.totalorder %v2425_v36, 1 }
 0x117   : > { %3232 = vmatmul.mubr.bf16.gmra.mrb[24].mxu1 %v3757_v17 }
 0x118   : > { %3404 = vmatmul.mubr.bf16.gmra.mrb[20].mxu0 %v2145_v30 }
 0x119   : > { %3407 = vmatprep.mubr.msk.bf16.mxu0 %vm3783_vm0, %v3782_v1  ;;  %vm2462_vm0 = vcmp.eq.s32.totalorder %v2422_v33, 1 }
 0x11a   : > { %v2431_v55 = vpop.permute.xlu1 %2430 }
 0x11b   : > { %vm2465_vm10 = vcmp.eq.s32.totalorder %v2431_v55, 1 }
 0x120   : > { %3408 = vmatmul.mubr.bf16.gmra.mrb[24].mxu0 %v2149_v0 }
 0x1a2   : > { %v1268_v56 = vpop.f32.mrb[0].mxu1 }
 0x1a3   : > { %v3165_v3 = vpop.f32.mrb[1].mxu1 }
 0x1a4   : > { %v1271_v4 = vpop.f32.mrb[2].mxu1  ;;  %v2437_v3 = vpop.permute.xlu1 %2436 }
 0x1a5   : > { %v3166_v10 = vpop.f32.mrb[3].mxu1  ;;  %vm2467_vm11 = vcmp.eq.s32.totalorder %v2437_v3, 1 }
 0x1a6   : > { %v2434_v10 = vpop.permute.xlu0 %2433 }
 0x1a7   : > { %vm2466_vm12 = vcmp.eq.s32.totalorder %v2434_v10, 1 }
 0x1aa   : > { %v1276_v11 = vpop.f32.mrb[4].mxu1 }
 0x1ab   : > { %v3169_v12 = vpop.f32.mrb[5].mxu1 }
 0x1ac   : > { %v1279_v8 = vpop.f32.mrb[6].mxu1 }
 0x1ad   : > { %v3170_v13 = vpop.f32.mrb[7].mxu1 }
 0x1b2   : > { %v1284_v16 = vpop.f32.mrb[8].mxu1 }
 0x1b3   : > { %v3173_v18 = vpop.f32.mrb[9].mxu1 }
 0x1b4   : > { %v1287_v20 = vpop.f32.mrb[10].mxu1 }
 0x1b5   : > { %v3174_v21 = vpop.f32.mrb[11].mxu1 }
 0x1ba   : > { %v4614_v5 = vpop.f32.mrb[12].mxu1 }
 0x1bb   : > { %v3177_v25 = vpop.f32.mrb[13].mxu1 }
 0x1bc   : > { %v4616_v1 = vpop.f32.mrb[14].mxu1 }
 0x1bd   : > { %v3178_v15 = vpop.f32.mrb[15].mxu1 }
 0x1c3   : > { %v2239_v22 = vpop.f32.mrb[0].mxu0 }
 0x1c4   : > { %v3427_v31 = vadd.f32 %v2239_v22, %v1268_v56  ;;  %v3385_v32 = vpop.f32.mrb[1].mxu0 }
 0x1c5   : > { %v2242_v14 = vpop.f32.mrb[2].mxu0 }
 0x1c6   : > { %v2315_v9 = vmul.f32 %v3427_v31, %v4621_v27  ;;  %v3428_v45 = vadd.f32 %v2242_v14, %v1271_v4  ;;  %v3386_v41 = vpop.f32.mrb[3].mxu0 }
 0x1c8   : > { %v2336_v57 = vadd.f32 %v4626_v34, %v2315_v9  ;;  %v2316_v47 = vmul.f32 %v3428_v45, %v4621_v27 }
 0x1ca   : > { %v2337_v35 = vadd.f32 %v4626_v34, %v2316_v47  ;;  %v2350_v26 = vmul.f32 0.01, %v2336_v57  ;;  %v2443_v47 = vpop.permute.xlu1 %2442 }
 0x1cb   : > { %v2247_v38 = vpop.f32.mrb[4].mxu0  ;;  %vm2469_vm13 = vcmp.eq.s32.totalorder %v2443_v47, 1 }
 0x1cc   : > { %v2364_v39 = vmax.f32 %v2336_v57, %v2350_v26  ;;  %v3429_v40 = vadd.f32 %v2247_v38, %v1276_v11  ;;  %v3389_v42 = vpop.f32.mrb[5].mxu0  ;;  %v2351_v48 = vmul.f32 0.01, %v2337_v35 }
 0x1cd   : > { %v2250_v6 = vpop.f32.mrb[6].mxu0 }
 0x1ce   : > { %v2317_v19 = vmul.f32 %v3429_v40, %v4621_v27  ;;  %v3430_v49 = vadd.f32 %v2250_v6, %v1279_v8  ;;  %v2365_v50 = vmax.f32 %v2337_v35, %v2351_v48  ;;  %v3390_v28 = vpop.f32.mrb[7].mxu0  ;;  %v2476_v51 = vsel %vm2462_vm0, %v2364_v39, 0.0  ;;  %v2440_v35 = vpop.permute.xlu0 %2439 }
 0x1cf   : > { %vm2468_vm14 = vcmp.eq.s32.totalorder %v2440_v35, 1  ;;  %v2449_v55 = vpop.permute.xlu1 %2448 }
 0x1d0   : > { %v2338_v52 = vadd.f32 %v4626_v34, %v2317_v19  ;;  %v2318_v53 = vmul.f32 %v3430_v49, %v4621_v27  ;;  %v2477_v23 = vsel %vm2463_vm8, %v2365_v50, 0.0  ;;  %vm2471_vm15 = vcmp.eq.s32.totalorder %v2449_v55, 1 }
 0x1d1   : > { %v2842_v7 = vpack.c.bf16 %v2477_v23, %v2476_v51 }
 0x1d2   : > { %v2339_v54 = vadd.f32 %v4626_v34, %v2318_v53  ;;  %v2352_v29 = vmul.f32 0.01, %v2338_v52 }
 0x1d3   : > { %2843 = vst [vmem:[%s4640_s22] sm:$0xff] %v2842_v7   ;;  %v2255_v2 = vpop.f32.mrb[8].mxu0 }
 0x1d4   : > { %v2366_v44 = vmax.f32 %v2338_v52, %v2352_v29  ;;  %v2353_v24 = vmul.f32 0.01, %v2339_v54  ;;  %v3431_v43 = vadd.f32 %v2255_v2, %v1284_v16  ;;  %v3393_v58 = vpop.f32.mrb[9].mxu0 }
 0x1d5   : > { %v2258_v37 = vpop.f32.mrb[10].mxu0 }
 0x1d6   : > { %v2367_v61 = vmax.f32 %v2339_v54, %v2353_v24  ;;  %v2319_v46 = vmul.f32 %v3431_v43, %v4621_v27  ;;  %v3432_v30 = vadd.f32 %v2258_v37, %v1287_v20  ;;  %v3394_v59 = vpop.f32.mrb[11].mxu0  ;;  %v2478_v63 = vsel %vm2464_vm9, %v2366_v44, 0.0 }
 0x1d8   : > { %v2479_v17 = vsel %vm2465_vm10, %v2367_v61, 0.0  ;;  %v2340_v62 = vadd.f32 %v4626_v34, %v2319_v46  ;;  %v2320_v0 = vmul.f32 %v3432_v30, %v4621_v27 }
 0x1d9   : > { %v2847_v56 = vpack.c.bf16 %v2479_v17, %v2478_v63 }
 0x1da   : > { %v2341_v4 = vadd.f32 %v4626_v34, %v2320_v0  ;;  %v2354_v11 = vmul.f32 0.01, %v2340_v62  ;;  %v1467_v12 = vpop.f32.mrb[16].mxu1 }
 0x1db   : > { %2874 = vst [vmem:[%s4640_s22 + $0x8] sm:$0xff] %v2847_v56   ;;  %v2263_v8 = vpop.f32.mrb[12].mxu0  ;;  %v3225_v13 = vpop.f32.mrb[17].mxu1 }
 0x1dc   : > { %v2355_v16 = vmul.f32 0.01, %v2341_v4  ;;  %v2368_v18 = vmax.f32 %v2340_v62, %v2354_v11  ;;  %v3433_v20 = vadd.f32 %v2263_v8, %v4614_v5  ;;  %v3397_v21 = vpop.f32.mrb[13].mxu0  ;;  %v1470_v25 = vpop.f32.mrb[18].mxu1 }
 0x1dd   : > { %v2266_v15 = vpop.f32.mrb[14].mxu0  ;;  %v3226_v22 = vpop.f32.mrb[19].mxu1 }
 0x1de   : > { %v2369_v31 = vmax.f32 %v2341_v4, %v2355_v16  ;;  %v2321_v32 = vmul.f32 %v3433_v20, %v4621_v27  ;;  %v3434_v33 = vadd.f32 %v2266_v15, %v4616_v1  ;;  %v3398_v14 = vpop.f32.mrb[15].mxu0  ;;  %v2480_v45 = vsel %vm2466_vm12, %v2368_v18, 0.0  ;;  %v2446_v62 = vpop.permute.xlu0 %2445 }
 0x1df   : > { %vm2470_vm1 = vcmp.eq.s32.totalorder %v2446_v62, 1 }
 0x1e0   : > { %v2481_v9 = vsel %vm2467_vm11, %v2369_v31, 0.0  ;;  %v2342_v41 = vadd.f32 %v4626_v34, %v2321_v32  ;;  %v2322_v57 = vmul.f32 %v3434_v33, %v4621_v27  ;;  %v2455_v31 = vpop.permute.xlu1 %2454 }
 0x1e1   : > { %v2852_v5 = vpack.c.bf16 %v2481_v9, %v2480_v45  ;;  %vm2473_vm2 = vcmp.eq.s32.totalorder %v2455_v31, 1 }
 0x1e2   : > { %v2356_v26 = vmul.f32 0.01, %v2342_v41  ;;  %v2343_v36 = vadd.f32 %v4626_v34, %v2322_v57  ;;  %v1475_v38 = vpop.f32.mrb[20].mxu1  ;;  %v2452_v33 = vpop.permute.xlu0 %2451 }
 0x1e3   : > { %2875 = vst [vmem:[%s4640_s22 + $0x10] sm:$0xff] %v2852_v5   ;;  %v2271_v39 = vpop.f32.mrb[16].mxu0  ;;  %v3229_v40 = vpop.f32.mrb[21].mxu1  ;;  %vm2472_vm4 = vcmp.eq.s32.totalorder %v2452_v33, 1 }
 0x1e4   : > { %v2370_v42 = vmax.f32 %v2342_v41, %v2356_v26  ;;  %v2357_v48 = vmul.f32 0.01, %v2343_v36  ;;  %v3435_v1 = vadd.f32 %v2271_v39, %v1467_v12  ;;  %v3401_v6 = vpop.f32.mrb[17].mxu0  ;;  %v1478_v60 = vpop.f32.mrb[22].mxu1 }
 0x1e5   : > { %v2274_v19 = vpop.f32.mrb[18].mxu0  ;;  %v3230_v49 = vpop.f32.mrb[23].mxu1 }
 0x1e6   : > { %v2371_v50 = vmax.f32 %v2343_v36, %v2357_v48  ;;  %v2323_v28 = vmul.f32 %v3435_v1, %v4621_v27  ;;  %v3436_v51 = vadd.f32 %v2274_v19, %v1470_v25  ;;  %v3402_v52 = vpop.f32.mrb[19].mxu0  ;;  %v2482_v53 = vsel %vm2468_vm14, %v2370_v42, 0.0  ;;  %v2461_v39 = vpop.permute.xlu1 %2460 }
 0x1e7   : > { %v2458_v40 = vpop.permute.xlu0 %2457  ;;  %vm2475_vm5 = vcmp.eq.s32.totalorder %v2461_v39, 1 }
 0x1e8   : > { %v2483_v23 = vsel %vm2469_vm13, %v2371_v50, 0.0  ;;  %v2344_v7 = vadd.f32 %v4626_v34, %v2323_v28  ;;  %v2324_v54 = vmul.f32 %v3436_v51, %v4621_v27  ;;  %vm2474_vm7 = vcmp.eq.s32.totalorder %v2458_v40, 1 }
 0x1e9   : > { %v2857_v29 = vpack.c.bf16 %v2483_v23, %v2482_v53 }
 0x1ea   : > { %v2358_v2 = vmul.f32 0.01, %v2344_v7  ;;  %v2345_v44 = vadd.f32 %v4626_v34, %v2324_v54  ;;  %v1483_v24 = vpop.f32.mrb[24].mxu1 }
 0x1eb   : > { %2876 = vst [vmem:[%s4640_s22 + $0x18] sm:$0xff] %v2857_v29   ;;  %v2279_v43 = vpop.f32.mrb[20].mxu0  ;;  %v3233_v58 = vpop.f32.mrb[25].mxu1 }
 0x1ec   : > { %v2372_v37 = vmax.f32 %v2344_v7, %v2358_v2  ;;  %v2359_v61 = vmul.f32 0.01, %v2345_v44  ;;  %v3437_v46 = vadd.f32 %v2279_v43, %v1475_v38  ;;  %v3405_v30 = vpop.f32.mrb[21].mxu0  ;;  %v1486_v59 = vpop.f32.mrb[26].mxu1 }
 0x1ed   : > { %v2282_v63 = vpop.f32.mrb[22].mxu0  ;;  %v3234_v17 = vpop.f32.mrb[27].mxu1 }
 0x1ee   : > { %v2373_v0 = vmax.f32 %v2345_v44, %v2359_v61  ;;  %v2325_v56 = vmul.f32 %v3437_v46, %v4621_v27  ;;  %v3438_v3 = vadd.f32 %v2282_v63, %v1478_v60  ;;  %v3406_v4 = vpop.f32.mrb[23].mxu0  ;;  %v2484_v10 = vsel %vm2470_vm1, %v2372_v37, 0.0 }
 0x1f0   : > { %v2485_v11 = vsel %vm2471_vm15, %v2373_v0, 0.0  ;;  %v2346_v12 = vadd.f32 %v4626_v34, %v2325_v56  ;;  %v2326_v8 = vmul.f32 %v3438_v3, %v4621_v27 }
 0x1f1   : > { %v2862_v13 = vpack.c.bf16 %v2485_v11, %v2484_v10 }
 0x1f2   : > { %v2360_v16 = vmul.f32 0.01, %v2346_v12  ;;  %v2347_v18 = vadd.f32 %v4626_v34, %v2326_v8 }
 0x1f3   : > { %2877 = vst [vmem:[%s4640_s22 + $0x20] sm:$0xff] %v2862_v13   ;;  %v2287_v20 = vpop.f32.mrb[24].mxu0 }
 0x1f4   : > { %v2374_v21 = vmax.f32 %v2346_v12, %v2360_v16  ;;  %v2361_v25 = vmul.f32 0.01, %v2347_v18  ;;  %v3439_v15 = vadd.f32 %v2287_v20, %v1483_v24  ;;  %v3409_v22 = vpop.f32.mrb[25].mxu0 }
 0x1f5   : > { %v2290_v32 = vpop.f32.mrb[26].mxu0 }
 0x1f6   : > { %v2375_v14 = vmax.f32 %v2347_v18, %v2361_v25  ;;  %v2327_v9 = vmul.f32 %v3439_v15, %v4621_v27  ;;  %v3440_v45 = vadd.f32 %v2290_v32, %v1486_v59  ;;  %v3410_v41 = vpop.f32.mrb[27].mxu0  ;;  %v2486_v57 = vsel %vm2472_vm4, %v2374_v21, 0.0 }
 0x1f8   : > { %v2487_v5 = vsel %vm2473_vm2, %v2375_v14, 0.0  ;;  %v2348_v47 = vadd.f32 %v4626_v34, %v2327_v9  ;;  %v2328_v35 = vmul.f32 %v3440_v45, %v4621_v27 }
 0x1f9   : > { %v2867_v26 = vpack.c.bf16 %v2487_v5, %v2486_v57 }
 0x1fa   : > { %v2362_v36 = vmul.f32 0.01, %v2348_v47  ;;  %v2349_v38 = vadd.f32 %v4626_v34, %v2328_v35 }
 0x1fb   : > { %2878 = vst [vmem:[%s4640_s22 + $0x28] sm:$0xff] %v2867_v26  }
 0x1fc   : > { %v2376_v42 = vmax.f32 %v2348_v47, %v2362_v36  ;;  %v2363_v48 = vmul.f32 0.01, %v2349_v38 }
 0x1fe   : > { %v2377_v1 = vmax.f32 %v2349_v38, %v2363_v48  ;;  %v2488_v6 = vsel %vm2474_vm7, %v2376_v42, 0.0 }
 0x200   : > { %v2489_v60 = vsel %vm2475_vm5, %v2377_v1, 0.0 }
 0x201   : > { %v2872_v19 = vpack.c.bf16 %v2489_v60, %v2488_v6 }
 0x203   : > { %2879 = vst [vmem:[%s4640_s22 + $0x30] sm:$0xff] %v2872_v19  }
 0x204 PF: > { %s17_s26 = sadd.s32 1, %s3780_s26   ;;  %s4689_s24 = smov %s3776_s25 }
 0x205   : > { %p14_p9 = scmp.ge.s32.totalorder %s17_s26, 4   ;;  %s4690_s25 = smov %s4692_s27 }
 0x207   :  { %16 = sbr.rel (!%p14_p9) target bundleno = 2 (0x2), region = 96 }

// kernel: encoder_forward.9
= control target key start
LH: loop header
LB: loop body
LE: loop exit
PB: predicated region body
PF: predicated region fallthrough
CT: control target
= control target key end

     0   :  { %s3954_s27 = smov 0   ;;  %s3956_s28 = smov 0   ;;  %s4823_s0 = inlined_call_operand.vmem [shape: bf16[224,128], index: 0, kind: input, shape index: {}, may-alias: {0,1,2}]   ;;  %s4824_s1 = inlined_call_operand.vmem [shape: bf16[224,128], index: 1, kind: input, shape index: {}, may-alias: {0,1,2}]   ;;  %s4825_s2 = inlined_call_operand.vmem [shape: bf16[224,128], index: 2, kind: input, shape index: {}, may-alias: {0,1,2}]   ;;  %s4826_s3 = inlined_call_operand.vmem [shape: bf16[1152,128], index: 3, kind: input, shape index: {}]   ;;  %s4827_s4 = inlined_call_operand.vmem [shape: f32[1,128], index: 4, kind: input, shape index: {}]   ;;  %s4828_s5 = inlined_call_operand.vmem [shape: f32[1,128], index: 5, kind: input, shape index: {}]   ;;  %s4829_s6 = inlined_call_operand.vmem [shape: f32[224,1], index: 6, kind: input, shape index: {}]   ;;  %s4830_s7 = inlined_call_operand.vmem [shape: bf16[224,128], index: 7, kind: input, shape index: {}]   ;;  %s4831_s8 = inlined_call_operand.vmem [shape: bf16[224,128], index: 8, kind: output, shape index: {}]  }
   0x1   :  { %s3958_s29 = smov 0  }
   0x2 LB: > { %s30_s30 = sadd.s32 1, %s3900_s28  ;;  %p2808_p0 = scmp.ge.s32.totalorder %s3904_s29, 1  ;;  %s3904_s29 = sphi %s3958_s29, %s18_s29   ;;  %s3900_s28 = sphi %s3956_s28, %s4833_s28   ;;  %s3896_s27 = sphi %s3954_s27, %s4832_s27  }
   0x3   : > { %p32_p1 = scmp.ge.s32.totalorder %s30_s30, 2  ;;  %p375_p2 = scmp.lt.s32.totalorder %s3904_s29, 3 }
   0x5   : > { %s4835_s30 = smov (%p32_p1, %s30_s30), 0  ;;  %p376_p3 = pnand %p2808_p0, %p375_p2 }
   0x6   : > { %v3790_v0 = vld [vmem:[%s4826_s3 + $0x40] sm:$0xff] (!%p376_p3)   ;;  %v3906_v1 = vmov (!%p376_p3), 0.0   ;;  %v3792_v3 = vld [vmem:[%s4826_s3 + $0x48] sm:$0xff] (!%p376_p3)   ;;  %vm3907_vm0 = vmmov (!%p376_p3), 0   ;;  %s2809_s15 = sadd.s32 (!%p376_p3), 4294967295, %s3896_s27  ;;  %s463_s18 = smul.u32 (!%p376_p3), 14, %s3896_s27 }
   0x7   : > { %379 = sbr.rel (%p376_p3) target bundleno = 514 (0x202), region = 52  ;;  %3139 = vmatprep.subr.bf16.mxu1 (!%p376_p3), %v3906_v1  ;;  %3315 = vmatprep.subr.bf16.mxu0 (!%p376_p3), %v3906_v1  ;;  %v3791_v2 = vld [vmem:[%s4826_s3 + $0x100] sm:$0xff] (!%p376_p3)   ;;  %v3793_v4 = vld [vmem:[%s4826_s3 + $0x108] sm:$0xff] (!%p376_p3)   ;;  %p452_p4 = scmp.gt.s32.totalorder (!%p376_p3), %s2809_s15, 0  ;;  %v3794_v5 = vld [vmem:[%s4826_s3 + $0x50] sm:$0xff] (!%p376_p3)   ;;  %vm618_vm1 = vcmask (!%p376_p3), 1044480  }
   0x8   : > { %3140 = vmatpush3.bf16.msra.mxu1 (!%p376_p3), %v3790_v0  ;;  %3155 = vmatprep.mubr.msk.bf16.mxu1 (!%p376_p3), %vm3907_vm0, %v3906_v1  ;;  %p464_p5 = scmp.lt.s32.totalorder (!%p376_p3), %s463_s18, 27  ;;  %v3795_v6 = vld [vmem:[%s4826_s3 + $0x110] sm:$0xff] (!%p376_p3)   ;;  %v3796_v7 = vld [vmem:[%s4826_s3 + $0x58] sm:$0xff] (!%p376_p3)   ;;  %v3798_v9 = vld [vmem:[%s4826_s3 + $0x60] sm:$0xff] (!%p376_p3)   ;;  %s469_s13 = sadd.s32 (!%p376_p3), 1, %s3896_s27  ;;  %vm1988_vm3 = vcmask (!%p376_p3), 1042432  }
   0x9   : > { %3316 = vmatpush3.bf16.msra.mxu0 (!%p376_p3), %v3791_v2  ;;  %3141 = vmatprep.subr.bf16.mxu1 (!%p376_p3), %v3906_v1  ;;  %v3797_v8 = vld [vmem:[%s4826_s3 + $0x118] sm:$0xff] (!%p376_p3)   ;;  %v3799_v10 = vld [vmem:[%s4826_s3 + $0x120] sm:$0xff] (!%p376_p3)   ;;  %v3800_v11 = vld [vmem:[%s4826_s3 + $0x68] sm:$0xff] (!%p376_p3)   ;;  %p470_p7 = scmp.lt.s32.totalorder (!%p376_p3), %s469_s13, 1  ;;  %vm1580_vm2 = vsmask.f32 (!%p376_p3), 7424 }
   0xa   : > { %3317 = vmatprep.subr.bf16.mxu0 (!%p376_p3), %v3906_v1  ;;  %3331 = vmatprep.mubr.msk.bf16.mxu0 (!%p376_p3), %vm3907_vm0, %v3906_v1  ;;  %v3801_v12 = vld [vmem:[%s4826_s3 + $0x128] sm:$0xff] (!%p376_p3)   ;;  %v3802_v13 = vld [vmem:[%s4826_s3 + $0x70] sm:$0xff] (!%p376_p3)   ;;  %v3804_v17 = vld [vmem:[%s4826_s3 + $0x78] sm:$0xff] (!%p376_p3)   ;;  %vm778_vm4 = vsmask.f32 (!%p376_p3), 5376 }
   0xb   : > { %v3803_v16 = vld [vmem:[%s4826_s3 + $0x130] sm:$0xff] (!%p376_p3)   ;;  %v3805_v20 = vld [vmem:[%s4826_s3 + $0x138] sm:$0xff] (!%p376_p3)   ;;  %v3808_v23 = vld [vmem:[%s4826_s3 + $0x140] sm:$0xff] (!%p376_p3)   ;;  %vm1780_vm5 = vsmask.f32 (!%p376_p3), 3328 }
   0xc   : > { %3142 = vmatpush3.bf16.msra.mxu1 (!%p376_p3), %v3792_v3  ;;  %v3811_v24 = vld [vmem:[%s4826_s3] sm:$0xff] (!%p376_p3)   ;;  %v3809_v26 = vld [vmem:[%s4826_s3 + $0x148] sm:$0xff] (!%p376_p3)   ;;  %v3812_v30 = vld [vmem:[%s4826_s3 + $0x150] sm:$0xff] (!%p376_p3)   ;;  %vm1010_vm6 = vsmask.f32 (!%p376_p3), 4352 }
   0xd   : > { %3318 = vmatpush3.bf16.msra.mxu0 (!%p376_p3), %v3793_v4  ;;  %3143 = vmatprep.subr.bf16.mxu1 (!%p376_p3), %v3906_v1  ;;  %v3815_v27 = vld [vmem:[%s4826_s3 + $0x8] sm:$0xff] (!%p376_p3)   ;;  %v3818_v31 = vld [vmem:[%s4826_s3 + $0x10] sm:$0xff] (!%p376_p3)   ;;  %v3813_v33 = vld [vmem:[%s4826_s3 + $0x158] sm:$0xff] (!%p376_p3)  }
   0xe   : > { %s4837_s15 = smov (!%p452_p4, %s2809_s15), 0  ;;  %3319 = vmatprep.subr.bf16.mxu0 %v3906_v1  ;;  %s4839_s18 = smov (!%p464_p5, %s463_s18), 27  ;;  %v3822_v34 = vld [vmem:[%s4826_s3 + $0x18] sm:$0xff]   ;;  %v3816_v36 = vld [vmem:[%s4826_s3 + $0x160] sm:$0xff]   ;;  %v3817_v40 = vld [vmem:[%s4826_s3 + $0x168] sm:$0xff]  }
   0xf   : > { %s454_s23 = smul.u32 14, %s4837_s15  ;;  %s4015_s10 = sshll.u32 %s4839_s18, 2  ;;  %v3825_v38 = vld [vmem:[%s4826_s3 + $0x20] sm:$0xff]   ;;  %v3828_v42 = vld [vmem:[%s4826_s3 + $0x28] sm:$0xff]   ;;  %v3820_v46 = vld [vmem:[%s4826_s3 + $0x170] sm:$0xff]  }
  0x10   : > { %3144 = vmatpush3.bf16.msra.mxu1 %v3794_v5  ;;  %s4031_s22 = scalar_lea.vmem %s4824_s1, %s4015_s10  ;;  %s4843_s13 = smov (!%p470_p7, %s469_s13), 1  ;;  %v3831_v49 = vld [vmem:[%s4826_s3 + $0x30] sm:$0xff]   ;;  %v3821_v50 = vld [vmem:[%s4826_s3 + $0x178] sm:$0xff]   ;;  %v3824_v59 = vld [vmem:[%s4826_s3 + $0x180] sm:$0xff]  }
  0x11   : > { %p455_p6 = scmp.lt.s32.totalorder %s454_s23, 27  ;;  %3320 = vmatpush3.bf16.msra.mxu0 %v3795_v6  ;;  %3145 = vmatprep.subr.bf16.mxu1 %v3906_v1  ;;  %v4048_v15 = vld [vmem:[%s4031_s22] sm:$0xff]   ;;  %v4067_v22 = vld [vmem:[%s4031_s22 + $0x8] sm:$0xff]   ;;  %v4093_v29 = vld [vmem:[%s4031_s22 + $0x10] sm:$0xff]   ;;  %s472_s9 = smul.u32 14, %s4843_s13 }
  0x12   : > { %3321 = vmatprep.subr.bf16.mxu0 %v3906_v1  ;;  %v620_v19 = vrot.slane %v4048_v15, 3  ;;  %v622_v25 = vrot.slane %v4067_v22, 3  ;;  %v624_v32 = vrot.slane %v4093_v29, 3  ;;  %v4123_v37 = vld [vmem:[%s4031_s22 + $0x18] sm:$0xff]   ;;  %v4140_v41 = vshll.u32 %v4048_v15, 16  ;;  %v4149_v44 = vld [vmem:[%s4031_s22 + $0x20] sm:$0xff]   ;;  %s4752_s12 = scalar_lea.vmem %s4830_s7, %s4015_s10  ;;  %s4775_s17 = scalar_lea.vmem %s4831_s8, %s4015_s10 }
  0x13   : > { %s4841_s23 = smov (!%p455_p6, %s454_s23), 27  ;;  %v626_v39 = vrot.slane %v4123_v37, 3  ;;  %p473_p8 = scmp.lt.s32.totalorder %s472_s9, 27  ;;  %v4152_v45 = vshrl.u32 %v4048_v15, 16  ;;  %v4158_v47 = vshll.u32 %v4067_v22, 16  ;;  %v628_v51 = vrot.slane %v4149_v44, 3 }
  0x14   : > { %s2810_s11 = sshll.u32 %s4841_s23, 2  ;;  %3146 = vmatpush3.bf16.msra.mxu1 %v3796_v7  ;;  %v623_v28 = vsel %vm618_vm1, %v620_v19, %v622_v25  ;;  %v625_v35 = vsel %vm618_vm1, %v622_v25, %v624_v32  ;;  %v1581_v48 = vrot.slane %v4140_v41, 1  ;;  %v3832_v54 = vld [vmem:[%s4826_s3 + $0x38] sm:$0xff]   ;;  %v4189_v56 = vld [vmem:[%s4031_s22 + $0x28] sm:$0xff]   ;;  %v4192_v57 = vshrl.u32 %v4067_v22, 16  ;;  %v3829_v4 = vld [vmem:[%s4826_s3 + $0x190] sm:$0xff]  }
  0x15   : > { %3322 = vmatpush3.bf16.msra.mxu0 %v3797_v8  ;;  %3147 = vmatprep.subr.bf16.mxu1 %v3906_v1  ;;  %s458_s19 = scalar_lea.vmem %s4823_s0, %s2810_s11  ;;  %v627_v43 = vsel %vm618_vm1, %v624_v32, %v626_v39  ;;  %s4845_s9 = smov (!%p473_p8, %s472_s9), 27  ;;  %v1583_v53 = vrot.slane %v4158_v47, 1  ;;  %v629_v55 = vsel %vm618_vm1, %v626_v39, %v628_v51  ;;  %v4199_v60 = vshll.u32 %v4093_v29, 16  ;;  %v3827_v0 = vld [vmem:[%s4826_s3 + $0x188] sm:$0xff]   ;;  %v4222_v5 = vld [vmem:[%s4031_s22 + $0x30] sm:$0xff]  }
  0x16   : > { %3323 = vmatprep.subr.bf16.mxu0 %v3906_v1  ;;  %v4045_v14 = vld [vmem:[%s458_s19 + $0x30] sm:$0xff]   ;;  %s2812_s16 = sshll.u32 %s4845_s9, 2  ;;  %v1582_v52 = vor.u32 %v1581_v48, %v4152_v45  ;;  %v630_v61 = vrot.slane %v4189_v56, 3  ;;  %v4225_v6 = vshrl.u32 %v4093_v29, 16  ;;  %v4228_v7 = vshll.u32 %v4123_v37, 16  ;;  %s2813_s27 = sshll.u32 %s4839_s18, 3 }
  0x17   : > { %v619_v18 = vrot.slane %v4045_v14, 3  ;;  %s4176_s23 = scalar_lea.vmem %s4825_s2, %s2812_s16  ;;  %v1585_v62 = vor.u32 %v1583_v53, %v4192_v57  ;;  %v1586_v63 = vrot.slane %v4199_v60, 1  ;;  %v4215_v2 = vshrl.u32 %v4045_v14, 16  ;;  %v3838_v48 = vld [vmem:[%s4826_s3 + $0x1b0] sm:$0xff]   ;;  %s4494_s20 = scalar_lea.vmem %s4829_s6, %s2813_s27 }
  0x18   : > { %3148 = vmatpush3.bf16.msra.mxu1 %v3798_v9  ;;  %v1584_v58 = vsel %vm1580_vm2, %v1582_v52, %v1583_v53  ;;  %v631_v3 = vsel %vm618_vm1, %v628_v51, %v630_v61  ;;  %v783_v9 = vshll.u32 %v4045_v14, 16  ;;  %v802_v39 = vrot.slane %v4158_v47, 3  ;;  %v3837_v52 = vld [vmem:[%s4826_s3 + $0x88] sm:$0xff]   ;;  %v3841_v53 = vld [vmem:[%s4826_s3 + $0x1b8] sm:$0xff]  }
  0x19   : > { %3324 = vmatpush3.bf16.msra.mxu0 %v3799_v10  ;;  %3149 = vmatprep.subr.bf16.mxu1 %v3906_v1  ;;  %v621_v21 = vsel %vm618_vm1, %v619_v18, %v620_v19  ;;  %v1587_v8 = vsel %vm1580_vm2, %v1585_v62, %v1586_v63  ;;  %v632_v10 = vrot.slane %v4222_v5, 3  ;;  %v790_v18 = vrot.slane %v4152_v45, 2 }
  0x1a   : > { %3325 = vmatprep.subr.bf16.mxu0 %v3906_v1  ;;  %v1990_v19 = vrot.slane %v4067_v22, 5  ;;  %v4325_v62 = vshll.u32 %v4222_v5, 16 }
  0x1b   : > { %v633_v25 = vsel %vm618_vm1, %v630_v61, %v632_v10  ;;  %v4322_v61 = vshrl.u32 %v4189_v56, 16  ;;  %v3842_v10 = vld [vmem:[%s4826_s3 + $0x98] sm:$0xff]  }
  0x1c   : > { %3150 = vmatpush3.bf16.msra.mxu1 %v3800_v11  ;;  %v782_v11 = vrot.slane %v4215_v2, 2 }
  0x1d   : > { %3326 = vmatpush3.bf16.msra.mxu0 %v3801_v12  ;;  %3151 = vmatprep.subr.bf16.mxu1 %v3906_v1  ;;  %v1588_v12 = vor.u32 %v1586_v63, %v4225_v6  ;;  %v3839_v63 = vld [vmem:[%s4826_s3 + $0x90] sm:$0xff]  }
  0x1e   : > { %3327 = vmatprep.subr.bf16.mxu0 %v3906_v1 }
  0x20   : > { %3152 = vmatpush3.bf16.msra.mxu1 %v3802_v13  ;;  %v1589_v13 = vrot.slane %v4228_v7, 1 }
  0x21   : > { %3328 = vmatpush3.bf16.msra.mxu0 %v3803_v16  ;;  %3153 = vmatprep.subr.bf16.mxu1 %v3906_v1  ;;  %v3833_v16 = vld [vmem:[%s4826_s3 + $0x198] sm:$0xff]  }
  0x22   : > { %3329 = vmatprep.subr.bf16.mxu0 %v3906_v1 }
  0x24   : > { %3154 = vmatpush3.bf16.msra.mxu1 %v3804_v17  ;;  %v1989_v17 = vrot.slane %v4048_v15, 5 }
  0x25   : > { %3330 = vmatpush3.bf16.msra.mxu0 %v3805_v20  ;;  %3183 = vmatprep.subr.bf16.mxu1 %v3906_v1  ;;  %v785_v20 = vrot.slane %v783_v9, 3 }
  0x26   : > { %3359 = vmatprep.subr.bf16.mxu0 %v3906_v1 }
  0x27   : > { %3156 = vmatmul.mubr.bf16.vlgmr.msra.gmra.mrb[0].mxu1 %v621_v21  ;;  %v793_v21 = vrot.slane %v4140_v41, 3 }
  0x28   : > { %3332 = vmatmul.mubr.bf16.vlgmr.msra.gmra.mrb[0].mxu0 %v4048_v15  ;;  %3159 = vmatprep.mubr.msk.bf16.mxu1 %vm3907_vm0, %v3906_v1  ;;  %v3834_v15 = vld [vmem:[%s4826_s3 + $0x1a0] sm:$0xff]  }
  0x29   : > { %3360 = vmatpush3.bf16.msra.mxu0 %v3808_v23  ;;  %3335 = vmatprep.mubr.msk.bf16.mxu0 %vm3907_vm0, %v3906_v1  ;;  %v4252_v23 = vshrl.u32 %v4123_v37, 16  ;;  %v794_v32 = vor.u32 %v793_v21, %v790_v18 }
  0x2a   : > { %3361 = vmatprep.subr.bf16.mxu0 %v3906_v1  ;;  %3184 = vmatpush3.bf16.msra.mxu1 %v3811_v24  ;;  %v4255_v24 = vshll.u32 %v4149_v44, 16 }
  0x2b   : > { %3185 = vmatprep.subr.bf16.mxu1 %v3906_v1 }
  0x2d   : > { %3362 = vmatpush3.bf16.msra.mxu0 %v3809_v26  ;;  %v4262_v26 = vsel %vm1988_vm3, %v1989_v17, %v1990_v19  ;;  %v4350_v17 = vshrl.u32 %v4222_v5, 16 }
  0x2e   : > { %3363 = vmatprep.subr.bf16.mxu0 %v3906_v1  ;;  %3186 = vmatpush3.bf16.msra.mxu1 %v3815_v27  ;;  %v1590_v27 = vsel %vm1580_vm2, %v1588_v12, %v1589_v13  ;;  %v817_v12 = vrot.slane %v4252_v23, 2 }
  0x2f   : > { %3160 = vmatmul.mubr.bf16.gmra.mrb[4].mxu1 %v623_v28  ;;  %3187 = vmatprep.subr.bf16.mxu1 %v3906_v1 }
  0x30   : > { %3336 = vmatmul.mubr.bf16.gmra.mrb[4].mxu0 %v4067_v22  ;;  %3163 = vmatprep.mubr.msk.bf16.mxu1 %vm3907_vm0, %v3906_v1  ;;  %v1992_v22 = vrot.slane %v4093_v29, 5 }
  0x31   : > { %3364 = vmatpush3.bf16.msra.mxu0 %v3812_v30  ;;  %3339 = vmatprep.mubr.msk.bf16.mxu0 %vm3907_vm0, %v3906_v1  ;;  %v1994_v30 = vrot.slane %v4123_v37, 5 }
  0x32   : > { %3365 = vmatprep.subr.bf16.mxu0 %v3906_v1  ;;  %3188 = vmatpush3.bf16.msra.mxu1 %v3818_v31  ;;  %v4268_v28 = vsel %vm1988_vm3, %v1990_v19, %v1992_v22  ;;  %v786_v31 = vor.u32 %v785_v20, %v782_v11  ;;  %v3844_v19 = vld [vmem:[%s4826_s3 + $0xa0] sm:$0xff]  }
  0x33   : > { %3189 = vmatprep.subr.bf16.mxu1 %v3906_v1 }
  0x35   : > { %3366 = vmatpush3.bf16.msra.mxu0 %v3813_v33  ;;  %v1591_v33 = vor.u32 %v1589_v13, %v4252_v23  ;;  %v820_v13 = vrot.slane %v4228_v7, 3 }
  0x36   : > { %3367 = vmatprep.subr.bf16.mxu0 %v3906_v1  ;;  %3190 = vmatpush3.bf16.msra.mxu1 %v3822_v34  ;;  %v1592_v34 = vrot.slane %v4255_v24, 1 }
  0x37   : > { %3164 = vmatmul.mubr.bf16.gmra.mrb[8].mxu1 %v625_v35  ;;  %3191 = vmatprep.subr.bf16.mxu1 %v3906_v1  ;;  %v3836_v35 = vld [vmem:[%s4826_s3 + $0x1a8] sm:$0xff]   ;;  %v821_v20 = vor.u32 %v820_v13, %v817_v12  ;;  %v1792_v12 = vrot.slane %v4252_v23, 4  ;;  %v1793_v13 = vrot.slane %v4228_v7, 5 }
  0x38   : > { %3340 = vmatmul.mubr.bf16.gmra.mrb[8].mxu0 %v4093_v29  ;;  %3167 = vmatprep.mubr.msk.bf16.mxu1 %vm3907_vm0, %v3906_v1  ;;  %v4276_v29 = vsel %vm1988_vm3, %v1992_v22, %v1994_v30 }
  0x39   : > { %3368 = vmatpush3.bf16.msra.mxu0 %v3816_v36  ;;  %3343 = vmatprep.mubr.msk.bf16.mxu0 %vm3907_vm0, %v3906_v1  ;;  %v799_v36 = vrot.slane %v4192_v57, 2 }
  0x3a   : > { %3369 = vmatprep.subr.bf16.mxu0 %v3906_v1  ;;  %3192 = vmatpush3.bf16.msra.mxu1 %v3825_v38  ;;  %v795_v38 = vsel %vm778_vm4, %v786_v31, %v794_v32  ;;  %v829_v31 = vrot.slane %v4255_v24, 3 }
  0x3b   : > { %3193 = vmatprep.subr.bf16.mxu1 %v3906_v1 }
  0x3d   : > { %3370 = vmatpush3.bf16.msra.mxu0 %v3817_v40  ;;  %v3835_v40 = vld [vmem:[%s4826_s3 + $0x80] sm:$0xff]  }
  0x3e   : > { %3371 = vmatprep.subr.bf16.mxu0 %v3906_v1  ;;  %3194 = vmatpush3.bf16.msra.mxu1 %v3828_v42  ;;  %v1593_v42 = vsel %vm1580_vm2, %v1591_v33, %v1592_v34 }
  0x3f   : > { %3168 = vmatmul.mubr.bf16.gmra.mrb[12].mxu1 %v627_v43  ;;  %3195 = vmatprep.subr.bf16.mxu1 %v3906_v1  ;;  %v4294_v43 = vshrl.u32 %v4149_v44, 16 }
  0x40   : > { %3344 = vmatmul.mubr.bf16.gmra.mrb[12].mxu0 %v4123_v37  ;;  %3171 = vmatprep.mubr.msk.bf16.mxu1 %vm3907_vm0, %v3906_v1  ;;  %v1998_v37 = vrot.slane %v4189_v56, 5 }
  0x41   : > { %3372 = vmatpush3.bf16.msra.mxu0 %v3820_v46  ;;  %3375 = vmatprep.mubr.msk.bf16.mxu0 %vm3907_vm0, %v3906_v1  ;;  %v4297_v46 = vshll.u32 %v4189_v56, 16 }
  0x42   : > { %3373 = vmatprep.subr.bf16.mxu0 %v3906_v1  ;;  %3196 = vmatpush3.bf16.msra.mxu1 %v3831_v49  ;;  %v803_v49 = vor.u32 %v802_v39, %v799_v36  ;;  %v1785_v36 = vrot.slane %v4158_v47, 5 }
  0x43   : > { %3197 = vmatprep.subr.bf16.mxu1 %v3906_v1  ;;  %v1595_v51 = vrot.slane %v4297_v46, 1 }
  0x45   : > { %3374 = vmatpush3.bf16.msra.mxu0 %v3821_v50  ;;  %v1594_v50 = vor.u32 %v1592_v34, %v4294_v43  ;;  %v1782_v34 = vrot.slane %v4140_v41, 5 }
  0x46   : > { %3403 = vmatprep.subr.bf16.mxu0 %v3906_v1  ;;  %3198 = vmatpush3.bf16.msra.mxu1 %v3832_v54  ;;  %v804_v54 = vsel %vm778_vm4, %v794_v32, %v803_v49  ;;  %v1781_v32 = vrot.slane %v4152_v45, 4 }
  0x47   : > { %3172 = vmatmul.mubr.bf16.gmra.mrb[16].mxu1 %v629_v55  ;;  %3227 = vmatprep.subr.bf16.mxu1 %v3906_v1  ;;  %v808_v55 = vrot.slane %v4225_v6, 2 }
  0x48   : > { %3376 = vmatmul.mubr.bf16.vlgmr.msra.gmra.mrb[0].mxu0 %v1584_v58  ;;  %3175 = vmatprep.mubr.msk.bf16.mxu1 %vm3907_vm0, %v3906_v1  ;;  %v811_v58 = vrot.slane %v4199_v60, 3 }
  0x49   : > { %3404 = vmatpush3.bf16.msra.mxu0 %v3824_v59  ;;  %3379 = vmatprep.mubr.msk.bf16.mxu0 %vm3907_vm0, %v3906_v1  ;;  %v1596_v59 = vsel %vm1580_vm2, %v1594_v50, %v1595_v51  ;;  %v835_v50 = vrot.slane %v4322_v61, 2 }
  0x4a   : > { %3405 = vmatprep.subr.bf16.mxu0 %v3906_v1 }
  0x4d   : > { %3406 = vmatpush3.bf16.msra.mxu0 %v3827_v0  ;;  %v812_v0 = vor.u32 %v811_v58, %v808_v55  ;;  %v1789_v55 = vrot.slane %v4199_v60, 5 }
  0x4e   : > { %3407 = vmatprep.subr.bf16.mxu0 %v3906_v1 }
  0x4f   : > { %3176 = vmatmul.mubr.bf16.gmra.mrb[20].mxu1 %v631_v3  ;;  %v1597_v3 = vor.u32 %v1595_v51, %v4322_v61  ;;  %v813_v11 = vsel %vm778_vm4, %v803_v49, %v812_v0  ;;  %v822_v22 = vsel %vm778_vm4, %v812_v0, %v821_v20  ;;  %v838_v51 = vrot.slane %v4297_v46, 3 }
  0x50   : > { %3380 = vmatmul.mubr.bf16.gmra.mrb[4].mxu0 %v1587_v8  ;;  %3179 = vmatprep.mubr.msk.bf16.mxu1 %vm3907_vm0, %v3906_v1  ;;  %v4339_v8 = vld [vmem:[%s4176_s23] sm:$0xff]  }
  0x51   : > { %3383 = vmatprep.mubr.msk.bf16.mxu0 %vm3907_vm0, %v3906_v1  ;;  %3408 = vmatpush3.bf16.msra.mxu0 %v3829_v4  ;;  %v1598_v4 = vrot.slane %v4325_v62, 1  ;;  %v4353_v18 = vshll.u32 %v4339_v8, 16  ;;  %v839_v58 = vor.u32 %v838_v51, %v835_v50  ;;  %v3852_v50 = vld [vmem:[%s4826_s3 + $0xc0] sm:$0xff]   ;;  %v3855_v51 = vld [vmem:[%s4826_s3 + $0x1f0] sm:$0xff]  }
  0x52   : > { %3409 = vmatprep.subr.bf16.mxu0 %v3906_v1 }
  0x53   : > { %v1600_v21 = vor.u32 %v1598_v4, %v4350_v17 }
  0x55   : > { %3410 = vmatpush3.bf16.msra.mxu0 %v3833_v16  ;;  %v1599_v16 = vsel %vm1580_vm2, %v1597_v3, %v1598_v4  ;;  %v844_v3 = vrot.slane %v4350_v17, 2  ;;  %v847_v4 = vrot.slane %v4325_v62, 3 }
  0x56   : > { %3411 = vmatprep.subr.bf16.mxu0 %v3906_v1 }
  0x57   : > { %3180 = vmatmul.mubr.bf16.gmra.mrb[24].mxu1 %v633_v25  ;;  %v1604_v25 = vrot.slane %v4353_v18, 1 }
  0x58   : > { %3384 = vmatmul.mubr.bf16.gmra.mrb[8].mxu0 %v1590_v27  ;;  %3199 = vmatprep.mubr.msk.bf16.mxu1 %vm3907_vm0, %v3906_v1  ;;  %v826_v27 = vrot.slane %v4294_v43, 2 }
  0x59   : > { %3387 = vmatprep.mubr.msk.bf16.mxu0 %vm3907_vm0, %v3906_v1  ;;  %3412 = vmatpush3.bf16.msra.mxu0 %v3834_v15  ;;  %v3846_v15 = vld [vmem:[%s4826_s3 + $0xa8] sm:$0xff]   ;;  %v1605_v33 = vsel %vm1580_vm2, %v1600_v21, %v1604_v25  ;;  %v1011_v21 = vrot.slane %v4215_v2, 3 }
  0x5a   : > { %3413 = vmatprep.subr.bf16.mxu0 %v3906_v1  ;;  %v830_v39 = vor.u32 %v829_v31, %v826_v27  ;;  %v1015_v27 = vrot.slane %v4140_v41, 4 }
  0x5c   : > { %v831_v49 = vsel %vm778_vm4, %v821_v20, %v830_v39  ;;  %v840_v0 = vsel %vm778_vm4, %v830_v39, %v839_v58  ;;  %v3850_v20 = vld [vmem:[%s4826_s3 + $0x1d8] sm:$0xff]   ;;  %v1018_v39 = vrot.slane %v4192_v57, 3 }
  0x5d   : > { %3414 = vmatpush3.bf16.msra.mxu0 %v3836_v35  ;;  %v1784_v35 = vrot.slane %v4192_v57, 4 }
  0x5e   : > { %3415 = vmatprep.subr.bf16.mxu0 %v3906_v1 }
  0x5f   : > { %3200 = vmatmul.mubr.bf16.vlgmr.msra.gmra.mrb[0].mxu1 %v795_v38  ;;  %v3848_v38 = vld [vmem:[%s4826_s3 + $0xb0] sm:$0xff]  }
  0x60   : > { %3388 = vmatmul.mubr.bf16.gmra.mrb[12].mxu0 %v1593_v42  ;;  %3203 = vmatprep.mubr.msk.bf16.mxu1 %vm3907_vm0, %v3906_v1  ;;  %v1786_v42 = vor.u32 %v1785_v36, %v1784_v35  ;;  %v3853_v36 = vld [vmem:[%s4826_s3 + $0x1e8] sm:$0xff]  }
  0x61   : > { %3391 = vmatprep.mubr.msk.bf16.mxu0 %vm3907_vm0, %v3906_v1  ;;  %3228 = vmatpush3.bf16.msra.mxu1 %v3835_v40  ;;  %v1783_v40 = vor.u32 %v1782_v34, %v1781_v32  ;;  %v1796_v32 = vrot.slane %v4294_v43, 4  ;;  %v3851_v34 = vld [vmem:[%s4826_s3 + $0x1e0] sm:$0xff]  }
  0x62   : > { %3229 = vmatprep.subr.bf16.mxu1 %v3906_v1  ;;  %3416 = vmatpush3.bf16.msra.mxu0 %v3838_v48  ;;  %v3849_v48 = vld [vmem:[%s4826_s3 + $0xb8] sm:$0xff]  }
  0x63   : > { %3417 = vmatprep.subr.bf16.mxu0 %v3906_v1 }
  0x65   : > { %3230 = vmatpush3.bf16.msra.mxu1 %v3837_v52  ;;  %v1787_v52 = vsel %vm1780_vm5, %v1783_v40, %v1786_v42  ;;  %v1019_v40 = vrot.slane %v4158_v47, 4 }
  0x66   : > { %3231 = vmatprep.subr.bf16.mxu1 %v3906_v1  ;;  %3418 = vmatpush3.bf16.msra.mxu0 %v3841_v53  ;;  %v3843_v53 = vld [vmem:[%s4826_s3 + $0x1c0] sm:$0xff]  }
  0x67   : > { %3204 = vmatmul.mubr.bf16.gmra.mrb[4].mxu1 %v804_v54  ;;  %3447 = vmatprep.subr.bf16.mxu0 %v3906_v1  ;;  %v1788_v54 = vrot.slane %v4225_v6, 4 }
  0x68   : > { %3392 = vmatmul.mubr.bf16.gmra.mrb[16].mxu0 %v1596_v59  ;;  %3207 = vmatprep.mubr.msk.bf16.mxu1 %vm3907_vm0, %v3906_v1 }
  0x69   : > { %3395 = vmatprep.mubr.msk.bf16.mxu0 %vm3907_vm0, %v3906_v1  ;;  %3232 = vmatpush3.bf16.msra.mxu1 %v3839_v63  ;;  %v1790_v59 = vor.u32 %v1789_v55, %v1788_v54  ;;  %v3845_v63 = vld [vmem:[%s4826_s3 + $0x1c8] sm:$0xff]   ;;  %v3857_v55 = vld [vmem:[%s4826_s3 + $0x1f8] sm:$0xff]  }
  0x6a   : > { %3233 = vmatprep.subr.bf16.mxu1 %v3906_v1  ;;  %v3854_v54 = vld [vmem:[%s4826_s3 + $0xc8] sm:$0xff]  }
  0x6d   : > { %3234 = vmatpush3.bf16.msra.mxu1 %v3842_v10  ;;  %v1791_v10 = vsel %vm1780_vm5, %v1786_v42, %v1790_v59 }
  0x6e   : > { %3235 = vmatprep.subr.bf16.mxu1 %v3906_v1 }
  0x6f   : > { %3208 = vmatmul.mubr.bf16.gmra.mrb[8].mxu1 %v813_v11  ;;  %v3847_v11 = vld [vmem:[%s4826_s3 + $0x1d0] sm:$0xff]  }
  0x70   : > { %3396 = vmatmul.mubr.bf16.gmra.mrb[20].mxu0 %v1599_v16  ;;  %3211 = vmatprep.mubr.msk.bf16.mxu1 %vm3907_vm0, %v3906_v1  ;;  %v848_v16 = vor.u32 %v847_v4, %v844_v3  ;;  %v1804_v3 = vrot.slane %v4350_v17, 4  ;;  %v1805_v4 = vrot.slane %v4325_v62, 5 }
  0x71   : > { %3399 = vmatprep.mubr.msk.bf16.mxu0 %vm3907_vm0, %v3906_v1  ;;  %3236 = vmatpush3.bf16.msra.mxu1 %v3844_v19  ;;  %v1794_v19 = vor.u32 %v1793_v13, %v1792_v12  ;;  %v1808_v13 = vshrl.u32 %v4339_v8, 16 }
  0x72   : > { %3237 = vmatprep.subr.bf16.mxu1 %v3906_v1  ;;  %v849_v25 = vsel %vm778_vm4, %v839_v58, %v848_v16  ;;  %v1806_v12 = vor.u32 %v1805_v4, %v1804_v3  ;;  %v3858_v16 = vld [vmem:[%s4826_s3 + $0xd8] sm:$0xff]   ;;  %v2461_v3 = vld [vmem:[%s4494_s20 + $0x48] sm:$0xff] }
  0x73   : > { %v1795_v31 = vsel %vm1780_vm5, %v1790_v59, %v1794_v19  ;;  %v1022_v59 = vrot.slane %v4225_v6, 3  ;;  %vm2475_vm1 = vcmp.gt.f32.partialorder %v2461_v3, 0.0  ;;  %v3872_v3 = vld [vmem:[%s4826_s3 + $0x108] sm:$0xff]  }
  0x75   : > { %3238 = vmatpush3.bf16.msra.mxu1 %v3846_v15  ;;  %v1012_v15 = vrot.slane %v783_v9, 4 }
  0x76   : > { %3239 = vmatprep.subr.bf16.mxu1 %v3906_v1 }
  0x77   : > { %3212 = vmatmul.mubr.bf16.gmra.mrb[12].mxu1 %v822_v22  ;;  %v1014_v22 = vrot.slane %v4152_v45, 3  ;;  %v1013_v14 = vor.u32 %v1012_v15, %v1011_v21  ;;  %v2453_v21 = vld [vmem:[%s4494_s20 + $0x8] sm:$0xff]  ;;  %v1026_v15 = vrot.slane %v4252_v23, 3 }
  0x78   : > { %3400 = vmatmul.mubr.bf16.gmra.mrb[24].mxu0 %v1605_v33  ;;  %3215 = vmatprep.mubr.msk.bf16.mxu1 %vm3907_vm0, %v3906_v1  ;;  %v1797_v33 = vrot.slane %v4255_v24, 5  ;;  %vm2467_vm9 = vcmp.gt.f32.partialorder %v2453_v21, 0.0  ;;  %v1034_v21 = vrot.slane %v4322_v61, 3 }
  0x79   : > { %3419 = vmatprep.mubr.msk.bf16.mxu0 %vm3907_vm0, %v3906_v1  ;;  %3240 = vmatpush3.bf16.msra.mxu1 %v3848_v38  ;;  %v1016_v9 = vor.u32 %v1015_v27, %v1014_v22  ;;  %v1027_v22 = vrot.slane %v4228_v7, 4  ;;  %v2455_v27 = vld [vmem:[%s4494_s20 + $0x18] sm:$0xff] }
  0x7a   : > { %3241 = vmatprep.subr.bf16.mxu1 %v3906_v1  ;;  %v1798_v35 = vor.u32 %v1797_v33, %v1796_v32  ;;  %vm2469_vm10 = vcmp.gt.f32.partialorder %v2455_v27, 0.0 }
  0x7b   : > { %v1017_v38 = vsel %vm1010_vm6, %v1013_v14, %v1016_v9  ;;  %v1810_v14 = vrot.slane %v1808_v13, 4 }
  0x7c   : > { %v1799_v42 = vsel %vm1780_vm5, %v1794_v19, %v1798_v35  ;;  %v3908_v19 = vmov 0  }
  0x7d   : > { %3242 = vmatpush3.bf16.msra.mxu1 %v3849_v48  ;;  %v1800_v48 = vrot.slane %v4322_v61, 4  ;;  %3788 = vset.pattern.permute.xlu0 %v3908_v19  ;;  %v2489_v27 = vsel %vm2475_vm1, 1, %v3908_v19 }
  0x7e   : > { %3271 = vmatprep.subr.bf16.mxu1 %v3906_v1  ;;  %3789 = vset.pattern.permute.xlu1 %v3908_v19 }
  0x7f   : > { %3216 = vmatmul.mubr.bf16.gmra.mrb[16].mxu1 %v831_v49  ;;  %v1801_v49 = vrot.slane %v4297_v46, 5 }
  0x80   : > { %3420 = vmatmul.mubr.bf16.vlgmr.msra.gmra.mrb[0].mxu0 %v1787_v52  ;;  %3219 = vmatprep.mubr.msk.bf16.mxu1 %vm3907_vm0, %v3906_v1  ;;  %v1020_v52 = vor.u32 %v1019_v40, %v1018_v39  ;;  %v2481_v39 = vsel %vm2467_vm9, 1, %v3908_v19  ;;  %v1028_v40 = vor.u32 %v1027_v22, %v1026_v15  ;;  %v1035_v22 = vrot.slane %v4297_v46, 4 }
  0x81   : > { %3448 = vmatpush3.bf16.msra.mxu0 %v3843_v53  ;;  %3423 = vmatprep.mubr.msk.bf16.mxu0 %vm3907_vm0, %v3906_v1  ;;  %v1802_v53 = vor.u32 %v1801_v49, %v1800_v48  ;;  %v3862_v49 = vld [vmem:[%s4826_s3 + $0xe8] sm:$0xff]  }
  0x82   : > { %3449 = vmatprep.subr.bf16.mxu0 %v3906_v1  ;;  %v1021_v58 = vsel %vm1010_vm6, %v1016_v9, %v1020_v52  ;;  %v1811_v9 = vrot.slane %v4353_v18, 5 }
  0x84   : > { %v1812_v48 = vor.u32 %v1811_v9, %v1810_v14  ;;  %v1036_v14 = vor.u32 %v1035_v22, %v1034_v21  ;;  %v3874_v21 = vld [vmem:[%s4826_s3 + $0x118] sm:$0xff]  }
  0x85   : > { %3450 = vmatpush3.bf16.msra.mxu0 %v3845_v63  ;;  %v1023_v63 = vrot.slane %v4199_v60, 4 }
  0x86   : > { %3451 = vmatprep.subr.bf16.mxu0 %v3906_v1 }
  0x87   : > { %3220 = vmatmul.mubr.bf16.gmra.mrb[20].mxu1 %v840_v0  ;;  %v1803_v0 = vsel %vm1780_vm5, %v1798_v35, %v1802_v53  ;;  %v3860_v35 = vld [vmem:[%s4826_s3 + $0xe0] sm:$0xff]  }
  0x88   : > { %3424 = vmatmul.mubr.bf16.gmra.mrb[4].mxu0 %v1791_v10  ;;  %3223 = vmatprep.mubr.msk.bf16.mxu1 %vm3907_vm0, %v3906_v1  ;;  %v3856_v10 = vld [vmem:[%s4826_s3 + $0xd0] sm:$0xff]  }
  0x89   : > { %3427 = vmatprep.mubr.msk.bf16.mxu0 %vm3907_vm0, %v3906_v1  ;;  %3452 = vmatpush3.bf16.msra.mxu0 %v3847_v11  ;;  %v1024_v11 = vor.u32 %v1023_v63, %v1022_v59  ;;  %v1813_v59 = vsel %vm1780_vm5, %v1806_v12, %v1812_v48  ;;  %v3864_v63 = vld [vmem:[%s4826_s3 + $0xf0] sm:$0xff]  }
  0x8a   : > { %3453 = vmatprep.subr.bf16.mxu0 %v3906_v1 }
  0x8d   : > { %3454 = vmatpush3.bf16.msra.mxu0 %v3850_v20  ;;  %v2452_v20 = vld [vmem:[%s4494_s20] sm:$0xff] }
  0x8e   : > { %3455 = vmatprep.subr.bf16.mxu0 %v3906_v1  ;;  %vm2466_vm7 = vcmp.gt.f32.partialorder %v2452_v20, 0.0  ;;  %v2463_v20 = vld [vmem:[%s4494_s20 + $0x58] sm:$0xff] }
  0x8f   : > { %3224 = vmatmul.mubr.bf16.gmra.mrb[24].mxu1 %v849_v25  ;;  %v2454_v25 = vld [vmem:[%s4494_s20 + $0x10] sm:$0xff]  ;;  %v2480_v32 = vsel %vm2466_vm7, 1, %v3908_v19  ;;  %vm2477_vm4 = vcmp.gt.f32.partialorder %v2463_v20, 0.0 }
  0x90   : > { %3428 = vmatmul.mubr.bf16.gmra.mrb[8].mxu0 %v1795_v31  ;;  %3243 = vmatprep.mubr.msk.bf16.mxu1 %vm3907_vm0, %v3906_v1  ;;  %vm2468_vm8 = vcmp.gt.f32.partialorder %v2454_v25, 0.0  ;;  %v1025_v31 = vsel %vm1010_vm6, %v1020_v52, %v1024_v11  ;;  %v1030_v52 = vrot.slane %v4294_v43, 3  ;;  %v2491_v9 = vsel %vm2477_vm4, 1, %v3908_v19 }
  0x91   : > { %3431 = vmatprep.mubr.msk.bf16.mxu0 %vm3907_vm0, %v3906_v1  ;;  %3456 = vmatpush3.bf16.msra.mxu0 %v3851_v34  ;;  %v2482_v33 = vsel %vm2468_vm8, 1, %v3908_v19  ;;  %v1807_v34 = vsel %vm1780_vm5, %v1802_v53, %v1806_v12  ;;  %v3865_v12 = vld [vmem:[%s4826_s3 + $0xf8] sm:$0xff]  }
  0x92   : > { %3457 = vmatprep.subr.bf16.mxu0 %v3906_v1  ;;  %2495 = vperm.xlu0 %3788, %v2480_v32   ;;  %v2464_v32 = vld [vmem:[%s4494_s20 + $0x60] sm:$0xff] }
  0x93   : > { %2501 = vperm.xlu1 %3789, %v2482_v33   ;;  %v2465_v33 = vld [vmem:[%s4494_s20 + $0x68] sm:$0xff]  ;;  %vm2478_vm5 = vcmp.gt.f32.partialorder %v2464_v32, 0.0  ;;  %v2179_v32 = vrot.slane %v4152_v45, 5 }
  0x94   : > { %vm2479_vm7 = vcmp.gt.f32.partialorder %v2465_v33, 0.0  ;;  %v2180_v33 = vrot.slane %v4140_v41, 6 }
  0x95   : > { %3458 = vmatpush3.bf16.msra.mxu0 %v3853_v36  ;;  %v2456_v36 = vld [vmem:[%s4494_s20 + $0x20] sm:$0xff] }
  0x96   : > { %3459 = vmatprep.subr.bf16.mxu0 %v3906_v1  ;;  %vm2470_vm11 = vcmp.gt.f32.partialorder %v2456_v36, 0.0  ;;  %2498 = vperm.xlu0 %3788, %v2481_v39   ;;  %v1039_v39 = vrot.slane %v4325_v62, 4 }
  0x97   : > { %3244 = vmatmul.mubr.bf16.vlgmr.msra.gmra.mrb[0].mxu1 %v1017_v38  ;;  %v2457_v38 = vld [vmem:[%s4494_s20 + $0x28] sm:$0xff]  ;;  %v2484_v53 = vsel %vm2470_vm11, 1, %v3908_v19 }
  0x98   : > { %3432 = vmatmul.mubr.bf16.gmra.mrb[12].mxu0 %v1799_v42  ;;  %3247 = vmatprep.mubr.msk.bf16.mxu1 %vm3907_vm0, %v3906_v1  ;;  %v2483_v42 = vsel %vm2469_vm10, 1, %v3908_v19  ;;  %vm2471_vm12 = vcmp.gt.f32.partialorder %v2457_v38, 0.0  ;;  %v1038_v38 = vrot.slane %v4350_v17, 3 }
  0x99   : > { %3435 = vmatprep.mubr.msk.bf16.mxu0 %vm3907_vm0, %v3906_v1  ;;  %3272 = vmatpush3.bf16.msra.mxu1 %v3852_v50  ;;  %v2458_v50 = vld [vmem:[%s4494_s20 + $0x30] sm:$0xff] }
  0x9a   : > { %3273 = vmatprep.subr.bf16.mxu1 %v3906_v1  ;;  %3460 = vmatpush3.bf16.msra.mxu0 %v3855_v51  ;;  %v2459_v51 = vld [vmem:[%s4494_s20 + $0x38] sm:$0xff]  ;;  %vm2472_vm13 = vcmp.gt.f32.partialorder %v2458_v50, 0.0  ;;  %v1040_v48 = vor.u32 %v1039_v39, %v1038_v38  ;;  %v1218_v50 = vrot.slane %v4152_v45, 7  ;;  %v2186_v38 = vrot.slane %v4225_v6, 5 }
  0x9b   : > { %3461 = vmatprep.subr.bf16.mxu0 %v3906_v1  ;;  %2504 = vperm.xlu1 %3789, %v2483_v42   ;;  %vm2473_vm14 = vcmp.gt.f32.partialorder %v2459_v51, 0.0  ;;  %v2486_v4 = vsel %vm2472_vm13, 1, %v3908_v19  ;;  %v3863_v42 = vld [vmem:[%s4826_s3 + $0x210] sm:$0xff]   ;;  %v1217_v51 = vrot.slane %v4215_v2, 7  ;;  %v2187_v39 = vrot.slane %v4199_v60, 6 }
  0x9c   : > { %2507 = vperm.xlu0 %3788, %v2484_v53   ;;  %v1996_v53 = vrot.slane %v4149_v44, 5  ;;  %v3869_v44 = vld [vmem:[%s4826_s3 + $0x230] sm:$0xff]  }
  0x9d   : > { %3274 = vmatpush3.bf16.msra.mxu1 %v3854_v54  ;;  %v1029_v54 = vsel %vm1010_vm6, %v1024_v11, %v1028_v40  ;;  %v2487_v11 = vsel %vm2473_vm14, 1, %v3908_v19 }
  0x9e   : > { %3275 = vmatprep.subr.bf16.mxu1 %v3906_v1  ;;  %3462 = vmatpush3.bf16.msra.mxu0 %v3857_v55  ;;  %v1031_v55 = vrot.slane %v4255_v24, 4  ;;  %v1997_v2 = vsel %vm1988_vm3, %v1994_v30, %v1996_v53  ;;  %v3871_v30 = vld [vmem:[%s4826_s3 + $0x100] sm:$0xff]   ;;  %v1999_v56 = vsel %vm1988_vm3, %v1996_v53, %v1998_v37 }
  0x9f   : > { %3248 = vmatmul.mubr.bf16.gmra.mrb[4].mxu1 %v1021_v58  ;;  %3491 = vmatprep.subr.bf16.mxu0 %v3906_v1  ;;  %v2485_v58 = vsel %vm2471_vm12, 1, %v3908_v19 }
  0xa0   : > { %3436 = vmatmul.mubr.bf16.gmra.mrb[16].mxu0 %v1803_v0  ;;  %3251 = vmatprep.mubr.msk.bf16.mxu1 %vm3907_vm0, %v3906_v1  ;;  %v2460_v0 = vld [vmem:[%s4494_s20 + $0x40] sm:$0xff] }
  0xa1   : > { %3439 = vmatprep.mubr.msk.bf16.mxu0 %vm3907_vm0, %v3906_v1  ;;  %3276 = vmatpush3.bf16.msra.mxu1 %v3856_v10  ;;  %v1032_v10 = vor.u32 %v1031_v55, %v1030_v52  ;;  %vm2474_vm15 = vcmp.gt.f32.partialorder %v2460_v0, 0.0  ;;  %v1219_v52 = vor.u32 %v1218_v50, %v4140_v41  ;;  %v1221_v55 = vrot.slane %v4192_v57, 7 }
  0xa2   : > { %3277 = vmatprep.subr.bf16.mxu1 %v3906_v1  ;;  %2510 = vperm.xlu1 %3789, %v2485_v58   ;;  %v2488_v25 = vsel %vm2474_vm15, 1, %v3908_v19  ;;  %v1224_v0 = vrot.slane %v4225_v6, 7  ;;  %v2181_v41 = vor.u32 %v2180_v33, %v2179_v32  ;;  %v2930_v32 = vld [vmem:[%s4752_s12] sm:$0xff]  }
  0xa3   : > { %2513 = vperm.xlu0 %3788, %v2486_v4   ;;  %v1033_v15 = vsel %vm1010_vm6, %v1028_v40, %v1032_v10  ;;  %v1037_v36 = vsel %vm1010_vm6, %v1032_v10, %v1036_v14  ;;  %v2493_v40 = vsel %vm2479_vm7, 1, %v3908_v19  ;;  %v1222_v58 = vor.u32 %v1221_v55, %v4158_v47 }
  0xa4   : > { %v1225_v4 = vor.u32 %v1224_v0, %v4199_v60  ;;  %v2000_v10 = vrot.slane %v4222_v5, 5  ;;  %v1236_v60 = vrot.slane %v4350_v17, 7 }
  0xa5   : > { %3278 = vmatpush3.bf16.msra.mxu1 %v3858_v16  ;;  %v2462_v16 = vld [vmem:[%s4494_s20 + $0x50] sm:$0xff] }
  0xa6   : > { %3279 = vmatprep.subr.bf16.mxu1 %v3906_v1  ;;  %2516 = vperm.xlu1 %3789, %v2487_v11   ;;  %vm2476_vm2 = vcmp.gt.f32.partialorder %v2462_v16, 0.0  ;;  %v3873_v11 = vld [vmem:[%s4826_s3 + $0x110] sm:$0xff]   ;;  %v1227_v16 = vrot.slane %v4252_v23, 7  ;;  %v2001_v20 = vsel %vm1988_vm3, %v1998_v37, %v2000_v10  ;;  %v2203_v37 = vrot.slane %v4325_v62, 6 }
  0xa7   : > { %3252 = vmatmul.mubr.bf16.gmra.mrb[8].mxu1 %v1025_v31  ;;  %v3859_v31 = vld [vmem:[%s4826_s3 + $0x200] sm:$0xff]   ;;  %2519 = vperm.xlu0 %3788, %v2488_v25   ;;  %v2002_v25 = vrot.slane %v4339_v8, 5 }
  0xa8   : > { %3440 = vmatmul.mubr.bf16.gmra.mrb[20].mxu0 %v1807_v34  ;;  %3255 = vmatprep.mubr.msk.bf16.mxu1 %vm3907_vm0, %v3906_v1  ;;  %v2490_v34 = vsel %vm2476_vm2, 1, %v3908_v19  ;;  %v1228_v5 = vor.u32 %v1227_v16, %v4228_v7 }
  0xa9   : > { %3443 = vmatprep.mubr.msk.bf16.mxu0 %vm3907_vm0, %v3906_v1  ;;  %3280 = vmatpush3.bf16.msra.mxu1 %v3860_v35  ;;  %v3861_v35 = vld [vmem:[%s4826_s3 + $0x208] sm:$0xff]  }
  0xaa   : > { %3281 = vmatprep.subr.bf16.mxu1 %v3906_v1  ;;  %2522 = vperm.xlu1 %3789, %v2489_v27   ;;  %v2003_v27 = vsel %vm1988_vm3, %v2000_v10, %v2002_v25  ;;  %vm2178_vm3 = vsmask.f32 2304 }
  0xab   : > { %2525 = vperm.xlu0 %3788, %v2490_v34   ;;  %v2182_v34 = vrot.slane %v4192_v57, 5 }
  0xad   : > { %3282 = vmatpush3.bf16.msra.mxu1 %v3862_v49  ;;  %v1041_v49 = vsel %vm1010_vm6, %v1036_v14, %v1040_v48  ;;  %vm1216_vm6 = vsmask.f32 256  ;;  %v2183_v14 = vrot.slane %v4158_v47, 6  ;;  %v3877_v47 = vld [vmem:[%s4826_s3 + $0x130] sm:$0xff]   ;;  %v2188_v48 = vor.u32 %v2187_v39, %v2186_v38 }
  0xae   : > { %3283 = vmatprep.subr.bf16.mxu1 %v3906_v1  ;;  %2528 = vperm.xlu1 %3789, %v2491_v9   ;;  %v1229_v22 = vsel %vm1216_vm6, %v1224_v0, %v1228_v5  ;;  %v3876_v9 = vld [vmem:[%s4826_s3 + $0x128] sm:$0xff]   ;;  %v2932_v38 = vunpack.c.h.bf16 %v2930_v32 }
  0xaf   : > { %3256 = vmatmul.mubr.bf16.gmra.mrb[12].mxu1 %v1029_v54  ;;  %v3868_v54 = vld [vmem:[%s4826_s3 + $0x228] sm:$0xff]   ;;  %v2184_v57 = vor.u32 %v2183_v14, %v2182_v34  ;;  %v4763_v14 = vld [vmem:[%s4828_s5] ss:$0 sm:$0xff] }
  0xb0   : > { %3444 = vmatmul.mubr.bf16.gmra.mrb[24].mxu0 %v1813_v59  ;;  %3259 = vmatprep.mubr.msk.bf16.mxu1 %vm3907_vm0, %v3906_v1  ;;  %v3870_v59 = vld [vmem:[%s4826_s3 + $0x238] sm:$0xff]  }
  0xb1   : > { %3463 = vmatprep.mubr.msk.bf16.mxu0 %vm3907_vm0, %v3906_v1  ;;  %3284 = vmatpush3.bf16.msra.mxu1 %v3864_v63  ;;  %v1223_v63 = vsel %vm1216_vm6, %v1218_v50, %v1222_v58  ;;  %v2191_v50 = vrot.slane %v4228_v7, 6  ;;  %v2195_v7 = vrot.slane %v4255_v24, 6  ;;  %v2202_v58 = vrot.slane %v4350_v17, 5  ;;  %v3881_v17 = vld [vmem:[%s4031_s22 + $0x30] sm:$0xff]  }
  0xb2   : > { %3285 = vmatprep.subr.bf16.mxu1 %v3906_v1  ;;  %2534 = vperm.xlu1 %3789, %v2493_v40   ;;  %v3878_v40 = vld [vmem:[%s4826_s3 + $0x138] sm:$0xff]  }
  0xb5   : > { %3286 = vmatpush3.bf16.msra.mxu1 %v3865_v12  ;;  %v1226_v12 = vsel %vm1216_vm6, %v1221_v55, %v1225_v4  ;;  %v2198_v55 = vrot.slane %v4322_v61, 5 }
  0xb6   : > { %3535 = vmatprep.subr.bf16.mxu1 %v3906_v1 }
  0xb7   : > { %3260 = vmatmul.mubr.bf16.gmra.mrb[16].mxu1 %v1033_v15  ;;  %v3875_v15 = vld [vmem:[%s4826_s3 + $0x120] sm:$0xff]  }
  0xb8   : > { %3464 = vmatmul.mubr.bf16.vlgmr.msra.gmra.mrb[0].mxu0 %v4262_v26  ;;  %3263 = vmatprep.mubr.msk.bf16.mxu1 %vm3907_vm0, %v3906_v1  ;;  %v2492_v26 = vsel %vm2478_vm5, 1, %v3908_v19  ;;  %v3866_v19 = vld [vmem:[%s4826_s3 + $0x218] sm:$0xff]  }
  0xb9   : > { %3492 = vmatpush3.bf16.msra.mxu0 %v3859_v31  ;;  %3467 = vmatprep.mubr.msk.bf16.mxu0 %vm3907_vm0, %v3906_v1  ;;  %v1230_v31 = vrot.slane %v4294_v43, 7 }
  0xba   : > { %3493 = vmatprep.subr.bf16.mxu0 %v3906_v1  ;;  %2531 = vperm.xlu0 %3788, %v2492_v26   ;;  %v1233_v26 = vrot.slane %v4322_v61, 7  ;;  %v3880_v61 = vld [vmem:[%s4031_s22 + $0x28] sm:$0xff]  }
  0xbb   : > { %v1231_v45 = vor.u32 %v1230_v31, %v4255_v24 }
  0xbd   : > { %3494 = vmatpush3.bf16.msra.mxu0 %v3861_v35  ;;  %v1232_v35 = vsel %vm1216_vm6, %v1227_v16, %v1231_v45 }
  0xbe   : > { %3495 = vmatprep.subr.bf16.mxu0 %v3906_v1 }
  0xbf   : > { %3264 = vmatmul.mubr.bf16.gmra.mrb[20].mxu1 %v1037_v36  ;;  %v2185_v36 = vsel %vm2178_vm3, %v2181_v41, %v2184_v57 }
  0xc0   : > { %3468 = vmatmul.mubr.bf16.gmra.mrb[4].mxu0 %v4268_v28  ;;  %3267 = vmatprep.mubr.msk.bf16.mxu1 %vm3907_vm0, %v3906_v1  ;;  %v3867_v28 = vld [vmem:[%s4826_s3 + $0x220] sm:$0xff]  }
  0xc1   : > { %3471 = vmatprep.mubr.msk.bf16.mxu0 %vm3907_vm0, %v3906_v1  ;;  %3496 = vmatpush3.bf16.msra.mxu0 %v3863_v42  ;;  %v1234_v42 = vor.u32 %v1233_v26, %v4297_v46 }
  0xc2   : > { %3497 = vmatprep.subr.bf16.mxu0 %v3906_v1 }
  0xc3   : > { %v1235_v6 = vsel %vm1216_vm6, %v1230_v31, %v1234_v42  ;;  %v4757_v31 = vld [vmem:[%s4827_s4] ss:$0 sm:$0xff]  ;;  %v2992_v42 = vld [vmem:[%s4752_s12 + $0x8] sm:$0xff]  }
  0xc5   : > { %3498 = vmatpush3.bf16.msra.mxu0 %v3866_v19  ;;  %v2189_v19 = vsel %vm2178_vm3, %v2184_v57, %v2188_v48 }
  0xc6   : > { %3499 = vmatprep.subr.bf16.mxu0 %v3906_v1 }
  0xc7   : > { %3268 = vmatmul.mubr.bf16.gmra.mrb[24].mxu1 %v1041_v49  ;;  %v2190_v49 = vrot.slane %v4252_v23, 5  ;;  %v2194_v23 = vrot.slane %v4294_v43, 5 }
  0xc8   : > { %3472 = vmatmul.mubr.bf16.gmra.mrb[8].mxu0 %v4276_v29  ;;  %3287 = vmatprep.mubr.msk.bf16.mxu1 %vm3907_vm0, %v3906_v1  ;;  %v1220_v29 = vsel %vm1216_vm6, %v1217_v51, %v1219_v52 }
  0xc9   : > { %3475 = vmatprep.mubr.msk.bf16.mxu0 %vm3907_vm0, %v3906_v1  ;;  %3500 = vmatpush3.bf16.msra.mxu0 %v3867_v28  ;;  %v1237_v28 = vor.u32 %v1236_v60, %v4325_v62  ;;  %v2192_v51 = vor.u32 %v2191_v50, %v2190_v49  ;;  %v2935_v50 = vunpack.c.l.bf16 %v2992_v42 }
  0xca   : > { %3501 = vmatprep.subr.bf16.mxu0 %v3906_v1 }
  0xcb   : > { %v1238_v52 = vsel %vm1216_vm6, %v1233_v26, %v1237_v28  ;;  %v2193_v53 = vsel %vm2178_vm3, %v2188_v48, %v2192_v51 }
  0xcd   : > { %3502 = vmatpush3.bf16.msra.mxu0 %v3868_v54  ;;  %v2196_v54 = vor.u32 %v2195_v7, %v2194_v23 }
  0xce   : > { %3503 = vmatprep.subr.bf16.mxu0 %v3906_v1 }
  0xcf   : > { %3288 = vmatmul.mubr.bf16.vlgmr.msra.gmra.mrb[0].mxu1 %v1220_v29  ;;  %v2197_v29 = vsel %vm2178_vm3, %v2192_v51, %v2196_v54 }
  0xd0   : > { %3476 = vmatmul.mubr.bf16.gmra.mrb[12].mxu0 %v1997_v2  ;;  %3291 = vmatprep.mubr.msk.bf16.mxu1 %vm3907_vm0, %v3906_v1  ;;  %v2199_v2 = vrot.slane %v4297_v46, 6  ;;  %v2204_v46 = vor.u32 %v2203_v37, %v2202_v58  ;;  %v2993_v58 = vld [vmem:[%s4752_s12 + $0x10] sm:$0xff]  }
  0xd1   : > { %3479 = vmatprep.mubr.msk.bf16.mxu0 %vm3907_vm0, %v3906_v1  ;;  %3543 = vmatpush3.bf16.msra.mxu1 %v3871_v30 }
  0xd2   : > { %3536 = vmatprep.subr.bf16.mxu1 %v3906_v1  ;;  %3504 = vmatpush3.bf16.msra.mxu0 %v3869_v44  ;;  %v3879_v44 = vld [vmem:[%s4031_s22 + $0x20] sm:$0xff]   ;;  %v2200_v24 = vor.u32 %v2199_v2, %v2198_v55  ;;  %v2936_v2 = vunpack.c.h.bf16 %v2992_v42 }
  0xd3   : > { %3505 = vmatprep.subr.bf16.mxu0 %v3906_v1 }
  0xd4   : > { %v2201_v43 = vsel %vm2178_vm3, %v2196_v54, %v2200_v24  ;;  %v2205_v30 = vsel %vm2178_vm3, %v2200_v24, %v2204_v46 }
  0xd5   : > { %3544 = vmatpush3.bf16.msra.mxu1 %v3872_v3 }
  0xd6   : > { %3537 = vmatprep.subr.bf16.mxu1 %v3906_v1  ;;  %3506 = vmatpush3.bf16.msra.mxu0 %v3870_v59  ;;  %v2206_v59 = vrot.slane %v1808_v13, 5 }
  0xd7   : > { %3292 = vmatmul.mubr.bf16.gmra.mrb[4].mxu1 %v1223_v63  ;;  %v2207_v63 = vrot.slane %v4353_v18, 6 }
  0xd8   : > { %3480 = vmatmul.mubr.bf16.gmra.mrb[16].mxu0 %v1999_v56  ;;  %3295 = vmatprep.mubr.msk.bf16.mxu1 %vm3907_vm0, %v3906_v1 }
  0xd9   : > { %3483 = vmatprep.mubr.msk.bf16.mxu0 %vm3907_vm0, %v3906_v1  ;;  %3545 = vmatpush3.bf16.msra.mxu1 %v3873_v11  ;;  %v2208_v62 = vor.u32 %v2207_v63, %v2206_v59  ;;  %v2939_v59 = vunpack.c.l.bf16 %v2993_v58 }
  0xda   : > { %3538 = vmatprep.subr.bf16.mxu1 %v3906_v1 }
  0xdb   : > { %v2209_v0 = vsel %vm2178_vm3, %v2204_v46, %v2208_v62 }
  0xdd   : > { %3546 = vmatpush3.bf16.msra.mxu1 %v3874_v21 }
  0xde   : > { %3539 = vmatprep.subr.bf16.mxu1 %v3906_v1 }
  0xdf   : > { %3296 = vmatmul.mubr.bf16.gmra.mrb[8].mxu1 %v1226_v12 }
  0xe0   : > { %3484 = vmatmul.mubr.bf16.gmra.mrb[20].mxu0 %v2001_v20  ;;  %3299 = vmatprep.mubr.msk.bf16.mxu1 %vm3907_vm0, %v3906_v1 }
  0xe1   : > { %3487 = vmatprep.mubr.msk.bf16.mxu0 %vm3907_vm0, %v3906_v1  ;;  %3547 = vmatpush3.bf16.msra.mxu1 %v3875_v15 }
  0xe2   : > { %3540 = vmatprep.subr.bf16.mxu1 %v3906_v1 }
  0xe5   : > { %3548 = vmatpush3.bf16.msra.mxu1 %v3876_v9 }
  0xe6   : > { %3541 = vmatprep.subr.bf16.mxu1 %v3906_v1 }
  0xe7   : > { %3300 = vmatmul.mubr.bf16.gmra.mrb[12].mxu1 %v1229_v22 }
  0xe8   : > { %3488 = vmatmul.mubr.bf16.gmra.mrb[24].mxu0 %v2003_v27  ;;  %3303 = vmatprep.mubr.msk.bf16.mxu1 %vm3907_vm0, %v3906_v1 }
  0xe9   : > { %3507 = vmatprep.mubr.msk.bf16.mxu0 %vm3907_vm0, %v3906_v1  ;;  %3549 = vmatpush3.bf16.msra.mxu1 %v3877_v47  ;;  %v2931_v47 = vunpack.c.l.bf16 %v2930_v32 }
  0xea   : > { %3542 = vmatprep.subr.bf16.mxu1 %v3906_v1 }
  0xed   : > { %3550 = vmatpush3.bf16.msra.mxu1 %v3878_v40 }
  0xef   : > { %3304 = vmatmul.mubr.bf16.gmra.mrb[16].mxu1 %v1232_v35 }
  0xf0   : > { %3508 = vmatmul.mubr.bf16.vlgmr.msra.gmra.mrb[0].mxu0 %v2185_v36  ;;  %3307 = vmatprep.mubr.msk.bf16.mxu1 %vm3907_vm0, %v3906_v1 }
  0xf1   : > { %3511 = vmatprep.mubr.msk.bf16.mxu0 %vm3907_vm0, %v3906_v1 }
  0xf7   : > { %3308 = vmatmul.mubr.bf16.gmra.mrb[20].mxu1 %v1235_v6 }
  0xf8   : > { %3512 = vmatmul.mubr.bf16.gmra.mrb[4].mxu0 %v2189_v19  ;;  %3311 = vmatprep.mubr.msk.bf16.mxu1 %vm3907_vm0, %v3906_v1 }
  0xf9   : > { %3515 = vmatprep.mubr.msk.bf16.mxu0 %vm3907_vm0, %v3906_v1 }
  0xff   : > { %3312 = vmatmul.mubr.bf16.gmra.mrb[24].mxu1 %v1238_v52 }
 0x100   : > { %3516 = vmatmul.mubr.bf16.gmra.mrb[8].mxu0 %v2193_v53  ;;  %3347 = vmatprep.mubr.msk.bf16.mxu1 %vm3907_vm0, %v3906_v1 }
 0x101   : > { %3519 = vmatprep.mubr.msk.bf16.mxu0 %vm3907_vm0, %v3906_v1 }
 0x107   : > { %3348 = vmatmul.mubr.bf16.vlgmr.msra.gmra.mrb[16].mxu1 %v3879_v44 }
 0x108   : > { %3520 = vmatmul.mubr.bf16.gmra.mrb[12].mxu0 %v2197_v29  ;;  %3351 = vmatprep.mubr.msk.bf16.mxu1 %vm3907_vm0, %v3906_v1 }
 0x109   : > { %3523 = vmatprep.mubr.msk.bf16.mxu0 %vm3907_vm0, %v3906_v1 }
 0x10f   : > { %3352 = vmatmul.mubr.bf16.gmra.mrb[20].mxu1 %v3880_v61 }
 0x110   : > { %3524 = vmatmul.mubr.bf16.gmra.mrb[16].mxu0 %v2201_v43  ;;  %3355 = vmatprep.mubr.msk.bf16.mxu1 %vm3907_vm0, %v3906_v1 }
 0x111   : > { %3527 = vmatprep.mubr.msk.bf16.mxu0 %vm3907_vm0, %v3906_v1  ;;  %v2496_v22 = vpop.permute.xlu0 %2495 }
 0x112   : > { %v2502_v49 = vpop.permute.xlu1 %2501 }
 0x113   : > { %vm2538_vm9 = vcmp.eq.s32.totalorder %v2502_v49, 1 }
 0x115   : > { %v2499_v36 = vpop.permute.xlu0 %2498 }
 0x116   : > { %vm2537_vm8 = vcmp.eq.s32.totalorder %v2499_v36, 1 }
 0x117   : > { %3356 = vmatmul.mubr.bf16.gmra.mrb[24].mxu1 %v3881_v17 }
 0x118   : > { %3528 = vmatmul.mubr.bf16.gmra.mrb[20].mxu0 %v2205_v30 }
 0x119   : > { %3531 = vmatprep.mubr.msk.bf16.mxu0 %vm3907_vm0, %v3906_v1  ;;  %vm2536_vm0 = vcmp.eq.s32.totalorder %v2496_v22, 1 }
 0x11a   : > { %v2505_v43 = vpop.permute.xlu1 %2504 }
 0x11b   : > { %vm2539_vm10 = vcmp.eq.s32.totalorder %v2505_v43, 1 }
 0x120   : > { %3532 = vmatmul.mubr.bf16.gmra.mrb[24].mxu0 %v2209_v0 }
 0x1a2   : > { %v1328_v56 = vpop.f32.mrb[0].mxu1 }
 0x1a3   : > { %v3289_v3 = vpop.f32.mrb[1].mxu1 }
 0x1a4   : > { %v1331_v4 = vpop.f32.mrb[2].mxu1 }
 0x1a5   : > { %v3290_v10 = vpop.f32.mrb[3].mxu1 }
 0x1aa   : > { %v1336_v11 = vpop.f32.mrb[4].mxu1 }
 0x1ab   : > { %v3293_v8 = vpop.f32.mrb[5].mxu1 }
 0x1ac   : > { %v1339_v13 = vpop.f32.mrb[6].mxu1 }
 0x1ad   : > { %v3294_v12 = vpop.f32.mrb[7].mxu1 }
 0x1ae   : > { %v2508_v12 = vpop.permute.xlu0 %2507 }
 0x1af   : > { %vm2540_vm12 = vcmp.eq.s32.totalorder %v2508_v12, 1 }
 0x1b2   : > { %v1344_v18 = vpop.f32.mrb[8].mxu1  ;;  %v2514_v42 = vpop.permute.xlu0 %2513 }
 0x1b3   : > { %v3297_v16 = vpop.f32.mrb[9].mxu1  ;;  %vm2542_vm14 = vcmp.eq.s32.totalorder %v2514_v42, 1 }
 0x1b4   : > { %v1347_v20 = vpop.f32.mrb[10].mxu1 }
 0x1b5   : > { %v3298_v21 = vpop.f32.mrb[11].mxu1 }
 0x1ba   : > { %v4744_v5 = vpop.f32.mrb[12].mxu1 }
 0x1bb   : > { %v3301_v1 = vpop.f32.mrb[13].mxu1 }
 0x1bc   : > { %v4746_v25 = vpop.f32.mrb[14].mxu1  ;;  %v2994_v1 = vld [vmem:[%s4752_s12 + $0x18] sm:$0xff]  }
 0x1bd   : > { %v3302_v15 = vpop.f32.mrb[15].mxu1 }
 0x1c3   : > { %v2299_v27 = vpop.f32.mrb[0].mxu0 }
 0x1c4   : > { %v3551_v33 = vadd.f32 %v2299_v27, %v1328_v56  ;;  %v3509_v34 = vpop.f32.mrb[1].mxu0 }
 0x1c5   : > { %v2302_v9 = vpop.f32.mrb[2].mxu0  ;;  %v2943_v34 = vunpack.c.l.bf16 %v2994_v1 }
 0x1c6   : > { %v2375_v45 = vmul.f32 %v3551_v33, %v4757_v31  ;;  %v3552_v41 = vadd.f32 %v2302_v9, %v1331_v4  ;;  %v3510_v57 = vpop.f32.mrb[3].mxu0 }
 0x1c8   : > { %v2396_v35 = vadd.f32 %v4763_v14, %v2375_v45  ;;  %v2376_v26 = vmul.f32 %v3552_v41, %v4757_v31 }
 0x1ca   : > { %v2397_v39 = vadd.f32 %v4763_v14, %v2376_v26  ;;  %v2438_v40 = vadd.f32 %v2931_v47, %v2396_v35 }
 0x1cb   : > { %v2307_v48 = vpop.f32.mrb[4].mxu0 }
 0x1cc   : > { %v3553_v6 = vadd.f32 %v2307_v48, %v1336_v11  ;;  %v2439_v60 = vadd.f32 %v2932_v38, %v2397_v39  ;;  %v3513_v19 = vpop.f32.mrb[5].mxu0  ;;  %v2550_v51 = vsel %vm2536_vm0, %v2438_v40, 0.0  ;;  %v2940_v11 = vunpack.c.h.bf16 %v2993_v58 }
 0x1cd   : > { %v2310_v28 = vpop.f32.mrb[6].mxu0  ;;  %v2944_v40 = vunpack.c.h.bf16 %v2994_v1  ;;  %v2995_v19 = vld [vmem:[%s4752_s12 + $0x20] sm:$0xff]  }
 0x1ce   : > { %v2377_v52 = vmul.f32 %v3553_v6, %v4757_v31  ;;  %v2551_v53 = vsel %vm2537_vm8, %v2439_v60, 0.0  ;;  %v3554_v23 = vadd.f32 %v2310_v28, %v1339_v13  ;;  %v3514_v7 = vpop.f32.mrb[7].mxu0  ;;  %v2511_v13 = vpop.permute.xlu1 %2510 }
 0x1cf   : > { %v2960_v54 = vpack.c.bf16 %v2551_v53, %v2550_v51  ;;  %vm2541_vm11 = vcmp.eq.s32.totalorder %v2511_v13, 1  ;;  %v2947_v53 = vunpack.c.l.bf16 %v2995_v19 }
 0x1d0   : > { %v2398_v29 = vadd.f32 %v4763_v14, %v2377_v52  ;;  %v2378_v55 = vmul.f32 %v3554_v23, %v4757_v31 }
 0x1d1   : > { %2961 = vst [vmem:[%s4775_s17] sm:$0xff] %v2960_v54  }
 0x1d2   : > { %v2440_v44 = vadd.f32 %v2935_v50, %v2398_v29  ;;  %v2399_v24 = vadd.f32 %v4763_v14, %v2378_v55 }
 0x1d3   : > { %v2315_v37 = vpop.f32.mrb[8].mxu0 }
 0x1d4   : > { %v2441_v61 = vadd.f32 %v2936_v2, %v2399_v24  ;;  %v3555_v46 = vadd.f32 %v2315_v37, %v1344_v18  ;;  %v3517_v30 = vpop.f32.mrb[9].mxu0  ;;  %v2552_v17 = vsel %vm2538_vm9, %v2440_v44, 0.0  ;;  %v2948_v37 = vunpack.c.h.bf16 %v2995_v19 }
 0x1d5   : > { %v2318_v63 = vpop.f32.mrb[10].mxu0 }
 0x1d6   : > { %v2553_v62 = vsel %vm2539_vm10, %v2441_v61, 0.0  ;;  %v2379_v0 = vmul.f32 %v3555_v46, %v4757_v31  ;;  %v3556_v56 = vadd.f32 %v2318_v63, %v1347_v20  ;;  %v3518_v3 = vpop.f32.mrb[11].mxu0  ;;  %v2520_v46 = vpop.permute.xlu0 %2519 }
 0x1d7   : > { %v2965_v4 = vpack.c.bf16 %v2553_v62, %v2552_v17  ;;  %v2996_v17 = vld [vmem:[%s4752_s12 + $0x28] sm:$0xff]   ;;  %vm2544_vm1 = vcmp.eq.s32.totalorder %v2520_v46, 1 }
 0x1d8   : > { %v2400_v10 = vadd.f32 %v4763_v14, %v2379_v0  ;;  %v2380_v8 = vmul.f32 %v3556_v56, %v4757_v31 }
 0x1d9   : > { %2998 = vst [vmem:[%s4775_s17 + $0x8] sm:$0xff] %v2965_v4  }
 0x1da   : > { %v2442_v18 = vadd.f32 %v2939_v59, %v2400_v10  ;;  %v2401_v16 = vadd.f32 %v4763_v14, %v2380_v8  ;;  %v1527_v21 = vpop.f32.mrb[16].mxu1 }
 0x1db   : > { %v2323_v15 = vpop.f32.mrb[12].mxu0  ;;  %v3349_v22 = vpop.f32.mrb[17].mxu1 }
 0x1dc   : > { %v2443_v20 = vadd.f32 %v2940_v11, %v2401_v16  ;;  %v3557_v27 = vadd.f32 %v2323_v15, %v4744_v5  ;;  %v3521_v32 = vpop.f32.mrb[13].mxu0  ;;  %v1530_v33 = vpop.f32.mrb[18].mxu1  ;;  %v2554_v41 = vsel %vm2540_vm12, %v2442_v18, 0.0  ;;  %v2951_v11 = vunpack.c.l.bf16 %v2996_v17 }
 0x1dd   : > { %v2326_v9 = vpop.f32.mrb[14].mxu0  ;;  %v3350_v45 = vpop.f32.mrb[19].mxu1 }
 0x1de   : > { %v2555_v57 = vsel %vm2541_vm11, %v2443_v20, 0.0  ;;  %v2381_v47 = vmul.f32 %v3557_v27, %v4757_v31  ;;  %v3558_v35 = vadd.f32 %v2326_v9, %v4746_v25  ;;  %v3522_v26 = vpop.f32.mrb[15].mxu0  ;;  %v2517_v5 = vpop.permute.xlu1 %2516  ;;  %v2952_v27 = vunpack.c.h.bf16 %v2996_v17 }
 0x1df   : > { %v2970_v36 = vpack.c.bf16 %v2555_v57, %v2554_v41  ;;  %vm2543_vm13 = vcmp.eq.s32.totalorder %v2517_v5, 1  ;;  %v2526_v41 = vpop.permute.xlu0 %2525 }
 0x1e0   : > { %v2402_v38 = vadd.f32 %v4763_v14, %v2381_v47  ;;  %v2382_v39 = vmul.f32 %v3558_v35, %v4757_v31  ;;  %vm2546_vm4 = vcmp.eq.s32.totalorder %v2526_v41, 1 }
 0x1e1   : > { %2999 = vst [vmem:[%s4775_s17 + $0x10] sm:$0xff] %v2970_v36  }
 0x1e2   : > { %v2444_v48 = vadd.f32 %v2943_v34, %v2402_v38  ;;  %v2403_v6 = vadd.f32 %v4763_v14, %v2382_v39  ;;  %v1535_v60 = vpop.f32.mrb[20].mxu1  ;;  %v2523_v61 = vpop.permute.xlu1 %2522  ;;  %v2997_v34 = vld [vmem:[%s4752_s12 + $0x30] sm:$0xff]  }
 0x1e3   : > { %v2331_v49 = vpop.f32.mrb[16].mxu0  ;;  %v3353_v50 = vpop.f32.mrb[21].mxu1  ;;  %vm2545_vm15 = vcmp.eq.s32.totalorder %v2523_v61, 1  ;;  %v2955_v26 = vunpack.c.l.bf16 %v2997_v34  ;;  %v2956_v19 = vunpack.c.h.bf16 %v2997_v34 }
 0x1e4   : > { %v2445_v25 = vadd.f32 %v2944_v40, %v2403_v6  ;;  %v3559_v28 = vadd.f32 %v2331_v49, %v1527_v21  ;;  %v3525_v51 = vpop.f32.mrb[17].mxu0  ;;  %v1538_v52 = vpop.f32.mrb[22].mxu1  ;;  %v2556_v54 = vsel %vm2542_vm14, %v2444_v48, 0.0 }
 0x1e5   : > { %v2334_v23 = vpop.f32.mrb[18].mxu0  ;;  %v3354_v7 = vpop.f32.mrb[23].mxu1 }
 0x1e6   : > { %v2557_v29 = vsel %vm2543_vm13, %v2445_v25, 0.0  ;;  %v2383_v55 = vmul.f32 %v3559_v28, %v4757_v31  ;;  %v3560_v2 = vadd.f32 %v2334_v23, %v1530_v33  ;;  %v3526_v44 = vpop.f32.mrb[19].mxu0  ;;  %v2529_v9 = vpop.permute.xlu1 %2528 }
 0x1e7   : > { %v2975_v24 = vpack.c.bf16 %v2557_v29, %v2556_v54  ;;  %vm2547_vm2 = vcmp.eq.s32.totalorder %v2529_v9, 1  ;;  %v2532_v50 = vpop.permute.xlu0 %2531 }
 0x1e8   : > { %v2404_v43 = vadd.f32 %v4763_v14, %v2383_v55  ;;  %v2384_v58 = vmul.f32 %v3560_v2, %v4757_v31  ;;  %vm2548_vm7 = vcmp.eq.s32.totalorder %v2532_v50, 1 }
 0x1e9   : > { %3000 = vst [vmem:[%s4775_s17 + $0x18] sm:$0xff] %v2975_v24  }
 0x1ea   : > { %v2446_v30 = vadd.f32 %v2947_v53, %v2404_v43  ;;  %v2405_v59 = vadd.f32 %v4763_v14, %v2384_v58  ;;  %v1543_v63 = vpop.f32.mrb[24].mxu1  ;;  %v2535_v49 = vpop.permute.xlu1 %2534 }
 0x1eb   : > { %v2339_v62 = vpop.f32.mrb[20].mxu0  ;;  %v3357_v0 = vpop.f32.mrb[25].mxu1  ;;  %vm2549_vm5 = vcmp.eq.s32.totalorder %v2535_v49, 1 }
 0x1ec   : > { %v2447_v56 = vadd.f32 %v2948_v37, %v2405_v59  ;;  %v3561_v3 = vadd.f32 %v2339_v62, %v1535_v60  ;;  %v3529_v4 = vpop.f32.mrb[21].mxu0  ;;  %v1546_v10 = vpop.f32.mrb[26].mxu1  ;;  %v2558_v12 = vsel %vm2544_vm1, %v2446_v30, 0.0 }
 0x1ed   : > { %v2342_v8 = vpop.f32.mrb[22].mxu0  ;;  %v3358_v13 = vpop.f32.mrb[27].mxu1 }
 0x1ee   : > { %v2559_v18 = vsel %vm2545_vm15, %v2447_v56, 0.0  ;;  %v2385_v16 = vmul.f32 %v3561_v3, %v4757_v31  ;;  %v3562_v21 = vadd.f32 %v2342_v8, %v1538_v52  ;;  %v3530_v1 = vpop.f32.mrb[23].mxu0 }
 0x1ef   : > { %v2980_v15 = vpack.c.bf16 %v2559_v18, %v2558_v12 }
 0x1f0   : > { %v2406_v22 = vadd.f32 %v4763_v14, %v2385_v16  ;;  %v2386_v20 = vmul.f32 %v3562_v21, %v4757_v31 }
 0x1f1   : > { %3001 = vst [vmem:[%s4775_s17 + $0x20] sm:$0xff] %v2980_v15  }
 0x1f2   : > { %v2448_v32 = vadd.f32 %v2951_v11, %v2406_v22  ;;  %v2407_v33 = vadd.f32 %v4763_v14, %v2386_v20 }
 0x1f3   : > { %v2347_v45 = vpop.f32.mrb[24].mxu0 }
 0x1f4   : > { %v2449_v57 = vadd.f32 %v2952_v27, %v2407_v33  ;;  %v3563_v47 = vadd.f32 %v2347_v45, %v1543_v63  ;;  %v3533_v35 = vpop.f32.mrb[25].mxu0  ;;  %v2560_v38 = vsel %vm2546_vm4, %v2448_v32, 0.0 }
 0x1f5   : > { %v2350_v36 = vpop.f32.mrb[26].mxu0 }
 0x1f6   : > { %v2561_v39 = vsel %vm2547_vm2, %v2449_v57, 0.0  ;;  %v2387_v40 = vmul.f32 %v3563_v47, %v4757_v31  ;;  %v3564_v5 = vadd.f32 %v2350_v36, %v1546_v10  ;;  %v3534_v42 = vpop.f32.mrb[27].mxu0 }
 0x1f7   : > { %v2985_v48 = vpack.c.bf16 %v2561_v39, %v2560_v38 }
 0x1f8   : > { %v2408_v6 = vadd.f32 %v4763_v14, %v2387_v40  ;;  %v2388_v60 = vmul.f32 %v3564_v5, %v4757_v31 }
 0x1f9   : > { %3002 = vst [vmem:[%s4775_s17 + $0x28] sm:$0xff] %v2985_v48  }
 0x1fa   : > { %v2450_v25 = vadd.f32 %v2955_v26, %v2408_v6  ;;  %v2409_v28 = vadd.f32 %v4763_v14, %v2388_v60 }
 0x1fc   : > { %v2451_v51 = vadd.f32 %v2956_v19, %v2409_v28  ;;  %v2562_v52 = vsel %vm2548_vm7, %v2450_v25, 0.0 }
 0x1fe   : > { %v2563_v53 = vsel %vm2549_vm5, %v2451_v51, 0.0 }
 0x1ff   : > { %v2990_v23 = vpack.c.bf16 %v2563_v53, %v2562_v52 }
 0x201   : > { %3003 = vst [vmem:[%s4775_s17 + $0x30] sm:$0xff] %v2990_v23  }
 0x202 PF: > { %s18_s29 = sadd.s32 1, %s3904_s29   ;;  %s4832_s27 = smov %s3900_s28 }
 0x203   : > { %p15_p9 = scmp.ge.s32.totalorder %s18_s29, 4   ;;  %s4833_s28 = smov %s4835_s30 }
 0x205   :  { %17 = sbr.rel (!%p15_p9) target bundleno = 2 (0x2), region = 103 }

// kernel: encoder_forward.10
= control target key start
LH: loop header
LB: loop body
LE: loop exit
PB: predicated region body
PF: predicated region fallthrough
CT: control target
= control target key end

     0   :  { %s1300_s27 = smov 0   ;;  %s1302_s28 = smov 0   ;;  %s1442_s0 = inlined_call_operand.vmem [shape: bf16[96,128], index: 0, kind: input, shape index: {}]   ;;  %s1443_s1 = inlined_call_operand.vmem [shape: bf16[128,128], index: 1, kind: input, shape index: {}]   ;;  %s1444_s2 = inlined_call_operand.vmem [shape: f32[1,128], index: 2, kind: input, shape index: {}]   ;;  %s1445_s3 = inlined_call_operand.vmem [shape: f32[1,128], index: 3, kind: input, shape index: {}]   ;;  %s1446_s4 = inlined_call_operand.vmem [shape: f32[96,1], index: 4, kind: input, shape index: {}]   ;;  %s1447_s5 = inlined_call_operand.vmem [shape: f32[1,128], index: 5, kind: input, shape index: {}]   ;;  %s1448_s6 = inlined_call_operand.vmem [shape: f32[1,128], index: 6, kind: input, shape index: {}]   ;;  %s1449_s7 = inlined_call_operand.vmem [shape: bf16[96,128], index: 7, kind: output, shape index: {0}]   ;;  %s1450_s8 = inlined_call_operand.vmem [shape: bf16[96,128], index: 8, kind: output, shape index: {1}]  }
   0x1   :  { %s1304_s29 = smov 0  }
   0x2 LB: > { %s38_s30 = sadd.s32 1, %s1246_s28  ;;  %p1053_p0 = scmp.ge.s32.totalorder %s1250_s29, 1  ;;  %s1250_s29 = sphi %s1304_s29, %s19_s29   ;;  %s1246_s28 = sphi %s1302_s28, %s1452_s28   ;;  %s1242_s27 = sphi %s1300_s27, %s1451_s27  }
   0x3   : > { %p40_p1 = scmp.ge.s32.totalorder %s38_s30, 2  ;;  %p353_p2 = scmp.lt.s32.totalorder %s1250_s29, 3 }
   0x5   : > { %s1454_s30 = smov (%p40_p1, %s38_s30), 0  ;;  %p354_p3 = pnand %p1053_p0, %p353_p2 }
   0x6   : > { %v1217_v0 = vld [vmem:[%s1443_s1] sm:$0xff] (!%p354_p3)   ;;  %v1252_v1 = vmov (!%p354_p3), 0.0   ;;  %v1218_v2 = vld [vmem:[%s1443_s1 + $0x8] sm:$0xff] (!%p354_p3)   ;;  %s426_s13 = smul.u32 (!%p354_p3), 6, %s1242_s27  ;;  %vm1253_vm0 = vmmov (!%p354_p3), 0   ;;  %v1254_v3 = vmov (!%p354_p3), 0  }
   0x7   : > { %357 = sbr.rel (%p354_p3) target bundleno = 277 (0x115), region = 48  ;;  %1144 = vmatprep.subr.bf16.mxu0 (!%p354_p3), %v1252_v1  ;;  %1172 = vmatprep.subr.bf16.mxu1 (!%p354_p3), %v1252_v1  ;;  %v1219_v4 = vld [vmem:[%s1443_s1 + $0x10] sm:$0xff] (!%p354_p3)   ;;  %v1220_v5 = vld [vmem:[%s1443_s1 + $0x18] sm:$0xff] (!%p354_p3)   ;;  %v1221_v9 = vld [vmem:[%s1443_s1 + $0x20] sm:$0xff] (!%p354_p3)  }
   0x8   : > { %1145 = vmatpush3.bf16.msra.mxu0 (!%p354_p3), %v1217_v0  ;;  %1180 = vmatpush3.bf16.msra.mxu1 (!%p354_p3), %v1217_v0  ;;  %p427_p4 = scmp.lt.s32.totalorder (!%p354_p3), %s426_s13, 11  ;;  %v1222_v17 = vld [vmem:[%s1443_s1 + $0x28] sm:$0xff] (!%p354_p3)   ;;  %v1223_v20 = vld [vmem:[%s1443_s1 + $0x30] sm:$0xff] (!%p354_p3)   ;;  %v1224_v21 = vld [vmem:[%s1443_s1 + $0x38] sm:$0xff] (!%p354_p3)  }
   0x9   : > { %1146 = vmatprep.subr.bf16.mxu0 (!%p354_p3), %v1252_v1  ;;  %1173 = vmatprep.subr.bf16.mxu1 (!%p354_p3), %v1252_v1  ;;  %v1069_v27 = vld [vmem:[%s1444_s2] ss:$0 sm:$0xff] (!%p354_p3) }
   0xa   : > { %1160 = vmatprep.mubr.msk.bf16.mxu0 (!%p354_p3), %vm1253_vm0, %v1252_v1  ;;  %1164 = vmatprep.mubr.msk.bf16.mxu1 (!%p354_p3), %vm1253_vm0, %v1252_v1  ;;  %v1070_v31 = vld [vmem:[%s1445_s3] ss:$0 sm:$0xff] (!%p354_p3) }
   0xb   : > { %1216 = vset.pattern.permute.xlu1 (!%p354_p3), %v1254_v3  ;;  %1215 = vset.pattern.permute.xlu0 (!%p354_p3), %v1254_v3  ;;  %v1077_v37 = vld [vmem:[%s1447_s5] ss:$0 sm:$0xff] (!%p354_p3) }
   0xc   : > { %1147 = vmatpush3.bf16.msra.mxu0 (!%p354_p3), %v1218_v2  ;;  %1181 = vmatpush3.bf16.msra.mxu1 (!%p354_p3), %v1218_v2  ;;  %v1078_v46 = vld [vmem:[%s1448_s6] ss:$0 sm:$0xff] (!%p354_p3) }
   0xd   : > { %1148 = vmatprep.subr.bf16.mxu0 (!%p354_p3), %v1252_v1  ;;  %1174 = vmatprep.subr.bf16.mxu1 (!%p354_p3), %v1252_v1 }
   0xe   : > { %s1456_s13 = smov (!%p427_p4, %s426_s13), 11 }
   0xf   : > { %s1340_s16 = sshll.u32 %s1456_s13, 2  ;;  %s1055_s17 = sshll.u32 %s1456_s13, 3 }
  0x10   : > { %s1346_s20 = scalar_lea.vmem %s1442_s0, %s1340_s16  ;;  %1149 = vmatpush3.bf16.msra.mxu0 %v1219_v4  ;;  %1182 = vmatpush3.bf16.msra.mxu1 %v1219_v4  ;;  %s454_s25 = scalar_lea.vmem %s1446_s4, %s1055_s17 }
  0x11   : > { %1150 = vmatprep.subr.bf16.mxu0 %v1252_v1  ;;  %1175 = vmatprep.subr.bf16.mxu1 %v1252_v1  ;;  %v691_v6 = vld [vmem:[%s454_s25 + $0x10] sm:$0xff]  ;;  %v689_v7 = vld [vmem:[%s454_s25] sm:$0xff]  ;;  %v692_v8 = vld [vmem:[%s454_s25 + $0x18] sm:$0xff]  ;;  %s1411_s26 = scalar_lea.vmem %s1449_s7, %s1340_s16  ;;  %s478_s10 = scalar_lea.vmem %s1450_s8, %s1340_s16 }
  0x12   : > { %vm697_vm1 = vcmp.gt.f32.partialorder %v691_v6, 0.0  ;;  %vm695_vm2 = vcmp.gt.f32.partialorder %v689_v7, 0.0  ;;  %vm698_vm3 = vcmp.gt.f32.partialorder %v692_v8, 0.0  ;;  %v690_v10 = vld [vmem:[%s454_s25 + $0x8] sm:$0xff]  ;;  %v693_v13 = vld [vmem:[%s454_s25 + $0x20] sm:$0xff]  ;;  %v1227_v24 = vld [vmem:[%s1346_s20 + $0x10] sm:$0xff]  }
  0x13   : > { %v703_v11 = vsel %vm697_vm1, 1, %v1254_v3  ;;  %v701_v12 = vsel %vm695_vm2, 1, %v1254_v3  ;;  %vm696_vm4 = vcmp.gt.f32.partialorder %v690_v10, 0.0  ;;  %v694_v14 = vld [vmem:[%s454_s25 + $0x28] sm:$0xff]  ;;  %v704_v15 = vsel %vm698_vm3, 1, %v1254_v3  ;;  %v1225_v22 = vld [vmem:[%s1346_s20] sm:$0xff]  }
  0x14   : > { %1151 = vmatpush3.bf16.msra.mxu0 %v1220_v5  ;;  %1183 = vmatpush3.bf16.msra.mxu1 %v1220_v5  ;;  %v702_v16 = vsel %vm696_vm4, 1, %v1254_v3  ;;  %vm699_vm5 = vcmp.gt.f32.partialorder %v693_v13, 0.0  ;;  %vm700_vm6 = vcmp.gt.f32.partialorder %v694_v14, 0.0  ;;  %v1226_v23 = vld [vmem:[%s1346_s20 + $0x8] sm:$0xff]  }
  0x15   : > { %1152 = vmatprep.subr.bf16.mxu0 %v1252_v1  ;;  %1176 = vmatprep.subr.bf16.mxu1 %v1252_v1  ;;  %v705_v18 = vsel %vm699_vm5, 1, %v1254_v3  ;;  %v706_v19 = vsel %vm700_vm6, 1, %v1254_v3 }
  0x16   : > { %714 = vperm.xlu1 %1216, %v703_v11   ;;  %708 = vperm.xlu0 %1215, %v701_v12  }
  0x18   : > { %1153 = vmatpush3.bf16.msra.mxu0 %v1221_v9  ;;  %1184 = vmatpush3.bf16.msra.mxu1 %v1221_v9 }
  0x19   : > { %1154 = vmatprep.subr.bf16.mxu0 %v1252_v1  ;;  %1177 = vmatprep.subr.bf16.mxu1 %v1252_v1 }
  0x1a   : > { %717 = vperm.xlu1 %1216, %v704_v15   ;;  %711 = vperm.xlu0 %1215, %v702_v16  }
  0x1c   : > { %1155 = vmatpush3.bf16.msra.mxu0 %v1222_v17  ;;  %1185 = vmatpush3.bf16.msra.mxu1 %v1222_v17 }
  0x1d   : > { %1156 = vmatprep.subr.bf16.mxu0 %v1252_v1  ;;  %1178 = vmatprep.subr.bf16.mxu1 %v1252_v1 }
  0x1e   : > { %720 = vperm.xlu0 %1215, %v705_v18   ;;  %723 = vperm.xlu1 %1216, %v706_v19  }
  0x20   : > { %1157 = vmatpush3.bf16.msra.mxu0 %v1223_v20  ;;  %1186 = vmatpush3.bf16.msra.mxu1 %v1223_v20 }
  0x21   : > { %1158 = vmatprep.subr.bf16.mxu0 %v1252_v1  ;;  %1179 = vmatprep.subr.bf16.mxu1 %v1252_v1 }
  0x24   : > { %1159 = vmatpush3.bf16.msra.mxu0 %v1224_v21  ;;  %1187 = vmatpush3.bf16.msra.mxu1 %v1224_v21 }
  0x27   : > { %1161 = vmatmul.mubr.bf16.vlgmr.msra.gmra.mrb[0].mxu0 %v1225_v22  ;;  %1165 = vmatmul.mubr.bf16.vlgmr.msra.gmra.mrb[0].mxu1 %v1226_v23 }
  0x28   : > { %1168 = vmatprep.mubr.msk.bf16.mxu1 %vm1253_vm0, %v1252_v1 }
  0x2f   : > { %1169 = vmatmul.mubr.bf16.gmra.mrb[4].mxu1 %v1227_v24 }
  0x95   : > { %v1381_v25 = vpop.permute.xlu1 %714  ;;  %v709_v26 = vpop.permute.xlu0 %708 }
  0x96   : > { %vm725_vm7 = vcmp.eq.s32.totalorder %v709_v26, 1  ;;  %vm727_vm8 = vcmp.eq.s32.totalorder %v1381_v25, 1 }
  0x99   : > { %v1386_v28 = vpop.permute.xlu1 %717  ;;  %v1388_v29 = vpop.permute.xlu0 %711 }
  0x9a   : > { %vm726_vm9 = vcmp.eq.s32.totalorder %v1388_v29, 1  ;;  %vm728_vm10 = vcmp.eq.s32.totalorder %v1386_v28, 1 }
  0x9d   : > { %v721_v61 = vpop.permute.xlu0 %720  ;;  %v724_v3 = vpop.permute.xlu1 %723 }
  0x9e   : > { %vm729_vm11 = vcmp.eq.s32.totalorder %v721_v61, 1  ;;  %vm730_vm12 = vcmp.eq.s32.totalorder %v724_v3, 1 }
  0xfa   : > { %v619_v30 = vpop.f32.mrb[0].mxu0  ;;  %v627_v32 = vpop.f32.mrb[0].mxu1 }
  0xfb   : > { %v670_v33 = vmul.f32 %v1069_v27, %v619_v30  ;;  %v672_v34 = vmul.f32 %v1069_v27, %v627_v32  ;;  %v1162_v35 = vpop.f32.mrb[1].mxu0  ;;  %v1166_v36 = vpop.f32.mrb[1].mxu1 }
  0xfc   : > { %v622_v38 = vpop.f32.mrb[2].mxu0  ;;  %v630_v39 = vpop.f32.mrb[2].mxu1 }
  0xfd   : > { %v683_v40 = vadd.f32 %v1070_v31, %v670_v33  ;;  %v685_v41 = vadd.f32 %v1070_v31, %v672_v34  ;;  %v671_v42 = vmul.f32 %v1069_v27, %v622_v38  ;;  %v673_v43 = vmul.f32 %v1069_v27, %v630_v39  ;;  %v1167_v44 = vpop.f32.mrb[3].mxu1  ;;  %v1163_v45 = vpop.f32.mrb[3].mxu0 }
  0xff   : > { %v774_v47 = vmul.f32 %v1077_v37, %v683_v40  ;;  %v776_v48 = vmul.f32 %v1077_v37, %v685_v41  ;;  %v684_v49 = vadd.f32 %v1070_v31, %v671_v42  ;;  %v686_v50 = vadd.f32 %v1070_v31, %v673_v43 }
 0x100   : > { %v731_v51 = vsel %vm725_vm7, %v683_v40, 0.0  ;;  %v733_v56 = vsel %vm727_vm8, %v685_v41, 0.0 }
 0x101   : > { %v789_v52 = vadd.f32 %v1078_v46, %v776_v48  ;;  %v775_v53 = vmul.f32 %v1077_v37, %v684_v49  ;;  %v787_v54 = vadd.f32 %v1078_v46, %v774_v47  ;;  %v732_v55 = vsel %vm726_vm9, %v684_v49, 0.0 }
 0x102   : > { %v777_v57 = vmul.f32 %v1077_v37, %v686_v50  ;;  %v734_v58 = vsel %vm728_vm10, %v686_v50, 0.0  ;;  %v1102_v59 = vpack.c.bf16 %v732_v55, %v731_v51  ;;  %v635_v60 = vpop.f32.mrb[4].mxu1 }
 0x103   : > { %v795_v62 = vmul.f32 0.01, %v789_v52  ;;  %v793_v63 = vmul.f32 0.01, %v787_v54  ;;  %v1107_v0 = vpack.c.bf16 %v734_v58, %v733_v56  ;;  %v788_v1 = vadd.f32 %v1078_v46, %v775_v53  ;;  %v1170_v2 = vpop.f32.mrb[5].mxu1 }
 0x104   : > { %v790_v4 = vadd.f32 %v1078_v46, %v777_v57  ;;  %1103 = vst [vmem:[%s1411_s26] sm:$0xff] %v1102_v59   ;;  %v674_v5 = vmul.f32 %v1069_v27, %v635_v60  ;;  %v638_v6 = vpop.f32.mrb[6].mxu1 }
 0x105   : > { %v801_v7 = vmax.f32 %v789_v52, %v795_v62  ;;  %v799_v8 = vmax.f32 %v787_v54, %v793_v63  ;;  %1129 = vst [vmem:[%s1411_s26 + $0x8] sm:$0xff] %v1107_v0   ;;  %v794_v9 = vmul.f32 0.01, %v788_v1  ;;  %v675_v10 = vmul.f32 %v1069_v27, %v638_v6  ;;  %v1171_v11 = vpop.f32.mrb[7].mxu1 }
 0x106   : > { %v796_v12 = vmul.f32 0.01, %v790_v4  ;;  %v687_v13 = vadd.f32 %v1070_v31, %v674_v5 }
 0x107   : > { %v805_v14 = vsel %vm725_vm7, %v799_v8, 0.0  ;;  %v800_v15 = vmax.f32 %v788_v1, %v794_v9  ;;  %v688_v16 = vadd.f32 %v1070_v31, %v675_v10  ;;  %v807_v17 = vsel %vm727_vm8, %v801_v7, 0.0 }
 0x108   : > { %v802_v18 = vmax.f32 %v790_v4, %v796_v12  ;;  %v778_v19 = vmul.f32 %v1077_v37, %v687_v13  ;;  %v735_v22 = vsel %vm729_vm11, %v687_v13, 0.0 }
 0x109   : > { %v806_v20 = vsel %vm726_vm9, %v800_v15, 0.0  ;;  %v779_v21 = vmul.f32 %v1077_v37, %v688_v16  ;;  %v736_v23 = vsel %vm730_vm12, %v688_v16, 0.0 }
 0x10a   : > { %v808_v24 = vsel %vm728_vm10, %v802_v18, 0.0  ;;  %v1117_v25 = vpack.c.bf16 %v806_v20, %v805_v14  ;;  %v791_v26 = vadd.f32 %v1078_v46, %v778_v19  ;;  %v1112_v27 = vpack.c.bf16 %v736_v23, %v735_v22 }
 0x10b   : > { %v1122_v30 = vpack.c.bf16 %v808_v24, %v807_v17  ;;  %v792_v31 = vadd.f32 %v1078_v46, %v779_v21 }
 0x10c   : > { %1118 = vst [vmem:[%s478_s10] sm:$0xff] %v1117_v25   ;;  %v797_v32 = vmul.f32 0.01, %v791_v26  ;;  %1130 = vst [vmem:[%s1411_s26 + $0x10] sm:$0xff] %v1112_v27  }
 0x10d   : > { %1131 = vst [vmem:[%s478_s10 + $0x8] sm:$0xff] %v1122_v30   ;;  %v798_v33 = vmul.f32 0.01, %v792_v31 }
 0x10e   : > { %v803_v29 = vmax.f32 %v791_v26, %v797_v32 }
 0x10f   : > { %v804_v34 = vmax.f32 %v792_v31, %v798_v33 }
 0x110   : > { %v809_v35 = vsel %vm729_vm11, %v803_v29, 0.0 }
 0x111   : > { %v810_v36 = vsel %vm730_vm12, %v804_v34, 0.0 }
 0x112   : > { %v1127_v37 = vpack.c.bf16 %v810_v36, %v809_v35 }
 0x114   : > { %1132 = vst [vmem:[%s478_s10 + $0x10] sm:$0xff] %v1127_v37  }
 0x115 PF: > { %s19_s29 = sadd.s32 1, %s1250_s29   ;;  %s1451_s27 = smov %s1246_s28 }
 0x116   : > { %p16_p5 = scmp.ge.s32.totalorder %s19_s29, 4   ;;  %s1452_s28 = smov %s1454_s30 }
 0x118   :  { %18 = sbr.rel (!%p16_p5) target bundleno = 2 (0x2), region = 116 }

// kernel: encoder_forward.13
= control target key start
LH: loop header
LB: loop body
LE: loop exit
PB: predicated region body
PF: predicated region fallthrough
CT: control target
= control target key end

     0   :  { %s806_s15 = smov 0   ;;  %s808_s16 = smov 0   ;;  %s881_s0 = inlined_call_operand.vmem [shape: bf16[96,128], index: 0, kind: input, shape index: {}]   ;;  %s882_s1 = inlined_call_operand.vmem [shape: bf16[128,128], index: 1, kind: input, shape index: {}]   ;;  %s883_s2 = inlined_call_operand.vmem [shape: f32[1,128], index: 2, kind: input, shape index: {}]   ;;  %s884_s3 = inlined_call_operand.vmem [shape: f32[1,128], index: 3, kind: input, shape index: {}]   ;;  %s885_s4 = inlined_call_operand.vmem [shape: f32[96,128], index: 4, kind: output, shape index: {}]  }
   0x1   :  { %s810_s17 = smov 0  }
   0x2 LB: > { %s33_s18 = sadd.s32 1, %s773_s16  ;;  %p645_p0 = scmp.ge.s32.totalorder %s777_s17, 1  ;;  %s777_s17 = sphi %s810_s17, %s14_s17   ;;  %s773_s16 = sphi %s808_s16, %s887_s16   ;;  %s769_s15 = sphi %s806_s15, %s886_s15  }
   0x3   : > { %p35_p1 = scmp.ge.s32.totalorder %s33_s18, 2  ;;  %p221_p2 = scmp.lt.s32.totalorder %s777_s17, 3 }
   0x5   : > { %s889_s18 = smov (%p35_p1, %s33_s18), 0  ;;  %p222_p3 = pnand %p645_p0, %p221_p2 }
   0x6   : > { %v744_v0 = vld [vmem:[%s882_s1] sm:$0xff] (!%p222_p3)   ;;  %v779_v1 = vmov (!%p222_p3), 0.0   ;;  %v745_v2 = vld [vmem:[%s882_s1 + $0x8] sm:$0xff] (!%p222_p3)   ;;  %s267_s23 = smul.u32 (!%p222_p3), 6, %s769_s15  ;;  %vm780_vm0 = vmmov (!%p222_p3), 0   ;;  %v746_v3 = vld [vmem:[%s882_s1 + $0x10] sm:$0xff] (!%p222_p3)  }
   0x7   : > { %225 = sbr.rel (%p222_p3) target bundleno = 266 (0x10a), region = 36  ;;  %702 = vmatprep.subr.bf16.mxu1 (!%p222_p3), %v779_v1  ;;  %674 = vmatprep.subr.bf16.mxu0 (!%p222_p3), %v779_v1  ;;  %v747_v4 = vld [vmem:[%s882_s1 + $0x18] sm:$0xff] (!%p222_p3)   ;;  %v748_v5 = vld [vmem:[%s882_s1 + $0x20] sm:$0xff] (!%p222_p3)   ;;  %v749_v6 = vld [vmem:[%s882_s1 + $0x28] sm:$0xff] (!%p222_p3)  }
   0x8   : > { %710 = vmatpush3.bf16.msra.mxu1 (!%p222_p3), %v744_v0  ;;  %675 = vmatpush3.bf16.msra.mxu0 (!%p222_p3), %v744_v0  ;;  %p268_p4 = scmp.lt.s32.totalorder (!%p222_p3), %s267_s23, 11  ;;  %v750_v7 = vld [vmem:[%s882_s1 + $0x30] sm:$0xff] (!%p222_p3)   ;;  %v751_v8 = vld [vmem:[%s882_s1 + $0x38] sm:$0xff] (!%p222_p3)   ;;  %v659_v12 = vld [vmem:[%s883_s2] ss:$0 sm:$0xff] (!%p222_p3) }
   0x9   : > { %703 = vmatprep.subr.bf16.mxu1 (!%p222_p3), %v779_v1  ;;  %676 = vmatprep.subr.bf16.mxu0 (!%p222_p3), %v779_v1  ;;  %v660_v14 = vld [vmem:[%s884_s3] ss:$0 sm:$0xff] (!%p222_p3) }
   0xa   : > { %694 = vmatprep.mubr.msk.bf16.mxu1 (!%p222_p3), %vm780_vm0, %v779_v1  ;;  %690 = vmatprep.mubr.msk.bf16.mxu0 (!%p222_p3), %vm780_vm0, %v779_v1 }
   0xc   : > { %711 = vmatpush3.bf16.msra.mxu1 (!%p222_p3), %v745_v2  ;;  %677 = vmatpush3.bf16.msra.mxu0 (!%p222_p3), %v745_v2 }
   0xd   : > { %704 = vmatprep.subr.bf16.mxu1 (!%p222_p3), %v779_v1  ;;  %678 = vmatprep.subr.bf16.mxu0 (!%p222_p3), %v779_v1 }
   0xe   : > { %s891_s23 = smov (!%p268_p4, %s267_s23), 11 }
   0xf   : > { %s646_s26 = sshll.u32 %s891_s23, 2  ;;  %s647_s19 = sshll.u32 %s891_s23, 3 }
  0x10   : > { %s841_s29 = scalar_lea.vmem %s881_s0, %s646_s26  ;;  %712 = vmatpush3.bf16.msra.mxu1 %v746_v3  ;;  %679 = vmatpush3.bf16.msra.mxu0 %v746_v3  ;;  %s298_s25 = scalar_lea.vmem %s885_s4, %s647_s19 }
  0x11   : > { %705 = vmatprep.subr.bf16.mxu1 %v779_v1  ;;  %680 = vmatprep.subr.bf16.mxu0 %v779_v1  ;;  %v752_v9 = vld [vmem:[%s841_s29 + $0x8] sm:$0xff]   ;;  %v753_v10 = vld [vmem:[%s841_s29] sm:$0xff]   ;;  %v754_v11 = vld [vmem:[%s841_s29 + $0x10] sm:$0xff]  }
  0x14   : > { %713 = vmatpush3.bf16.msra.mxu1 %v747_v4  ;;  %681 = vmatpush3.bf16.msra.mxu0 %v747_v4 }
  0x15   : > { %706 = vmatprep.subr.bf16.mxu1 %v779_v1  ;;  %682 = vmatprep.subr.bf16.mxu0 %v779_v1 }
  0x18   : > { %714 = vmatpush3.bf16.msra.mxu1 %v748_v5  ;;  %683 = vmatpush3.bf16.msra.mxu0 %v748_v5 }
  0x19   : > { %707 = vmatprep.subr.bf16.mxu1 %v779_v1  ;;  %684 = vmatprep.subr.bf16.mxu0 %v779_v1 }
  0x1c   : > { %715 = vmatpush3.bf16.msra.mxu1 %v749_v6  ;;  %685 = vmatpush3.bf16.msra.mxu0 %v749_v6 }
  0x1d   : > { %708 = vmatprep.subr.bf16.mxu1 %v779_v1  ;;  %686 = vmatprep.subr.bf16.mxu0 %v779_v1 }
  0x20   : > { %716 = vmatpush3.bf16.msra.mxu1 %v750_v7  ;;  %687 = vmatpush3.bf16.msra.mxu0 %v750_v7 }
  0x21   : > { %709 = vmatprep.subr.bf16.mxu1 %v779_v1  ;;  %688 = vmatprep.subr.bf16.mxu0 %v779_v1 }
  0x24   : > { %717 = vmatpush3.bf16.msra.mxu1 %v751_v8  ;;  %689 = vmatpush3.bf16.msra.mxu0 %v751_v8 }
  0x27   : > { %695 = vmatmul.mubr.bf16.vlgmr.msra.gmra.mrb[0].mxu1 %v752_v9  ;;  %691 = vmatmul.mubr.bf16.vlgmr.msra.gmra.mrb[0].mxu0 %v753_v10 }
  0x28   : > { %698 = vmatprep.mubr.msk.bf16.mxu1 %vm780_vm0, %v779_v1 }
  0x2f   : > { %699 = vmatmul.mubr.bf16.gmra.mrb[4].mxu1 %v754_v11 }
  0xfa   : > { %v447_v13 = vpop.f32.mrb[0].mxu1  ;;  %v439_v15 = vpop.f32.mrb[0].mxu0 }
  0xfb   : > { %v492_v16 = vmul.f32 %v659_v12, %v447_v13  ;;  %v696_v17 = vpop.f32.mrb[1].mxu1  ;;  %v490_v18 = vmul.f32 %v659_v12, %v439_v15  ;;  %v692_v19 = vpop.f32.mrb[1].mxu0 }
  0xfc   : > { %v450_v20 = vpop.f32.mrb[2].mxu1  ;;  %v442_v21 = vpop.f32.mrb[2].mxu0 }
  0xfd   : > { %v505_v22 = vadd.f32 %v660_v14, %v492_v16  ;;  %v493_v23 = vmul.f32 %v659_v12, %v450_v20  ;;  %v697_v24 = vpop.f32.mrb[3].mxu1  ;;  %v503_v25 = vadd.f32 %v660_v14, %v490_v18  ;;  %v491_v26 = vmul.f32 %v659_v12, %v442_v21  ;;  %v693_v27 = vpop.f32.mrb[3].mxu0 }
  0xff   : > { %511 = vst [vmem:[%s298_s25 + $0x10] sm:$0xff] %v505_v22  ;;  %v506_v28 = vadd.f32 %v660_v14, %v493_v23  ;;  %509 = vst [vmem:[%s298_s25] sm:$0xff] %v503_v25  ;;  %v504_v29 = vadd.f32 %v660_v14, %v491_v26 }
 0x101   : > { %512 = vst [vmem:[%s298_s25 + $0x18] sm:$0xff] %v506_v28  ;;  %510 = vst [vmem:[%s298_s25 + $0x8] sm:$0xff] %v504_v29 }
 0x102   : > { %v455_v30 = vpop.f32.mrb[4].mxu1 }
 0x103   : > { %v494_v31 = vmul.f32 %v659_v12, %v455_v30  ;;  %v700_v32 = vpop.f32.mrb[5].mxu1 }
 0x104   : > { %v458_v33 = vpop.f32.mrb[6].mxu1 }
 0x105   : > { %v507_v34 = vadd.f32 %v660_v14, %v494_v31  ;;  %v495_v35 = vmul.f32 %v659_v12, %v458_v33  ;;  %v701_v36 = vpop.f32.mrb[7].mxu1 }
 0x107   : > { %513 = vst [vmem:[%s298_s25 + $0x20] sm:$0xff] %v507_v34  ;;  %v508_v37 = vadd.f32 %v660_v14, %v495_v35 }
 0x109   : > { %514 = vst [vmem:[%s298_s25 + $0x28] sm:$0xff] %v508_v37 }
 0x10a PF: > { %s14_s17 = sadd.s32 1, %s777_s17   ;;  %s886_s15 = smov %s773_s16 }
 0x10b   : > { %p11_p5 = scmp.ge.s32.totalorder %s14_s17, 4   ;;  %s887_s16 = smov %s889_s18 }
 0x10d   :  { %13 = sbr.rel (!%p11_p5) target bundleno = 2 (0x2), region = 83 }

// kernel: encoder_forward.11
= control target key start
LH: loop header
LB: loop body
LE: loop exit
PB: predicated region body
PF: predicated region fallthrough
CT: control target
= control target key end

     0   :  { %s2794_s24 = smov 0   ;;  %s2796_s25 = smov 0   ;;  %s3372_s0 = inlined_call_operand.vmem [shape: bf16[96,128], index: 0, kind: input, shape index: {}, may-alias: {0,1,2}]   ;;  %s3373_s1 = inlined_call_operand.vmem [shape: bf16[96,128], index: 1, kind: input, shape index: {}, may-alias: {0,1,2}]   ;;  %s3374_s2 = inlined_call_operand.vmem [shape: bf16[96,128], index: 2, kind: input, shape index: {}, may-alias: {0,1,2}]   ;;  %s3375_s3 = inlined_call_operand.vmem [shape: bf16[1152,128], index: 3, kind: input, shape index: {}]   ;;  %s3376_s4 = inlined_call_operand.vmem [shape: f32[1,128], index: 4, kind: input, shape index: {}]   ;;  %s3377_s5 = inlined_call_operand.vmem [shape: f32[1,128], index: 5, kind: input, shape index: {}]   ;;  %s3378_s6 = inlined_call_operand.vmem [shape: f32[96,1], index: 6, kind: input, shape index: {}]   ;;  %s3379_s7 = inlined_call_operand.vmem [shape: bf16[96,128], index: 7, kind: output, shape index: {}]  }
   0x1   :  { %s2798_s26 = smov 0  }
   0x2 LB: > { %s29_s27 = sadd.s32 1, %s2745_s25  ;;  %p2051_p0 = scmp.ge.s32.totalorder %s2749_s26, 1  ;;  %s2749_s26 = sphi %s2798_s26, %s17_s26   ;;  %s2745_s25 = sphi %s2796_s25, %s3381_s25   ;;  %s2741_s24 = sphi %s2794_s24, %s3380_s24  }
   0x3   : > { %p31_p1 = scmp.ge.s32.totalorder %s29_s27, 2  ;;  %p334_p2 = scmp.lt.s32.totalorder %s2749_s26, 3 }
   0x5   : > { %s3383_s27 = smov (%p31_p1, %s29_s27), 0  ;;  %p335_p3 = pnand %p2051_p0, %p334_p2 }
   0x6   : > { %v2650_v0 = vld [vmem:[%s3375_s3 + $0x40] sm:$0xff] (!%p335_p3)   ;;  %v2751_v1 = vmov (!%p335_p3), 0.0   ;;  %v2652_v3 = vld [vmem:[%s3375_s3 + $0x48] sm:$0xff] (!%p335_p3)   ;;  %vm2752_vm0 = vmmov (!%p335_p3), 0   ;;  %s2052_s11 = sadd.s32 (!%p335_p3), 4294967295, %s2741_s24  ;;  %s412_s14 = smul.u32 (!%p335_p3), 6, %s2741_s24 }
   0x7   : > { %338 = sbr.rel (%p335_p3) target bundleno = 403 (0x193), region = 48  ;;  %2267 = vmatprep.subr.bf16.mxu1 (!%p335_p3), %v2751_v1  ;;  %2379 = vmatprep.subr.bf16.mxu0 (!%p335_p3), %v2751_v1  ;;  %v2651_v2 = vld [vmem:[%s3375_s3 + $0x100] sm:$0xff] (!%p335_p3)   ;;  %v2653_v4 = vld [vmem:[%s3375_s3 + $0x108] sm:$0xff] (!%p335_p3)   ;;  %p401_p4 = scmp.gt.s32.totalorder (!%p335_p3), %s2052_s11, 0  ;;  %v2654_v5 = vld [vmem:[%s3375_s3 + $0x50] sm:$0xff] (!%p335_p3)   ;;  %vm526_vm1 = vcmask (!%p335_p3), 1042432  }
   0x8   : > { %2268 = vmatpush3.bf16.msra.mxu1 (!%p335_p3), %v2650_v0  ;;  %2283 = vmatprep.mubr.msk.bf16.mxu1 (!%p335_p3), %vm2752_vm0, %v2751_v1  ;;  %p413_p5 = scmp.lt.s32.totalorder (!%p335_p3), %s412_s14, 11  ;;  %v2655_v6 = vld [vmem:[%s3375_s3 + $0x110] sm:$0xff] (!%p335_p3)   ;;  %v2656_v7 = vld [vmem:[%s3375_s3 + $0x58] sm:$0xff] (!%p335_p3)   ;;  %v2658_v9 = vld [vmem:[%s3375_s3 + $0x60] sm:$0xff] (!%p335_p3)   ;;  %s418_s15 = sadd.s32 (!%p335_p3), 1, %s2741_s24  ;;  %vm1508_vm4 = vcmask (!%p335_p3), 1044480  }
   0x9   : > { %2380 = vmatpush3.bf16.msra.mxu0 (!%p335_p3), %v2651_v2  ;;  %2269 = vmatprep.subr.bf16.mxu1 (!%p335_p3), %v2751_v1  ;;  %v2657_v8 = vld [vmem:[%s3375_s3 + $0x118] sm:$0xff] (!%p335_p3)   ;;  %v2659_v10 = vld [vmem:[%s3375_s3 + $0x120] sm:$0xff] (!%p335_p3)   ;;  %v2660_v11 = vld [vmem:[%s3375_s3 + $0x68] sm:$0xff] (!%p335_p3)   ;;  %p419_p7 = scmp.lt.s32.totalorder (!%p335_p3), %s418_s15, 1  ;;  %vm642_vm2 = vsmask.f32 (!%p335_p3), 3328 }
   0xa   : > { %2381 = vmatprep.subr.bf16.mxu0 (!%p335_p3), %v2751_v1  ;;  %2395 = vmatprep.mubr.msk.bf16.mxu0 (!%p335_p3), %vm2752_vm0, %v2751_v1  ;;  %v2661_v12 = vld [vmem:[%s3375_s3 + $0x128] sm:$0xff] (!%p335_p3)   ;;  %v2662_v13 = vld [vmem:[%s3375_s3 + $0x70] sm:$0xff] (!%p335_p3)   ;;  %v2664_v17 = vld [vmem:[%s3375_s3 + $0x78] sm:$0xff] (!%p335_p3)   ;;  %vm1216_vm3 = vsmask.f32 (!%p335_p3), 7424 }
   0xb   : > { %v2663_v16 = vld [vmem:[%s3375_s3 + $0x130] sm:$0xff] (!%p335_p3)   ;;  %v2665_v20 = vld [vmem:[%s3375_s3 + $0x138] sm:$0xff] (!%p335_p3)   ;;  %v2668_v21 = vld [vmem:[%s3375_s3] sm:$0xff] (!%p335_p3)   ;;  %vm948_vm5 = vsmask.f32 (!%p335_p3), 256 }
   0xc   : > { %2270 = vmatpush3.bf16.msra.mxu1 (!%p335_p3), %v2652_v3  ;;  %v2669_v24 = vld [vmem:[%s3375_s3 + $0x140] sm:$0xff] (!%p335_p3)   ;;  %v2670_v25 = vld [vmem:[%s3375_s3 + $0x8] sm:$0xff] (!%p335_p3)   ;;  %v2672_v28 = vld [vmem:[%s3375_s3 + $0x10] sm:$0xff] (!%p335_p3)   ;;  %vm1646_vm6 = vsmask.f32 (!%p335_p3), 4352 }
   0xd   : > { %2382 = vmatpush3.bf16.msra.mxu0 (!%p335_p3), %v2653_v4  ;;  %2271 = vmatprep.subr.bf16.mxu1 (!%p335_p3), %v2751_v1  ;;  %v2671_v27 = vld [vmem:[%s3375_s3 + $0x148] sm:$0xff] (!%p335_p3)   ;;  %v2673_v31 = vld [vmem:[%s3375_s3 + $0x150] sm:$0xff] (!%p335_p3)   ;;  %v2674_v32 = vld [vmem:[%s3375_s3 + $0x18] sm:$0xff] (!%p335_p3)   ;;  %vm802_vm13 = vsmask.f32 (!%p335_p3), 2304 }
   0xe   : > { %s3385_s11 = smov (!%p401_p4, %s2052_s11), 0  ;;  %2383 = vmatprep.subr.bf16.mxu0 %v2751_v1  ;;  %s3387_s14 = smov (!%p413_p5, %s412_s14), 11  ;;  %v2675_v34 = vld [vmem:[%s3375_s3 + $0x158] sm:$0xff]   ;;  %v2677_v35 = vld [vmem:[%s3375_s3 + $0x20] sm:$0xff]   ;;  %v2679_v41 = vld [vmem:[%s3375_s3 + $0x28] sm:$0xff]  }
   0xf   : > { %s403_s19 = smul.u32 6, %s3385_s11  ;;  %s2054_s28 = sshll.u32 %s3387_s14, 2  ;;  %v2678_v37 = vld [vmem:[%s3375_s3 + $0x160] sm:$0xff]   ;;  %v2680_v43 = vld [vmem:[%s3375_s3 + $0x168] sm:$0xff]   ;;  %v2682_v47 = vld [vmem:[%s3375_s3 + $0x30] sm:$0xff]  }
  0x10   : > { %2272 = vmatpush3.bf16.msra.mxu1 %v2654_v5  ;;  %s2870_s17 = scalar_lea.vmem %s3373_s1, %s2054_s28  ;;  %s3391_s15 = smov (!%p419_p7, %s418_s15), 1  ;;  %v2683_v51 = vld [vmem:[%s3375_s3 + $0x170] sm:$0xff]   ;;  %v2684_v54 = vld [vmem:[%s3375_s3 + $0x38] sm:$0xff]   ;;  %v2686_v61 = vld [vmem:[%s3375_s3 + $0x80] sm:$0xff]   ;;  %vm1360_vm14 = vsmask.f32 5376 }
  0x11   : > { %p404_p6 = scmp.lt.s32.totalorder %s403_s19, 11  ;;  %2384 = vmatpush3.bf16.msra.mxu0 %v2655_v6  ;;  %2273 = vmatprep.subr.bf16.mxu1 %v2751_v1  ;;  %v2887_v15 = vld [vmem:[%s2870_s17] sm:$0xff]   ;;  %v2910_v23 = vld [vmem:[%s2870_s17 + $0x8] sm:$0xff]   ;;  %v2935_v29 = vld [vmem:[%s2870_s17 + $0x10] sm:$0xff]   ;;  %s421_s8 = smul.u32 6, %s3391_s15 }
  0x12   : > { %2385 = vmatprep.subr.bf16.mxu0 %v2751_v1  ;;  %v528_v19 = vrot.slane %v2887_v15, 5  ;;  %v530_v26 = vrot.slane %v2910_v23, 5  ;;  %v532_v33 = vrot.slane %v2935_v29, 5  ;;  %v2971_v40 = vshrl.u32 %v2887_v15, 16  ;;  %v2685_v58 = vld [vmem:[%s3375_s3 + $0x178] sm:$0xff]   ;;  %v2687_v0 = vld [vmem:[%s3375_s3 + $0x180] sm:$0xff]  }
  0x13   : > { %s3389_s19 = smov (!%p404_p6, %s403_s19), 11  ;;  %p422_p8 = scmp.lt.s32.totalorder %s421_s8, 11  ;;  %v2983_v42 = vshll.u32 %v2887_v15, 16  ;;  %v2998_v46 = vshll.u32 %v2910_v23, 16  ;;  %v3006_v50 = vshrl.u32 %v2910_v23, 16  ;;  %v3030_v62 = vshll.u32 %v2935_v29, 16 }
  0x14   : > { %s2053_s29 = sshll.u32 %s3389_s19, 2  ;;  %2274 = vmatpush3.bf16.msra.mxu1 %v2656_v7  ;;  %v531_v30 = vsel %vm526_vm1, %v528_v19, %v530_v26  ;;  %v533_v36 = vsel %vm526_vm1, %v530_v26, %v532_v33  ;;  %v654_v48 = vrot.slane %v2971_v40, 4  ;;  %v3037_v2 = vshrl.u32 %v2935_v29, 16  ;;  %v2688_v5 = vld [vmem:[%s3375_s3 + $0x88] sm:$0xff]   ;;  %s2056_s15 = sshll.u32 %s3387_s14, 3 }
  0x15   : > { %2386 = vmatpush3.bf16.msra.mxu0 %v2657_v8  ;;  %2275 = vmatprep.subr.bf16.mxu1 %v2751_v1  ;;  %s407_s13 = scalar_lea.vmem %s3372_s0, %s2053_s29  ;;  %s3393_s8 = smov (!%p422_p8, %s421_s8), 11  ;;  %v657_v49 = vrot.slane %v2983_v42, 5  ;;  %v1217_v52 = vrot.slane %v2983_v42, 1  ;;  %v1219_v53 = vrot.slane %v2998_v46, 1  ;;  %v663_v57 = vrot.slane %v3006_v50, 4  ;;  %v2689_v6 = vld [vmem:[%s3375_s3 + $0x188] sm:$0xff]  }
  0x16   : > { %2387 = vmatprep.subr.bf16.mxu0 %v2751_v1  ;;  %v2884_v14 = vld [vmem:[%s407_s13 + $0x10] sm:$0xff]   ;;  %s2055_s18 = sshll.u32 %s3393_s8, 2  ;;  %v666_v60 = vrot.slane %v2998_v46, 5  ;;  %v1222_v7 = vrot.slane %v3030_v62, 1  ;;  %v953_v26 = vrot.slane %v3006_v50, 7  ;;  %s3139_s21 = scalar_lea.vmem %s3378_s6, %s2056_s15 }
  0x17   : > { %v527_v18 = vrot.slane %v2884_v14, 5  ;;  %v2966_v38 = vshrl.u32 %v2884_v14, 16  ;;  %v647_v39 = vshll.u32 %v2884_v14, 16  ;;  %s2976_s20 = scalar_lea.vmem %s3374_s2, %s2055_s18  ;;  %v658_v56 = vor.u32 %v657_v49, %v654_v48  ;;  %v2694_v49 = vld [vmem:[%s3375_s3 + $0xa0] sm:$0xff]   ;;  %v2700_v14 = vld [vmem:[%s3375_s3 + $0x1b0] sm:$0xff]   ;;  %s453_s15 = scalar_lea.vmem %s3379_s7, %s2054_s28 }
  0x18   : > { %2276 = vmatpush3.bf16.msra.mxu1 %v2658_v9  ;;  %v1218_v59 = vor.u32 %v1217_v52, %v2971_v40  ;;  %v3042_v4 = vld [vmem:[%s2976_s20] sm:$0xff]   ;;  %v667_v8 = vor.u32 %v666_v60, %v663_v57  ;;  %v672_v9 = vrot.slane %v3037_v2, 4  ;;  %v954_v33 = vor.u32 %v953_v26, %v2998_v46 }
  0x19   : > { %2388 = vmatpush3.bf16.msra.mxu0 %v2659_v10  ;;  %2277 = vmatprep.subr.bf16.mxu1 %v2751_v1  ;;  %v529_v22 = vsel %vm526_vm1, %v527_v18, %v528_v19  ;;  %v646_v44 = vrot.slane %v2966_v38, 4  ;;  %v649_v45 = vrot.slane %v647_v39, 5  ;;  %v950_v10 = vrot.slane %v2971_v40, 7 }
  0x1a   : > { %2389 = vmatprep.subr.bf16.mxu0 %v2751_v1  ;;  %v1220_v3 = vsel %vm1216_vm3, %v1218_v59, %v1219_v53  ;;  %v675_v18 = vrot.slane %v3030_v62, 5  ;;  %v1510_v19 = vrot.slane %v2910_v23, 3  ;;  %v1648_v48 = vrot.slane %v2983_v42, 4 }
  0x1b   : > { %v650_v55 = vor.u32 %v649_v45, %v646_v44  ;;  %v1650_v52 = vrot.slane %v3006_v50, 3  ;;  %v1655_v57 = vrot.slane %v3030_v62, 4 }
  0x1c   : > { %2278 = vmatpush3.bf16.msra.mxu1 %v2660_v11  ;;  %v1221_v11 = vor.u32 %v1219_v53, %v3006_v50  ;;  %v1651_v53 = vrot.slane %v2998_v46, 4 }
  0x1d   : > { %2390 = vmatpush3.bf16.msra.mxu0 %v2661_v12  ;;  %2279 = vmatprep.subr.bf16.mxu1 %v2751_v1  ;;  %v659_v63 = vsel %vm642_vm2, %v650_v55, %v658_v56  ;;  %v3057_v12 = vshll.u32 %v3042_v4, 16 }
  0x1e   : > { %2391 = vmatprep.subr.bf16.mxu0 %v2751_v1  ;;  %v1652_v59 = vor.u32 %v1651_v53, %v1650_v52  ;;  %v2704_v52 = vld [vmem:[%s3375_s3 + $0x1c0] sm:$0xff]   ;;  %v1368_v53 = vrot.slane %v3037_v2, 2 }
  0x1f   : > { %v1659_v60 = vrot.slane %v3057_v12, 4 }
  0x20   : > { %2280 = vmatpush3.bf16.msra.mxu1 %v2662_v13  ;;  %v949_v13 = vrot.slane %v2966_v38, 7 }
  0x21   : > { %2392 = vmatpush3.bf16.msra.mxu0 %v2663_v16  ;;  %2281 = vmatprep.subr.bf16.mxu1 %v2751_v1  ;;  %v951_v16 = vor.u32 %v950_v10, %v2983_v42 }
  0x22   : > { %2393 = vmatprep.subr.bf16.mxu0 %v2751_v1 }
  0x24   : > { %2282 = vmatpush3.bf16.msra.mxu1 %v2664_v17  ;;  %v1509_v17 = vrot.slane %v2887_v15, 3 }
  0x25   : > { %2394 = vmatpush3.bf16.msra.mxu0 %v2665_v20  ;;  %2295 = vmatprep.subr.bf16.mxu1 %v2751_v1  ;;  %v2690_v20 = vld [vmem:[%s3375_s3 + $0x90] sm:$0xff]  }
  0x26   : > { %2407 = vmatprep.subr.bf16.mxu0 %v2751_v1 }
  0x27   : > { %2284 = vmatmul.mubr.bf16.vlgmr.msra.gmra.mrb[0].mxu1 %v529_v22  ;;  %v668_v22 = vsel %vm642_vm2, %v658_v56, %v667_v8  ;;  %v1654_v56 = vrot.slane %v3037_v2, 3 }
  0x28   : > { %2296 = vmatpush3.bf16.msra.mxu1 %v2668_v21  ;;  %2396 = vmatmul.mubr.bf16.vlgmr.msra.gmra.mrb[0].mxu0 %v2887_v15  ;;  %v2691_v21 = vld [vmem:[%s3375_s3 + $0x190] sm:$0xff]   ;;  %v1223_v15 = vsel %vm1216_vm3, %v1221_v11, %v1222_v7 }
  0x29   : > { %2408 = vmatpush3.bf16.msra.mxu0 %v2669_v24  ;;  %2297 = vmatprep.subr.bf16.mxu1 %v2751_v1  ;;  %v3079_v24 = vsel %vm948_vm5, %v949_v13, %v951_v16  ;;  %v1815_v13 = vld [vmem:[%s3139_s21 + $0x8] sm:$0xff] }
  0x2a   : > { %2409 = vmatprep.subr.bf16.mxu0 %v2751_v1  ;;  %2287 = vmatprep.mubr.msk.bf16.mxu1 %vm2752_vm0, %v2751_v1  ;;  %vm1821_vm10 = vcmp.gt.f32.partialorder %v1815_v13, 0.0  ;;  %v2715_v13 = vld [vmem:[%s3375_s3 + $0xf0] sm:$0xff]  }
  0x2b   : > { %2399 = vmatprep.mubr.msk.bf16.mxu0 %vm2752_vm0, %v2751_v1 }
  0x2c   : > { %2298 = vmatpush3.bf16.msra.mxu1 %v2670_v25  ;;  %v1228_v25 = vrot.slane %v3057_v12, 1 }
  0x2d   : > { %2410 = vmatpush3.bf16.msra.mxu0 %v2671_v27  ;;  %2299 = vmatprep.subr.bf16.mxu1 %v2751_v1  ;;  %v1512_v27 = vrot.slane %v2935_v29, 3 }
  0x2e   : > { %2411 = vmatprep.subr.bf16.mxu0 %v2751_v1 }
  0x2f   : > { %2288 = vmatmul.mubr.bf16.gmra.mrb[4].mxu1 %v531_v30  ;;  %v1224_v30 = vor.u32 %v1222_v7, %v3037_v2 }
  0x30   : > { %2300 = vmatpush3.bf16.msra.mxu1 %v2672_v28  ;;  %2400 = vmatmul.mubr.bf16.gmra.mrb[4].mxu0 %v2910_v23  ;;  %v3082_v23 = vsel %vm1508_vm4, %v1509_v17, %v1510_v19  ;;  %v676_v28 = vor.u32 %v675_v18, %v672_v9  ;;  %v2697_v9 = vld [vmem:[%s3375_s3 + $0x1a8] sm:$0xff]   ;;  %v803_v17 = vrot.slane %v2966_v38, 5  ;;  %v804_v18 = vrot.slane %v647_v39, 6 }
  0x31   : > { %2412 = vmatpush3.bf16.msra.mxu0 %v2673_v31  ;;  %2301 = vmatprep.subr.bf16.mxu1 %v2751_v1  ;;  %v2692_v31 = vld [vmem:[%s3375_s3 + $0x98] sm:$0xff]   ;;  %v1229_v45 = vsel %vm1216_vm3, %v1224_v30, %v1228_v25  ;;  %v1361_v25 = vrot.slane %v2971_v40, 2  ;;  %v1362_v38 = vrot.slane %v2983_v42, 3  ;;  %v1364_v39 = vrot.slane %v3006_v50, 2 }
  0x32   : > { %2413 = vmatprep.subr.bf16.mxu0 %v2751_v1  ;;  %2291 = vmatprep.mubr.msk.bf16.mxu1 %vm2752_vm0, %v2751_v1  ;;  %v677_v44 = vsel %vm642_vm2, %v667_v8, %v676_v28  ;;  %v1818_v28 = vld [vmem:[%s3139_s21 + $0x20] sm:$0xff]  ;;  %v2701_v30 = vld [vmem:[%s3375_s3 + $0xb8] sm:$0xff]  }
  0x33   : > { %2403 = vmatprep.mubr.msk.bf16.mxu0 %vm2752_vm0, %v2751_v1  ;;  %vm1824_vm12 = vcmp.gt.f32.partialorder %v1818_v28, 0.0 }
  0x34   : > { %2302 = vmatpush3.bf16.msra.mxu1 %v2674_v32  ;;  %v2693_v32 = vld [vmem:[%s3375_s3 + $0x198] sm:$0xff]  }
  0x35   : > { %2414 = vmatpush3.bf16.msra.mxu0 %v2675_v34  ;;  %2303 = vmatprep.subr.bf16.mxu1 %v2751_v1  ;;  %v3097_v34 = vsel %vm1508_vm4, %v1510_v19, %v1512_v27 }
  0x36   : > { %2415 = vmatprep.subr.bf16.mxu0 %v2751_v1 }
  0x37   : > { %2292 = vmatmul.mubr.bf16.gmra.mrb[8].mxu1 %v533_v36  ;;  %v3106_v36 = vsel %vm948_vm5, %v950_v10, %v954_v33  ;;  %v1363_v33 = vor.u32 %v1362_v38, %v1361_v25 }
  0x38   : > { %2304 = vmatpush3.bf16.msra.mxu1 %v2677_v35  ;;  %2404 = vmatmul.mubr.bf16.gmra.mrb[8].mxu0 %v2935_v29  ;;  %v956_v29 = vrot.slane %v3037_v2, 7  ;;  %v1514_v35 = vrot.slane %v3042_v4, 3 }
  0x39   : > { %2416 = vmatpush3.bf16.msra.mxu0 %v2678_v37  ;;  %2305 = vmatprep.subr.bf16.mxu1 %v2751_v1 }
  0x3a   : > { %2417 = vmatprep.subr.bf16.mxu0 %v2751_v1  ;;  %2311 = vmatprep.mubr.msk.bf16.mxu1 %vm2752_vm0, %v2751_v1  ;;  %v957_v37 = vor.u32 %v956_v29, %v3030_v62 }
  0x3b   : > { %2423 = vmatprep.mubr.msk.bf16.mxu0 %vm2752_vm0, %v2751_v1 }
  0x3c   : > { %2306 = vmatpush3.bf16.msra.mxu1 %v2679_v41  ;;  %v3110_v41 = vsel %vm1508_vm4, %v1512_v27, %v1514_v35 }
  0x3d   : > { %2418 = vmatpush3.bf16.msra.mxu0 %v2680_v43  ;;  %2307 = vmatprep.subr.bf16.mxu1 %v2751_v1  ;;  %v1647_v43 = vrot.slane %v2971_v40, 3 }
  0x3e   : > { %2419 = vmatprep.subr.bf16.mxu0 %v2751_v1 }
  0x3f   : > { %v1649_v55 = vor.u32 %v1648_v48, %v1647_v43  ;;  %v811_v48 = vrot.slane %v2998_v46, 6 }
  0x40   : > { %2308 = vmatpush3.bf16.msra.mxu1 %v2682_v47  ;;  %v1372_v47 = vshrl.u32 %v3042_v4, 16  ;;  %v2710_v4 = vld [vmem:[%s3375_s3 + $0x1d8] sm:$0xff]  }
  0x41   : > { %2420 = vmatpush3.bf16.msra.mxu0 %v2683_v51  ;;  %2309 = vmatprep.subr.bf16.mxu1 %v2751_v1  ;;  %v3123_v51 = vsel %vm948_vm5, %v953_v26, %v957_v37  ;;  %v3150_v7 = vsel %vm1646_vm6, %v1649_v55, %v1652_v59  ;;  %v1365_v26 = vrot.slane %v2998_v46, 3  ;;  %v2705_v46 = vld [vmem:[%s3375_s3 + $0xc8] sm:$0xff]  }
  0x42   : > { %2421 = vmatprep.subr.bf16.mxu0 %v2751_v1  ;;  %v2706_v55 = vld [vmem:[%s3375_s3 + $0x1c8] sm:$0xff]  }
  0x43   : > { %v1366_v29 = vor.u32 %v1365_v26, %v1364_v39 }
  0x44   : > { %2310 = vmatpush3.bf16.msra.mxu1 %v2684_v54  ;;  %v2695_v54 = vld [vmem:[%s3375_s3 + $0x1a0] sm:$0xff]  }
  0x45   : > { %2422 = vmatpush3.bf16.msra.mxu0 %v2685_v58  ;;  %2323 = vmatprep.subr.bf16.mxu1 %v2751_v1  ;;  %v1658_v58 = vrot.slane %v1372_v47, 3 }
  0x46   : > { %2435 = vmatprep.subr.bf16.mxu0 %v2751_v1 }
  0x47   : > { %2312 = vmatmul.mubr.bf16.vlgmr.msra.gmra.mrb[0].mxu1 %v659_v63  ;;  %v1814_v63 = vld [vmem:[%s3139_s21] sm:$0xff]  ;;  %v1660_v8 = vor.u32 %v1659_v60, %v1658_v58  ;;  %v815_v60 = vrot.slane %v3030_v62, 6 }
  0x48   : > { %2324 = vmatpush3.bf16.msra.mxu1 %v2686_v61  ;;  %2424 = vmatmul.mubr.bf16.vlgmr.msra.gmra.mrb[0].mxu0 %v1220_v3  ;;  %v1816_v61 = vld [vmem:[%s3139_s21 + $0x10] sm:$0xff]  ;;  %v2753_v3 = vmov 0   ;;  %vm1820_vm8 = vcmp.gt.f32.partialorder %v1814_v63, 0.0 }
  0x49   : > { %2436 = vmatpush3.bf16.msra.mxu0 %v2687_v0  ;;  %2325 = vmatprep.subr.bf16.mxu1 %v2751_v1  ;;  %v1656_v0 = vor.u32 %v1655_v57, %v1654_v56  ;;  %vm1822_vm7 = vcmp.gt.f32.partialorder %v1816_v61, 0.0  ;;  %v1826_v19 = vsel %vm1820_vm8, 1, %v2753_v3  ;;  %v1830_v37 = vsel %vm1824_vm12, 1, %v2753_v3  ;;  %v2707_v57 = vld [vmem:[%s3375_s3 + $0xd0] sm:$0xff]  }
  0x4a   : > { %2437 = vmatprep.subr.bf16.mxu0 %v2751_v1  ;;  %2315 = vmatprep.mubr.msk.bf16.mxu1 %vm2752_vm0, %v2751_v1  ;;  %v1828_v11 = vsel %vm1822_vm7, 1, %v2753_v3  ;;  %v2708_v61 = vld [vmem:[%s3375_s3 + $0x1d0] sm:$0xff]  }
  0x4b   : > { %2427 = vmatprep.mubr.msk.bf16.mxu0 %vm2752_vm0, %v2751_v1  ;;  %2649 = vset.pattern.permute.xlu1 %v2753_v3  ;;  %v3157_v10 = vsel %vm1646_vm6, %v1652_v59, %v1656_v0  ;;  %v3164_v16 = vsel %vm1646_vm6, %v1656_v0, %v1660_v8  ;;  %v814_v59 = vrot.slane %v3037_v2, 5  ;;  %v1374_v0 = vrot.slane %v1372_v47, 2 }
  0x4c   : > { %2326 = vmatpush3.bf16.msra.mxu1 %v2688_v5  ;;  %v1817_v5 = vld [vmem:[%s3139_s21 + $0x18] sm:$0xff]  ;;  %2648 = vset.pattern.permute.xlu0 %v2753_v3 }
  0x4d   : > { %2438 = vmatpush3.bf16.msra.mxu0 %v2689_v6  ;;  %2327 = vmatprep.subr.bf16.mxu1 %v2751_v1  ;;  %v2696_v6 = vld [vmem:[%s3375_s3 + $0xa8] sm:$0xff]   ;;  %vm1823_vm9 = vcmp.gt.f32.partialorder %v1817_v5, 0.0  ;;  %v816_v2 = vor.u32 %v815_v60, %v814_v59 }
  0x4e   : > { %2439 = vmatprep.subr.bf16.mxu0 %v2751_v1  ;;  %1839 = vperm.xlu1 %2649, %v1828_v11   ;;  %v1829_v27 = vsel %vm1823_vm9, 1, %v2753_v3  ;;  %v2714_v11 = vld [vmem:[%s3375_s3 + $0x1e8] sm:$0xff]  }
  0x4f   : > { %2316 = vmatmul.mubr.bf16.gmra.mrb[4].mxu1 %v668_v22  ;;  %v806_v22 = vrot.slane %v2971_v40, 5  ;;  %1833 = vperm.xlu0 %2648, %v1826_v19   ;;  %v1827_v40 = vsel %vm1821_vm10, 1, %v2753_v3  ;;  %v2718_v19 = vld [vmem:[%s3375_s3 + $0x1f8] sm:$0xff]  }
  0x50   : > { %2328 = vmatpush3.bf16.msra.mxu1 %v2690_v20  ;;  %2428 = vmatmul.mubr.bf16.gmra.mrb[4].mxu0 %v1223_v15  ;;  %v1819_v20 = vld [vmem:[%s3139_s21 + $0x28] sm:$0xff]  ;;  %v807_v15 = vrot.slane %v2983_v42, 6  ;;  %v2702_v42 = vld [vmem:[%s3375_s3 + $0x1b8] sm:$0xff]  }
  0x51   : > { %2440 = vmatpush3.bf16.msra.mxu0 %v2691_v21  ;;  %2329 = vmatprep.subr.bf16.mxu1 %v2751_v1  ;;  %v2698_v21 = vld [vmem:[%s3375_s3 + $0xb0] sm:$0xff]   ;;  %vm1825_vm11 = vcmp.gt.f32.partialorder %v1819_v20, 0.0  ;;  %v2719_v20 = vld [vmem:[%s3375_s3 + $0x200] sm:$0xff]  }
  0x52   : > { %2441 = vmatprep.subr.bf16.mxu0 %v2751_v1  ;;  %2319 = vmatprep.mubr.msk.bf16.mxu1 %vm2752_vm0, %v2751_v1  ;;  %v1831_v35 = vsel %vm1825_vm11, 1, %v2753_v3  ;;  %v1375_v3 = vrot.slane %v3057_v12, 3  ;;  %v2711_v12 = vld [vmem:[%s3375_s3 + $0xe0] sm:$0xff]  }
  0x53   : > { %2431 = vmatprep.mubr.msk.bf16.mxu0 %vm2752_vm0, %v2751_v1  ;;  %1842 = vperm.xlu1 %2649, %v1829_v27  }
  0x54   : > { %2330 = vmatpush3.bf16.msra.mxu1 %v2692_v31  ;;  %v805_v31 = vor.u32 %v804_v18, %v803_v17  ;;  %1836 = vperm.xlu0 %2648, %v1827_v40   ;;  %v1376_v47 = vor.u32 %v1375_v3, %v1374_v0  ;;  %v2716_v17 = vld [vmem:[%s3375_s3 + $0x1f0] sm:$0xff]   ;;  %v2717_v18 = vld [vmem:[%s3375_s3 + $0xf8] sm:$0xff]  }
  0x55   : > { %2442 = vmatpush3.bf16.msra.mxu0 %v2693_v32  ;;  %2331 = vmatprep.subr.bf16.mxu1 %v2751_v1  ;;  %v808_v32 = vor.u32 %v807_v15, %v806_v22 }
  0x56   : > { %2443 = vmatprep.subr.bf16.mxu0 %v2751_v1 }
  0x57   : > { %2320 = vmatmul.mubr.bf16.gmra.mrb[8].mxu1 %v677_v44  ;;  %v809_v43 = vsel %vm802_vm13, %v805_v31, %v808_v32  ;;  %v2703_v44 = vld [vmem:[%s3375_s3 + $0xc0] sm:$0xff]   ;;  %1848 = vperm.xlu1 %2649, %v1831_v35  }
  0x58   : > { %2332 = vmatpush3.bf16.msra.mxu1 %v2694_v49  ;;  %2432 = vmatmul.mubr.bf16.gmra.mrb[8].mxu0 %v1229_v45  ;;  %v810_v45 = vrot.slane %v3006_v50, 5  ;;  %v1367_v49 = vsel %vm1360_vm14, %v1363_v33, %v1366_v29 }
  0x59   : > { %2444 = vmatpush3.bf16.msra.mxu0 %v2695_v54  ;;  %2333 = vmatprep.subr.bf16.mxu1 %v2751_v1  ;;  %v1369_v54 = vrot.slane %v3030_v62, 3  ;;  %v2709_v62 = vld [vmem:[%s3375_s3 + $0xd8] sm:$0xff]  }
  0x5a   : > { %2445 = vmatprep.subr.bf16.mxu0 %v2751_v1  ;;  %2339 = vmatprep.mubr.msk.bf16.mxu1 %vm2752_vm0, %v2751_v1  ;;  %v812_v50 = vor.u32 %v811_v48, %v810_v45  ;;  %v2135_v45 = vld [vmem:[%s3376_s4] ss:$0 sm:$0xff] }
  0x5b   : > { %2451 = vmatprep.mubr.msk.bf16.mxu0 %vm2752_vm0, %v2751_v1  ;;  %1845 = vperm.xlu0 %2648, %v1830_v37   ;;  %v1370_v56 = vor.u32 %v1369_v54, %v1368_v53 }
  0x5c   : > { %2334 = vmatpush3.bf16.msra.mxu1 %v2696_v6  ;;  %v813_v58 = vsel %vm802_vm13, %v808_v32, %v812_v50  ;;  %v817_v5 = vsel %vm802_vm13, %v812_v50, %v816_v2  ;;  %v2712_v6 = vld [vmem:[%s3375_s3 + $0x1e0] sm:$0xff]  }
  0x5d   : > { %2446 = vmatpush3.bf16.msra.mxu0 %v2697_v9  ;;  %2335 = vmatprep.subr.bf16.mxu1 %v2751_v1  ;;  %v1371_v63 = vsel %vm1360_vm14, %v1366_v29, %v1370_v56  ;;  %v1377_v8 = vsel %vm1360_vm14, %v1370_v56, %v1376_v47  ;;  %v2713_v9 = vld [vmem:[%s3375_s3 + $0xe8] sm:$0xff]   ;;  %v2136_v50 = vld [vmem:[%s3377_s5] ss:$0 sm:$0xff] }
  0x5e   : > { %2447 = vmatprep.subr.bf16.mxu0 %v2751_v1 }
  0x60   : > { %2336 = vmatpush3.bf16.msra.mxu1 %v2698_v21  ;;  %v2720_v21 = vld [vmem:[%s3375_s3 + $0x208] sm:$0xff]  }
  0x61   : > { %2448 = vmatpush3.bf16.msra.mxu0 %v2700_v14  ;;  %2337 = vmatprep.subr.bf16.mxu1 %v2751_v1 }
  0x62   : > { %2449 = vmatprep.subr.bf16.mxu0 %v2751_v1 }
  0x64   : > { %2338 = vmatpush3.bf16.msra.mxu1 %v2701_v30 }
  0x65   : > { %2450 = vmatpush3.bf16.msra.mxu0 %v2702_v42  ;;  %2351 = vmatprep.subr.bf16.mxu1 %v2751_v1 }
  0x66   : > { %2463 = vmatprep.subr.bf16.mxu0 %v2751_v1 }
  0x67   : > { %2340 = vmatmul.mubr.bf16.vlgmr.msra.gmra.mrb[0].mxu1 %v809_v43 }
  0x68   : > { %2352 = vmatpush3.bf16.msra.mxu1 %v2703_v44  ;;  %2452 = vmatmul.mubr.bf16.vlgmr.msra.gmra.mrb[0].mxu0 %v1367_v49 }
  0x69   : > { %2464 = vmatpush3.bf16.msra.mxu0 %v2704_v52  ;;  %2353 = vmatprep.subr.bf16.mxu1 %v2751_v1 }
  0x6a   : > { %2465 = vmatprep.subr.bf16.mxu0 %v2751_v1  ;;  %2343 = vmatprep.mubr.msk.bf16.mxu1 %vm2752_vm0, %v2751_v1 }
  0x6b   : > { %2455 = vmatprep.mubr.msk.bf16.mxu0 %vm2752_vm0, %v2751_v1 }
  0x6c   : > { %2354 = vmatpush3.bf16.msra.mxu1 %v2705_v46 }
  0x6d   : > { %2466 = vmatpush3.bf16.msra.mxu0 %v2706_v55  ;;  %2355 = vmatprep.subr.bf16.mxu1 %v2751_v1 }
  0x6e   : > { %2467 = vmatprep.subr.bf16.mxu0 %v2751_v1 }
  0x6f   : > { %2344 = vmatmul.mubr.bf16.gmra.mrb[4].mxu1 %v813_v58 }
  0x70   : > { %2356 = vmatpush3.bf16.msra.mxu1 %v2707_v57  ;;  %2456 = vmatmul.mubr.bf16.gmra.mrb[4].mxu0 %v1371_v63 }
  0x71   : > { %2468 = vmatpush3.bf16.msra.mxu0 %v2708_v61  ;;  %2357 = vmatprep.subr.bf16.mxu1 %v2751_v1 }
  0x72   : > { %2469 = vmatprep.subr.bf16.mxu0 %v2751_v1  ;;  %2347 = vmatprep.mubr.msk.bf16.mxu1 %vm2752_vm0, %v2751_v1 }
  0x73   : > { %2459 = vmatprep.mubr.msk.bf16.mxu0 %vm2752_vm0, %v2751_v1 }
  0x74   : > { %2358 = vmatpush3.bf16.msra.mxu1 %v2709_v62 }
  0x75   : > { %2470 = vmatpush3.bf16.msra.mxu0 %v2710_v4  ;;  %2359 = vmatprep.subr.bf16.mxu1 %v2751_v1 }
  0x76   : > { %2471 = vmatprep.subr.bf16.mxu0 %v2751_v1 }
  0x77   : > { %2348 = vmatmul.mubr.bf16.gmra.mrb[8].mxu1 %v817_v5 }
  0x78   : > { %2360 = vmatpush3.bf16.msra.mxu1 %v2711_v12  ;;  %2460 = vmatmul.mubr.bf16.gmra.mrb[8].mxu0 %v1377_v8 }
  0x79   : > { %2472 = vmatpush3.bf16.msra.mxu0 %v2712_v6  ;;  %2361 = vmatprep.subr.bf16.mxu1 %v2751_v1 }
  0x7a   : > { %2473 = vmatprep.subr.bf16.mxu0 %v2751_v1  ;;  %2367 = vmatprep.mubr.msk.bf16.mxu1 %vm2752_vm0, %v2751_v1 }
  0x7b   : > { %2479 = vmatprep.mubr.msk.bf16.mxu0 %vm2752_vm0, %v2751_v1 }
  0x7c   : > { %2362 = vmatpush3.bf16.msra.mxu1 %v2713_v9 }
  0x7d   : > { %2474 = vmatpush3.bf16.msra.mxu0 %v2714_v11  ;;  %2363 = vmatprep.subr.bf16.mxu1 %v2751_v1 }
  0x7e   : > { %2475 = vmatprep.subr.bf16.mxu0 %v2751_v1 }
  0x80   : > { %2364 = vmatpush3.bf16.msra.mxu1 %v2715_v13 }
  0x81   : > { %2476 = vmatpush3.bf16.msra.mxu0 %v2716_v17  ;;  %2365 = vmatprep.subr.bf16.mxu1 %v2751_v1 }
  0x82   : > { %2477 = vmatprep.subr.bf16.mxu0 %v2751_v1 }
  0x84   : > { %2366 = vmatpush3.bf16.msra.mxu1 %v2717_v18 }
  0x85   : > { %2478 = vmatpush3.bf16.msra.mxu0 %v2718_v19  ;;  %2519 = vmatprep.subr.bf16.mxu1 %v2751_v1 }
  0x86   : > { %2491 = vmatprep.subr.bf16.mxu0 %v2751_v1 }
  0x87   : > { %2368 = vmatmul.mubr.bf16.vlgmr.msra.gmra.mrb[0].mxu1 %v3079_v24  ;;  %v2721_v24 = vld [vmem:[%s3375_s3 + $0x210] sm:$0xff]  }
  0x88   : > { %2480 = vmatmul.mubr.bf16.vlgmr.msra.gmra.mrb[0].mxu0 %v3082_v23  ;;  %2527 = vmatpush3.bf16.msra.mxu1 %v2719_v20  ;;  %v2722_v23 = vld [vmem:[%s3375_s3 + $0x218] sm:$0xff]  }
  0x89   : > { %2492 = vmatpush3.bf16.msra.mxu0 %v2719_v20  ;;  %2520 = vmatprep.subr.bf16.mxu1 %v2751_v1 }
  0x8a   : > { %2493 = vmatprep.subr.bf16.mxu0 %v2751_v1  ;;  %2371 = vmatprep.mubr.msk.bf16.mxu1 %vm2752_vm0, %v2751_v1 }
  0x8b   : > { %2483 = vmatprep.mubr.msk.bf16.mxu0 %vm2752_vm0, %v2751_v1 }
  0x8c   : > { %2528 = vmatpush3.bf16.msra.mxu1 %v2720_v21 }
  0x8d   : > { %2494 = vmatpush3.bf16.msra.mxu0 %v2720_v21  ;;  %2521 = vmatprep.subr.bf16.mxu1 %v2751_v1 }
  0x8e   : > { %2495 = vmatprep.subr.bf16.mxu0 %v2751_v1 }
  0x8f   : > { %2372 = vmatmul.mubr.bf16.gmra.mrb[4].mxu1 %v3106_v36  ;;  %v2724_v36 = vld [vmem:[%s3375_s3 + $0x228] sm:$0xff]  }
  0x90   : > { %2484 = vmatmul.mubr.bf16.gmra.mrb[4].mxu0 %v3097_v34  ;;  %2529 = vmatpush3.bf16.msra.mxu1 %v2721_v24  ;;  %v2723_v34 = vld [vmem:[%s3375_s3 + $0x220] sm:$0xff]  }
  0x91   : > { %2496 = vmatpush3.bf16.msra.mxu0 %v2721_v24  ;;  %2522 = vmatprep.subr.bf16.mxu1 %v2751_v1 }
  0x92   : > { %2497 = vmatprep.subr.bf16.mxu0 %v2751_v1  ;;  %2375 = vmatprep.mubr.msk.bf16.mxu1 %vm2752_vm0, %v2751_v1 }
  0x93   : > { %2487 = vmatprep.mubr.msk.bf16.mxu0 %vm2752_vm0, %v2751_v1 }
  0x94   : > { %2530 = vmatpush3.bf16.msra.mxu1 %v2722_v23 }
  0x95   : > { %2498 = vmatpush3.bf16.msra.mxu0 %v2722_v23  ;;  %2523 = vmatprep.subr.bf16.mxu1 %v2751_v1 }
  0x96   : > { %2499 = vmatprep.subr.bf16.mxu0 %v2751_v1 }
  0x97   : > { %2376 = vmatmul.mubr.bf16.gmra.mrb[8].mxu1 %v3123_v51  ;;  %v2726_v51 = vld [vmem:[%s3375_s3 + $0x238] sm:$0xff]  }
  0x98   : > { %2488 = vmatmul.mubr.bf16.gmra.mrb[8].mxu0 %v3110_v41  ;;  %2531 = vmatpush3.bf16.msra.mxu1 %v2723_v34  ;;  %v2725_v41 = vld [vmem:[%s3375_s3 + $0x230] sm:$0xff]  }
  0x99   : > { %2500 = vmatpush3.bf16.msra.mxu0 %v2723_v34  ;;  %2524 = vmatprep.subr.bf16.mxu1 %v2751_v1 }
  0x9a   : > { %2501 = vmatprep.subr.bf16.mxu0 %v2751_v1  ;;  %2507 = vmatprep.mubr.msk.bf16.mxu0 %vm2752_vm0, %v2751_v1 }
  0x9b   : > { %2511 = vmatprep.mubr.msk.bf16.mxu1 %vm2752_vm0, %v2751_v1 }
  0x9c   : > { %2532 = vmatpush3.bf16.msra.mxu1 %v2724_v36 }
  0x9d   : > { %2502 = vmatpush3.bf16.msra.mxu0 %v2724_v36  ;;  %2525 = vmatprep.subr.bf16.mxu1 %v2751_v1 }
  0x9e   : > { %2503 = vmatprep.subr.bf16.mxu0 %v2751_v1 }
  0xa0   : > { %2533 = vmatpush3.bf16.msra.mxu1 %v2725_v41 }
  0xa1   : > { %2504 = vmatpush3.bf16.msra.mxu0 %v2725_v41  ;;  %2526 = vmatprep.subr.bf16.mxu1 %v2751_v1 }
  0xa2   : > { %2505 = vmatprep.subr.bf16.mxu0 %v2751_v1 }
  0xa4   : > { %2534 = vmatpush3.bf16.msra.mxu1 %v2726_v51 }
  0xa5   : > { %2506 = vmatpush3.bf16.msra.mxu0 %v2726_v51 }
  0xa7   : > { %2512 = vmatmul.mubr.bf16.vlgmr.msra.gmra.mrb[12].mxu1 %v3157_v10 }
  0xa8   : > { %2508 = vmatmul.mubr.bf16.vlgmr.msra.gmra.mrb[0].mxu0 %v3150_v7  ;;  %2515 = vmatprep.mubr.msk.bf16.mxu1 %vm2752_vm0, %v2751_v1 }
  0xaf   : > { %2516 = vmatmul.mubr.bf16.gmra.mrb[16].mxu1 %v3164_v16 }
  0xcd   : > { %v1840_v49 = vpop.permute.xlu1 %1839 }
  0xce   : > { %v1834_v0 = vpop.permute.xlu0 %1833  ;;  %vm1852_vm15 = vcmp.eq.s32.totalorder %v1840_v49, 1 }
  0xcf   : > { %vm1850_vm0 = vcmp.eq.s32.totalorder %v1834_v0, 1 }
  0xd2   : > { %v1843_v13 = vpop.permute.xlu1 %1842 }
  0xd3   : > { %vm1853_vm1 = vcmp.eq.s32.totalorder %v1843_v13, 1  ;;  %v1837_v21 = vpop.permute.xlu0 %1836 }
  0xd4   : > { %vm1851_vm2 = vcmp.eq.s32.totalorder %v1837_v21, 1 }
 0x15a   : > { %v1044_v22 = vpop.f32.mrb[0].mxu1 }
 0x15b   : > { %v2369_v15 = vpop.f32.mrb[1].mxu1 }
 0x15c   : > { %v1047_v25 = vpop.f32.mrb[2].mxu1 }
 0x15d   : > { %v2370_v14 = vpop.f32.mrb[3].mxu1 }
 0x162   : > { %v1052_v38 = vpop.f32.mrb[4].mxu1 }
 0x163   : > { %v1609_v39 = vpop.f32.mrb[4].mxu0  ;;  %v2373_v26 = vpop.f32.mrb[5].mxu1 }
 0x164   : > { %v2537_v27 = vadd.f32 %v1609_v39, %v1052_v38  ;;  %v2485_v28 = vpop.f32.mrb[5].mxu0  ;;  %v1055_v40 = vpop.f32.mrb[6].mxu1 }
 0x165   : > { %v1612_v30 = vpop.f32.mrb[6].mxu0  ;;  %v2374_v31 = vpop.f32.mrb[7].mxu1 }
 0x166   : > { %v2539_v10 = vadd.f32 %v1612_v30, %v1055_v40  ;;  %v2486_v32 = vpop.f32.mrb[7].mxu0  ;;  %v1849_v31 = vpop.permute.xlu1 %1848 }
 0x167   : > { %v1846_v32 = vpop.permute.xlu0 %1845  ;;  %vm1855_vm3 = vcmp.eq.s32.totalorder %v1849_v31, 1 }
 0x168   : > { %vm1854_vm4 = vcmp.eq.s32.totalorder %v1846_v32, 1 }
 0x16a   : > { %v1060_v7 = vpop.f32.mrb[8].mxu1 }
 0x16b   : > { %v1617_v42 = vpop.f32.mrb[8].mxu0  ;;  %v2377_v33 = vpop.f32.mrb[9].mxu1 }
 0x16c   : > { %v2541_v1 = vadd.f32 %v1617_v42, %v1060_v7  ;;  %v2489_v29 = vpop.f32.mrb[9].mxu0  ;;  %v1063_v16 = vpop.f32.mrb[10].mxu1 }
 0x16d   : > { %v1620_v35 = vpop.f32.mrb[10].mxu0  ;;  %v2378_v37 = vpop.f32.mrb[11].mxu1 }
 0x16e   : > { %v2543_v43 = vadd.f32 %v1620_v35, %v1063_v16  ;;  %v2490_v44 = vpop.f32.mrb[11].mxu0 }
 0x17a   : > { %v1755_v48 = vpop.f32.mrb[12].mxu1 }
 0x17b   : > { %v1747_v52 = vpop.f32.mrb[0].mxu0  ;;  %v2538_v53 = vadd.f32 %v2537_v27, %v1755_v48  ;;  %v2513_v54 = vpop.f32.mrb[13].mxu1 }
 0x17c   : > { %v2535_v46 = vadd.f32 %v1747_v52, %v1044_v22  ;;  %v2509_v55 = vpop.f32.mrb[1].mxu0  ;;  %v1758_v56 = vpop.f32.mrb[14].mxu1 }
 0x17d   : > { %v1785_v57 = vmul.f32 %v2538_v53, %v2135_v45  ;;  %v1750_v58 = vpop.f32.mrb[2].mxu0  ;;  %v2540_v59 = vadd.f32 %v2539_v10, %v1758_v56  ;;  %v2514_v60 = vpop.f32.mrb[15].mxu1 }
 0x17e   : > { %v1783_v61 = vmul.f32 %v2535_v46, %v2135_v45  ;;  %v2536_v63 = vadd.f32 %v1750_v58, %v1047_v25  ;;  %v2510_v3 = vpop.f32.mrb[3].mxu0 }
 0x17f   : > { %v1798_v62 = vadd.f32 %v2136_v50, %v1785_v57  ;;  %v1786_v2 = vmul.f32 %v2540_v59, %v2135_v45 }
 0x180   : > { %v1796_v4 = vadd.f32 %v2136_v50, %v1783_v61  ;;  %v1784_v47 = vmul.f32 %v2536_v63, %v2135_v45 }
 0x181   : > { %v1799_v12 = vadd.f32 %v2136_v50, %v1786_v2  ;;  %v1804_v5 = vmul.f32 0.01, %v1798_v62 }
 0x182   : > { %v1797_v6 = vadd.f32 %v2136_v50, %v1784_v47  ;;  %v1802_v8 = vmul.f32 0.01, %v1796_v4  ;;  %v1763_v9 = vpop.f32.mrb[16].mxu1 }
 0x183   : > { %v1810_v11 = vmax.f32 %v1798_v62, %v1804_v5  ;;  %v1805_v17 = vmul.f32 0.01, %v1799_v12  ;;  %v2542_v18 = vadd.f32 %v2541_v1, %v1763_v9  ;;  %v2517_v19 = vpop.f32.mrb[17].mxu1 }
 0x184   : > { %v1808_v20 = vmax.f32 %v1796_v4, %v1802_v8  ;;  %v1803_v24 = vmul.f32 0.01, %v1797_v6  ;;  %v1766_v23 = vpop.f32.mrb[18].mxu1 }
 0x185   : > { %v1811_v34 = vmax.f32 %v1799_v12, %v1805_v17  ;;  %v1787_v36 = vmul.f32 %v2542_v18, %v2135_v45  ;;  %v2544_v41 = vadd.f32 %v2543_v43, %v1766_v23  ;;  %v2518_v51 = vpop.f32.mrb[19].mxu1  ;;  %v1858_v15 = vsel %vm1852_vm15, %v1810_v11, 0.0 }
 0x186   : > { %v1809_v22 = vmax.f32 %v1797_v6, %v1803_v24  ;;  %v1856_v39 = vsel %vm1850_vm0, %v1808_v20, 0.0 }
 0x187   : > { %v1859_v25 = vsel %vm1853_vm1, %v1811_v34, 0.0  ;;  %v1800_v14 = vadd.f32 %v2136_v50, %v1787_v36  ;;  %v1788_v38 = vmul.f32 %v2544_v41, %v2135_v45 }
 0x188   : > { %v2159_v26 = vpack.c.bf16 %v1859_v25, %v1858_v15  ;;  %v1857_v27 = vsel %vm1851_vm2, %v1809_v22, 0.0 }
 0x189   : > { %v2154_v28 = vpack.c.bf16 %v1857_v27, %v1856_v39  ;;  %v1801_v40 = vadd.f32 %v2136_v50, %v1788_v38  ;;  %v1806_v30 = vmul.f32 0.01, %v1800_v14 }
 0x18a   : > { %2166 = vst [vmem:[%s453_s15 + $0x8] sm:$0xff] %v2159_v26  }
 0x18b   : > { %2155 = vst [vmem:[%s453_s15] sm:$0xff] %v2154_v28   ;;  %v1807_v10 = vmul.f32 0.01, %v1801_v40  ;;  %v1812_v7 = vmax.f32 %v1800_v14, %v1806_v30 }
 0x18d   : > { %v1813_v42 = vmax.f32 %v1801_v40, %v1807_v10  ;;  %v1860_v1 = vsel %vm1854_vm4, %v1812_v7, 0.0 }
 0x18f   : > { %v1861_v33 = vsel %vm1855_vm3, %v1813_v42, 0.0 }
 0x190   : > { %v2164_v29 = vpack.c.bf16 %v1861_v33, %v1860_v1 }
 0x192   : > { %2167 = vst [vmem:[%s453_s15 + $0x10] sm:$0xff] %v2164_v29  }
 0x193 PF: > { %s17_s26 = sadd.s32 1, %s2749_s26   ;;  %s3380_s24 = smov %s2745_s25 }
 0x194   : > { %p14_p9 = scmp.ge.s32.totalorder %s17_s26, 4   ;;  %s3381_s25 = smov %s3383_s27 }
 0x196   :  { %16 = sbr.rel (!%p14_p9) target bundleno = 2 (0x2), region = 96 }

// kernel: encoder_forward.12
= control target key start
LH: loop header
LB: loop body
LE: loop exit
PB: predicated region body
PF: predicated region fallthrough
CT: control target
= control target key end

     0   :  { %s2895_s27 = smov 0   ;;  %s2897_s28 = smov 0   ;;  %s3480_s0 = inlined_call_operand.vmem [shape: bf16[96,128], index: 0, kind: input, shape index: {}, may-alias: {0,1,2}]   ;;  %s3481_s1 = inlined_call_operand.vmem [shape: bf16[96,128], index: 1, kind: input, shape index: {}, may-alias: {0,1,2}]   ;;  %s3482_s2 = inlined_call_operand.vmem [shape: bf16[96,128], index: 2, kind: input, shape index: {}, may-alias: {0,1,2}]   ;;  %s3483_s3 = inlined_call_operand.vmem [shape: bf16[1152,128], index: 3, kind: input, shape index: {}]   ;;  %s3484_s4 = inlined_call_operand.vmem [shape: f32[1,128], index: 4, kind: input, shape index: {}]   ;;  %s3485_s5 = inlined_call_operand.vmem [shape: f32[1,128], index: 5, kind: input, shape index: {}]   ;;  %s3486_s6 = inlined_call_operand.vmem [shape: f32[96,1], index: 6, kind: input, shape index: {}]   ;;  %s3487_s7 = inlined_call_operand.vmem [shape: bf16[96,128], index: 7, kind: input, shape index: {}]   ;;  %s3488_s8 = inlined_call_operand.vmem [shape: bf16[96,128], index: 8, kind: output, shape index: {}]  }
   0x1   :  { %s2899_s29 = smov 0  }
   0x2 LB: > { %s30_s30 = sadd.s32 1, %s2841_s28  ;;  %p2132_p0 = scmp.ge.s32.totalorder %s2845_s29, 1  ;;  %s2845_s29 = sphi %s2899_s29, %s18_s29   ;;  %s2841_s28 = sphi %s2897_s28, %s3490_s28   ;;  %s2837_s27 = sphi %s2895_s27, %s3489_s27  }
   0x3   : > { %p32_p1 = scmp.ge.s32.totalorder %s30_s30, 2  ;;  %p375_p2 = scmp.lt.s32.totalorder %s2845_s29, 3 }
   0x5   : > { %s3492_s30 = smov (%p32_p1, %s30_s30), 0  ;;  %p376_p3 = pnand %p2132_p0, %p375_p2 }
   0x6   : > { %v2746_v0 = vld [vmem:[%s3483_s3 + $0x40] sm:$0xff] (!%p376_p3)   ;;  %v2847_v1 = vmov (!%p376_p3), 0.0   ;;  %v2748_v3 = vld [vmem:[%s3483_s3 + $0x48] sm:$0xff] (!%p376_p3)   ;;  %vm2848_vm0 = vmmov (!%p376_p3), 0   ;;  %s2133_s15 = sadd.s32 (!%p376_p3), 4294967295, %s2837_s27  ;;  %s463_s18 = smul.u32 (!%p376_p3), 6, %s2837_s27 }
   0x7   : > { %379 = sbr.rel (%p376_p3) target bundleno = 401 (0x191), region = 52  ;;  %2363 = vmatprep.subr.bf16.mxu1 (!%p376_p3), %v2847_v1  ;;  %2475 = vmatprep.subr.bf16.mxu0 (!%p376_p3), %v2847_v1  ;;  %v2747_v2 = vld [vmem:[%s3483_s3 + $0x100] sm:$0xff] (!%p376_p3)   ;;  %v2749_v4 = vld [vmem:[%s3483_s3 + $0x108] sm:$0xff] (!%p376_p3)   ;;  %p452_p4 = scmp.gt.s32.totalorder (!%p376_p3), %s2133_s15, 0  ;;  %v2750_v5 = vld [vmem:[%s3483_s3 + $0x50] sm:$0xff] (!%p376_p3)   ;;  %vm586_vm1 = vcmask (!%p376_p3), 1042432  }
   0x8   : > { %2364 = vmatpush3.bf16.msra.mxu1 (!%p376_p3), %v2746_v0  ;;  %2379 = vmatprep.mubr.msk.bf16.mxu1 (!%p376_p3), %vm2848_vm0, %v2847_v1  ;;  %p464_p5 = scmp.lt.s32.totalorder (!%p376_p3), %s463_s18, 11  ;;  %v2751_v6 = vld [vmem:[%s3483_s3 + $0x110] sm:$0xff] (!%p376_p3)   ;;  %v2752_v7 = vld [vmem:[%s3483_s3 + $0x58] sm:$0xff] (!%p376_p3)   ;;  %v2754_v9 = vld [vmem:[%s3483_s3 + $0x60] sm:$0xff] (!%p376_p3)   ;;  %s469_s21 = sadd.s32 (!%p376_p3), 1, %s2837_s27  ;;  %vm1568_vm4 = vcmask (!%p376_p3), 1044480  }
   0x9   : > { %2476 = vmatpush3.bf16.msra.mxu0 (!%p376_p3), %v2747_v2  ;;  %2365 = vmatprep.subr.bf16.mxu1 (!%p376_p3), %v2847_v1  ;;  %v2753_v8 = vld [vmem:[%s3483_s3 + $0x118] sm:$0xff] (!%p376_p3)   ;;  %v2755_v10 = vld [vmem:[%s3483_s3 + $0x120] sm:$0xff] (!%p376_p3)   ;;  %v2756_v11 = vld [vmem:[%s3483_s3 + $0x68] sm:$0xff] (!%p376_p3)   ;;  %p470_p7 = scmp.lt.s32.totalorder (!%p376_p3), %s469_s21, 1  ;;  %vm702_vm2 = vsmask.f32 (!%p376_p3), 3328 }
   0xa   : > { %2477 = vmatprep.subr.bf16.mxu0 (!%p376_p3), %v2847_v1  ;;  %2491 = vmatprep.mubr.msk.bf16.mxu0 (!%p376_p3), %vm2848_vm0, %v2847_v1  ;;  %v2757_v12 = vld [vmem:[%s3483_s3 + $0x128] sm:$0xff] (!%p376_p3)   ;;  %v2758_v13 = vld [vmem:[%s3483_s3 + $0x70] sm:$0xff] (!%p376_p3)   ;;  %v2760_v17 = vld [vmem:[%s3483_s3 + $0x78] sm:$0xff] (!%p376_p3)   ;;  %vm1276_vm3 = vsmask.f32 (!%p376_p3), 7424 }
   0xb   : > { %v2759_v16 = vld [vmem:[%s3483_s3 + $0x130] sm:$0xff] (!%p376_p3)   ;;  %v2761_v20 = vld [vmem:[%s3483_s3 + $0x138] sm:$0xff] (!%p376_p3)   ;;  %v2764_v21 = vld [vmem:[%s3483_s3] sm:$0xff] (!%p376_p3)   ;;  %vm1008_vm5 = vsmask.f32 (!%p376_p3), 256 }
   0xc   : > { %2366 = vmatpush3.bf16.msra.mxu1 (!%p376_p3), %v2748_v3  ;;  %v2765_v24 = vld [vmem:[%s3483_s3 + $0x140] sm:$0xff] (!%p376_p3)   ;;  %v2766_v25 = vld [vmem:[%s3483_s3 + $0x8] sm:$0xff] (!%p376_p3)   ;;  %v2768_v28 = vld [vmem:[%s3483_s3 + $0x10] sm:$0xff] (!%p376_p3)   ;;  %vm1706_vm6 = vsmask.f32 (!%p376_p3), 4352 }
   0xd   : > { %2478 = vmatpush3.bf16.msra.mxu0 (!%p376_p3), %v2749_v4  ;;  %2367 = vmatprep.subr.bf16.mxu1 (!%p376_p3), %v2847_v1  ;;  %v2767_v27 = vld [vmem:[%s3483_s3 + $0x148] sm:$0xff] (!%p376_p3)   ;;  %v2769_v31 = vld [vmem:[%s3483_s3 + $0x150] sm:$0xff] (!%p376_p3)   ;;  %v2770_v32 = vld [vmem:[%s3483_s3 + $0x18] sm:$0xff] (!%p376_p3)   ;;  %vm862_vm13 = vsmask.f32 (!%p376_p3), 2304 }
   0xe   : > { %s3494_s15 = smov (!%p452_p4, %s2133_s15), 0  ;;  %2479 = vmatprep.subr.bf16.mxu0 %v2847_v1  ;;  %s3496_s18 = smov (!%p464_p5, %s463_s18), 11  ;;  %v2771_v34 = vld [vmem:[%s3483_s3 + $0x158] sm:$0xff]   ;;  %v2773_v35 = vld [vmem:[%s3483_s3 + $0x20] sm:$0xff]   ;;  %v2775_v41 = vld [vmem:[%s3483_s3 + $0x28] sm:$0xff]  }
   0xf   : > { %s454_s23 = smul.u32 6, %s3494_s15  ;;  %s2956_s10 = sshll.u32 %s3496_s18, 2  ;;  %v2774_v37 = vld [vmem:[%s3483_s3 + $0x160] sm:$0xff]   ;;  %v2776_v43 = vld [vmem:[%s3483_s3 + $0x168] sm:$0xff]   ;;  %v2778_v47 = vld [vmem:[%s3483_s3 + $0x30] sm:$0xff]  }
  0x10   : > { %2368 = vmatpush3.bf16.msra.mxu1 %v2750_v5  ;;  %s2972_s22 = scalar_lea.vmem %s3481_s1, %s2956_s10  ;;  %s3500_s21 = smov (!%p470_p7, %s469_s21), 1  ;;  %v2779_v51 = vld [vmem:[%s3483_s3 + $0x170] sm:$0xff]   ;;  %v2780_v54 = vld [vmem:[%s3483_s3 + $0x38] sm:$0xff]   ;;  %v2782_v61 = vld [vmem:[%s3483_s3 + $0x80] sm:$0xff]   ;;  %vm1420_vm14 = vsmask.f32 5376 }
  0x11   : > { %p455_p6 = scmp.lt.s32.totalorder %s454_s23, 11  ;;  %2480 = vmatpush3.bf16.msra.mxu0 %v2751_v6  ;;  %2369 = vmatprep.subr.bf16.mxu1 %v2847_v1  ;;  %v2989_v15 = vld [vmem:[%s2972_s22] sm:$0xff]   ;;  %v3012_v23 = vld [vmem:[%s2972_s22 + $0x8] sm:$0xff]   ;;  %v3037_v29 = vld [vmem:[%s2972_s22 + $0x10] sm:$0xff]   ;;  %s472_s15 = smul.u32 6, %s3500_s21 }
  0x12   : > { %2481 = vmatprep.subr.bf16.mxu0 %v2847_v1  ;;  %v588_v19 = vrot.slane %v2989_v15, 5  ;;  %v590_v26 = vrot.slane %v3012_v23, 5  ;;  %v592_v33 = vrot.slane %v3037_v29, 5  ;;  %v3073_v40 = vshrl.u32 %v2989_v15, 16  ;;  %v2781_v58 = vld [vmem:[%s3483_s3 + $0x178] sm:$0xff]   ;;  %v2783_v0 = vld [vmem:[%s3483_s3 + $0x180] sm:$0xff]   ;;  %s3456_s20 = scalar_lea.vmem %s3487_s7, %s2956_s10 }
  0x13   : > { %s3498_s23 = smov (!%p455_p6, %s454_s23), 11  ;;  %p473_p8 = scmp.lt.s32.totalorder %s472_s15, 11  ;;  %v3085_v42 = vshll.u32 %v2989_v15, 16  ;;  %v3100_v46 = vshll.u32 %v3012_v23, 16  ;;  %v3108_v50 = vshrl.u32 %v3012_v23, 16  ;;  %v3132_v62 = vshll.u32 %v3037_v29, 16 }
  0x14   : > { %s2134_s11 = sshll.u32 %s3498_s23, 2  ;;  %2370 = vmatpush3.bf16.msra.mxu1 %v2752_v7  ;;  %v591_v30 = vsel %vm586_vm1, %v588_v19, %v590_v26  ;;  %v593_v36 = vsel %vm586_vm1, %v590_v26, %v592_v33  ;;  %v714_v48 = vrot.slane %v3073_v40, 4  ;;  %v3139_v2 = vshrl.u32 %v3037_v29, 16  ;;  %v2784_v5 = vld [vmem:[%s3483_s3 + $0x88] sm:$0xff]  }
  0x15   : > { %2482 = vmatpush3.bf16.msra.mxu0 %v2753_v8  ;;  %2371 = vmatprep.subr.bf16.mxu1 %v2847_v1  ;;  %s458_s19 = scalar_lea.vmem %s3480_s0, %s2134_s11  ;;  %s3502_s15 = smov (!%p473_p8, %s472_s15), 11  ;;  %v717_v49 = vrot.slane %v3085_v42, 5  ;;  %v1277_v52 = vrot.slane %v3085_v42, 1  ;;  %v1279_v53 = vrot.slane %v3100_v46, 1  ;;  %v723_v57 = vrot.slane %v3108_v50, 4  ;;  %v2785_v6 = vld [vmem:[%s3483_s3 + $0x188] sm:$0xff]  }
  0x16   : > { %2483 = vmatprep.subr.bf16.mxu0 %v2847_v1  ;;  %v2986_v14 = vld [vmem:[%s458_s19 + $0x10] sm:$0xff]   ;;  %s2136_s27 = sshll.u32 %s3502_s15, 2  ;;  %v726_v60 = vrot.slane %v3100_v46, 5  ;;  %v1282_v7 = vrot.slane %v3132_v62, 1  ;;  %v1013_v26 = vrot.slane %v3108_v50, 7  ;;  %s513_s11 = scalar_lea.vmem %s3488_s8, %s2956_s10 }
  0x17   : > { %v587_v18 = vrot.slane %v2986_v14, 5  ;;  %v3068_v38 = vshrl.u32 %v2986_v14, 16  ;;  %v707_v39 = vshll.u32 %v2986_v14, 16  ;;  %s3078_s9 = scalar_lea.vmem %s3482_s2, %s2136_s27  ;;  %v718_v56 = vor.u32 %v717_v49, %v714_v48  ;;  %v2790_v49 = vld [vmem:[%s3483_s3 + $0xa0] sm:$0xff]   ;;  %s2137_s27 = sshll.u32 %s3496_s18, 3  ;;  %v2796_v14 = vld [vmem:[%s3483_s3 + $0x1b0] sm:$0xff]  }
  0x18   : > { %2372 = vmatpush3.bf16.msra.mxu1 %v2754_v9  ;;  %v1278_v59 = vor.u32 %v1277_v52, %v3073_v40  ;;  %v3144_v4 = vld [vmem:[%s3078_s9] sm:$0xff]   ;;  %v727_v8 = vor.u32 %v726_v60, %v723_v57  ;;  %v732_v9 = vrot.slane %v3139_v2, 4  ;;  %v1014_v33 = vor.u32 %v1013_v26, %v3100_v46  ;;  %s3241_s13 = scalar_lea.vmem %s3486_s6, %s2137_s27 }
  0x19   : > { %2484 = vmatpush3.bf16.msra.mxu0 %v2755_v10  ;;  %2373 = vmatprep.subr.bf16.mxu1 %v2847_v1  ;;  %v589_v22 = vsel %vm586_vm1, %v587_v18, %v588_v19  ;;  %v706_v44 = vrot.slane %v3068_v38, 4  ;;  %v709_v45 = vrot.slane %v707_v39, 5  ;;  %v1010_v10 = vrot.slane %v3073_v40, 7 }
  0x1a   : > { %2485 = vmatprep.subr.bf16.mxu0 %v2847_v1  ;;  %v1280_v3 = vsel %vm1276_vm3, %v1278_v59, %v1279_v53  ;;  %v735_v18 = vrot.slane %v3132_v62, 5  ;;  %v1570_v19 = vrot.slane %v3012_v23, 3  ;;  %v1708_v48 = vrot.slane %v3085_v42, 4 }
  0x1b   : > { %v710_v55 = vor.u32 %v709_v45, %v706_v44  ;;  %v1710_v52 = vrot.slane %v3108_v50, 3  ;;  %v1715_v57 = vrot.slane %v3132_v62, 4 }
  0x1c   : > { %2374 = vmatpush3.bf16.msra.mxu1 %v2756_v11  ;;  %v1281_v11 = vor.u32 %v1279_v53, %v3108_v50  ;;  %v1711_v53 = vrot.slane %v3100_v46, 4 }
  0x1d   : > { %2486 = vmatpush3.bf16.msra.mxu0 %v2757_v12  ;;  %2375 = vmatprep.subr.bf16.mxu1 %v2847_v1  ;;  %v719_v63 = vsel %vm702_vm2, %v710_v55, %v718_v56  ;;  %v3159_v12 = vshll.u32 %v3144_v4, 16 }
  0x1e   : > { %2487 = vmatprep.subr.bf16.mxu0 %v2847_v1  ;;  %v1712_v59 = vor.u32 %v1711_v53, %v1710_v52  ;;  %v2800_v52 = vld [vmem:[%s3483_s3 + $0x1c0] sm:$0xff]   ;;  %v1428_v53 = vrot.slane %v3139_v2, 2 }
  0x1f   : > { %v1719_v60 = vrot.slane %v3159_v12, 4 }
  0x20   : > { %2376 = vmatpush3.bf16.msra.mxu1 %v2758_v13  ;;  %v1009_v13 = vrot.slane %v3068_v38, 7 }
  0x21   : > { %2488 = vmatpush3.bf16.msra.mxu0 %v2759_v16  ;;  %2377 = vmatprep.subr.bf16.mxu1 %v2847_v1  ;;  %v1011_v16 = vor.u32 %v1010_v10, %v3085_v42 }
  0x22   : > { %2489 = vmatprep.subr.bf16.mxu0 %v2847_v1 }
  0x24   : > { %2378 = vmatpush3.bf16.msra.mxu1 %v2760_v17  ;;  %v1569_v17 = vrot.slane %v2989_v15, 3 }
  0x25   : > { %2490 = vmatpush3.bf16.msra.mxu0 %v2761_v20  ;;  %2391 = vmatprep.subr.bf16.mxu1 %v2847_v1  ;;  %v2786_v20 = vld [vmem:[%s3483_s3 + $0x90] sm:$0xff]  }
  0x26   : > { %2503 = vmatprep.subr.bf16.mxu0 %v2847_v1 }
  0x27   : > { %2380 = vmatmul.mubr.bf16.vlgmr.msra.gmra.mrb[0].mxu1 %v589_v22  ;;  %v728_v22 = vsel %vm702_vm2, %v718_v56, %v727_v8  ;;  %v1714_v56 = vrot.slane %v3139_v2, 3 }
  0x28   : > { %2392 = vmatpush3.bf16.msra.mxu1 %v2764_v21  ;;  %2492 = vmatmul.mubr.bf16.vlgmr.msra.gmra.mrb[0].mxu0 %v2989_v15  ;;  %v2787_v21 = vld [vmem:[%s3483_s3 + $0x190] sm:$0xff]   ;;  %v1283_v15 = vsel %vm1276_vm3, %v1281_v11, %v1282_v7 }
  0x29   : > { %2504 = vmatpush3.bf16.msra.mxu0 %v2765_v24  ;;  %2393 = vmatprep.subr.bf16.mxu1 %v2847_v1  ;;  %v3181_v24 = vsel %vm1008_vm5, %v1009_v13, %v1011_v16  ;;  %v1881_v13 = vld [vmem:[%s3241_s13 + $0x8] sm:$0xff] }
  0x2a   : > { %2505 = vmatprep.subr.bf16.mxu0 %v2847_v1  ;;  %2383 = vmatprep.mubr.msk.bf16.mxu1 %vm2848_vm0, %v2847_v1  ;;  %vm1887_vm10 = vcmp.gt.f32.partialorder %v1881_v13, 0.0  ;;  %v2811_v13 = vld [vmem:[%s3483_s3 + $0xf0] sm:$0xff]  }
  0x2b   : > { %2495 = vmatprep.mubr.msk.bf16.mxu0 %vm2848_vm0, %v2847_v1 }
  0x2c   : > { %2394 = vmatpush3.bf16.msra.mxu1 %v2766_v25  ;;  %v1288_v25 = vrot.slane %v3159_v12, 1 }
  0x2d   : > { %2506 = vmatpush3.bf16.msra.mxu0 %v2767_v27  ;;  %2395 = vmatprep.subr.bf16.mxu1 %v2847_v1  ;;  %v1572_v27 = vrot.slane %v3037_v29, 3 }
  0x2e   : > { %2507 = vmatprep.subr.bf16.mxu0 %v2847_v1 }
  0x2f   : > { %2384 = vmatmul.mubr.bf16.gmra.mrb[4].mxu1 %v591_v30  ;;  %v1284_v30 = vor.u32 %v1282_v7, %v3139_v2 }
  0x30   : > { %2396 = vmatpush3.bf16.msra.mxu1 %v2768_v28  ;;  %2496 = vmatmul.mubr.bf16.gmra.mrb[4].mxu0 %v3012_v23  ;;  %v3184_v23 = vsel %vm1568_vm4, %v1569_v17, %v1570_v19  ;;  %v736_v28 = vor.u32 %v735_v18, %v732_v9  ;;  %v2793_v9 = vld [vmem:[%s3483_s3 + $0x1a8] sm:$0xff]   ;;  %v863_v17 = vrot.slane %v3068_v38, 5  ;;  %v864_v18 = vrot.slane %v707_v39, 6 }
  0x31   : > { %2508 = vmatpush3.bf16.msra.mxu0 %v2769_v31  ;;  %2397 = vmatprep.subr.bf16.mxu1 %v2847_v1  ;;  %v2788_v31 = vld [vmem:[%s3483_s3 + $0x98] sm:$0xff]   ;;  %v1289_v45 = vsel %vm1276_vm3, %v1284_v30, %v1288_v25  ;;  %v1421_v25 = vrot.slane %v3073_v40, 2  ;;  %v1422_v38 = vrot.slane %v3085_v42, 3  ;;  %v1424_v39 = vrot.slane %v3108_v50, 2 }
  0x32   : > { %2509 = vmatprep.subr.bf16.mxu0 %v2847_v1  ;;  %2387 = vmatprep.mubr.msk.bf16.mxu1 %vm2848_vm0, %v2847_v1  ;;  %v737_v44 = vsel %vm702_vm2, %v727_v8, %v736_v28  ;;  %v1884_v28 = vld [vmem:[%s3241_s13 + $0x20] sm:$0xff]  ;;  %v2797_v30 = vld [vmem:[%s3483_s3 + $0xb8] sm:$0xff]  }
  0x33   : > { %2499 = vmatprep.mubr.msk.bf16.mxu0 %vm2848_vm0, %v2847_v1  ;;  %vm1890_vm12 = vcmp.gt.f32.partialorder %v1884_v28, 0.0 }
  0x34   : > { %2398 = vmatpush3.bf16.msra.mxu1 %v2770_v32  ;;  %v2789_v32 = vld [vmem:[%s3483_s3 + $0x198] sm:$0xff]  }
  0x35   : > { %2510 = vmatpush3.bf16.msra.mxu0 %v2771_v34  ;;  %2399 = vmatprep.subr.bf16.mxu1 %v2847_v1  ;;  %v3199_v34 = vsel %vm1568_vm4, %v1570_v19, %v1572_v27 }
  0x36   : > { %2511 = vmatprep.subr.bf16.mxu0 %v2847_v1 }
  0x37   : > { %2388 = vmatmul.mubr.bf16.gmra.mrb[8].mxu1 %v593_v36  ;;  %v3208_v36 = vsel %vm1008_vm5, %v1010_v10, %v1014_v33  ;;  %v1423_v33 = vor.u32 %v1422_v38, %v1421_v25 }
  0x38   : > { %2400 = vmatpush3.bf16.msra.mxu1 %v2773_v35  ;;  %2500 = vmatmul.mubr.bf16.gmra.mrb[8].mxu0 %v3037_v29  ;;  %v1016_v29 = vrot.slane %v3139_v2, 7  ;;  %v1574_v35 = vrot.slane %v3144_v4, 3 }
  0x39   : > { %2512 = vmatpush3.bf16.msra.mxu0 %v2774_v37  ;;  %2401 = vmatprep.subr.bf16.mxu1 %v2847_v1 }
  0x3a   : > { %2513 = vmatprep.subr.bf16.mxu0 %v2847_v1  ;;  %2407 = vmatprep.mubr.msk.bf16.mxu1 %vm2848_vm0, %v2847_v1  ;;  %v1017_v37 = vor.u32 %v1016_v29, %v3132_v62 }
  0x3b   : > { %2519 = vmatprep.mubr.msk.bf16.mxu0 %vm2848_vm0, %v2847_v1 }
  0x3c   : > { %2402 = vmatpush3.bf16.msra.mxu1 %v2775_v41  ;;  %v3212_v41 = vsel %vm1568_vm4, %v1572_v27, %v1574_v35 }
  0x3d   : > { %2514 = vmatpush3.bf16.msra.mxu0 %v2776_v43  ;;  %2403 = vmatprep.subr.bf16.mxu1 %v2847_v1  ;;  %v1707_v43 = vrot.slane %v3073_v40, 3 }
  0x3e   : > { %2515 = vmatprep.subr.bf16.mxu0 %v2847_v1 }
  0x3f   : > { %v1709_v55 = vor.u32 %v1708_v48, %v1707_v43  ;;  %v871_v48 = vrot.slane %v3100_v46, 6 }
  0x40   : > { %2404 = vmatpush3.bf16.msra.mxu1 %v2778_v47  ;;  %v1432_v47 = vshrl.u32 %v3144_v4, 16  ;;  %v2806_v4 = vld [vmem:[%s3483_s3 + $0x1d8] sm:$0xff]  }
  0x41   : > { %2516 = vmatpush3.bf16.msra.mxu0 %v2779_v51  ;;  %2405 = vmatprep.subr.bf16.mxu1 %v2847_v1  ;;  %v3225_v51 = vsel %vm1008_vm5, %v1013_v26, %v1017_v37  ;;  %v3252_v7 = vsel %vm1706_vm6, %v1709_v55, %v1712_v59  ;;  %v1425_v26 = vrot.slane %v3100_v46, 3  ;;  %v2801_v46 = vld [vmem:[%s3483_s3 + $0xc8] sm:$0xff]  }
  0x42   : > { %2517 = vmatprep.subr.bf16.mxu0 %v2847_v1  ;;  %v2802_v55 = vld [vmem:[%s3483_s3 + $0x1c8] sm:$0xff]  }
  0x43   : > { %v1426_v29 = vor.u32 %v1425_v26, %v1424_v39 }
  0x44   : > { %2406 = vmatpush3.bf16.msra.mxu1 %v2780_v54  ;;  %v2791_v54 = vld [vmem:[%s3483_s3 + $0x1a0] sm:$0xff]  }
  0x45   : > { %2518 = vmatpush3.bf16.msra.mxu0 %v2781_v58  ;;  %2419 = vmatprep.subr.bf16.mxu1 %v2847_v1  ;;  %v1718_v58 = vrot.slane %v1432_v47, 3 }
  0x46   : > { %2531 = vmatprep.subr.bf16.mxu0 %v2847_v1 }
  0x47   : > { %2408 = vmatmul.mubr.bf16.vlgmr.msra.gmra.mrb[0].mxu1 %v719_v63  ;;  %v1880_v63 = vld [vmem:[%s3241_s13] sm:$0xff]  ;;  %v1720_v8 = vor.u32 %v1719_v60, %v1718_v58  ;;  %v875_v60 = vrot.slane %v3132_v62, 6 }
  0x48   : > { %2420 = vmatpush3.bf16.msra.mxu1 %v2782_v61  ;;  %2520 = vmatmul.mubr.bf16.vlgmr.msra.gmra.mrb[0].mxu0 %v1280_v3  ;;  %v1882_v61 = vld [vmem:[%s3241_s13 + $0x10] sm:$0xff]  ;;  %v2849_v3 = vmov 0   ;;  %vm1886_vm8 = vcmp.gt.f32.partialorder %v1880_v63, 0.0 }
  0x49   : > { %2532 = vmatpush3.bf16.msra.mxu0 %v2783_v0  ;;  %2421 = vmatprep.subr.bf16.mxu1 %v2847_v1  ;;  %v1716_v0 = vor.u32 %v1715_v57, %v1714_v56  ;;  %vm1888_vm7 = vcmp.gt.f32.partialorder %v1882_v61, 0.0  ;;  %v1892_v19 = vsel %vm1886_vm8, 1, %v2849_v3  ;;  %v1896_v37 = vsel %vm1890_vm12, 1, %v2849_v3  ;;  %v2803_v57 = vld [vmem:[%s3483_s3 + $0xd0] sm:$0xff]  }
  0x4a   : > { %2533 = vmatprep.subr.bf16.mxu0 %v2847_v1  ;;  %2411 = vmatprep.mubr.msk.bf16.mxu1 %vm2848_vm0, %v2847_v1  ;;  %v1894_v11 = vsel %vm1888_vm7, 1, %v2849_v3  ;;  %v2804_v61 = vld [vmem:[%s3483_s3 + $0x1d0] sm:$0xff]  }
  0x4b   : > { %2523 = vmatprep.mubr.msk.bf16.mxu0 %vm2848_vm0, %v2847_v1  ;;  %2745 = vset.pattern.permute.xlu1 %v2849_v3  ;;  %v3259_v10 = vsel %vm1706_vm6, %v1712_v59, %v1716_v0  ;;  %v3266_v16 = vsel %vm1706_vm6, %v1716_v0, %v1720_v8  ;;  %v874_v59 = vrot.slane %v3139_v2, 5  ;;  %v1434_v0 = vrot.slane %v1432_v47, 2 }
  0x4c   : > { %2422 = vmatpush3.bf16.msra.mxu1 %v2784_v5  ;;  %v1883_v5 = vld [vmem:[%s3241_s13 + $0x18] sm:$0xff]  ;;  %2744 = vset.pattern.permute.xlu0 %v2849_v3 }
  0x4d   : > { %2534 = vmatpush3.bf16.msra.mxu0 %v2785_v6  ;;  %2423 = vmatprep.subr.bf16.mxu1 %v2847_v1  ;;  %v2792_v6 = vld [vmem:[%s3483_s3 + $0xa8] sm:$0xff]   ;;  %vm1889_vm9 = vcmp.gt.f32.partialorder %v1883_v5, 0.0  ;;  %v876_v2 = vor.u32 %v875_v60, %v874_v59 }
  0x4e   : > { %2535 = vmatprep.subr.bf16.mxu0 %v2847_v1  ;;  %1905 = vperm.xlu1 %2745, %v1894_v11   ;;  %v1895_v27 = vsel %vm1889_vm9, 1, %v2849_v3  ;;  %v2810_v11 = vld [vmem:[%s3483_s3 + $0x1e8] sm:$0xff]  }
  0x4f   : > { %2412 = vmatmul.mubr.bf16.gmra.mrb[4].mxu1 %v728_v22  ;;  %v866_v22 = vrot.slane %v3073_v40, 5  ;;  %1899 = vperm.xlu0 %2744, %v1892_v19   ;;  %v1893_v40 = vsel %vm1887_vm10, 1, %v2849_v3  ;;  %v2814_v19 = vld [vmem:[%s3483_s3 + $0x1f8] sm:$0xff]  }
  0x50   : > { %2424 = vmatpush3.bf16.msra.mxu1 %v2786_v20  ;;  %2524 = vmatmul.mubr.bf16.gmra.mrb[4].mxu0 %v1283_v15  ;;  %v1885_v20 = vld [vmem:[%s3241_s13 + $0x28] sm:$0xff]  ;;  %v867_v15 = vrot.slane %v3085_v42, 6  ;;  %v2798_v42 = vld [vmem:[%s3483_s3 + $0x1b8] sm:$0xff]  }
  0x51   : > { %2536 = vmatpush3.bf16.msra.mxu0 %v2787_v21  ;;  %2425 = vmatprep.subr.bf16.mxu1 %v2847_v1  ;;  %v2794_v21 = vld [vmem:[%s3483_s3 + $0xb0] sm:$0xff]   ;;  %vm1891_vm11 = vcmp.gt.f32.partialorder %v1885_v20, 0.0  ;;  %v2815_v20 = vld [vmem:[%s3483_s3 + $0x200] sm:$0xff]  }
  0x52   : > { %2537 = vmatprep.subr.bf16.mxu0 %v2847_v1  ;;  %2415 = vmatprep.mubr.msk.bf16.mxu1 %vm2848_vm0, %v2847_v1  ;;  %v1897_v35 = vsel %vm1891_vm11, 1, %v2849_v3  ;;  %v1435_v3 = vrot.slane %v3159_v12, 3  ;;  %v2807_v12 = vld [vmem:[%s3483_s3 + $0xe0] sm:$0xff]  }
  0x53   : > { %2527 = vmatprep.mubr.msk.bf16.mxu0 %vm2848_vm0, %v2847_v1  ;;  %1908 = vperm.xlu1 %2745, %v1895_v27  }
  0x54   : > { %2426 = vmatpush3.bf16.msra.mxu1 %v2788_v31  ;;  %v865_v31 = vor.u32 %v864_v18, %v863_v17  ;;  %1902 = vperm.xlu0 %2744, %v1893_v40   ;;  %v1436_v47 = vor.u32 %v1435_v3, %v1434_v0  ;;  %v2812_v17 = vld [vmem:[%s3483_s3 + $0x1f0] sm:$0xff]   ;;  %v2813_v18 = vld [vmem:[%s3483_s3 + $0xf8] sm:$0xff]  }
  0x55   : > { %2538 = vmatpush3.bf16.msra.mxu0 %v2789_v32  ;;  %2427 = vmatprep.subr.bf16.mxu1 %v2847_v1  ;;  %v868_v32 = vor.u32 %v867_v15, %v866_v22 }
  0x56   : > { %2539 = vmatprep.subr.bf16.mxu0 %v2847_v1 }
  0x57   : > { %2416 = vmatmul.mubr.bf16.gmra.mrb[8].mxu1 %v737_v44  ;;  %v869_v43 = vsel %vm862_vm13, %v865_v31, %v868_v32  ;;  %v2799_v44 = vld [vmem:[%s3483_s3 + $0xc0] sm:$0xff]   ;;  %1914 = vperm.xlu1 %2745, %v1897_v35  }
  0x58   : > { %2428 = vmatpush3.bf16.msra.mxu1 %v2790_v49  ;;  %2528 = vmatmul.mubr.bf16.gmra.mrb[8].mxu0 %v1289_v45  ;;  %v870_v45 = vrot.slane %v3108_v50, 5  ;;  %v1427_v49 = vsel %vm1420_vm14, %v1423_v33, %v1426_v29 }
  0x59   : > { %2540 = vmatpush3.bf16.msra.mxu0 %v2791_v54  ;;  %2429 = vmatprep.subr.bf16.mxu1 %v2847_v1  ;;  %v1429_v54 = vrot.slane %v3132_v62, 3  ;;  %v2805_v62 = vld [vmem:[%s3483_s3 + $0xd8] sm:$0xff]  }
  0x5a   : > { %2541 = vmatprep.subr.bf16.mxu0 %v2847_v1  ;;  %2435 = vmatprep.mubr.msk.bf16.mxu1 %vm2848_vm0, %v2847_v1  ;;  %v872_v50 = vor.u32 %v871_v48, %v870_v45  ;;  %v2217_v48 = vld [vmem:[%s3484_s4] ss:$0 sm:$0xff] }
  0x5b   : > { %2547 = vmatprep.mubr.msk.bf16.mxu0 %vm2848_vm0, %v2847_v1  ;;  %1911 = vperm.xlu0 %2744, %v1896_v37   ;;  %v1430_v56 = vor.u32 %v1429_v54, %v1428_v53 }
  0x5c   : > { %2430 = vmatpush3.bf16.msra.mxu1 %v2792_v6  ;;  %v873_v58 = vsel %vm862_vm13, %v868_v32, %v872_v50  ;;  %v877_v5 = vsel %vm862_vm13, %v872_v50, %v876_v2  ;;  %v2808_v6 = vld [vmem:[%s3483_s3 + $0x1e0] sm:$0xff]  }
  0x5d   : > { %2542 = vmatpush3.bf16.msra.mxu0 %v2793_v9  ;;  %2431 = vmatprep.subr.bf16.mxu1 %v2847_v1  ;;  %v1431_v63 = vsel %vm1420_vm14, %v1426_v29, %v1430_v56  ;;  %v1437_v8 = vsel %vm1420_vm14, %v1430_v56, %v1436_v47  ;;  %v2809_v9 = vld [vmem:[%s3483_s3 + $0xe8] sm:$0xff]   ;;  %v2234_v50 = vld [vmem:[%s3456_s20] sm:$0xff]  }
  0x5e   : > { %2543 = vmatprep.subr.bf16.mxu0 %v2847_v1  ;;  %v2235_v2 = vunpack.c.l.bf16 %v2234_v50 }
  0x60   : > { %2432 = vmatpush3.bf16.msra.mxu1 %v2794_v21  ;;  %v2816_v21 = vld [vmem:[%s3483_s3 + $0x208] sm:$0xff]  }
  0x61   : > { %2544 = vmatpush3.bf16.msra.mxu0 %v2796_v14  ;;  %2433 = vmatprep.subr.bf16.mxu1 %v2847_v1 }
  0x62   : > { %2545 = vmatprep.subr.bf16.mxu0 %v2847_v1 }
  0x64   : > { %2434 = vmatpush3.bf16.msra.mxu1 %v2797_v30 }
  0x65   : > { %2546 = vmatpush3.bf16.msra.mxu0 %v2798_v42  ;;  %2447 = vmatprep.subr.bf16.mxu1 %v2847_v1 }
  0x66   : > { %2559 = vmatprep.subr.bf16.mxu0 %v2847_v1 }
  0x67   : > { %2436 = vmatmul.mubr.bf16.vlgmr.msra.gmra.mrb[0].mxu1 %v869_v43 }
  0x68   : > { %2448 = vmatpush3.bf16.msra.mxu1 %v2799_v44  ;;  %2548 = vmatmul.mubr.bf16.vlgmr.msra.gmra.mrb[0].mxu0 %v1427_v49 }
  0x69   : > { %2560 = vmatpush3.bf16.msra.mxu0 %v2800_v52  ;;  %2449 = vmatprep.subr.bf16.mxu1 %v2847_v1  ;;  %v2260_v52 = vld [vmem:[%s3456_s20 + $0x8] sm:$0xff]  }
  0x6a   : > { %2561 = vmatprep.subr.bf16.mxu0 %v2847_v1  ;;  %2439 = vmatprep.mubr.msk.bf16.mxu1 %vm2848_vm0, %v2847_v1 }
  0x6b   : > { %2551 = vmatprep.mubr.msk.bf16.mxu0 %vm2848_vm0, %v2847_v1 }
  0x6c   : > { %2450 = vmatpush3.bf16.msra.mxu1 %v2801_v46 }
  0x6d   : > { %2562 = vmatpush3.bf16.msra.mxu0 %v2802_v55  ;;  %2451 = vmatprep.subr.bf16.mxu1 %v2847_v1 }
  0x6e   : > { %2563 = vmatprep.subr.bf16.mxu0 %v2847_v1 }
  0x6f   : > { %2440 = vmatmul.mubr.bf16.gmra.mrb[4].mxu1 %v873_v58 }
  0x70   : > { %2452 = vmatpush3.bf16.msra.mxu1 %v2803_v57  ;;  %2552 = vmatmul.mubr.bf16.gmra.mrb[4].mxu0 %v1431_v63  ;;  %v2218_v57 = vld [vmem:[%s3485_s5] ss:$0 sm:$0xff] }
  0x71   : > { %2564 = vmatpush3.bf16.msra.mxu0 %v2804_v61  ;;  %2453 = vmatprep.subr.bf16.mxu1 %v2847_v1  ;;  %v2239_v61 = vunpack.c.l.bf16 %v2260_v52 }
  0x72   : > { %2565 = vmatprep.subr.bf16.mxu0 %v2847_v1  ;;  %2443 = vmatprep.mubr.msk.bf16.mxu1 %vm2848_vm0, %v2847_v1 }
  0x73   : > { %2555 = vmatprep.mubr.msk.bf16.mxu0 %vm2848_vm0, %v2847_v1 }
  0x74   : > { %2454 = vmatpush3.bf16.msra.mxu1 %v2805_v62 }
  0x75   : > { %2566 = vmatpush3.bf16.msra.mxu0 %v2806_v4  ;;  %2455 = vmatprep.subr.bf16.mxu1 %v2847_v1 }
  0x76   : > { %2567 = vmatprep.subr.bf16.mxu0 %v2847_v1 }
  0x77   : > { %2444 = vmatmul.mubr.bf16.gmra.mrb[8].mxu1 %v877_v5 }
  0x78   : > { %2456 = vmatpush3.bf16.msra.mxu1 %v2807_v12  ;;  %2556 = vmatmul.mubr.bf16.gmra.mrb[8].mxu0 %v1437_v8 }
  0x79   : > { %2568 = vmatpush3.bf16.msra.mxu0 %v2808_v6  ;;  %2457 = vmatprep.subr.bf16.mxu1 %v2847_v1  ;;  %v2240_v6 = vunpack.c.h.bf16 %v2260_v52 }
  0x7a   : > { %2569 = vmatprep.subr.bf16.mxu0 %v2847_v1  ;;  %2463 = vmatprep.mubr.msk.bf16.mxu1 %vm2848_vm0, %v2847_v1 }
  0x7b   : > { %2575 = vmatprep.mubr.msk.bf16.mxu0 %vm2848_vm0, %v2847_v1 }
  0x7c   : > { %2458 = vmatpush3.bf16.msra.mxu1 %v2809_v9 }
  0x7d   : > { %2570 = vmatpush3.bf16.msra.mxu0 %v2810_v11  ;;  %2459 = vmatprep.subr.bf16.mxu1 %v2847_v1  ;;  %v2236_v11 = vunpack.c.h.bf16 %v2234_v50 }
  0x7e   : > { %2571 = vmatprep.subr.bf16.mxu0 %v2847_v1 }
  0x80   : > { %2460 = vmatpush3.bf16.msra.mxu1 %v2811_v13 }
  0x81   : > { %2572 = vmatpush3.bf16.msra.mxu0 %v2812_v17  ;;  %2461 = vmatprep.subr.bf16.mxu1 %v2847_v1 }
  0x82   : > { %2573 = vmatprep.subr.bf16.mxu0 %v2847_v1 }
  0x84   : > { %2462 = vmatpush3.bf16.msra.mxu1 %v2813_v18 }
  0x85   : > { %2574 = vmatpush3.bf16.msra.mxu0 %v2814_v19  ;;  %2615 = vmatprep.subr.bf16.mxu1 %v2847_v1  ;;  %v2261_v19 = vld [vmem:[%s3456_s20 + $0x10] sm:$0xff]  }
  0x86   : > { %2587 = vmatprep.subr.bf16.mxu0 %v2847_v1 }
  0x87   : > { %2464 = vmatmul.mubr.bf16.vlgmr.msra.gmra.mrb[0].mxu1 %v3181_v24  ;;  %v2817_v24 = vld [vmem:[%s3483_s3 + $0x210] sm:$0xff]  }
  0x88   : > { %2576 = vmatmul.mubr.bf16.vlgmr.msra.gmra.mrb[0].mxu0 %v3184_v23  ;;  %2623 = vmatpush3.bf16.msra.mxu1 %v2815_v20  ;;  %v2818_v23 = vld [vmem:[%s3483_s3 + $0x218] sm:$0xff]  }
  0x89   : > { %2588 = vmatpush3.bf16.msra.mxu0 %v2815_v20  ;;  %2616 = vmatprep.subr.bf16.mxu1 %v2847_v1 }
  0x8a   : > { %2589 = vmatprep.subr.bf16.mxu0 %v2847_v1  ;;  %2467 = vmatprep.mubr.msk.bf16.mxu1 %vm2848_vm0, %v2847_v1 }
  0x8b   : > { %2579 = vmatprep.mubr.msk.bf16.mxu0 %vm2848_vm0, %v2847_v1 }
  0x8c   : > { %2624 = vmatpush3.bf16.msra.mxu1 %v2816_v21 }
  0x8d   : > { %2590 = vmatpush3.bf16.msra.mxu0 %v2816_v21  ;;  %2617 = vmatprep.subr.bf16.mxu1 %v2847_v1 }
  0x8e   : > { %2591 = vmatprep.subr.bf16.mxu0 %v2847_v1 }
  0x8f   : > { %2468 = vmatmul.mubr.bf16.gmra.mrb[4].mxu1 %v3208_v36  ;;  %v2820_v36 = vld [vmem:[%s3483_s3 + $0x228] sm:$0xff]  }
  0x90   : > { %2580 = vmatmul.mubr.bf16.gmra.mrb[4].mxu0 %v3199_v34  ;;  %2625 = vmatpush3.bf16.msra.mxu1 %v2817_v24  ;;  %v2819_v34 = vld [vmem:[%s3483_s3 + $0x220] sm:$0xff]  }
  0x91   : > { %2592 = vmatpush3.bf16.msra.mxu0 %v2817_v24  ;;  %2618 = vmatprep.subr.bf16.mxu1 %v2847_v1 }
  0x92   : > { %2593 = vmatprep.subr.bf16.mxu0 %v2847_v1  ;;  %2471 = vmatprep.mubr.msk.bf16.mxu1 %vm2848_vm0, %v2847_v1 }
  0x93   : > { %2583 = vmatprep.mubr.msk.bf16.mxu0 %vm2848_vm0, %v2847_v1 }
  0x94   : > { %2626 = vmatpush3.bf16.msra.mxu1 %v2818_v23 }
  0x95   : > { %2594 = vmatpush3.bf16.msra.mxu0 %v2818_v23  ;;  %2619 = vmatprep.subr.bf16.mxu1 %v2847_v1 }
  0x96   : > { %2595 = vmatprep.subr.bf16.mxu0 %v2847_v1 }
  0x97   : > { %2472 = vmatmul.mubr.bf16.gmra.mrb[8].mxu1 %v3225_v51  ;;  %v2822_v51 = vld [vmem:[%s3483_s3 + $0x238] sm:$0xff]  }
  0x98   : > { %2584 = vmatmul.mubr.bf16.gmra.mrb[8].mxu0 %v3212_v41  ;;  %2627 = vmatpush3.bf16.msra.mxu1 %v2819_v34  ;;  %v2821_v41 = vld [vmem:[%s3483_s3 + $0x230] sm:$0xff]  }
  0x99   : > { %2596 = vmatpush3.bf16.msra.mxu0 %v2819_v34  ;;  %2620 = vmatprep.subr.bf16.mxu1 %v2847_v1 }
  0x9a   : > { %2597 = vmatprep.subr.bf16.mxu0 %v2847_v1  ;;  %2603 = vmatprep.mubr.msk.bf16.mxu0 %vm2848_vm0, %v2847_v1 }
  0x9b   : > { %2607 = vmatprep.mubr.msk.bf16.mxu1 %vm2848_vm0, %v2847_v1 }
  0x9c   : > { %2628 = vmatpush3.bf16.msra.mxu1 %v2820_v36 }
  0x9d   : > { %2598 = vmatpush3.bf16.msra.mxu0 %v2820_v36  ;;  %2621 = vmatprep.subr.bf16.mxu1 %v2847_v1 }
  0x9e   : > { %2599 = vmatprep.subr.bf16.mxu0 %v2847_v1 }
  0xa0   : > { %2629 = vmatpush3.bf16.msra.mxu1 %v2821_v41 }
  0xa1   : > { %2600 = vmatpush3.bf16.msra.mxu0 %v2821_v41  ;;  %2622 = vmatprep.subr.bf16.mxu1 %v2847_v1 }
  0xa2   : > { %2601 = vmatprep.subr.bf16.mxu0 %v2847_v1 }
  0xa4   : > { %2630 = vmatpush3.bf16.msra.mxu1 %v2822_v51 }
  0xa5   : > { %2602 = vmatpush3.bf16.msra.mxu0 %v2822_v51 }
  0xa7   : > { %2608 = vmatmul.mubr.bf16.vlgmr.msra.gmra.mrb[12].mxu1 %v3259_v10 }
  0xa8   : > { %2604 = vmatmul.mubr.bf16.vlgmr.msra.gmra.mrb[0].mxu0 %v3252_v7  ;;  %2611 = vmatprep.mubr.msk.bf16.mxu1 %vm2848_vm0, %v2847_v1 }
  0xaf   : > { %2612 = vmatmul.mubr.bf16.gmra.mrb[16].mxu1 %v3266_v16 }
  0xcd   : > { %v1906_v45 = vpop.permute.xlu1 %1905 }
  0xce   : > { %v1900_v53 = vpop.permute.xlu0 %1899  ;;  %vm1918_vm15 = vcmp.eq.s32.totalorder %v1906_v45, 1 }
  0xcf   : > { %vm1916_vm1 = vcmp.eq.s32.totalorder %v1900_v53, 1 }
  0xd2   : > { %v1909_v18 = vpop.permute.xlu1 %1908 }
  0xd3   : > { %vm1919_vm0 = vcmp.eq.s32.totalorder %v1909_v18, 1  ;;  %v1903_v24 = vpop.permute.xlu0 %1902 }
  0xd4   : > { %vm1917_vm2 = vcmp.eq.s32.totalorder %v1903_v24, 1 }
 0x15a   : > { %v1104_v22 = vpop.f32.mrb[0].mxu1 }
 0x15b   : > { %v2465_v15 = vpop.f32.mrb[1].mxu1 }
 0x15c   : > { %v1107_v25 = vpop.f32.mrb[2].mxu1 }
 0x15d   : > { %v2466_v14 = vpop.f32.mrb[3].mxu1 }
 0x162   : > { %v1112_v38 = vpop.f32.mrb[4].mxu1 }
 0x163   : > { %v1669_v39 = vpop.f32.mrb[4].mxu0  ;;  %v2469_v26 = vpop.f32.mrb[5].mxu1 }
 0x164   : > { %v2633_v27 = vadd.f32 %v1669_v39, %v1112_v38  ;;  %v2581_v28 = vpop.f32.mrb[5].mxu0  ;;  %v1115_v40 = vpop.f32.mrb[6].mxu1 }
 0x165   : > { %v1672_v30 = vpop.f32.mrb[6].mxu0  ;;  %v2470_v10 = vpop.f32.mrb[7].mxu1 }
 0x166   : > { %v2635_v31 = vadd.f32 %v1672_v30, %v1115_v40  ;;  %v2582_v7 = vpop.f32.mrb[7].mxu0 }
 0x16a   : > { %v1120_v32 = vpop.f32.mrb[8].mxu1 }
 0x16b   : > { %v1677_v42 = vpop.f32.mrb[8].mxu0  ;;  %v2473_v1 = vpop.f32.mrb[9].mxu1 }
 0x16c   : > { %v2637_v33 = vadd.f32 %v1677_v42, %v1120_v32  ;;  %v2585_v16 = vpop.f32.mrb[9].mxu0  ;;  %v1123_v29 = vpop.f32.mrb[10].mxu1 }
 0x16d   : > { %v1680_v35 = vpop.f32.mrb[10].mxu0  ;;  %v2474_v37 = vpop.f32.mrb[11].mxu1 }
 0x16e   : > { %v2639_v43 = vadd.f32 %v1680_v35, %v1123_v29  ;;  %v2586_v44 = vpop.f32.mrb[11].mxu0  ;;  %v1915_v32 = vpop.permute.xlu1 %1914 }
 0x16f   : > { %v1912_v42 = vpop.permute.xlu0 %1911  ;;  %vm1921_vm3 = vcmp.eq.s32.totalorder %v1915_v32, 1 }
 0x170   : > { %vm1920_vm4 = vcmp.eq.s32.totalorder %v1912_v42, 1 }
 0x17a   : > { %v1815_v49 = vpop.f32.mrb[12].mxu1 }
 0x17b   : > { %v1807_v54 = vpop.f32.mrb[0].mxu0  ;;  %v2634_v46 = vadd.f32 %v2633_v27, %v1815_v49  ;;  %v2609_v55 = vpop.f32.mrb[13].mxu1 }
 0x17c   : > { %v2631_v56 = vadd.f32 %v1807_v54, %v1104_v22  ;;  %v2605_v58 = vpop.f32.mrb[1].mxu0  ;;  %v1818_v59 = vpop.f32.mrb[14].mxu1  ;;  %v2243_v22 = vunpack.c.l.bf16 %v2261_v19 }
 0x17d   : > { %v1845_v60 = vmul.f32 %v2634_v46, %v2217_v48  ;;  %v1810_v63 = vpop.f32.mrb[2].mxu0  ;;  %v2636_v0 = vadd.f32 %v2635_v31, %v1818_v59  ;;  %v2610_v3 = vpop.f32.mrb[15].mxu1  ;;  %v2244_v31 = vunpack.c.h.bf16 %v2261_v19 }
 0x17e   : > { %v1843_v62 = vmul.f32 %v2631_v56, %v2217_v48  ;;  %v2632_v4 = vadd.f32 %v1810_v63, %v1107_v25  ;;  %v2606_v47 = vpop.f32.mrb[3].mxu0 }
 0x17f   : > { %v1858_v12 = vadd.f32 %v2218_v57, %v1845_v60  ;;  %v1846_v5 = vmul.f32 %v2636_v0, %v2217_v48 }
 0x180   : > { %v1856_v8 = vadd.f32 %v2218_v57, %v1843_v62  ;;  %v1844_v9 = vmul.f32 %v2632_v4, %v2217_v48 }
 0x181   : > { %v1876_v13 = vadd.f32 %v2239_v61, %v1858_v12  ;;  %v1859_v17 = vadd.f32 %v2218_v57, %v1846_v5 }
 0x182   : > { %v1874_v20 = vadd.f32 %v2235_v2, %v1856_v8  ;;  %v1857_v21 = vadd.f32 %v2218_v57, %v1844_v9  ;;  %v1823_v23 = vpop.f32.mrb[16].mxu1 }
 0x183   : > { %v1877_v34 = vadd.f32 %v2240_v6, %v1859_v17  ;;  %v2638_v36 = vadd.f32 %v2637_v33, %v1823_v23  ;;  %v2613_v41 = vpop.f32.mrb[17].mxu1  ;;  %v1924_v25 = vsel %vm1918_vm15, %v1876_v13, 0.0 }
 0x184   : > { %v1875_v51 = vadd.f32 %v2236_v11, %v1857_v21  ;;  %v1826_v15 = vpop.f32.mrb[18].mxu1  ;;  %v1922_v27 = vsel %vm1916_vm1, %v1874_v20, 0.0 }
 0x185   : > { %v1925_v14 = vsel %vm1919_vm0, %v1877_v34, 0.0  ;;  %v1847_v38 = vmul.f32 %v2638_v36, %v2217_v48  ;;  %v2640_v39 = vadd.f32 %v2639_v43, %v1826_v15  ;;  %v2614_v26 = vpop.f32.mrb[19].mxu1 }
 0x186   : > { %v2253_v28 = vpack.c.bf16 %v1925_v14, %v1924_v25  ;;  %v1923_v40 = vsel %vm1917_vm2, %v1875_v51, 0.0 }
 0x187   : > { %v2248_v30 = vpack.c.bf16 %v1923_v40, %v1922_v27  ;;  %v1860_v10 = vadd.f32 %v2218_v57, %v1847_v38  ;;  %v1848_v7 = vmul.f32 %v2640_v39, %v2217_v48 }
 0x188   : > { %2262 = vst [vmem:[%s513_s11 + $0x8] sm:$0xff] %v2253_v28  }
 0x189   : > { %2249 = vst [vmem:[%s513_s11] sm:$0xff] %v2248_v30   ;;  %v1878_v1 = vadd.f32 %v2243_v22, %v1860_v10  ;;  %v1861_v33 = vadd.f32 %v2218_v57, %v1848_v7 }
 0x18b   : > { %v1879_v16 = vadd.f32 %v2244_v31, %v1861_v33  ;;  %v1926_v29 = vsel %vm1920_vm4, %v1878_v1, 0.0 }
 0x18d   : > { %v1927_v35 = vsel %vm1921_vm3, %v1879_v16, 0.0 }
 0x18e   : > { %v2258_v37 = vpack.c.bf16 %v1927_v35, %v1926_v29 }
 0x190   : > { %2263 = vst [vmem:[%s513_s11 + $0x10] sm:$0xff] %v2258_v37  }
 0x191 PF: > { %s18_s29 = sadd.s32 1, %s2845_s29   ;;  %s3489_s27 = smov %s2841_s28 }
 0x192   : > { %p15_p9 = scmp.ge.s32.totalorder %s18_s29, 4   ;;  %s3490_s28 = smov %s3492_s30 }
 0x194   :  { %17 = sbr.rel (!%p15_p9) target bundleno = 2 (0x2), region = 103 }

</bundles_post_ra>
